<compile_context>
chip_gen: v5e
topology: v5e:2x2
jax: 0.10.0
libtpu: 0.0.40
codegen_flags: <defaults>
</compile_context>

<pallas_src>
import functools
import math

import jax
import jax.numpy as jnp
from jax.experimental import pallas as pl
from jax.experimental.pallas import tpu as pltpu

_BN_EPS = 1e-5
_ACT_DTYPE = jnp.bfloat16
# Border fill for the pre-padded raw-conv layout: the next layer's in-kernel BN+ReLU
# (scale > 0) maps it to exactly 0, i.e. it behaves like zero padding of the
# *activated* feature map.
_NEG_BORDER = -1e30


@functools.lru_cache(maxsize=None)
def _vmem_limit_bytes():
    """Generation-aware scoped-VMEM cap (raise on v5e/v6e, stay modest on v7x)."""
    try:
        cap = int(pltpu.get_tpu_info().vmem_capacity_bytes)
        return min((cap * 3) // 4, 96 * 1024 * 1024)
    except Exception:
        return 48 * 1024 * 1024


def _cparams(*dim_sem):
    return pltpu.CompilerParams(
        dimension_semantics=dim_sem if dim_sem else None,
        vmem_limit_bytes=_vmem_limit_bytes())


# --------------------------------------------------------------------------
# Fused layer: [BN+ReLU of previous layer] -> 3x3 conv -> BN stats -> (pool) -> pad
# --------------------------------------------------------------------------
def _conv_layer_kernel(x_ref, sc_ref, sh_ref, w_ref, y_ref, st_ref, *,
                       h, wd, cin, cout, pool, apply_act, pad_out, fold):
    x = x_ref[0]                                            # (h+2, wd+2, cin) bf16
    if apply_act:
        sc = sc_ref[...].reshape(1, 1, cin)
        sh = sh_ref[...].reshape(1, 1, cin)
        x = jnp.maximum(x.astype(jnp.float32) * sc + sh, 0.0).astype(_ACT_DTYPE)

    def mm(tile, wmat):
        k = tile.shape[-1]
        return jnp.dot(tile.reshape(h * wd, k), wmat,
                       preferred_element_type=jnp.float32)

    if fold:
        # Small-Cin path: dy folded into the contraction dim -> 3 matmuls with K = 3*cin.
        slab = jnp.concatenate([x[0:h], x[1:h + 1], x[2:h + 2]], axis=-1)
        acc = mm(slab[:, 0:wd, :], w_ref[0])
        acc = acc + mm(slab[:, 1:wd + 1, :], w_ref[1])
        acc = acc + mm(slab[:, 2:wd + 2, :], w_ref[2])
    else:
        # Large-Cin path: 9 accumulating K=cin matmuls, no slab-concat copies.
        acc = None
        for dy in range(3):
            for dx in range(3):
                part = mm(x[dy:dy + h, dx:dx + wd, :], w_ref[dy, dx])
                acc = part if acc is None else acc + part

    # Per-image BN partial sums over the *un-pooled* conv output (f32 accumulator).
    # TODO(synk): stats from f32 acc but normalization applied to bf16-rounded output;
    # the mismatch is tiny but nonzero.
    st_ref[0] = jnp.concatenate(
        [jnp.sum(acc, axis=0, keepdims=True),
         jnp.sum(acc * acc, axis=0, keepdims=True)], axis=0)        # (2, cout)

    out = acc.reshape(h, wd, cout)
    if pool:
        # 2x2 max-pool on the raw conv output; commutes with the downstream
        # positive-scale BN + ReLU, and quarters the HBM writeback.
        # TODO(synk): if this reshape relayout shows up in Mosaic profiles, a strided
        # read/compaction variant could replace it.
        out = out.reshape(h // 2, 2, wd // 2, 2, cout)
        out = jnp.maximum(out[:, 0], out[:, 1])
        out = jnp.maximum(out[:, :, 0], out[:, :, 1])
    out = out.astype(y_ref.dtype)

    if pad_out:
        ho, wo = out.shape[0], out.shape[1]
        cpad = jnp.full((ho, 1, cout), _NEG_BORDER, out.dtype)
        rows = jnp.concatenate([cpad, out, cpad], axis=1)            # (ho, wo+2, cout)
        rpad = jnp.full((1, wo + 2, cout), _NEG_BORDER, out.dtype)
        y_ref[0] = jnp.concatenate([rpad, rows, rpad], axis=0)       # (ho+2, wo+2, cout)
    else:
        y_ref[0] = out


def conv_bn_layer(x_pad, scale, shift, wk, *, h, wd, cin, cout, pool,
                  apply_act, pad_out):
    """x_pad: (N, h+2, wd+2, cin) bf16 padded raw input of this layer;
    scale/shift: (1, cin) f32 BN params of the *previous* layer (ignored if apply_act
    is False); wk: folded (3, 3*cin, cout) or (3, 3, cin, cout) bf16 weights."""
    n = x_pad.shape[0]
    ho, wo = (h // 2, wd // 2) if pool else (h, wd)
    oh, ow = (ho + 2, wo + 2) if pad_out else (ho, wo)
    fold = wk.ndim == 3
    kernel = functools.partial(
        _conv_layer_kernel, h=h, wd=wd, cin=cin, cout=cout,
        pool=pool, apply_act=apply_act, pad_out=pad_out, fold=fold)
    if fold:
        w_spec = pl.BlockSpec((3, 3 * cin, cout), lambda i: (0, 0, 0))
    else:
        w_spec = pl.BlockSpec((3, 3, cin, cout), lambda i: (0, 0, 0, 0))
    # TODO(synk): pipeline_mode=pl.Buffered(1) on w_spec would drop the redundant
    # double-buffer of the (up to 4.5 MiB) weight; left at the default for safety.
    # TODO(synk): whole-image tiles; add row tiling (with halo) for resolutions where a
    # layer's padded image no longer fits the VMEM budget.
    y, stats = pl.pallas_call(
        kernel,
        grid=(n,),
        in_specs=[
            pl.BlockSpec((1, h + 2, wd + 2, cin), lambda i: (i, 0, 0, 0)),
            pl.BlockSpec((1, cin), lambda i: (0, 0)),
            pl.BlockSpec((1, cin), lambda i: (0, 0)),
            w_spec,
        ],
        out_specs=[
            pl.BlockSpec((1, oh, ow, cout), lambda i: (i, 0, 0, 0)),
            pl.BlockSpec((1, 2, cout), lambda i: (i, 0, 0)),
        ],
        out_shape=[
            jax.ShapeDtypeStruct((n, oh, ow, cout), _ACT_DTYPE),
            jax.ShapeDtypeStruct((n, 2, cout), jnp.float32),
        ],
        compiler_params=_cparams("parallel"),
    )(x_pad, scale, shift, wk)
    return y, stats


def _bn_scale_shift(stats, count):
    """stats: (N, 2, C) per-image (sum, sum-of-squares) -> training-mode BN scale/shift
    (gamma=1, beta=0, biased variance, eps=1e-5)."""
    tot = jnp.sum(stats, axis=0)                           # (2, C)
    mean = tot[0] / count
    # TODO(synk): E[x^2]-E[x]^2 in f32; a shifted two-pass variance would be more robust.
    var = jnp.maximum(tot[1] / count - mean * mean, 0.0)
    scale = jax.lax.rsqrt(var + _BN_EPS)
    shift = -mean * scale
    return scale[None, :], shift[None, :]


# --------------------------------------------------------------------------
# Output head: BN+ReLU of the last layer + 1x1 conv (512 -> 1), lane-dense
# --------------------------------------------------------------------------
def _head_kernel(x_ref, sc_ref, sh_ref, w_ref, b_ref, o_ref):
    x = jnp.maximum(x_ref[...].astype(jnp.float32) * sc_ref[...] + sh_ref[...], 0.0)
    o_ref[...] = (jnp.dot(x.astype(_ACT_DTYPE), w_ref[...],
                          preferred_element_type=jnp.float32) + b_ref[...])


def conv1x1_head(x, scale, shift, w_pad, b_pad):
    """x: (N, H, W, 512) raw last conv output (bf16); the 1-wide 1x1 conv is computed
    against a (512, 128) zero-padded weight so every store is lane-dense; column 0 of
    the result is the real output channel."""
    n, h, wd, c = x.shape
    r = n * h * wd
    xf = x.reshape(r, c)                                   # contiguous flatten, no transpose
    tr = 512 if r >= 512 else max(8, -(-r // 8) * 8)
    r_pad = -(-r // tr) * tr
    if r_pad != r:
        xf = jnp.concatenate([xf, jnp.zeros((r_pad - r, c), xf.dtype)], axis=0)
    out = pl.pallas_call(
        _head_kernel,
        grid=(r_pad // tr,),
        in_specs=[
            pl.BlockSpec((tr, c), lambda i: (i, 0)),
            pl.BlockSpec((1, c), lambda i: (0, 0)),
            pl.BlockSpec((1, c), lambda i: (0, 0)),
            pl.BlockSpec((c, 128), lambda i: (0, 0)),
            pl.BlockSpec((1, 128), lambda i: (0, 0)),
        ],
        out_specs=pl.BlockSpec((tr, 128), lambda i: (i, 0)),
        out_shape=jax.ShapeDtypeStruct((r_pad, 128), jnp.float32),
        compiler_params=_cparams("parallel"),
    )(xf, scale, shift, w_pad, b_pad)
    return out[:r, 0].reshape(n, h, wd)[:, None, :, :]


# --------------------------------------------------------------------------
# Parameter construction + forward pass
# --------------------------------------------------------------------------
FRONT_CFG = [64, 64, 'M', 128, 128, 'M', 256, 256, 256, 'M', 512, 512, 512, 'M']
BACK_CFG = [512, 512, 512]


def _conv_plan():
    """Collapse cfg into (cin, cout, pool_after) descriptors (each 'M' follows a conv)."""
    plan = []
    in_c = 3
    for v in FRONT_CFG + BACK_CFG:
        if v == 'M':
            cin, cout, _ = plan[-1]
            plan[-1] = (cin, cout, True)
        else:
            plan.append((in_c, v, False))
            in_c = v
    return plan


def init_params(key):
    """kaiming_normal_(fan_out, relu) conv weights; conv biases are zero and cancelled
    by the batch-stat BN mean subtraction, so they are omitted; BN gamma=1/beta=0."""
    plan = _conv_plan()
    conv_ws = []
    for idx, (cin, cout, _) in enumerate(plan):
        key, sub = jax.random.split(key)
        std = math.sqrt(2.0 / (cout * 3 * 3))                        # fan_out = Cout*k*k
        w4 = jax.random.normal(sub, (3, 3, cin, cout), jnp.float32) * std  # (dy,dx,ci,co)
        if idx == 0:
            w4 = jnp.pad(w4, ((0, 0), (0, 0), (0, 5), (0, 0)))       # Cin 3 -> 8 (zeros)
            cin = 8
        if cin < 256:
            # dy folded into K: wk[dx, dy*cin + ci, co]
            wk = jnp.transpose(w4, (1, 0, 2, 3)).reshape(3, 3 * cin, cout)
        else:
            wk = w4                                                  # (dy, dx, ci, co)
        conv_ws.append(wk.astype(_ACT_DTYPE))
    key, sub = jax.random.split(key)
    w1 = jax.random.normal(sub, (512,), jnp.float32) * math.sqrt(2.0)  # 1x1, fan_out = 1
    w_pad = jnp.zeros((512, 128), jnp.float32).at[:, 0].set(w1).astype(_ACT_DTYPE)
    b_pad = jnp.zeros((1, 128), jnp.float32)                         # conv bias init = 0
    return {"convs": conv_ws, "out_w": w_pad, "out_b": b_pad}


def vgg16_forward(x_nchw, params):
    plan = _conv_plan()
    x = jnp.transpose(x_nchw, (0, 2, 3, 1)).astype(jnp.float32)      # NCHW -> NHWC
    n, h, wd, _ = x.shape
    # Layer-0 input: spatial zero pad + channel pad 3 -> 8 (reuses the generic conv path).
    cur = jnp.pad(x, ((0, 0), (1, 1), (1, 1), (0, 5))).astype(_ACT_DTYPE)
    scale = jnp.ones((1, 8), jnp.float32)        # unused: layer 0 has apply_act=False
    shift = jnp.zeros((1, 8), jnp.float32)

    for idx, (cin, cout, pool) in enumerate(plan):
        cin_eff = 8 if idx == 0 else cin
        last = idx == len(plan) - 1
        if pool:
            assert h % 2 == 0 and wd % 2 == 0
        cur, stats = conv_bn_layer(
            cur, scale, shift, params["convs"][idx],
            h=h, wd=wd, cin=cin_eff, cout=cout, pool=pool,
            apply_act=(idx > 0), pad_out=not last)
        scale, shift = _bn_scale_shift(stats, float(n * h * wd))     # stats are pre-pool
        if pool:
            h, wd = h // 2, wd // 2

    return conv1x1_head(cur, scale, shift, params["out_w"], params["out_b"])


if __name__ == "__main__":
    key = jax.random.PRNGKey(0)
    kp, kx = jax.random.split(key)
    params = init_params(kp)
    x = jax.random.normal(kx, (2, 3, 32, 32), jnp.float32)           # NCHW input
    y = vgg16_forward(x, params)
    jax.block_until_ready(y)
    assert y.shape == (2, 1, 2, 2), y.shape                          # 4 maxpools: 32 -> 2
    assert bool(jnp.all(jnp.isfinite(y)))
    print("KERNEL_OK")
</pallas_src>

<mosaic_0001>
module attributes {stable_mosaic.version = 11 : i64} {
  func.func @_conv_layer_kernel(%arg0: i32, %arg1: memref<1x34x34x8xbf16, #tpu.memory_space<vmem>>, %arg2: memref<1x8xf32, #tpu.memory_space<vmem>>, %arg3: memref<1x8xf32, #tpu.memory_space<vmem>>, %arg4: memref<3x24x64xbf16, #tpu.memory_space<vmem>>, %arg5: memref<1x34x34x64xbf16, #tpu.memory_space<vmem>>, %arg6: memref<1x2x64xf32, #tpu.memory_space<vmem>>) attributes {dimension_semantics = [#tpu.dimension_semantics<parallel>], iteration_bounds = array<i64: 2>, scalar_prefetch = 0 : i64, scratch_operands = 0 : i64, tpu.core_type = #tpu.core_type<tc>, window_params = [{transform_indices = @transform_0, window_bounds = array<i64: 1, 34, 34, 8>}, {pipeline_mode = #tpu.pipeline_mode<synchronous>, transform_indices = @transform_1, window_bounds = array<i64: 1, 8>}, {pipeline_mode = #tpu.pipeline_mode<synchronous>, transform_indices = @transform_2, window_bounds = array<i64: 1, 8>}, {pipeline_mode = #tpu.pipeline_mode<synchronous>, transform_indices = @transform_3, window_bounds = array<i64: 3, 24, 64>}, {transform_indices = @transform_4, window_bounds = array<i64: 1, 34, 34, 64>}, {transform_indices = @transform_5, window_bounds = array<i64: 1, 2, 64>}]} {
    %c0 = arith.constant 0 : index
    %c0_0 = arith.constant 0 : index
    %c0_1 = arith.constant 0 : index
    %c0_2 = arith.constant 0 : index
    %0 = vector.load %arg1[%c0, %c0_0, %c0_1, %c0_2] : memref<1x34x34x8xbf16, #tpu.memory_space<vmem>>, vector<1x34x34x8xbf16>
    %1 = vector.shape_cast %0 : vector<1x34x34x8xbf16> to vector<34x34x8xbf16>
    %2 = vector.extract_strided_slice %1 {offsets = [0, 0, 0], sizes = [32, 34, 8], strides = [1, 1, 1]} : vector<34x34x8xbf16> to vector<32x34x8xbf16>
    %3 = vector.extract_strided_slice %1 {offsets = [1, 0, 0], sizes = [32, 34, 8], strides = [1, 1, 1]} : vector<34x34x8xbf16> to vector<32x34x8xbf16>
    %4 = vector.extract_strided_slice %1 {offsets = [2, 0, 0], sizes = [32, 34, 8], strides = [1, 1, 1]} : vector<34x34x8xbf16> to vector<32x34x8xbf16>
    %5 = tpu.concatenate %2, %3, %4 in 2 : vector<32x34x8xbf16>, vector<32x34x8xbf16>, vector<32x34x8xbf16> -> vector<32x34x24xbf16>
    %6 = vector.extract_strided_slice %5 {offsets = [0, 0, 0], sizes = [32, 32, 24], strides = [1, 1, 1]} : vector<32x34x24xbf16> to vector<32x32x24xbf16>
    %c0_3 = arith.constant 0 : index
    %c0_4 = arith.constant 0 : index
    %c0_5 = arith.constant 0 : index
    %7 = vector.load %arg4[%c0_3, %c0_4, %c0_5] : memref<3x24x64xbf16, #tpu.memory_space<vmem>>, vector<1x24x64xbf16>
    %8 = vector.shape_cast %7 : vector<1x24x64xbf16> to vector<24x64xbf16>
    %9 = vector.shape_cast %6 : vector<32x32x24xbf16> to vector<1024x24xbf16>
    %cst = arith.constant dense<0.000000e+00> : vector<1024x64xf32>
    %10 = tpu.matmul %9, %8, %cst {dimension_numbers = #tpu.dot_dimension_numbers<[1], [0], [0], [1], [0, 0, 1, 1], [], []>} : vector<1024x24xbf16>, vector<24x64xbf16>, vector<1024x64xf32> -> vector<1024x64xf32>
    %11 = vector.extract_strided_slice %5 {offsets = [0, 1, 0], sizes = [32, 32, 24], strides = [1, 1, 1]} : vector<32x34x24xbf16> to vector<32x32x24xbf16>
    %c1 = arith.constant 1 : index
    %c0_6 = arith.constant 0 : index
    %c0_7 = arith.constant 0 : index
    %12 = vector.load %arg4[%c1, %c0_6, %c0_7] : memref<3x24x64xbf16, #tpu.memory_space<vmem>>, vector<1x24x64xbf16>
    %13 = vector.shape_cast %12 : vector<1x24x64xbf16> to vector<24x64xbf16>
    %14 = vector.shape_cast %11 : vector<32x32x24xbf16> to vector<1024x24xbf16>
    %cst_8 = arith.constant dense<0.000000e+00> : vector<1024x64xf32>
    %15 = tpu.matmul %14, %13, %cst_8 {dimension_numbers = #tpu.dot_dimension_numbers<[1], [0], [0], [1], [0, 0, 1, 1], [], []>} : vector<1024x24xbf16>, vector<24x64xbf16>, vector<1024x64xf32> -> vector<1024x64xf32>
    %16 = arith.addf %10, %15 : vector<1024x64xf32>
    %17 = vector.extract_strided_slice %5 {offsets = [0, 2, 0], sizes = [32, 32, 24], strides = [1, 1, 1]} : vector<32x34x24xbf16> to vector<32x32x24xbf16>
    %c2 = arith.constant 2 : index
    %c0_9 = arith.constant 0 : index
    %c0_10 = arith.constant 0 : index
    %18 = vector.load %arg4[%c2, %c0_9, %c0_10] : memref<3x24x64xbf16, #tpu.memory_space<vmem>>, vector<1x24x64xbf16>
    %19 = vector.shape_cast %18 : vector<1x24x64xbf16> to vector<24x64xbf16>
    %20 = vector.shape_cast %17 : vector<32x32x24xbf16> to vector<1024x24xbf16>
    %cst_11 = arith.constant dense<0.000000e+00> : vector<1024x64xf32>
    %21 = tpu.matmul %20, %19, %cst_11 {dimension_numbers = #tpu.dot_dimension_numbers<[1], [0], [0], [1], [0, 0, 1, 1], [], []>} : vector<1024x24xbf16>, vector<24x64xbf16>, vector<1024x64xf32> -> vector<1024x64xf32>
    %22 = arith.addf %16, %21 : vector<1024x64xf32>
    %cst_12 = arith.constant dense<0.000000e+00> : vector<64xf32>
    %23 = vector.multi_reduction <add>, %22, %cst_12 [0] : vector<1024x64xf32> to vector<64xf32>
    %24 = vector.shape_cast %23 : vector<64xf32> to vector<1x64xf32>
    %25 = arith.mulf %22, %22 : vector<1024x64xf32>
    %cst_13 = arith.constant dense<0.000000e+00> : vector<64xf32>
    %26 = vector.multi_reduction <add>, %25, %cst_13 [0] : vector<1024x64xf32> to vector<64xf32>
    %27 = vector.shape_cast %26 : vector<64xf32> to vector<1x64xf32>
    %28 = tpu.concatenate %24, %27 in 0 : vector<1x64xf32>, vector<1x64xf32> -> vector<2x64xf32>
    %c0_14 = arith.constant 0 : index
    %c0_15 = arith.constant 0 : index
    %c0_16 = arith.constant 0 : index
    %29 = vector.load %arg6[%c0_14, %c0_15, %c0_16] : memref<1x2x64xf32, #tpu.memory_space<vmem>>, vector<1x2x64xf32>
    %30 = vector.shape_cast %29 : vector<1x2x64xf32> to vector<2x64xf32>
    %31 = vector.shape_cast %28 : vector<2x64xf32> to vector<1x2x64xf32>
    tpu.vector_store %arg6[%c0_14, %c0_15, %c0_16], %31 {strides = array<i32>} : memref<1x2x64xf32, #tpu.memory_space<vmem>>, vector<1x2x64xf32>,
    %32 = vector.shape_cast %22 : vector<1024x64xf32> to vector<32x32x64xf32>
    %33 = arith.truncf %32 : vector<32x32x64xf32> to vector<32x32x64xbf16>
    %cst_17 = arith.constant -1.000260e+30 : bf16
    %34 = vector.broadcast %cst_17 : bf16 to vector<32x1x64xbf16>
    %35 = tpu.concatenate %34, %33, %34 in 1 : vector<32x1x64xbf16>, vector<32x32x64xbf16>, vector<32x1x64xbf16> -> vector<32x34x64xbf16>
    %cst_18 = arith.constant -1.000260e+30 : bf16
    %36 = vector.broadcast %cst_18 : bf16 to vector<1x34x64xbf16>
    %37 = tpu.concatenate %36, %35, %36 in 0 : vector<1x34x64xbf16>, vector<32x34x64xbf16>, vector<1x34x64xbf16> -> vector<34x34x64xbf16>
    %c0_19 = arith.constant 0 : index
    %c0_20 = arith.constant 0 : index
    %c0_21 = arith.constant 0 : index
    %c0_22 = arith.constant 0 : index
    %38 = vector.load %arg5[%c0_19, %c0_20, %c0_21, %c0_22] : memref<1x34x34x64xbf16, #tpu.memory_space<vmem>>, vector<1x34x34x64xbf16>
    %39 = vector.shape_cast %38 : vector<1x34x34x64xbf16> to vector<34x34x64xbf16>
    %40 = vector.shape_cast %37 : vector<34x34x64xbf16> to vector<1x34x34x64xbf16>
    tpu.vector_store %arg5[%c0_19, %c0_20, %c0_21, %c0_22], %40 {strides = array<i32>} : memref<1x34x34x64xbf16, #tpu.memory_space<vmem>>, vector<1x34x34x64xbf16>,
    return
  }
  func.func @transform_0(%arg0: i32) -> (i32, i32, i32, i32) {
    %c0_i32 = arith.constant 0 : i32
    %c0_i32_0 = arith.constant 0 : i32
    %c0_i32_1 = arith.constant 0 : i32
    %c0_i32_2 = arith.constant 0 : i32
    return %arg0, %c0_i32, %c0_i32_0, %c0_i32_1 : i32, i32, i32, i32
  }
  func.func @transform_1(%arg0: i32) -> (i32, i32) {
    %c0_i32 = arith.constant 0 : i32
    %c0_i32_0 = arith.constant 0 : i32
    %c0_i32_1 = arith.constant 0 : i32
    return %c0_i32, %c0_i32_0 : i32, i32
  }
  func.func @transform_2(%arg0: i32) -> (i32, i32) {
    %c0_i32 = arith.constant 0 : i32
    %c0_i32_0 = arith.constant 0 : i32
    %c0_i32_1 = arith.constant 0 : i32
    return %c0_i32, %c0_i32_0 : i32, i32
  }
  func.func @transform_3(%arg0: i32) -> (i32, i32, i32) {
    %c0_i32 = arith.constant 0 : i32
    %c0_i32_0 = arith.constant 0 : i32
    %c0_i32_1 = arith.constant 0 : i32
    %c0_i32_2 = arith.constant 0 : i32
    return %c0_i32, %c0_i32_0, %c0_i32_1 : i32, i32, i32
  }
  func.func @transform_4(%arg0: i32) -> (i32, i32, i32, i32) {
    %c0_i32 = arith.constant 0 : i32
    %c0_i32_0 = arith.constant 0 : i32
    %c0_i32_1 = arith.constant 0 : i32
    %c0_i32_2 = arith.constant 0 : i32
    return %arg0, %c0_i32, %c0_i32_0, %c0_i32_1 : i32, i32, i32, i32
  }
  func.func @transform_5(%arg0: i32) -> (i32, i32, i32) {
    %c0_i32 = arith.constant 0 : i32
    %c0_i32_0 = arith.constant 0 : i32
    %c0_i32_1 = arith.constant 0 : i32
    return %arg0, %c0_i32, %c0_i32_0 : i32, i32, i32
  }
}

</mosaic_0001>

<bundles_post_ra>
// kernel: tpu_custom_call.1
= control target key start
LH: loop header
LB: loop body
LE: loop exit
PB: predicated region body
PF: predicated region fallthrough
CT: control target
= control target key end

     0   :  { %11 = vsyncpa [#allocation3], 0  ;;  %s11025_s0 = inlined_call_operand.vmem [shape: bf16[2,34,34,8], index: 0, kind: input, shape index: {}]   ;;  %s11026_s1 = inlined_call_operand.vmem [shape: f32[1,8], index: 1, kind: input, shape index: {}]   ;;  %s11027_s2 = inlined_call_operand.vmem [shape: f32[1,8], index: 2, kind: input, shape index: {}]   ;;  %s11028_s3 = inlined_call_operand.vmem [shape: bf16[3,24,64], index: 3, kind: input, shape index: {}]   ;;  %s11029_s4 = inlined_call_operand.vmem [shape: bf16[2,34,34,64], index: 4, kind: output, shape index: {0}]   ;;  %s11030_s5 = inlined_call_operand.hbm [shape: f32[2,2,64], index: 5, kind: output, shape index: {1}]  }
   0x1   :  { %13 = vsyncpa [#allocation3 + $0x1], 0  ;;  %s7495_s18 = smov 0   ;;  %s7497_s19 = smov 0  }
   0x2   :  { %s7499_s20 = smov 0   ;;  %s7501_s1 = smov 0  }
   0x3 LB: > { %s7516_s2 = sadd.s32 4294967295, %s7460_s1   ;;  %s6739_s21 = sadd.s32 4294967294, %s7460_s1   ;;  %s7460_s1 = sphi %s7501_s1, %s11215_s1   ;;  %s7456_s20 = sphi %s7499_s20, %s11214_s20   ;;  %s7452_s19 = sphi %s7497_s19, %s11213_s19   ;;  %s7448_s18 = sphi %s7495_s18, %s11212_s18  }
   0x4   : > { %s7520_s22 = sadd.s32 1, %s7460_s1   ;;  %s141_s23 = sadd.s32 1, %s7456_s20 }
   0x5   : > { %s138_s24 = ssub.s32 %s7460_s1, %s7520_s22  ;;  %p151_p0 = scmp.ne.s32.totalorder %s7456_s20, %s7452_s19 }
   0x6   : > { %p139_p1 = scmp.eq.s32.totalorder %s138_s24, 0  ;;  %p152_p2 = scmp.eq.s32.totalorder %s7516_s2, 1 }
   0x7   : > { %p157_p3 = scmp.ne.s32.totalorder %s7452_s19, %s7448_s18  ;;  %p158_p4 = scmp.eq.s32.totalorder %s6739_s21, 1 }
   0x8   : > { %s7531_s25 = scalar_select %p139_p1, %s7456_s20, %s141_s23  }
   0x9   : > { %p7533_p5 = por %p152_p2, %p151_p0  ;;  %p7537_p6 = por %p158_p4, %p157_p3 }
   0xa   : > { %p6742_p7 = scmp.ge.s32.totalorder %s7460_s1, 1  ;;  %p193_p8 = scmp.lt.s32.totalorder %s7460_s1, 3 }
   0xc   : > { %p194_p9 = pnand %p6742_p7, %p193_p8 }
   0xe   : > { %197 = sbr.rel (%p194_p9) target bundleno = 1134 (0x46e), region = 36 }
  0x13   : > { %p226_p10 = scmp.lt.s32.totalorder %s7516_s2, 1  ;;  %s7462_s8 = smov 8   ;;  %v1718_v32 = vld [vmem:[%s11028_s3 + $0x8] sm:$0xf]  ;;  %vm2470_vm0 = vcmask 1043456   ;;  %v7300_v40 = vld [vmem:[%s11028_s3] sm:$0xff] }
  0x14   : > { %s7463_s9 = smov 16   ;;  %v2808_v33 = vunpack.c.l.b16 %v1718_v32  ;;  %v7159_v42 = vld [vmem:[%s11028_s3 + $0x20] sm:$0xf]  ;;  %v7020_v46 = vld [vmem:[%s11028_s3 + $0x14] sm:$0xf]  ;;  %v7718_v53 = vld [vmem:[%s11028_s3 + $0x18] sm:$0xff] }
  0x15   : > { %s7545_s28 = scalar_select %p226_p10, %s7516_s2, 1  ;;  %v3538_v45 = vunpack.c.l.b16 %v7159_v42  ;;  %v2273_v48 = vunpack.c.l.b16 %v7020_v46  ;;  %v7301_v55 = vld [vmem:[%s11028_s3 + $0xc] sm:$0xff]  ;;  %vm1234_vm1 = vcmask 64512   ;;  %vm1523_vm2 = vcmask 130048  }
  0x16   : > { %v2810_v34 = vpack.c.b16 %v2808_v33, %v2808_v33  ;;  %vm2277_vm3 = vcmask 195584   ;;  %vm3372_vm4 = vcmask 1046528   ;;  %vm1723_vm5 = vsmask.f32 7424  ;;  %s7418_s24 = scalar_lea.hbm %s11030_s5, 4 }
  0x17   : > { %s7309_s29 = smul.u32 680, %s7545_s28  ;;  %v3540_v47 = vpack.c.b16 %v3538_v45, %v3538_v45  ;;  %v2275_v51 = vpack.c.b16 %v2273_v48, %v2273_v48  ;;  %vm4194_vm6 = vcmask 523264   ;;  %vm5297_vm7 = vsmask.f32 256  ;;  %s223_s28 = sand.u32 1, %s7452_s19  }
  0x18   : > { %v2941_v38 = vsel %vm2470_vm0, %v2810_v34, 0  ;;  %vm4845_vm8 = vcmask 1040384   ;;  %vm6459_vm10 = vcmask 519168   ;;  %vm6464_vm11 = vcmask 516096  }
  0x19   : > { %s7553_s7 = scalar_lea.vmem %s11025_s0, %s7309_s29  ;;  %2949 = vmatpush.bf16.msra.mxu1 %v2941_v38  ;;  %v7711_v50 = vsel %vm2470_vm0, %v3540_v47, 0  ;;  %v2472_v52 = vsel %vm2470_vm0, %v2275_v51, 0  ;;  %vm8299_vm9 = vmand %vm4845_vm8, %vm5297_vm7  ;;  %s8328_s11 = scalar_lea.vmem %s11029_s4, %s7309_s29  ;;  %vm4847_vm12 = vcmask 517120  }
  0x1a   : > { %v7556_v0 = vld [vmem:[%s7553_s7 + $0x14] sm:$0xff]  ;;  %v7559_v1 = vld [vmem:[%s7553_s7 + $0x28] sm:$0xff]  ;;  %v247_v2 = vld [vmem:[%s7553_s7 + $0x24] sm:$0x1]  ;;  %3743 = vmatpush.bf16.msra.mxu2 %v7711_v50  ;;  %2480 = vmatpush.bf16.msra.mxu0 %v2472_v52  ;;  %s6743_s29 = sshll.u32 %s223_s28, 1 }
  0x1b   : > { %837 = vrot.lane.b32.xlu0 %v7556_v0, %s7462_s8  ;;  %1042 = vrot.lane.b32.xlu1 %v7559_v1, %s7463_s9  ;;  %v577_v3 = vunpack.c.l.b16 %v247_v2  ;;  %v252_v5 = vld [vmem:[%s7553_s7 + $0x38] sm:$0x1]  ;;  %v7570_v6 = vld [vmem:[%s7553_s7 + $0x1c] sm:$0xff]  ;;  %s225_s13 = scalar_lea.vmem [#allocation2], %s6743_s29 }
  0x1c   : > { %v7573_v7 = vld [vmem:[%s7553_s7 + $0x30] sm:$0xff]  ;;  %v582_v8 = vunpack.c.l.b16 %v252_v5  ;;  %v7590_v10 = vld [vmem:[%s7553_s7 + $0x3c] sm:$0xff]  ;;  %v257_v11 = vld [vmem:[%s7553_s7 + $0x4c] sm:$0x1]  ;;  %7303 = vmatpush.bf16.msra.mxu3 %v2472_v52  ;;  %s6652_s14 = sshll.u32 %s225_s13, 4  ;;  %s6653_s14 = int_to_ptr.vmem [resolvable:$true] %s6652_s14 }
  0x1d   : > { %v7566_v4 = vpack.c.b16 %v577_v3, %v577_v3  ;;  %v7594_v12 = vld [vmem:[%s7553_s7 + $0x44] sm:$0xff]  ;;  %v587_v13 = vunpack.c.l.b16 %v257_v11  ;;  %v7605_v15 = vld [vmem:[%s7553_s7 + $0x1f4] sm:$0xff]  ;;  %v7617_v17 = vld [vmem:[%s7553_s7 + $0x1fc] sm:$0xff]  ;;  %2950 = vmatpush.bf16.msra.mxu1 %v7300_v40 }
  0x1e   : > { %v7581_v9 = vpack.c.b16 %v582_v8, %v582_v8  ;;  %v7608_v16 = vld [vmem:[%s7553_s7 + $0x208] sm:$0xff]  ;;  %v7620_v18 = vld [vmem:[%s7553_s7 + $0x210] sm:$0xff]  ;;  %v367_v19 = vld [vmem:[%s7553_s7 + $0x204] sm:$0x1]  ;;  %3744 = vmatpush.bf16.msra.mxu2 %v7718_v53  ;;  %2481 = vmatpush.bf16.msra.mxu0 %v7301_v55 }
  0x1f   : > { %841 = vrot.lane.b32.xlu2 %v7566_v4, %s7462_s8  ;;  %v7602_v14 = vpack.c.b16 %v587_v13, %v587_v13  ;;  %v7630_v20 = vld [vmem:[%s7553_s7 + $0x50] sm:$0xff]  ;;  %v7633_v21 = vld [vmem:[%s7553_s7 + $0x58] sm:$0xff]  ;;  %v697_v22 = vunpack.c.l.b16 %v367_v19  ;;  %v262_v26 = vld [vmem:[%s7553_s7 + $0x60] sm:$0x1] }
  0x20   : > { %v372_v23 = vld [vmem:[%s7553_s7 + $0x218] sm:$0x1]  ;;  %v592_v28 = vunpack.c.l.b16 %v262_v26  ;;  %v7656_v30 = vld [vmem:[%s7553_s7 + $0x21c] sm:$0xff]  ;;  %v7665_v31 = vld [vmem:[%s7553_s7 + $0x224] sm:$0xff]  ;;  %7304 = vmatpush.bf16.msra.mxu3 %v7301_v55 }
  0x21   : > { %v702_v24 = vunpack.c.l.b16 %v372_v23  ;;  %v7642_v25 = vpack.c.b16 %v697_v22, %v697_v22  ;;  %v7677_v35 = vld [vmem:[%s7553_s7 + $0x64] sm:$0xff]  ;;  %v7680_v36 = vld [vmem:[%s7553_s7 + $0x6c] sm:$0xff]  ;;  %v267_v41 = vld [vmem:[%s7553_s7 + $0x74] sm:$0x1] }
  0x22   : > { %v7653_v29 = vpack.c.b16 %v592_v28, %v592_v28  ;;  %v377_v37 = vld [vmem:[%s7553_s7 + $0x22c] sm:$0x1]  ;;  %v597_v44 = vunpack.c.l.b16 %v267_v41  ;;  %v7721_v54 = vld [vmem:[%s7553_s7 + $0x230] sm:$0xff]  ;;  %v7736_v57 = vld [vmem:[%s7553_s7 + $0x238] sm:$0xff] }
  0x23   : > { %839 = vrot.lane.b32.xlu0 %v7570_v6, %s7462_s8  ;;  %1044 = vrot.lane.b32.xlu1 %v7573_v7, %s7463_s9  ;;  %v7645_v27 = vpack.c.b16 %v702_v24, %v702_v24  ;;  %v707_v39 = vunpack.c.l.b16 %v377_v37  ;;  %v7244_v59 = vld [vmem:[%s7553_s7 + $0x78] sm:$0xff]  ;;  %v7748_v60 = vld [vmem:[%s7553_s7 + $0x80] sm:$0xff] }
  0x24   : > { %v7708_v49 = vpack.c.b16 %v597_v44, %v597_v44  ;;  %7305 = vmatpush.bf16.msrb.mxu3 %v2941_v38  ;;  %v382_v61 = vld [vmem:[%s7553_s7 + $0x240] sm:$0x1]  ;;  %v272_v8 = vld [vmem:[%s7553_s7 + $0x88] sm:$0x1]  ;;  %v242_v32 = vld [vmem:[%s7553_s7 + $0x10] sm:$0x1] }
  0x25   : > { %v7697_v43 = vpack.c.b16 %v707_v39, %v707_v39  ;;  %v7232_v63 = vld [vmem:[%s7553_s7] sm:$0xff]  ;;  %v712_v2 = vunpack.c.l.b16 %v382_v61  ;;  %v602_v22 = vunpack.c.l.b16 %v272_v8  ;;  %v7233_v26 = vld [vmem:[%s7553_s7 + $0x8] sm:$0xff]  ;;  %v572_v39 = vunpack.c.l.b16 %v242_v32 }
  0x26   : > { %v7782_v46 = vld [vmem:[%s7553_s7 + $0x244] sm:$0xff]  ;;  %v7810_v32 = vld [vmem:[%s7553_s7 + $0x8c] sm:$0xff] }
  0x27   : > { %1046 = vrot.lane.b32.xlu2 %v7581_v9, %s7463_s9  ;;  %v7762_v19 = vpack.c.b16 %v712_v2, %v712_v2  ;;  %v7774_v28 = vpack.c.b16 %v602_v22, %v602_v22  ;;  %v730_v55 = vpack.c.b16 %v572_v39, %v572_v39 }
  0x28   : > { %7306 = vmatpush.bf16.msrb.mxu3 %v7300_v40 }
  0x2b   : > { %843 = vrot.lane.b32.xlu0 %v7559_v1, %s7462_s8  ;;  %845 = vrot.lane.b32.xlu1 %v7573_v7, %s7462_s8 }
  0x2f   : > { %1048 = vrot.lane.b32.xlu2 %v7590_v10, %s7463_s9 }
  0x33   : > { %1050 = vrot.lane.b32.xlu0 %v7594_v12, %s7463_s9  ;;  %847 = vrot.lane.b32.xlu1 %v7581_v9, %s7462_s8 }
  0x37   : > { %1052 = vrot.lane.b32.xlu2 %v7602_v14, %s7463_s9 }
  0x3b   : > { %981 = vrot.lane.b32.xlu0 %v7605_v15, %s7462_s8  ;;  %1186 = vrot.lane.b32.xlu1 %v7608_v16, %s7463_s9 }
  0x3f   : > { %983 = vrot.lane.b32.xlu2 %v7617_v17, %s7462_s8 }
  0x43   : > { %1188 = vrot.lane.b32.xlu0 %v7620_v18, %s7463_s9  ;;  %849 = vrot.lane.b32.xlu1 %v7590_v10, %s7462_s8 }
  0x47   : > { %851 = vrot.lane.b32.xlu2 %v7594_v12, %s7462_s8 }
  0x4b   : > { %1054 = vrot.lane.b32.xlu0 %v7630_v20, %s7463_s9  ;;  %1056 = vrot.lane.b32.xlu1 %v7633_v21, %s7463_s9 }
  0x4f   : > { %985 = vrot.lane.b32.xlu2 %v7642_v25, %s7462_s8 }
  0x53   : > { %1190 = vrot.lane.b32.xlu0 %v7645_v27, %s7463_s9  ;;  %853 = vrot.lane.b32.xlu1 %v7602_v14, %s7462_s8 }
  0x57   : > { %1058 = vrot.lane.b32.xlu2 %v7653_v29, %s7463_s9 }
  0x5b   : > { %987 = vrot.lane.b32.xlu0 %v7608_v16, %s7462_s8  ;;  %1192 = vrot.lane.b32.xlu1 %v7656_v30, %s7463_s9 }
  0x5f   : > { %989 = vrot.lane.b32.xlu2 %v7620_v18, %s7462_s8 }
  0x63   : > { %1194 = vrot.lane.b32.xlu0 %v7665_v31, %s7463_s9  ;;  %855 = vrot.lane.b32.xlu1 %v7630_v20, %s7462_s8 }
  0x67   : > { %857 = vrot.lane.b32.xlu2 %v7633_v21, %s7462_s8 }
  0x6b   : > { %1060 = vrot.lane.b32.xlu0 %v7677_v35, %s7463_s9  ;;  %1062 = vrot.lane.b32.xlu1 %v7680_v36, %s7463_s9 }
  0x6f   : > { %991 = vrot.lane.b32.xlu2 %v7645_v27, %s7462_s8 }
  0x73   : > { %1196 = vrot.lane.b32.xlu0 %v7697_v43, %s7463_s9  ;;  %859 = vrot.lane.b32.xlu1 %v7653_v29, %s7462_s8 }
  0x77   : > { %1064 = vrot.lane.b32.xlu2 %v7708_v49, %s7463_s9 }
  0x79   : > { %v7729_v56 = vpop.permute.xlu2 %841 }
  0x7b   : > { %993 = vrot.lane.b32.xlu0 %v7656_v30, %s7462_s8  ;;  %1198 = vrot.lane.b32.xlu1 %v7721_v54, %s7463_s9 }
  0x7f   : > { %995 = vrot.lane.b32.xlu2 %v7665_v31, %s7462_s8 }
  0x81   : > { %v7740_v58 = vpop.permute.xlu2 %1046 }
  0x83   : > { %1200 = vrot.lane.b32.xlu0 %v7736_v57, %s7463_s9  ;;  %861 = vrot.lane.b32.xlu1 %v7677_v35, %s7462_s8 }
  0x87   : > { %863 = vrot.lane.b32.xlu2 %v7680_v36, %s7462_s8 }
  0x89   : > { %v7753_v62 = vpop.permute.xlu2 %1048 }
  0x8b   : > { %1066 = vrot.lane.b32.xlu0 %v7244_v59, %s7463_s9  ;;  %1068 = vrot.lane.b32.xlu1 %v7748_v60, %s7463_s9 }
  0x8d   : > { %v838_v3 = vpop.permute.xlu0 %837  ;;  %v1043_v5 = vpop.permute.xlu1 %1042 }
  0x8e   : > { %v1237_v11 = vsel %vm1234_vm1, %v7232_v63, %v838_v3  ;;  %v7793_v3 = vld [vmem:[%s7553_s7 + $0x24c] sm:$0xff] }
  0x8f   : > { %v1525_v13 = vsel %vm1523_vm2, %v1237_v11, %v1043_v5  ;;  %997 = vrot.lane.b32.xlu2 %v7697_v43, %s7462_s8  ;;  %v1243_v5 = vsel %vm1234_vm1, %v730_v55, %v7729_v56 }
  0x90   : > { %7093 = vmatmul.msk.bf16.vlgmr.msra.gmra.mxu1 %vm2277_vm3, %v1525_v13  ;;  %v1726_v24 = vshll.u32 %v1525_v13, 16  ;;  %v1724_v41 = vshrl.u32 %v1525_v13, 16  ;;  %v3373_v42 = vrot.slane %v1525_v13, 1  ;;  %v1529_v11 = vsel %vm1523_vm2, %v1243_v5, %v7740_v58  ;;  %v7815_v58 = vld [vmem:[%s7553_s7 + $0x94] sm:$0xff] }
  0x91   : > { %v7767_v23 = vpop.permute.xlu2 %1052  ;;  %v1737_v13 = vshll.u32 %v1529_v11, 16  ;;  %v3376_v56 = vrot.slane %v1529_v11, 1 }
  0x92   : > { %v1728_v37 = vrot.slane %v1726_v24, 1 }
  0x93   : > { %1202 = vrot.lane.b32.xlu0 %v7762_v19, %s7463_s9  ;;  %865 = vrot.lane.b32.xlu1 %v7708_v49, %s7462_s8 }
  0x94   : > { %v1729_v51 = vor.u32 %v1728_v37, %v1724_v41  ;;  %v387_v37 = vld [vmem:[%s7553_s7 + $0x254] sm:$0x1] }
  0x95   : > { %v840_v33 = vpop.permute.xlu0 %839  ;;  %v1045_v34 = vpop.permute.xlu1 %1044 }
  0x96   : > { %v1240_v38 = vsel %vm1234_vm1, %v7233_v26, %v840_v33  ;;  %v1739_v33 = vrot.slane %v1737_v13, 1 }
  0x97   : > { %v1527_v40 = vsel %vm1523_vm2, %v1240_v38, %v1045_v34  ;;  %1070 = vrot.lane.b32.xlu2 %v7774_v28, %s7463_s9 }
  0x98   : > { %v1730_v44 = vshll.u32 %v1527_v40, 16  ;;  %v3374_v45 = vrot.slane %v1527_v40, 1  ;;  %v1734_v26 = vshrl.u32 %v1527_v40, 16 }
  0x99   : > { %v984_v47 = vpop.permute.xlu2 %983 }
  0x9a   : > { %v3375_v48 = vsel %vm3372_vm4, %v3373_v42, %v3374_v45  ;;  %v1732_v52 = vrot.slane %v1730_v44, 1  ;;  %v3377_v39 = vsel %vm3372_vm4, %v3374_v45, %v3376_v56  ;;  %v277_v45 = vld [vmem:[%s7553_s7 + $0x9c] sm:$0x1] }
  0x9b   : > { %999 = vrot.lane.b32.xlu0 %v7721_v54, %s7462_s8  ;;  %7164 = vmatmul.msk.bf16.vlgmr.msra.gmra.mxu2 %vm2277_vm3, %v3375_v48 }
  0x9c   : > { %v1733_v61 = vsel %vm1723_vm5, %v1729_v51, %v1732_v52  ;;  %1204 = vrot.lane.b32.xlu1 %v7782_v46, %s7463_s9  ;;  %v1736_v34 = vor.u32 %v1734_v26, %v1732_v52 }
  0x9d   : > { %v844_v63 = vpop.permute.xlu0 %843  ;;  %7025 = vmatmul.msk.bf16.vlgmr.msra.gmra.mxu0 %vm2277_vm3, %v1733_v61  ;;  %v846_v2 = vpop.permute.xlu1 %845  ;;  %v7281_v61 = vld [vmem:[%s7553_s7 + $0x1e8] sm:$0xff] }
  0x9e   : > { %v1740_v41 = vsel %vm1723_vm5, %v1736_v34, %v1739_v33  ;;  %v1249_v48 = vsel %vm1234_vm1, %v7570_v6, %v846_v2  ;;  %v1456_v26 = vsel %vm1234_vm1, %v7281_v61, %v984_v47 }
  0x9f   : > { %1001 = vrot.lane.b32.xlu2 %v7736_v57, %s7462_s8 }
  0xa0   : > { %7094 = vmatmul.msk.bf16.gmra.mxu1 %vm2277_vm3, %v1527_v40  ;;  %v7280_v40 = vld [vmem:[%s7553_s7 + $0x1e0] sm:$0xff] }
  0xa1   : > { %v7800_v8 = vpop.permute.xlu2 %851 }
  0xa3   : > { %1206 = vrot.lane.b32.xlu0 %v7793_v3, %s7463_s9 }
  0xa4   : > { %867 = vrot.lane.b32.xlu1 %v7244_v59, %s7462_s8  ;;  %v1246_v59 = vsel %vm1234_vm1, %v7556_v0, %v844_v63 }
  0xa5   : > { %v1051_v22 = vpop.permute.xlu0 %1050  ;;  %v7807_v24 = vpop.permute.xlu1 %847  ;;  %v1531_v42 = vsel %vm1523_vm2, %v1246_v59, %v7753_v62  ;;  %v607_v62 = vunpack.c.l.b16 %v277_v45  ;;  %v7869_v45 = vld [vmem:[%s7553_s7 + $0x258] sm:$0xff] }
  0xa6   : > { %v1743_v63 = vshll.u32 %v1531_v42, 16  ;;  %v7848_v11 = vsel %vm1523_vm2, %v1249_v48, %v1051_v22  ;;  %v1741_v33 = vshrl.u32 %v1531_v42, 16  ;;  %v362_v48 = vld [vmem:[%s7553_s7 + $0x1f0] sm:$0x1] }
  0xa7   : > { %869 = vrot.lane.b32.xlu2 %v7748_v60, %s7462_s8  ;;  %v717_v60 = vunpack.c.l.b16 %v387_v37  ;;  %v7856_v56 = vpack.c.b16 %v607_v62, %v607_v62  ;;  %v1747_v37 = vshll.u32 %v7848_v11, 16 }
  0xa8   : > { %v1745_v34 = vrot.slane %v1743_v63, 1  ;;  %v692_v63 = vunpack.c.l.b16 %v362_v48  ;;  %v7923_v48 = vld [vmem:[%s7553_s7 + $0xa8] sm:$0xff] }
  0xa9   : > { %v7818_v38 = vpop.permute.xlu2 %985  ;;  %v7840_v55 = vpack.c.b16 %v717_v60, %v717_v60 }
  0xab   : > { %1072 = vrot.lane.b32.xlu0 %v7810_v32, %s7463_s9  ;;  %7165 = vmatmul.msk.bf16.gmra.mxu2 %vm2277_vm3, %v3377_v39  ;;  %v3378_v39 = vrot.slane %v1531_v42, 1 }
  0xac   : > { %1074 = vrot.lane.b32.xlu1 %v7815_v58, %s7463_s9 }
  0xad   : > { %v982_v44 = vpop.permute.xlu0 %981  ;;  %7026 = vmatmul.msk.bf16.gmra.mxu0 %vm2277_vm3, %v1740_v41  ;;  %v1187_v0 = vpop.permute.xlu1 %1186 }
  0xae   : > { %v1453_v51 = vsel %vm1234_vm1, %v7280_v40, %v982_v44  ;;  %v3379_v40 = vrot.slane %v7848_v11, 1  ;;  %v1746_v44 = vor.u32 %v1745_v34, %v1741_v33  ;;  %v7891_v33 = vpack.c.b16 %v692_v63, %v692_v63 }
  0xaf   : > { %v7838_v52 = vsel %vm1523_vm2, %v1453_v51, %v1187_v0  ;;  %1003 = vrot.lane.b32.xlu2 %v7762_v19, %s7462_s8  ;;  %v1749_v0 = vrot.slane %v1747_v37, 1 }
  0xb0   : > { %7095 = vmatmul.msk.bf16.gmra.mxu1 %vm2277_vm3, %v1531_v42  ;;  %v2134_v5 = vshll.u32 %v7838_v52, 16  ;;  %v2132_v2 = vshrl.u32 %v7838_v52, 16  ;;  %v3380_v42 = vsel %vm3372_vm4, %v3378_v39, %v3379_v40 }
  0xb1   : > { %v7850_v6 = vpop.permute.xlu2 %1058 }
  0xb2   : > { %v2136_v13 = vrot.slane %v2134_v5, 1  ;;  %v1750_v5 = vsel %vm1723_vm5, %v1746_v44, %v1749_v0 }
  0xb3   : > { %1208 = vrot.lane.b32.xlu0 %v7840_v55, %s7463_s9 }
  0xb4   : > { %871 = vrot.lane.b32.xlu1 %v7774_v28, %s7462_s8  ;;  %v2137_v41 = vor.u32 %v2136_v13, %v2132_v2 }
  0xb5   : > { %v1189_v22 = vpop.permute.xlu0 %1188  ;;  %v850_v59 = vpop.permute.xlu1 %849 }
  0xb6   : > { %v7863_v60 = vsel %vm1523_vm2, %v1456_v26, %v1189_v22  ;;  %v7889_v26 = vld [vmem:[%s7553_s7 + $0x260] sm:$0xff]  ;;  %v1255_v63 = vsel %vm1234_vm1, %v7559_v1, %v850_v59 }
  0xb7   : > { %v2138_v47 = vshll.u32 %v7863_v60, 16  ;;  %1076 = vrot.lane.b32.xlu2 %v7856_v56, %s7463_s9 }
  0xb9   : > { %v2140_v51 = vrot.slane %v2138_v47, 1  ;;  %v7872_v61 = vpop.permute.xlu2 %989 }
  0xbb   : > { %1005 = vrot.lane.b32.xlu0 %v7782_v46, %s7462_s8  ;;  %7166 = vmatmul.msk.bf16.gmra.mxu2 %vm2277_vm3, %v3380_v42  ;;  %v2141_v62 = vsel %vm1723_vm5, %v2137_v41, %v2140_v51  ;;  %v1252_v46 = vsel %vm1234_vm1, %v7566_v4, %v7807_v24  ;;  %v2142_v4 = vshrl.u32 %v7863_v60, 16  ;;  %v7918_v41 = vld [vmem:[%s7553_s7 + $0xa0] sm:$0xff] }
  0xbc   : > { %7073 = vmatmul.msk.bf16.vlgmr.msra.gmra.mxu3 %vm2277_vm3, %v2141_v62  ;;  %1210 = vrot.lane.b32.xlu1 %v7869_v45, %s7463_s9  ;;  %v1535_v34 = vsel %vm1523_vm2, %v1252_v46, %v7767_v23 }
  0xbd   : > { %v1055_v2 = vpop.permute.xlu0 %1054  ;;  %7027 = vmatmul.msk.bf16.gmra.mxu0 %vm2277_vm3, %v1750_v5  ;;  %v1057_v13 = vpop.permute.xlu1 %1056  ;;  %7307 = vmatpush.bf16.msra.mxu3 %v7711_v50  ;;  %v1459_v50 = vsel %vm1234_vm1, %v7891_v33, %v7818_v38  ;;  %v1754_v24 = vshll.u32 %v1535_v34, 16  ;;  %v2144_v44 = vor.u32 %v2142_v4, %v2140_v51 }
  0xbe   : > { %v1537_v46 = vsel %vm1523_vm2, %v1255_v63, %v1055_v2 }
  0xbf   : > { %1007 = vrot.lane.b32.xlu2 %v7793_v3, %s7462_s8  ;;  %v1751_v3 = vshrl.u32 %v7848_v11, 16  ;;  %v1756_v38 = vrot.slane %v1754_v24, 1  ;;  %v1760_v24 = vshll.u32 %v1537_v46, 16  ;;  %v3383_v63 = vrot.slane %v1537_v46, 1 }
  0xc0   : > { %7096 = vmatmul.msk.bf16.gmra.mxu1 %vm2277_vm3, %v7848_v11 }
  0xc1   : > { %v7899_v37 = vpop.permute.xlu2 %857  ;;  %7308 = vmatpush.bf16.msra.mxu3 %v7718_v53  ;;  %v3381_v53 = vrot.slane %v1535_v34, 1  ;;  %v1753_v11 = vor.u32 %v1751_v3, %v1749_v0  ;;  %v1258_v34 = vsel %vm1234_vm1, %v7573_v7, %v7800_v8 }
  0xc3   : > { %1212 = vrot.lane.b32.xlu0 %v7889_v26, %s7463_s9  ;;  %v3382_v5 = vsel %vm3372_vm4, %v3379_v40, %v3381_v53  ;;  %v1757_v51 = vsel %vm1723_vm5, %v1753_v11, %v1756_v38  ;;  %v282_v40 = vld [vmem:[%s7553_s7 + $0xb0] sm:$0x1]  ;;  %v7957_v53 = vsel %vm1523_vm2, %v1258_v34, %v1057_v13  ;;  %v1758_v38 = vshrl.u32 %v1537_v46, 16 }
  0xc4   : > { %873 = vrot.lane.b32.xlu1 %v7810_v32, %s7462_s8  ;;  %v392_v32 = vld [vmem:[%s7553_s7 + $0x268] sm:$0x1]  ;;  %v612_v2 = vunpack.c.l.b16 %v282_v40  ;;  %v1762_v11 = vrot.slane %v1760_v24, 1  ;;  %v1764_v13 = vshll.u32 %v7957_v53, 16 }
  0xc5   : > { %v1191_v23 = vpop.permute.xlu0 %1190  ;;  %v7911_v22 = vpop.permute.xlu1 %853  ;;  %v722_v0 = vunpack.c.l.b16 %v392_v32 }
  0xc6   : > { %v7914_v39 = vsel %vm1523_vm2, %v1459_v50, %v1191_v23 }
  0xc7   : > { %v2145_v47 = vshll.u32 %v7914_v39, 16  ;;  %875 = vrot.lane.b32.xlu2 %v7815_v58, %s7462_s8  ;;  %v7950_v3 = vpack.c.b16 %v722_v0, %v722_v0  ;;  %v1763_v0 = vor.u32 %v1762_v11, %v1758_v38 }
  0xc9   : > { %v2147_v42 = vrot.slane %v2145_v47, 1  ;;  %v7926_v62 = vpop.permute.xlu2 %991  ;;  %v1465_v47 = vsel %vm1234_vm1, %v7617_v17, %v7872_v61 }
  0xcb   : > { %1078 = vrot.lane.b32.xlu0 %v7918_v41, %s7463_s9  ;;  %7167 = vmatmul.msk.bf16.gmra.mxu2 %vm2277_vm3, %v3382_v5  ;;  %v2148_v58 = vsel %vm1723_vm5, %v2144_v44, %v2147_v42  ;;  %v7967_v44 = vpack.c.b16 %v612_v2, %v612_v2  ;;  %v3384_v5 = vrot.slane %v7957_v53, 1 }
  0xcc   : > { %7074 = vmatmul.msk.bf16.gmra.mxu3 %vm2277_vm3, %v2148_v58  ;;  %1080 = vrot.lane.b32.xlu1 %v7923_v48, %s7463_s9 }
  0xcd   : > { %v988_v1 = vpop.permute.xlu0 %987  ;;  %7028 = vmatmul.msk.bf16.gmra.mxu0 %vm2277_vm3, %v1757_v51  ;;  %v1193_v59 = vpop.permute.xlu1 %1192  ;;  %v1766_v51 = vrot.slane %v1764_v13, 1 }
  0xce   : > { %v1462_v4 = vsel %vm1234_vm1, %v7605_v15, %v988_v1  ;;  %v7980_v1 = vld [vmem:[%s7553_s7 + $0x26c] sm:$0xff] }
  0xcf   : > { %v7948_v50 = vsel %vm1523_vm2, %v1462_v4, %v1193_v59  ;;  %1009 = vrot.lane.b32.xlu2 %v7840_v55, %s7462_s8  ;;  %v1767_v4 = vsel %vm1723_vm5, %v1763_v0, %v1766_v51 }
  0xd0   : > { %7097 = vmatmul.msk.bf16.gmra.mxu1 %vm2277_vm3, %v1537_v46  ;;  %v2151_v23 = vshll.u32 %v7948_v50, 16  ;;  %v2149_v15 = vshrl.u32 %v7948_v50, 16  ;;  %v3385_v46 = vsel %vm3372_vm4, %v3383_v63, %v3384_v5  ;;  %v8024_v63 = vld [vmem:[%s7553_s7 + $0xb4] sm:$0xff] }
  0xd1   : > { %v7959_v7 = vpop.permute.xlu2 %1064 }
  0xd2   : > { %v2153_v8 = vrot.slane %v2151_v23, 1  ;;  %v1261_v23 = vsel %vm1234_vm1, %v7581_v9, %v7911_v22  ;;  %v1468_v9 = vsel %vm1234_vm1, %v7642_v25, %v7926_v62 }
  0xd3   : > { %1214 = vrot.lane.b32.xlu0 %v7950_v3, %s7463_s9 }
  0xd4   : > { %877 = vrot.lane.b32.xlu1 %v7856_v56, %s7462_s8  ;;  %v2154_v61 = vor.u32 %v2153_v8, %v2149_v15  ;;  %v1541_v15 = vsel %vm1523_vm2, %v1261_v23, %v7850_v6 }
  0xd5   : > { %v1195_v32 = vpop.permute.xlu0 %1194  ;;  %v856_v42 = vpop.permute.xlu1 %855  ;;  %v1771_v22 = vshll.u32 %v1541_v15, 16  ;;  %v3386_v11 = vrot.slane %v1541_v15, 1  ;;  %v1267_v15 = vsel %vm1234_vm1, %v7594_v12, %v7899_v37 }
  0xd6   : > { %v7974_v58 = vsel %vm1523_vm2, %v1465_v47, %v1195_v32 }
  0xd7   : > { %v2155_v17 = vshll.u32 %v7974_v58, 16  ;;  %1082 = vrot.lane.b32.xlu2 %v7967_v44, %s7463_s9  ;;  %v2159_v47 = vshrl.u32 %v7974_v58, 16  ;;  %v1773_v62 = vrot.slane %v1771_v22, 1 }
  0xd9   : > { %v2157_v59 = vrot.slane %v2155_v17, 1  ;;  %v7982_v40 = vpop.permute.xlu2 %995 }
  0xdb   : > { %1011 = vrot.lane.b32.xlu0 %v7869_v45, %s7462_s8  ;;  %7168 = vmatmul.msk.bf16.gmra.mxu2 %vm2277_vm3, %v3385_v46  ;;  %v2158_v34 = vsel %vm1723_vm5, %v2154_v61, %v2157_v59  ;;  %v7998_v45 = vld [vmem:[%s7553_s7 + $0x274] sm:$0xff]  ;;  %v2161_v17 = vor.u32 %v2159_v47, %v2157_v59  ;;  %v8029_v61 = vld [vmem:[%s7553_s7 + $0xbc] sm:$0xff] }
  0xdc   : > { %7075 = vmatmul.msk.bf16.gmra.mxu3 %vm2277_vm3, %v2158_v34  ;;  %1216 = vrot.lane.b32.xlu1 %v7980_v1, %s7463_s9  ;;  %v1264_v34 = vsel %vm1234_vm1, %v7590_v10, %v856_v42 }
  0xdd   : > { %v1061_v2 = vpop.permute.xlu0 %1060  ;;  %7029 = vmatmul.msk.bf16.gmra.mxu0 %vm2277_vm3, %v1767_v4  ;;  %v1063_v24 = vpop.permute.xlu1 %1062  ;;  %v3387_v4 = vsel %vm3372_vm4, %v3384_v5, %v3386_v11  ;;  %v287_v5 = vld [vmem:[%s7553_s7 + $0xc4] sm:$0x1] }
  0xde   : > { %v1543_v23 = vsel %vm1523_vm2, %v1264_v34, %v1061_v2  ;;  %v617_v2 = vunpack.c.l.b16 %v287_v5  ;;  %v8063_v11 = vsel %vm1523_vm2, %v1267_v15, %v1063_v24 }
  0xdf   : > { %1013 = vrot.lane.b32.xlu2 %v7889_v26, %s7462_s8  ;;  %v1768_v26 = vshrl.u32 %v7957_v53, 16  ;;  %v1777_v22 = vshll.u32 %v1543_v23, 16  ;;  %v1781_v24 = vshll.u32 %v8063_v11, 16  ;;  %v3388_v34 = vrot.slane %v1543_v23, 1 }
  0xe0   : > { %7098 = vmatmul.msk.bf16.gmra.mxu1 %vm2277_vm3, %v7957_v53 }
  0xe1   : > { %v8006_v8 = vpop.permute.xlu2 %863  ;;  %v1770_v53 = vor.u32 %v1768_v26, %v1766_v51 }
  0xe3   : > { %1218 = vrot.lane.b32.xlu0 %v7998_v45, %s7463_s9  ;;  %v1774_v59 = vsel %vm1723_vm5, %v1770_v53, %v1773_v62  ;;  %v1775_v62 = vshrl.u32 %v1543_v23, 16  ;;  %v1779_v53 = vrot.slane %v1777_v22, 1 }
  0xe4   : > { %879 = vrot.lane.b32.xlu1 %v7918_v41, %s7462_s8  ;;  %v397_v41 = vld [vmem:[%s7553_s7 + $0x27c] sm:$0x1] }
  0xe5   : > { %v1197_v6 = vpop.permute.xlu0 %1196  ;;  %v8017_v38 = vpop.permute.xlu1 %859  ;;  %v727_v51 = vunpack.c.l.b16 %v397_v41 }
  0xe6   : > { %v8020_v13 = vsel %vm1523_vm2, %v1468_v9, %v1197_v6 }
  0xe7   : > { %11067 = vst [vmem:[#allocation5_spill] sm:$0xff] %v8020_v13  ;;  %v2162_v32 = vshll.u32 %v8020_v13, 16  ;;  %881 = vrot.lane.b32.xlu2 %v7923_v48, %s7462_s8  ;;  %v8056_v26 = vpack.c.b16 %v727_v51, %v727_v51  ;;  %v1780_v51 = vor.u32 %v1779_v53, %v1775_v62 }
  0xe9   : > { %v2164_v0 = vrot.slane %v2162_v32, 1  ;;  %v8032_v46 = vpop.permute.xlu2 %997  ;;  %v1474_v32 = vsel %vm1234_vm1, %v7620_v18, %v7982_v40 }
  0xeb   : > { %1084 = vrot.lane.b32.xlu0 %v8024_v63, %s7463_s9  ;;  %7169 = vmatmul.msk.bf16.gmra.mxu2 %vm2277_vm3, %v3387_v4  ;;  %v2165_v48 = vsel %vm1723_vm5, %v2161_v17, %v2164_v0  ;;  %v8073_v17 = vpack.c.b16 %v617_v2, %v617_v2  ;;  %v3389_v4 = vrot.slane %v8063_v11, 1 }
  0xec   : > { %7076 = vmatmul.msk.bf16.gmra.mxu3 %vm2277_vm3, %v2165_v48  ;;  %1086 = vrot.lane.b32.xlu1 %v8029_v61, %s7463_s9 }
  0xed   : > { %v994_v10 = vpop.permute.xlu0 %993  ;;  %7030 = vmatmul.msk.bf16.gmra.mxu0 %vm2277_vm3, %v1774_v59  ;;  %v1199_v42 = vpop.permute.xlu1 %1198  ;;  %v1783_v59 = vrot.slane %v1781_v24, 1 }
  0xee   : > { %v1471_v47 = vsel %vm1234_vm1, %v7608_v16, %v994_v10  ;;  %v8086_v10 = vld [vmem:[%s7553_s7 + $0x280] sm:$0xff] }
  0xef   : > { %v8054_v9 = vsel %vm1523_vm2, %v1471_v47, %v1199_v42  ;;  %1015 = vrot.lane.b32.xlu2 %v7950_v3, %s7462_s8  ;;  %v1784_v47 = vsel %vm1723_vm5, %v1780_v51, %v1783_v59 }
  0xf0   : > { %7099 = vmatmul.msk.bf16.gmra.mxu1 %vm2277_vm3, %v1543_v23  ;;  %v2168_v6 = vshll.u32 %v8054_v9, 16  ;;  %v2166_v16 = vshrl.u32 %v8054_v9, 16  ;;  %v3390_v23 = vsel %vm3372_vm4, %v3388_v34, %v3389_v4  ;;  %v8130_v34 = vld [vmem:[%s7553_s7 + $0xc8] sm:$0xff] }
  0xf1   : > { %v8065_v12 = vpop.permute.xlu2 %1070 }
  0xf2   : > { %v2170_v37 = vrot.slane %v2168_v6, 1  ;;  %v1270_v6 = vsel %vm1234_vm1, %v7602_v14, %v8017_v38  ;;  %v1477_v14 = vsel %vm1234_vm1, %v7645_v27, %v8032_v46 }
  0xf3   : > { %1220 = vrot.lane.b32.xlu0 %v8056_v26, %s7463_s9 }
  0xf4   : > { %883 = vrot.lane.b32.xlu1 %v7967_v44, %s7462_s8  ;;  %v2171_v40 = vor.u32 %v2170_v37, %v2166_v16  ;;  %v1547_v16 = vsel %vm1523_vm2, %v1270_v6, %v7959_v7  ;;  %v1276_v6 = vsel %vm1234_vm1, %v7633_v21, %v8006_v8 }
  0xf5   : > { %v1201_v41 = vpop.permute.xlu0 %1200  ;;  %v862_v0 = vpop.permute.xlu1 %861  ;;  %v1788_v38 = vshll.u32 %v1547_v16, 16  ;;  %v3391_v53 = vrot.slane %v1547_v16, 1 }
  0xf6   : > { %v8080_v48 = vsel %vm1523_vm2, %v1474_v32, %v1201_v41 }
  0xf7   : > { %v2172_v18 = vshll.u32 %v8080_v48, 16  ;;  %1088 = vrot.lane.b32.xlu2 %v8073_v17, %s7463_s9  ;;  %v2176_v32 = vshrl.u32 %v8080_v48, 16  ;;  %v1790_v27 = vrot.slane %v1788_v38, 1 }
  0xf9   : > { %v2174_v42 = vrot.slane %v2172_v18, 1  ;;  %v8088_v5 = vpop.permute.xlu2 %1001 }
  0xfb   : > { %1017 = vrot.lane.b32.xlu0 %v7980_v1, %s7462_s8  ;;  %7170 = vmatmul.msk.bf16.gmra.mxu2 %vm2277_vm3, %v3390_v23  ;;  %v2175_v15 = vsel %vm1723_vm5, %v2171_v40, %v2174_v42  ;;  %v8104_v1 = vld [vmem:[%s7553_s7 + $0x288] sm:$0xff]  ;;  %v2178_v18 = vor.u32 %v2176_v32, %v2174_v42  ;;  %v1273_v23 = vsel %vm1234_vm1, %v7630_v20, %v862_v0 }
  0xfc   : > { %7077 = vmatmul.msk.bf16.gmra.mxu3 %vm2277_vm3, %v2175_v15  ;;  %1222 = vrot.lane.b32.xlu1 %v8086_v10, %s7463_s9  ;;  %v3392_v15 = vsel %vm3372_vm4, %v3389_v4, %v3391_v53  ;;  %v292_v4 = vld [vmem:[%s7553_s7 + $0xd8] sm:$0x1] }
  0xfd   : > { %v1067_v2 = vpop.permute.xlu0 %1066  ;;  %7031 = vmatmul.msk.bf16.gmra.mxu0 %vm2277_vm3, %v1784_v47  ;;  %v1069_v22 = vpop.permute.xlu1 %1068 }
  0xfe   : > { %v1549_v47 = vsel %vm1523_vm2, %v1273_v23, %v1067_v2  ;;  %v622_v2 = vunpack.c.l.b16 %v292_v4  ;;  %v8169_v21 = vsel %vm1523_vm2, %v1276_v6, %v1069_v22  ;;  %v7298_v4 = vld [vmem:[%s7553_s7 + $0x294] sm:$0xff] }
  0xff   : > { %1019 = vrot.lane.b32.xlu2 %v7998_v45, %s7462_s8  ;;  %v1785_v45 = vshrl.u32 %v8063_v11, 16  ;;  %v1794_v38 = vshll.u32 %v1549_v47, 16  ;;  %v1798_v22 = vshll.u32 %v8169_v21, 16  ;;  %v3393_v23 = vrot.slane %v1549_v47, 1 }
 0x100   : > { %7100 = vmatmul.msk.bf16.gmra.mxu1 %vm2277_vm3, %v8063_v11  ;;  %v8135_v11 = vld [vmem:[%s7553_s7 + $0xd0] sm:$0xff] }
 0x101   : > { %v8112_v37 = vpop.permute.xlu2 %869  ;;  %v1787_v46 = vor.u32 %v1785_v45, %v1783_v59 }
 0x103   : > { %1224 = vrot.lane.b32.xlu0 %v8104_v1, %s7463_s9  ;;  %v1791_v42 = vsel %vm1723_vm5, %v1787_v46, %v1790_v27  ;;  %v1792_v27 = vshrl.u32 %v1549_v47, 16  ;;  %v1796_v46 = vrot.slane %v1794_v38, 1 }
 0x104   : > { %885 = vrot.lane.b32.xlu1 %v8024_v63, %s7462_s8  ;;  %v402_v63 = vld [vmem:[%s7553_s7 + $0x290] sm:$0x1] }
 0x105   : > { %v1203_v7 = vpop.permute.xlu0 %1202  ;;  %v8123_v62 = vpop.permute.xlu1 %865  ;;  %v833_v59 = vunpack.c.l.b16 %v402_v63 }
 0x106   : > { %v8126_v24 = vsel %vm1523_vm2, %v1477_v14, %v1203_v7 }
 0x107   : > { %11068 = vst [vmem:[#allocation6_spill] sm:$0xff] %v8126_v24  ;;  %v2179_v41 = vshll.u32 %v8126_v24, 16  ;;  %887 = vrot.lane.b32.xlu2 %v8029_v61, %s7462_s8  ;;  %v8162_v45 = vpack.c.b16 %v833_v59, %v833_v59 }
 0x109   : > { %v2181_v40 = vrot.slane %v2179_v41, 1  ;;  %v8138_v51 = vpop.permute.xlu2 %1003  ;;  %v1483_v41 = vsel %vm1234_vm1, %v7665_v31, %v8088_v5 }
 0x10b   : > { %1090 = vrot.lane.b32.xlu0 %v8130_v34, %s7463_s9  ;;  %7171 = vmatmul.msk.bf16.gmra.mxu2 %vm2277_vm3, %v3392_v15  ;;  %v2182_v61 = vsel %vm1723_vm5, %v2178_v18, %v2181_v40  ;;  %v8179_v18 = vpack.c.b16 %v622_v2, %v622_v2  ;;  %v3394_v15 = vrot.slane %v8169_v21, 1 }
 0x10c   : > { %7078 = vmatmul.msk.bf16.gmra.mxu3 %vm2277_vm3, %v2182_v61  ;;  %1092 = vrot.lane.b32.xlu1 %v8135_v11, %s7463_s9 }
 0x10d   : > { %v1000_v20 = vpop.permute.xlu0 %999  ;;  %7032 = vmatmul.msk.bf16.gmra.mxu0 %vm2277_vm3, %v1791_v42  ;;  %v2952_v0 = vpop.f32.mrf.mxu1  ;;  %v1797_v42 = vor.u32 %v1796_v46, %v1792_v27  ;;  %v7299_v27 = vld [vmem:[%s7553_s7 + $0x29c] sm:$0xff] }
 0x10e   : > { %v1480_v16 = vsel %vm1234_vm1, %v7656_v30, %v1000_v20  ;;  %v1205_v32 = vpop.permute.xlu1 %1204  ;;  %v1800_v20 = vrot.slane %v1798_v22, 1 }
 0x10f   : > { %v8160_v14 = vsel %vm1523_vm2, %v1480_v16, %v1205_v32  ;;  %1021 = vrot.lane.b32.xlu2 %v8056_v26, %s7462_s8  ;;  %v3395_v32 = vsel %vm3372_vm4, %v3393_v23, %v3394_v15 }
 0x110   : > { %7101 = vmatmul.msk.bf16.gmra.mxu1 %vm2277_vm3, %v1549_v47  ;;  %v2185_v7 = vshll.u32 %v8160_v14, 16  ;;  %v2183_v30 = vshrl.u32 %v8160_v14, 16  ;;  %v1801_v38 = vsel %vm1723_vm5, %v1797_v42, %v1800_v20 }
 0x111   : > { %v8171_v8 = vpop.permute.xlu2 %1076 }
 0x112   : > { %v2187_v53 = vrot.slane %v2185_v7, 1 }
 0x113   : > { %1226 = vrot.lane.b32.xlu0 %v8162_v45, %s7463_s9 }
 0x114   : > { %889 = vrot.lane.b32.xlu1 %v8073_v17, %s7462_s8  ;;  %v2188_v5 = vor.u32 %v2187_v53, %v2183_v30  ;;  %v1279_v53 = vsel %vm1234_vm1, %v7653_v29, %v8123_v62  ;;  %v1486_v62 = vsel %vm1234_vm1, %v7697_v43, %v8138_v51 }
 0x115   : > { %v1207_v63 = vpop.permute.xlu0 %1206  ;;  %v2954_v40 = vpop.f32.mrf.mxu1  ;;  %v1553_v22 = vsel %vm1523_vm2, %v1279_v53, %v8065_v12  ;;  %v8238_v53 = vld [vmem:[%s7553_s7 + $0xdc] sm:$0xff] }
 0x116   : > { %v8186_v61 = vsel %vm1523_vm2, %v1483_v41, %v1207_v63  ;;  %v8188_v59 = vpop.permute.xlu1 %867 }
 0x117   : > { %v2189_v31 = vshll.u32 %v8186_v61, 16  ;;  %1094 = vrot.lane.b32.xlu2 %v8179_v18, %s7463_s9  ;;  %v2193_v29 = vshrl.u32 %v8186_v61, 16 }
 0x119   : > { %v2191_v6 = vrot.slane %v2189_v31, 1  ;;  %v8194_v16 = vpop.permute.xlu2 %1007 }
 0x11a   : > { %v2483_v47 = vpop.f32.mrf.mxu0 }
 0x11b   : > { %1023 = vrot.lane.b32.xlu0 %v8086_v10, %s7462_s8  ;;  %7172 = vmatmul.msk.bf16.gmra.mxu2 %vm2277_vm3, %v3395_v32  ;;  %v2192_v2 = vsel %vm1723_vm5, %v2188_v5, %v2191_v6  ;;  %v2953_v46 = vadd.f32 %v2952_v0, %v2483_v47  ;;  %v1805_v0 = vshll.u32 %v1553_v22, 16  ;;  %v3396_v5 = vrot.slane %v1553_v22, 1 }
 0x11c   : > { %7079 = vmatmul.msk.bf16.gmra.mxu3 %vm2277_vm3, %v2192_v2  ;;  %1228 = vrot.lane.b32.xlu1 %v7298_v4, %s7463_s9 }
 0x11d   : > { %v8204_v7 = vpop.permute.xlu0 %1072  ;;  %7033 = vmatmul.msk.bf16.gmra.mxu0 %vm2277_vm3, %v1801_v38  ;;  %v2957_v30 = vpop.f32.mrf.mxu1 }
 0x11e   : > { %v3746_v10 = vpop.f32.mrf.mxu2  ;;  %v8210_v41 = vpop.permute.xlu1 %1074 }
 0x11f   : > { %1025 = vrot.lane.b32.xlu2 %v8104_v1, %s7462_s8  ;;  %v4066_v23 = vadd.f32 %v3746_v10, %v2953_v46  ;;  %v1802_v1 = vshrl.u32 %v8169_v21, 16  ;;  %v407_v10 = vld [vmem:[%s7553_s7 + $0x2a4] sm:$0x1]  ;;  %v3397_v46 = vsel %vm3372_vm4, %v3394_v15, %v3396_v5 }
 0x120   : > { %7102 = vmatmul.msk.bf16.gmra.mxu1 %vm2277_vm3, %v8169_v21 }
 0x121   : > { %v8219_v63 = vpop.permute.xlu2 %875  ;;  %v4456_v47 = vmul.f32 %v4066_v23, %v4066_v23  ;;  %v4849_v21 = vpack.c.bf16 %v4066_v23, %v4066_v23  ;;  %v1804_v22 = vor.u32 %v1802_v1, %v1800_v20 }
 0x122   : > { %v2485_v31 = vpop.f32.mrf.mxu0 }
 0x123   : > { %1230 = vrot.lane.b32.xlu0 %v7299_v27, %s7463_s9  ;;  %v2955_v12 = vadd.f32 %v2954_v40, %v2485_v31  ;;  %v1807_v40 = vrot.slane %v1805_v0, 1  ;;  %v4195_v27 = vsel %vm4194_vm6, %v4066_v23, 0.0  ;;  %v8246_v31 = vld [vmem:[%s7553_s7 + $0xe4] sm:$0xff]  ;;  %v1038_v0 = vunpack.c.l.b16 %v407_v10 }
 0x124   : > { %891 = vrot.lane.b32.xlu1 %v8130_v34, %s7462_s8  ;;  %v2195_v34 = vor.u32 %v2193_v29, %v2191_v6  ;;  %v1282_v6 = vsel %vm1234_vm1, %v7677_v35, %v8188_v59  ;;  %v5105_v15 = vunpack.c.l.b16 %v4849_v21  ;;  %v1285_v59 = vsel %vm1234_vm1, %v7680_v36, %v8112_v37 }
 0x125   : > { %v1209_v42 = vpop.permute.xlu0 %1208  ;;  %v8229_v4 = vpop.f32.mrf.mxu1  ;;  %v1808_v35 = vsel %vm1723_vm5, %v1804_v22, %v1807_v40 }
 0x126   : > { %v8232_v32 = vsel %vm1523_vm2, %v1486_v62, %v1209_v42  ;;  %v3748_v43 = vpop.f32.mrf.mxu2  ;;  %v8234_v51 = vpop.permute.xlu1 %871 }
 0x127   : > { %11069 = vst [vmem:[#allocation7_spill] sm:$0xff] %v8232_v32  ;;  %v2196_v2 = vshll.u32 %v8232_v32, 16  ;;  %v4067_v38 = vadd.f32 %v3748_v43, %v2955_v12  ;;  %893 = vrot.lane.b32.xlu2 %v8135_v11, %s7462_s8  ;;  %v4584_v11 = vsel %vm4194_vm6, %v4456_v47, 0.0  ;;  %v8269_v47 = vsel %vm1523_vm2, %v1282_v6, %v8204_v7 }
 0x128   : > { %v1811_v7 = vshll.u32 %v8269_v47, 16 }
 0x129   : > { %v2198_v62 = vrot.slane %v2196_v2, 1  ;;  %v4196_v42 = vsel %vm4194_vm6, %v4067_v38, 0.0  ;;  %v4457_v32 = vmul.f32 %v4067_v38, %v4067_v38  ;;  %v4850_v12 = vpack.c.bf16 %v4067_v38, %v4067_v38  ;;  %v8249_v43 = vpop.permute.xlu2 %1009 }
 0x12a   : > { %v4197_v29 = vadd.f32 %v4196_v42, %v4195_v27  ;;  %v2488_v23 = vpop.f32.mrf.mxu0 }
 0x12b   : > { %v4585_v20 = vsel %vm4194_vm6, %v4457_v32, 0.0  ;;  %v5106_v1 = vunpack.c.l.b16 %v4850_v12  ;;  %1096 = vrot.lane.b32.xlu0 %v8238_v53, %s7463_s9  ;;  %7173 = vmatmul.msk.bf16.gmra.mxu2 %vm2277_vm3, %v3397_v46  ;;  %v2199_v5 = vsel %vm1723_vm5, %v2195_v34, %v2198_v62  ;;  %v2958_v21 = vadd.f32 %v2957_v30, %v2488_v23 }
 0x12c   : > { %v4586_v2 = vadd.f32 %v4585_v20, %v4584_v11  ;;  %7080 = vmatmul.msk.bf16.gmra.mxu3 %vm2277_vm3, %v2199_v5  ;;  %1098 = vrot.lane.b32.xlu1 %v8246_v31, %s7463_s9  ;;  %v1041_v46 = vpack.c.b16 %v1038_v0, %v1038_v0  ;;  %v8284_v30 = vsel %vm1523_vm2, %v1285_v59, %v8210_v41  ;;  %v3398_v59 = vrot.slane %v8269_v47, 1 }
 0x12d   : > { %v5233_v32 = vpack.c.b16 %v5106_v1, %v5105_v15  ;;  %v1006_v38 = vpop.permute.xlu0 %1005  ;;  %7034 = vmatmul.msk.bf16.gmra.mxu0 %vm2277_vm3, %v1808_v35  ;;  %v8272_v34 = vpop.f32.mrf.mxu1  ;;  %v1492_v41 = vsel %vm1234_vm1, %v7736_v57, %v8194_v16  ;;  %v1813_v35 = vrot.slane %v1811_v7, 1  ;;  %v1815_v57 = vshll.u32 %v8284_v30, 16 }
 0x12e   : > { %v1489_v10 = vsel %vm1234_vm1, %v7721_v54, %v1006_v38  ;;  %v3751_v40 = vpop.f32.mrf.mxu2  ;;  %v1211_v27 = vpop.permute.xlu1 %1210 }
 0x12f   : > { %v5299_v22 = vshrl.u32 %v5233_v32, 16  ;;  %v4068_v36 = vadd.f32 %v3751_v40, %v2958_v21  ;;  %v8277_v37 = vsel %vm1523_vm2, %v1489_v10, %v1211_v27  ;;  %1027 = vrot.lane.b32.xlu2 %v8162_v45, %s7462_s8  ;;  %v5302_v42 = vshll.u32 %v5233_v32, 16 }
 0x130   : > { %7103 = vmatmul.msk.bf16.gmra.mxu1 %vm2277_vm3, %v8269_v47  ;;  %v2202_v54 = vshll.u32 %v8277_v37, 16  ;;  %v2200_v1 = vshrl.u32 %v8277_v37, 16 }
 0x131   : > { %v8289_v62 = vrot.slane %v5299_v22, 7  ;;  %v4198_v12 = vsel %vm4194_vm6, %v4068_v36, 0.0  ;;  %v4458_v6 = vmul.f32 %v4068_v36, %v4068_v36  ;;  %v8292_v11 = vpop.permute.xlu2 %1082 }
 0x132   : > { %v4199_v45 = vadd.f32 %v4198_v12, %v4197_v29  ;;  %v2490_v23 = vpop.f32.mrf.mxu0  ;;  %v2204_v5 = vrot.slane %v2202_v54, 1  ;;  %v1809_v29 = vshrl.u32 %v8269_v47, 16 }
 0x133   : > { %v5304_v15 = vor.u32 %v5302_v42, %v8289_v62  ;;  %v4587_v20 = vsel %vm4194_vm6, %v4458_v6, 0.0  ;;  %1232 = vrot.lane.b32.xlu0 %v1041_v46, %s7463_s9  ;;  %v2960_v32 = vadd.f32 %v8229_v4, %v2490_v23  ;;  %v4851_v4 = vpack.c.bf16 %v4068_v36, %v4068_v36  ;;  %v297_v23 = vld [vmem:[%s7553_s7 + $0xec] sm:$0x1] }
 0x134   : > { %v4588_v16 = vadd.f32 %v4587_v20, %v4586_v2  ;;  %895 = vrot.lane.b32.xlu1 %v8179_v18, %s7462_s8  ;;  %v2205_v42 = vor.u32 %v2204_v5, %v2200_v1  ;;  %v1814_v12 = vor.u32 %v1813_v35, %v1809_v29  ;;  %v8331_v6 = vrot.slane %v1815_v57, 1 }
 0x135   : > { %v1213_v21 = vpop.permute.xlu0 %1212  ;;  %v8313_v38 = vpop.f32.mrf.mxu1  ;;  %v5844_v10 = vsel %vm8299_vm9, 4048220490, %v5304_v15  ;;  %v627_v5 = vunpack.c.l.b16 %v297_v23  ;;  %v5107_v29 = vunpack.c.l.b16 %v4851_v4  ;;  %v7257_v23 = vld [vmem:[%s7553_s7 + $0xf8] sm:$0xff] }
 0x136   : > { %v8319_v27 = vsel %vm1523_vm2, %v1492_v41, %v1213_v21  ;;  %v3753_v2 = vpop.f32.mrf.mxu2  ;;  %v8321_v46 = vpop.permute.xlu1 %873  ;;  %v5975_v22 = vunpack.c.l.b16 %v5844_v10  ;;  %v5976_v47 = vunpack.c.h.b16 %v5844_v10 }
 0x137   : > { %v2206_v7 = vshll.u32 %v8319_v27, 16  ;;  %v4069_v54 = vadd.f32 %v3753_v2, %v2960_v32  ;;  %v11072_v32 = vrot.slane %v8284_v30, 1 }
 0x138   : > { %v6137_v41 = vpack.c.b16 %v5975_v22, %v5975_v22  ;;  %v6138_v15 = vpack.c.b16 %v5976_v47, %v5976_v47  ;;  %v8357_v22 = vpack.c.b16 %v627_v5, %v627_v5  ;;  %v1495_v5 = vsel %vm1234_vm1, %v7762_v19, %v8249_v43 }
 0x139   : > { %v4200_v20 = vsel %vm4194_vm6, %v4069_v54, 0.0  ;;  %v4459_v21 = vmul.f32 %v4069_v54, %v4069_v54  ;;  %v4852_v10 = vpack.c.bf16 %v4069_v54, %v4069_v54  ;;  %v8335_v40 = vrot.slane %v2206_v7, 1  ;;  %v8337_v24 = vpop.permute.xlu2 %1013 }
 0x13a   : > { %v4201_v36 = vadd.f32 %v4200_v20, %v4199_v45  ;;  %v2493_v13 = vpop.f32.mrf.mxu0  ;;  %v3400_v1 = vsel %vm3372_vm4, %v3398_v59, %v11072_v32  ;;  %6466 = vst.msk [vmem:[%s8328_s11 + $0x14] sm:$0xf] %vm6459_vm10, %v6137_v41  ;;  %v1818_v59 = vsel %vm1723_vm5, %v1814_v12, %v8331_v6  ;;  %1100 = vrot.lane.b32.xlu2 %v8357_v22, %s7463_s9 }
 0x13b   : > { %v4589_v35 = vsel %vm4194_vm6, %v4459_v21, 0.0  ;;  %v5108_v57 = vunpack.c.l.b16 %v4852_v10  ;;  %7174 = vmatmul.msk.bf16.gmra.mxu2 %vm2277_vm3, %v3400_v1  ;;  %v2209_v2 = vsel %vm1723_vm5, %v2205_v42, %v8335_v40  ;;  %897 = vrot.lane.b32.xlu0 %v8238_v53, %s7462_s8  ;;  %6467 = vst.msk [vmem:[%s8328_s11 + $0x18] sm:$0xf] %vm6459_vm10, %v6138_v15  ;;  %v2963_v7 = vadd.f32 %v8272_v34, %v2493_v13 }
 0x13c   : > { %v4590_v45 = vadd.f32 %v4589_v35, %v4588_v16  ;;  %7081 = vmatmul.msk.bf16.gmra.mxu3 %vm2277_vm3, %v2209_v2  ;;  %899 = vrot.lane.b32.xlu1 %v8246_v31, %s7462_s8  ;;  %v1288_v16 = vsel %vm1234_vm1, %v7708_v49, %v8234_v51  ;;  %v2210_v10 = vshrl.u32 %v8319_v27, 16 }
 0x13d   : > { %v5234_v47 = vpack.c.b16 %v5108_v57, %v5107_v29  ;;  %v8359_v4 = vpop.permute.xlu0 %1078  ;;  %7035 = vmatmul.msk.bf16.gmra.mxu0 %vm2277_vm3, %v1818_v59  ;;  %v8362_v53 = vpop.f32.mrf.mxu1  ;;  %v1559_v15 = vsel %vm1523_vm2, %v1288_v16, %v8171_v8  ;;  %v1819_v8 = vshrl.u32 %v8284_v30, 16 }
 0x13e   : > { %v3756_v54 = vpop.f32.mrf.mxu2  ;;  %v8368_v42 = vpop.permute.xlu1 %1080  ;;  %v1822_v29 = vshll.u32 %v1559_v15, 16  ;;  %v3401_v19 = vrot.slane %v1559_v15, 1 }
 0x13f   : > { %v5306_v31 = vshrl.u32 %v5234_v47, 16  ;;  %v8372_v12 = vpop.f32.mrf.mxu3  ;;  %v4070_v41 = vadd.f32 %v3756_v54, %v2963_v7  ;;  %v5309_v13 = vshll.u32 %v5234_v47, 16 }
 0x140   : > { %7104 = vmatmul.msk.bf16.gmra.mxu1 %vm2277_vm3, %v8284_v30  ;;  %v1824_v15 = vrot.slane %v1822_v29, 1 }
 0x141   : > { %v8379_v49 = vrot.slane %v5306_v31, 7  ;;  %v4202_v51 = vsel %vm4194_vm6, %v4070_v41, 0.0  ;;  %v4460_v34 = vmul.f32 %v4070_v41, %v4070_v41  ;;  %v8382_v21 = vpop.permute.xlu2 %881 }
 0x142   : > { %v2495_v20 = vpop.f32.mrf.mxu0  ;;  %v4203_v1 = vadd.f32 %v4202_v51, %v4201_v36 }
 0x143   : > { %v5311_v32 = vor.u32 %v5309_v13, %v8379_v49  ;;  %1104 = vrot.lane.b32.xlu0 %v7257_v23, %s7463_s9  ;;  %v4591_v35 = vsel %vm4194_vm6, %v4460_v34, 0.0  ;;  %v2965_v36 = vadd.f32 %v8313_v38, %v2495_v20  ;;  %v4853_v13 = vpack.c.bf16 %v4070_v41, %v4070_v41  ;;  %v7352_v41 = vld [vmem:[%s7553_s7 + $0x78] sm:$0xff] }
 0x144   : > { %901 = vrot.lane.b32.xlu1 %v8357_v22, %s7462_s8  ;;  %v4592_v2 = vadd.f32 %v4591_v35, %v4590_v45  ;;  %v2212_v38 = vor.u32 %v2210_v10, %v8335_v40  ;;  %v11074_v10 = vrot.slane %v8284_v30, 1 }
 0x145   : > { %v5312_v57 = vsel %vm5297_vm7, %v8289_v62, %v5311_v32  ;;  %v1215_v59 = vpop.permute.xlu0 %1214  ;;  %v8397_v47 = vpop.f32.mrf.mxu1  ;;  %v1821_v32 = vor.u32 %v1819_v8, %v8331_v6  ;;  %v5876_v6 = vsel %vm8299_vm9, %v8379_v49, 4048220490  ;;  %v5109_v8 = vunpack.c.l.b16 %v4853_v13 }
 0x146   : > { %v5977_v43 = vunpack.c.l.b16 %v5312_v57  ;;  %v5978_v16 = vunpack.c.h.b16 %v5312_v57  ;;  %v8400_v7 = vsel %vm1523_vm2, %v1495_v5, %v1215_v59  ;;  %v3758_v54 = vpop.f32.mrf.mxu2  ;;  %v8402_v31 = vpop.permute.xlu1 %877  ;;  %v3402_v29 = vsel %vm3372_vm4, %v11074_v10, %v3401_v19 }
 0x147   : > { %v2213_v62 = vshll.u32 %v8400_v7, 16  ;;  %v4071_v45 = vadd.f32 %v3758_v54, %v2965_v36  ;;  %v8405_v51 = vpop.f32.mrf.mxu3  ;;  %v1291_v36 = vsel %vm1234_vm1, %v7352_v41, %v8321_v46  ;;  %v1825_v49 = vsel %vm1723_vm5, %v1821_v32, %v1824_v15 }
 0x148   : > { %11073 = vst [vmem:[#allocation8_spill] sm:$0xff] %v8405_v51  ;;  %v6139_v34 = vpack.c.b16 %v5977_v43, %v5977_v43  ;;  %v6140_v20 = vpack.c.b16 %v5978_v16, %v5978_v16  ;;  %v8436_v13 = vsel %vm1523_vm2, %v1291_v36, %v8359_v4 }
 0x149   : > { %v2215_v5 = vrot.slane %v2213_v62, 1  ;;  %v4204_v35 = vsel %vm4194_vm6, %v4071_v45, 0.0  ;;  %v4461_v57 = vmul.f32 %v4071_v45, %v4071_v45  ;;  %v4854_v59 = vpack.c.bf16 %v4071_v45, %v4071_v45  ;;  %v8431_v62 = vpop.permute.xlu2 %1015 }
 0x14a   : > { %6468 = vst.msk [vmem:[%s8328_s11 + $0x1c] sm:$0xf] %vm6459_vm10, %v6139_v34  ;;  %v4205_v54 = vadd.f32 %v4204_v35, %v4203_v1  ;;  %v2498_v40 = vpop.f32.mrf.mxu0  ;;  %v7353_v1 = vld [vmem:[%s7553_s7 + $0x80] sm:$0xff] }
 0x14b   : > { %6469 = vst.msk [vmem:[%s8328_s11 + $0x20] sm:$0xf] %vm6459_vm10, %v6140_v20  ;;  %v4593_v43 = vsel %vm4194_vm6, %v4461_v57, 0.0  ;;  %v5110_v16 = vunpack.c.l.b16 %v4854_v59  ;;  %7175 = vmatmul.msk.bf16.gmra.mxu2 %vm2277_vm3, %v3402_v29  ;;  %v2216_v46 = vsel %vm1723_vm5, %v2212_v38, %v2215_v5  ;;  %v1294_v30 = vsel %vm1234_vm1, %v7353_v1, %v8219_v63  ;;  %v7354_v20 = vld [vmem:[%s7553_s7 + $0x244] sm:$0xff] }
 0x14c   : > { %v4594_v19 = vadd.f32 %v4593_v43, %v4592_v2  ;;  %7082 = vmatmul.msk.bf16.gmra.mxu3 %vm2277_vm3, %v2216_v46  ;;  %905 = vrot.lane.b32.xlu1 %v7257_v23, %s7462_s8  ;;  %v2968_v38 = vadd.f32 %v8362_v53, %v2498_v40  ;;  %v5979_v2 = vunpack.c.l.b16 %v5876_v6  ;;  %v1828_v53 = vshll.u32 %v8436_v13, 16 }
 0x14d   : > { %v5235_v45 = vpack.c.b16 %v5110_v16, %v5109_v8  ;;  %v1012_v34 = vpop.permute.xlu0 %1011  ;;  %7036 = vmatmul.msk.bf16.gmra.mxu0 %vm2277_vm3, %v1825_v49  ;;  %v8440_v63 = vpop.f32.mrf.mxu1  ;;  %v8452_v59 = vsel %vm1523_vm2, %v1294_v30, %v8368_v42  ;;  %v7355_v16 = vld [vmem:[%s7553_s7 + $0x24c] sm:$0xff] }
 0x14e   : > { %v1498_v15 = vsel %vm1234_vm1, %v7354_v20, %v1012_v34  ;;  %v3761_v32 = vpop.f32.mrf.mxu2  ;;  %v1217_v5 = vpop.permute.xlu1 %1216  ;;  %v6141_v36 = vpack.c.b16 %v5979_v2, %v5979_v2  ;;  %v1501_v46 = vsel %vm1234_vm1, %v7355_v16, %v8337_v24  ;;  %v7256_v42 = vld [vmem:[%s7553_s7 + $0xf0] sm:$0xff]  ;;  %v1830_v34 = vrot.slane %v1828_v53, 1 }
 0x14f   : > { %v5314_v35 = vshrl.u32 %v5235_v45, 16  ;;  %v4072_v23 = vadd.f32 %v3761_v32, %v2968_v38  ;;  %v8444_v57 = vpop.f32.mrf.mxu3  ;;  %v8447_v4 = vsel %vm1523_vm2, %v1498_v15, %v1217_v5  ;;  %v5317_v10 = vshll.u32 %v5235_v45, 16  ;;  %1102 = vrot.lane.b32.xlu2 %v7256_v42, %s7463_s9  ;;  %903 = vrot.lane.b32.xlu0 %v7256_v42, %s7462_s8 }
 0x150   : > { %11075 = vst [vmem:[#allocation9_spill] sm:$0xff] %v8444_v57  ;;  %7105 = vmatmul.msk.bf16.gmra.mxu1 %vm2277_vm3, %v8436_v13  ;;  %v2219_v41 = vshll.u32 %v8447_v4, 16  ;;  %v2217_v49 = vshrl.u32 %v8447_v4, 16  ;;  %v1826_v45 = vshrl.u32 %v8436_v13, 16  ;;  %v3403_v24 = vrot.slane %v8436_v13, 1 }
 0x151   : > { %v8457_v40 = vrot.slane %v5314_v35, 7  ;;  %v4206_v29 = vsel %vm4194_vm6, %v4072_v23, 0.0  ;;  %v4462_v6 = vmul.f32 %v4072_v23, %v4072_v23  ;;  %6470 = vst.msk [vmem:[%s8328_s11 + $0x24] sm:$0x1] %vm6464_vm11, %v6141_v36  ;;  %v4855_v13 = vpack.c.bf16 %v4072_v23, %v4072_v23 }
 0x152   : > { %v4207_v8 = vadd.f32 %v4206_v29, %v4205_v54  ;;  %v2500_v43 = vpop.f32.mrf.mxu0  ;;  %v2221_v38 = vrot.slane %v2219_v41, 1  ;;  %v1832_v54 = vshll.u32 %v8452_v59, 16  ;;  %v1831_v16 = vor.u32 %v1830_v34, %v1826_v45 }
 0x153   : > { %v5319_v1 = vor.u32 %v5317_v10, %v8457_v40  ;;  %v4595_v30 = vsel %vm4194_vm6, %v4462_v6, 0.0  ;;  %v2970_v20 = vadd.f32 %v8397_v47, %v2500_v43  ;;  %v5111_v45 = vunpack.c.l.b16 %v4855_v13 }
 0x154   : > { %v4596_v2 = vadd.f32 %v4595_v30, %v4594_v19  ;;  %v2222_v43 = vor.u32 %v2221_v38, %v2217_v49  ;;  %v1834_v42 = vrot.slane %v1832_v54, 1  ;;  %v302_v30 = vld [vmem:[%s7553_s7 + $0x100] sm:$0x1]  ;;  %v1297_v13 = vsel %vm1234_vm1, %v7774_v28, %v8402_v31 }
 0x155   : > { %v1219_v15 = vpop.permute.xlu0 %1218  ;;  %v8475_v32 = vpop.f32.mrf.mxu1  ;;  %v5845_v5 = vsel %vm8299_vm9, 4048220490, %v5319_v1  ;;  %v632_v38 = vunpack.c.l.b16 %v302_v30  ;;  %v1836_v28 = vshrl.u32 %v8452_v59, 16  ;;  %v1565_v31 = vsel %vm1523_vm2, %v1297_v13, %v8292_v11 }
 0x156   : > { %v8481_v53 = vsel %vm1523_vm2, %v1501_v46, %v1219_v15  ;;  %v3763_v19 = vpop.f32.mrf.mxu2  ;;  %v8483_v41 = vpop.permute.xlu1 %879  ;;  %v5980_v36 = vunpack.c.l.b16 %v5845_v5  ;;  %v5981_v10 = vunpack.c.h.b16 %v5845_v5 }
 0x157   : > { %v2223_v47 = vshll.u32 %v8481_v53, 16  ;;  %v4073_v29 = vadd.f32 %v3763_v19, %v2970_v20  ;;  %v8486_v6 = vpop.f32.mrf.mxu3  ;;  %v8488_v1 = vpop.permute.xlu2 %1088  ;;  %v11077_v19 = vrot.slane %v8452_v59, 1  ;;  %v1838_v11 = vor.u32 %v1836_v28, %v1834_v42 }
 0x158   : > { %11076 = vst [vmem:[#allocation10_spill] sm:$0xff] %v8486_v6  ;;  %v6142_v46 = vpack.c.b16 %v5980_v36, %v5980_v36  ;;  %v6143_v15 = vpack.c.b16 %v5981_v10, %v5981_v10 }
 0x159   : > { %v4208_v35 = vsel %vm4194_vm6, %v4073_v29, 0.0  ;;  %v4463_v57 = vmul.f32 %v4073_v29, %v4073_v29  ;;  %v4856_v5 = vpack.c.bf16 %v4073_v29, %v4073_v29  ;;  %v2225_v23 = vrot.slane %v2223_v47, 1 }
 0x15a   : > { %v4209_v51 = vadd.f32 %v4208_v35, %v4207_v8  ;;  %v2503_v20 = vpop.f32.mrf.mxu0  ;;  %v3405_v49 = vsel %vm3372_vm4, %v3403_v24, %v11077_v19  ;;  %6471 = vst.msk [vmem:[%s8328_s11 + $0x28] sm:$0xf] %vm6459_vm10, %v6142_v46  ;;  %v1835_v8 = vsel %vm1723_vm5, %v1831_v16, %v1834_v42  ;;  %v8504_v35 = vpack.c.b16 %v632_v38, %v632_v38  ;;  %v7259_v24 = vld [vmem:[%s7553_s7 + $0x10c] sm:$0xff] }
 0x15b   : > { %v4597_v34 = vsel %vm4194_vm6, %v4463_v57, 0.0  ;;  %v5112_v54 = vunpack.c.l.b16 %v4856_v5  ;;  %7176 = vmatmul.msk.bf16.gmra.mxu2 %vm2277_vm3, %v3405_v49  ;;  %v2226_v36 = vsel %vm1723_vm5, %v2222_v43, %v2225_v23  ;;  %6472 = vst.msk [vmem:[%s8328_s11 + $0x2c] sm:$0xf] %vm6459_vm10, %v6143_v15  ;;  %1110 = vrot.lane.b32.xlu0 %v7259_v24, %s7463_s9 }
 0x15c   : > { %v4598_v10 = vadd.f32 %v4597_v34, %v4596_v2  ;;  %7083 = vmatmul.msk.bf16.gmra.mxu3 %vm2277_vm3, %v2226_v36  ;;  %v2973_v2 = vadd.f32 %v8440_v63, %v2503_v20  ;;  %1106 = vrot.lane.b32.xlu2 %v8504_v35, %s7463_s9  ;;  %v1504_v36 = vsel %vm1234_vm1, %v7840_v55, %v8431_v62 }
 0x15d   : > { %v5236_v47 = vpack.c.b16 %v5112_v54, %v5111_v45  ;;  %v8507_v29 = vpop.permute.xlu0 %1084  ;;  %7037 = vmatmul.msk.bf16.gmra.mxu0 %vm2277_vm3, %v1835_v8  ;;  %v8510_v57 = vpop.f32.mrf.mxu1  ;;  %907 = vrot.lane.b32.xlu1 %v8504_v35, %s7462_s8  ;;  %v2227_v45 = vshrl.u32 %v8481_v53, 16  ;;  %v1839_v8 = vshll.u32 %v1565_v31, 16 }
 0x15e   : > { %v3766_v43 = vpop.f32.mrf.mxu2  ;;  %v8516_v30 = vpop.permute.xlu1 %1086 }
 0x15f   : > { %v5321_v16 = vshrl.u32 %v5236_v47, 16  ;;  %v8521_v46 = vpop.f32.mrf.mxu3  ;;  %v4074_v15 = vadd.f32 %v3766_v43, %v2973_v2  ;;  %v5324_v5 = vshll.u32 %v5236_v47, 16  ;;  %v8531_v38 = vpop.permute.xlu2 %1019 }
 0x160   : > { %11078 = vst [vmem:[#allocation11_spill] sm:$0xff] %v8521_v46  ;;  %7106 = vmatmul.msk.bf16.gmra.mxu1 %vm2277_vm3, %v8452_v59 }
 0x161   : > { %v5323_v63 = vrot.slane %v5321_v16, 7  ;;  %v4210_v20 = vsel %vm4194_vm6, %v4074_v15, 0.0  ;;  %v4464_v19 = vmul.f32 %v4074_v15, %v4074_v15  ;;  %v4857_v42 = vpack.c.bf16 %v4074_v15, %v4074_v15 }
 0x162   : > { %v2505_v49 = vpop.f32.mrf.mxu0  ;;  %v4211_v54 = vadd.f32 %v4210_v20, %v4209_v51 }
 0x163   : > { %v5326_v34 = vor.u32 %v5324_v5, %v5323_v63  ;;  %v4599_v2 = vsel %vm4194_vm6, %v4464_v19, 0.0  ;;  %v2975_v43 = vadd.f32 %v8475_v32, %v2505_v49  ;;  %v3406_v5 = vrot.slane %v1565_v31, 1 }
 0x164   : > { %v4600_v13 = vadd.f32 %v4599_v2, %v4598_v10  ;;  %v2229_v32 = vor.u32 %v2227_v45, %v2225_v23  ;;  %v1841_v31 = vrot.slane %v1839_v8, 1  ;;  %v11081_v45 = vrot.slane %v8452_v59, 1 }
 0x165   : > { %v5327_v47 = vsel %vm5297_vm7, %v8457_v40, %v5326_v34  ;;  %v1221_v16 = vpop.permute.xlu0 %1220  ;;  %v8541_v46 = vpop.f32.mrf.mxu1  ;;  %911 = vrot.lane.b32.xlu1 %v7259_v24, %s7462_s8  ;;  %v7356_v34 = vld [vmem:[%s7553_s7 + $0x8c] sm:$0xff]  ;;  %v5877_v8 = vsel %vm8299_vm9, %v5323_v63, 4048220490 }
 0x166   : > { %v5982_v51 = vunpack.c.l.b16 %v5327_v47  ;;  %v5983_v20 = vunpack.c.h.b16 %v5327_v47  ;;  %v8544_v6 = vsel %vm1523_vm2, %v1504_v36, %v1221_v16  ;;  %v3768_v55 = vpop.f32.mrf.mxu2  ;;  %v8546_v62 = vpop.permute.xlu1 %883  ;;  %v1300_v36 = vsel %vm1234_vm1, %v7356_v34, %v8483_v41 }
 0x167   : > { %11079 = vst [vmem:[#allocation12_spill] sm:$0xff] %v8544_v6  ;;  %v2230_v40 = vshll.u32 %v8544_v6, 16  ;;  %v4075_v10 = vadd.f32 %v3768_v55, %v2975_v43  ;;  %v8549_v28 = vpop.f32.mrf.mxu3  ;;  %v3407_v24 = vsel %vm3372_vm4, %v11081_v45, %v3406_v5  ;;  %v5113_v41 = vunpack.c.l.b16 %v4857_v42  ;;  %v8574_v5 = vpop.permute.xlu2 %887  ;;  %v7357_v42 = vld [vmem:[%s7553_s7 + $0x94] sm:$0xff] }
 0x168   : > { %11080 = vst [vmem:[#allocation13_spill] sm:$0xff] %v8549_v28  ;;  %v6144_v19 = vpack.c.b16 %v5982_v51, %v5982_v51  ;;  %v6145_v49 = vpack.c.b16 %v5983_v20, %v5983_v20  ;;  %v1842_v63 = vsel %vm1723_vm5, %v1838_v11, %v1841_v31 }
 0x169   : > { %v2232_v2 = vrot.slane %v2230_v40, 1  ;;  %v4212_v47 = vsel %vm4194_vm6, %v4075_v10, 0.0  ;;  %v4465_v15 = vmul.f32 %v4075_v10, %v4075_v10  ;;  %v4858_v16 = vpack.c.bf16 %v4075_v10, %v4075_v10 }
 0x16a   : > { %6473 = vst.msk [vmem:[%s8328_s11 + $0x30] sm:$0xf] %vm6459_vm10, %v6144_v19  ;;  %v4213_v43 = vadd.f32 %v4212_v47, %v4211_v54  ;;  %v2508_v23 = vpop.f32.mrf.mxu0  ;;  %v8570_v54 = vsel %vm1523_vm2, %v1300_v36, %v8507_v29  ;;  %v1303_v40 = vsel %vm1234_vm1, %v7357_v42, %v8382_v21  ;;  %v5984_v29 = vunpack.c.l.b16 %v5877_v8 }
 0x16b   : > { %6474 = vst.msk [vmem:[%s8328_s11 + $0x34] sm:$0xf] %vm6459_vm10, %v6145_v49  ;;  %v4601_v51 = vsel %vm4194_vm6, %v4465_v15, 0.0  ;;  %v5114_v20 = vunpack.c.l.b16 %v4858_v16  ;;  %7177 = vmatmul.msk.bf16.gmra.mxu2 %vm2277_vm3, %v3407_v24  ;;  %v2233_v55 = vsel %vm1723_vm5, %v2229_v32, %v2232_v2  ;;  %v2978_v19 = vadd.f32 %v8510_v57, %v2508_v23 }
 0x16c   : > { %v4602_v59 = vadd.f32 %v4601_v51, %v4600_v13  ;;  %7084 = vmatmul.msk.bf16.gmra.mxu3 %vm2277_vm3, %v2233_v55  ;;  %v7358_v13 = vld [vmem:[%s7553_s7 + $0x258] sm:$0xff]  ;;  %v1845_v31 = vshll.u32 %v8570_v54, 16  ;;  %v8593_v15 = vsel %vm1523_vm2, %v1303_v40, %v8516_v30  ;;  %v6146_v23 = vpack.c.b16 %v5984_v29, %v5984_v29  ;;  %v7359_v55 = vld [vmem:[%s7553_s7 + $0x260] sm:$0xff] }
 0x16d   : > { %v5237_v10 = vpack.c.b16 %v5114_v20, %v5113_v41  ;;  %v1018_v49 = vpop.permute.xlu0 %1017  ;;  %7038 = vmatmul.msk.bf16.gmra.mxu0 %vm2277_vm3, %v1842_v63  ;;  %v8581_v32 = vpop.f32.mrf.mxu1  ;;  %v1510_v63 = vsel %vm1234_vm1, %v7359_v55, %v8531_v38  ;;  %v7258_v30 = vld [vmem:[%s7553_s7 + $0x104] sm:$0xff]  ;;  %v1843_v42 = vshrl.u32 %v8570_v54, 16  ;;  %v3408_v38 = vrot.slane %v8570_v54, 1 }
 0x16e   : > { %v1507_v34 = vsel %vm1234_vm1, %v7358_v13, %v1018_v49  ;;  %v3771_v36 = vpop.f32.mrf.mxu2  ;;  %v1223_v11 = vpop.permute.xlu1 %1222  ;;  %6475 = vst.msk [vmem:[%s8328_s11 + $0x38] sm:$0x1] %vm6464_vm11, %v6146_v23  ;;  %v1847_v40 = vrot.slane %v1845_v31, 1  ;;  %1108 = vrot.lane.b32.xlu2 %v7258_v30, %s7463_s9  ;;  %909 = vrot.lane.b32.xlu0 %v7258_v30, %s7462_s8 }
 0x16f   : > { %v5329_v2 = vshrl.u32 %v5237_v10, 16  ;;  %v4076_v21 = vadd.f32 %v3771_v36, %v2978_v19  ;;  %v8586_v47 = vpop.f32.mrf.mxu3  ;;  %v8589_v57 = vsel %vm1523_vm2, %v1507_v34, %v1223_v11  ;;  %v5332_v24 = vshll.u32 %v5237_v10, 16 }
 0x170   : > { %11082 = vst [vmem:[#allocation14_spill] sm:$0xff] %v8586_v47  ;;  %7107 = vmatmul.msk.bf16.gmra.mxu1 %vm2277_vm3, %v8570_v54  ;;  %v2236_v16 = vshll.u32 %v8589_v57, 16  ;;  %v1849_v10 = vshll.u32 %v8593_v15, 16  ;;  %v1848_v54 = vor.u32 %v1847_v40, %v1843_v42 }
 0x171   : > { %v8598_v45 = vrot.slane %v5329_v2, 7  ;;  %v4214_v8 = vsel %vm4194_vm6, %v4076_v21, 0.0  ;;  %v4466_v41 = vmul.f32 %v4076_v21, %v4076_v21 }
 0x172   : > { %v4215_v51 = vadd.f32 %v4214_v8, %v4213_v43  ;;  %v2510_v20 = vpop.f32.mrf.mxu0  ;;  %v2234_v43 = vshrl.u32 %v8589_v57, 16  ;;  %v2238_v13 = vrot.slane %v2236_v16, 1  ;;  %v1851_v30 = vrot.slane %v1849_v10, 1 }
 0x173   : > { %v5334_v19 = vor.u32 %v5332_v24, %v8598_v45  ;;  %v4603_v49 = vsel %vm4194_vm6, %v4466_v41, 0.0  ;;  %v2980_v34 = vadd.f32 %v8541_v46, %v2510_v20  ;;  %v4859_v41 = vpack.c.bf16 %v4076_v21, %v4076_v21 }
 0x174   : > { %v4604_v29 = vadd.f32 %v4603_v49, %v4602_v59  ;;  %v1022_v49 = vpop.permute.xlu2 %1021  ;;  %v307_v59 = vld [vmem:[%s7553_s7 + $0x114] sm:$0x1] }
 0x175   : > { %v1225_v36 = vpop.permute.xlu0 %1224  ;;  %v8616_v11 = vpop.f32.mrf.mxu1  ;;  %v5846_v31 = vsel %vm8299_vm9, 4048220490, %v5334_v19  ;;  %v2239_v19 = vor.u32 %v2238_v13, %v2234_v43  ;;  %v5115_v10 = vunpack.c.l.b16 %v4859_v41 }
 0x176   : > { %v8622_v2 = vsel %vm1523_vm2, %v1510_v63, %v1225_v36  ;;  %v3773_v16 = vpop.f32.mrf.mxu2  ;;  %v8624_v23 = vpop.permute.xlu1 %885  ;;  %v5985_v24 = vunpack.c.l.b16 %v5846_v31  ;;  %v5986_v8 = vunpack.c.h.b16 %v5846_v31 }
 0x177   : > { %v2240_v46 = vshll.u32 %v8622_v2, 16  ;;  %v4077_v20 = vadd.f32 %v3773_v16, %v2980_v34  ;;  %v8627_v55 = vpop.f32.mrf.mxu3  ;;  %v11084_v34 = vrot.slane %v8593_v15, 1  ;;  %v637_v16 = vunpack.c.l.b16 %v307_v59 }
 0x178   : > { %11083 = vst [vmem:[#allocation15_spill] sm:$0xff] %v8627_v55  ;;  %v6147_v63 = vpack.c.b16 %v5985_v24, %v5985_v24  ;;  %v6148_v36 = vpack.c.b16 %v5986_v8, %v5986_v8 }
 0x179   : > { %v2242_v47 = vrot.slane %v2240_v46, 1  ;;  %v4216_v28 = vsel %vm4194_vm6, %v4077_v20, 0.0  ;;  %v4467_v6 = vmul.f32 %v4077_v20, %v4077_v20  ;;  %v4860_v42 = vpack.c.bf16 %v4077_v20, %v4077_v20  ;;  %v7261_v46 = vld [vmem:[%s7553_s7 + $0x120] sm:$0xff] }
 0x17a   : > { %v4217_v21 = vadd.f32 %v4216_v28, %v4215_v51  ;;  %v2513_v40 = vpop.f32.mrf.mxu0  ;;  %v3410_v31 = vsel %vm3372_vm4, %v3408_v38, %v11084_v34  ;;  %6476 = vst.msk [vmem:[%s8328_s11 + $0x3c] sm:$0xf] %vm6459_vm10, %v6147_v63  ;;  %v1852_v28 = vsel %vm1723_vm5, %v1848_v54, %v1851_v30  ;;  %v8642_v51 = vpack.c.b16 %v637_v16, %v637_v16 }
 0x17b   : > { %v4605_v43 = vsel %vm4194_vm6, %v4467_v6, 0.0  ;;  %v5116_v13 = vunpack.c.l.b16 %v4860_v42  ;;  %7178 = vmatmul.msk.bf16.gmra.mxu2 %vm2277_vm3, %v3410_v31  ;;  %6477 = vst.msk [vmem:[%s8328_s11 + $0x40] sm:$0xf] %vm6459_vm10, %v6148_v36  ;;  %v2243_v8 = vsel %vm1723_vm5, %v2239_v19, %v2242_v47  ;;  %v2983_v41 = vadd.f32 %v8581_v32, %v2513_v40  ;;  %1116 = vrot.lane.b32.xlu0 %v7261_v46, %s7463_s9 }
 0x17c   : > { %v4606_v24 = vadd.f32 %v4605_v43, %v4604_v29  ;;  %7085 = vmatmul.msk.bf16.gmra.mxu3 %vm2277_vm3, %v2243_v8  ;;  %v1306_v29 = vsel %vm1234_vm1, %v7856_v56, %v8546_v62  ;;  %1112 = vrot.lane.b32.xlu2 %v8642_v51, %s7463_s9  ;;  %v1853_v56 = vshrl.u32 %v8593_v15, 16  ;;  %v8670_v16 = vpop.permute.xlu2 %1094  ;;  %v1513_v8 = vsel %vm1234_vm1, %v7950_v3, %v1022_v49 }
 0x17d   : > { %v5238_v38 = vpack.c.b16 %v5116_v13, %v5115_v10  ;;  %v8646_v59 = vpop.permute.xlu0 %1090  ;;  %7039 = vmatmul.msk.bf16.gmra.mxu0 %vm2277_vm3, %v1852_v28  ;;  %v8649_v6 = vpop.f32.mrf.mxu1  ;;  %913 = vrot.lane.b32.xlu1 %v8642_v51, %s7462_s8  ;;  %v1571_v62 = vsel %vm1523_vm2, %v1306_v29, %v8488_v1  ;;  %v2244_v10 = vshrl.u32 %v8622_v2, 16 }
 0x17e   : > { %v3776_v20 = vpop.f32.mrf.mxu2  ;;  %v8655_v54 = vpop.permute.xlu1 %1092  ;;  %v1856_v28 = vshll.u32 %v1571_v62, 16  ;;  %v3411_v55 = vrot.slane %v1571_v62, 1 }
 0x17f   : > { %v5336_v19 = vshrl.u32 %v5238_v38, 16  ;;  %v8660_v63 = vpop.f32.mrf.mxu3  ;;  %v4078_v36 = vadd.f32 %v3776_v20, %v2983_v41  ;;  %v5339_v42 = vshll.u32 %v5238_v38, 16  ;;  %v1855_v20 = vor.u32 %v1853_v56, %v1851_v30 }
 0x180   : > { %11085 = vst [vmem:[#allocation16_spill] sm:$0xff] %v8660_v63  ;;  %7108 = vmatmul.msk.bf16.gmra.mxu1 %vm2277_vm3, %v8593_v15  ;;  %v2246_v30 = vor.u32 %v2244_v10, %v2242_v47  ;;  %v1858_v62 = vrot.slane %v1856_v28, 1 }
 0x181   : > { %v5338_v32 = vrot.slane %v5336_v19, 7  ;;  %v4218_v40 = vsel %vm4194_vm6, %v4078_v36, 0.0  ;;  %v4468_v34 = vmul.f32 %v4078_v36, %v4078_v36  ;;  %v4861_v56 = vpack.c.bf16 %v4078_v36, %v4078_v36 }
 0x182   : > { %v2515_v31 = vpop.f32.mrf.mxu0  ;;  %v4219_v13 = vadd.f32 %v4218_v40, %v4217_v21 }
 0x183   : > { %v5341_v43 = vor.u32 %v5339_v42, %v5338_v32  ;;  %v4607_v41 = vsel %vm4194_vm6, %v4468_v34, 0.0  ;;  %v2985_v29 = vadd.f32 %v8616_v11, %v2515_v31  ;;  %v5878_v28 = vsel %vm8299_vm9, %v5338_v32, 4048220490  ;;  %v7361_v32 = vld [vmem:[%s7553_s7 + $0xa8] sm:$0xff] }
 0x184   : > { %v4608_v38 = vadd.f32 %v4607_v41, %v4606_v24 }
 0x185   : > { %v5342_v1 = vsel %vm5297_vm7, %v8598_v45, %v5341_v43  ;;  %v1227_v19 = vpop.permute.xlu0 %1226  ;;  %v8679_v63 = vpop.f32.mrf.mxu1  ;;  %917 = vrot.lane.b32.xlu1 %v7261_v46, %s7462_s8  ;;  %v7360_v43 = vld [vmem:[%s7553_s7 + $0xa0] sm:$0xff] }
 0x186   : > { %v5987_v42 = vunpack.c.l.b16 %v5342_v1  ;;  %v5988_v21 = vunpack.c.h.b16 %v5342_v1  ;;  %v8682_v40 = vsel %vm1523_vm2, %v1513_v8, %v1227_v19  ;;  %v3778_v3 = vpop.f32.mrf.mxu2  ;;  %v8684_v49 = vpop.permute.xlu1 %889  ;;  %v1309_v8 = vsel %vm1234_vm1, %v7360_v43, %v8624_v23  ;;  %v7362_v43 = vld [vmem:[%s7553_s7 + $0x26c] sm:$0xff] }
 0x187   : > { %11086 = vst [vmem:[#allocation17_spill] sm:$0xff] %v8682_v40  ;;  %v2247_v45 = vshll.u32 %v8682_v40, 16  ;;  %v4079_v24 = vadd.f32 %v3778_v3, %v2985_v29  ;;  %v8687_v11 = vpop.f32.mrf.mxu3  ;;  %v11088_v19 = vrot.slane %v8593_v15, 1  ;;  %v5117_v23 = vunpack.c.l.b16 %v4861_v56 }
 0x188   : > { %11087 = vst [vmem:[#allocation18_spill] sm:$0xff] %v8687_v11  ;;  %v6149_v34 = vpack.c.b16 %v5987_v42, %v5987_v42  ;;  %v6150_v31 = vpack.c.b16 %v5988_v21, %v5988_v21  ;;  %v1312_v56 = vsel %vm1234_vm1, %v7361_v32, %v8574_v5  ;;  %v7260_v32 = vld [vmem:[%s7553_s7 + $0x118] sm:$0xff] }
 0x189   : > { %v2249_v41 = vrot.slane %v2247_v45, 1  ;;  %v4220_v1 = vsel %vm4194_vm6, %v4079_v24, 0.0  ;;  %v4469_v47 = vmul.f32 %v4079_v24, %v4079_v24  ;;  %v4862_v36 = vpack.c.bf16 %v4079_v24, %v4079_v24  ;;  %v1026_v45 = vpop.permute.xlu2 %1025  ;;  %1114 = vrot.lane.b32.xlu2 %v7260_v32, %s7463_s9  ;;  %915 = vrot.lane.b32.xlu0 %v7260_v32, %s7462_s8 }
 0x18a   : > { %6478 = vst.msk [vmem:[%s8328_s11 + $0x44] sm:$0xf] %vm6459_vm10, %v6149_v34  ;;  %v4221_v10 = vadd.f32 %v4220_v1, %v4219_v13  ;;  %v2518_v29 = vpop.f32.mrf.mxu0  ;;  %v3412_v46 = vsel %vm3372_vm4, %v11088_v19, %v3411_v55  ;;  %v8708_v13 = vsel %vm1523_vm2, %v1309_v8, %v8646_v59  ;;  %v1859_v55 = vsel %vm1723_vm5, %v1855_v20, %v1858_v62 }
 0x18b   : > { %6479 = vst.msk [vmem:[%s8328_s11 + $0x48] sm:$0xf] %vm6459_vm10, %v6150_v31  ;;  %v4609_v42 = vsel %vm4194_vm6, %v4469_v47, 0.0  ;;  %v5118_v21 = vunpack.c.l.b16 %v4862_v36  ;;  %7179 = vmatmul.msk.bf16.gmra.mxu2 %vm2277_vm3, %v3412_v46  ;;  %v2250_v3 = vsel %vm1723_vm5, %v2246_v30, %v2249_v41  ;;  %v2988_v34 = vadd.f32 %v8649_v6, %v2518_v29 }
 0x18c   : > { %v4610_v15 = vadd.f32 %v4609_v42, %v4608_v38  ;;  %7086 = vmatmul.msk.bf16.gmra.mxu3 %vm2277_vm3, %v2250_v3  ;;  %v5989_v59 = vunpack.c.l.b16 %v5878_v28  ;;  %v1862_v8 = vshll.u32 %v8708_v13, 16  ;;  %v8729_v47 = vsel %vm1523_vm2, %v1312_v56, %v8655_v54  ;;  %v7363_v3 = vld [vmem:[%s7553_s7 + $0x274] sm:$0xff] }
 0x18d   : > { %v5239_v24 = vpack.c.b16 %v5118_v21, %v5117_v23  ;;  %v1024_v31 = vpop.permute.xlu0 %1023  ;;  %7040 = vmatmul.msk.bf16.gmra.mxu0 %vm2277_vm3, %v1859_v55  ;;  %v8717_v30 = vpop.f32.mrf.mxu1  ;;  %v1519_v55 = vsel %vm1234_vm1, %v7363_v3, %v1026_v45  ;;  %v1860_v54 = vshrl.u32 %v8708_v13, 16  ;;  %v3413_v45 = vrot.slane %v8708_v13, 1 }
 0x18e   : > { %v1516_v38 = vsel %vm1234_vm1, %v7362_v43, %v1024_v31  ;;  %v3781_v20 = vpop.f32.mrf.mxu2  ;;  %v1229_v62 = vpop.permute.xlu1 %1228  ;;  %v6151_v29 = vpack.c.b16 %v5989_v59, %v5989_v59  ;;  %v1864_v56 = vrot.slane %v1862_v8, 1 }
 0x18f   : > { %v5344_v5 = vshrl.u32 %v5239_v24, 16  ;;  %v4080_v41 = vadd.f32 %v3781_v20, %v2988_v34  ;;  %v8722_v6 = vpop.f32.mrf.mxu3  ;;  %v8725_v1 = vsel %vm1523_vm2, %v1516_v38, %v1229_v62  ;;  %v5347_v46 = vshll.u32 %v5239_v24, 16 }
 0x190   : > { %11089 = vst [vmem:[#allocation19_spill] sm:$0xff] %v8722_v6  ;;  %7109 = vmatmul.msk.bf16.gmra.mxu1 %vm2277_vm3, %v8708_v13  ;;  %v2253_v36 = vshll.u32 %v8725_v1, 16  ;;  %v1866_v24 = vshll.u32 %v8729_v47, 16  ;;  %v2251_v43 = vshrl.u32 %v8725_v1, 16  ;;  %v1865_v13 = vor.u32 %v1864_v56, %v1860_v54 }
 0x191   : > { %11090 = vst [vmem:[#allocation20_spill] sm:$0xff] %v8725_v1  ;;  %v8734_v19 = vrot.slane %v5344_v5, 7  ;;  %v4222_v28 = vsel %vm4194_vm6, %v4080_v41, 0.0  ;;  %v4470_v23 = vmul.f32 %v4080_v41, %v4080_v41  ;;  %v11092_v56 = vrot.slane %v8729_v47, 1 }
 0x192   : > { %v4223_v42 = vadd.f32 %v4222_v28, %v4221_v10  ;;  %v2520_v21 = vpop.f32.mrf.mxu0  ;;  %6480 = vst.msk [vmem:[%s8328_s11 + $0x4c] sm:$0x1] %vm6464_vm11, %v6151_v29  ;;  %v2255_v10 = vrot.slane %v2253_v36, 1  ;;  %v8759_v29 = vpop.permute.xlu2 %893  ;;  %v1868_v32 = vrot.slane %v1866_v24, 1 }
 0x193   : > { %v5349_v34 = vor.u32 %v5347_v46, %v8734_v19  ;;  %v4611_v31 = vsel %vm4194_vm6, %v4470_v23, 0.0  ;;  %v2990_v38 = vadd.f32 %v8679_v63, %v2520_v21  ;;  %v4863_v23 = vpack.c.bf16 %v4080_v41, %v4080_v41 }
 0x194   : > { %v4612_v59 = vadd.f32 %v4611_v31, %v4610_v15  ;;  %v312_v31 = vld [vmem:[%s7553_s7 + $0x128] sm:$0x1] }
 0x195   : > { %v1231_v20 = vpop.permute.xlu0 %1230  ;;  %v8751_v62 = vpop.f32.mrf.mxu1  ;;  %v5847_v8 = vsel %vm8299_vm9, 4048220490, %v5349_v34  ;;  %v2256_v34 = vor.u32 %v2255_v10, %v2251_v43  ;;  %v5119_v24 = vunpack.c.l.b16 %v4863_v23 }
 0x196   : > { %v8757_v5 = vsel %vm1523_vm2, %v1519_v55, %v1231_v20  ;;  %v3783_v36 = vpop.f32.mrf.mxu2  ;;  %v5990_v46 = vunpack.c.l.b16 %v5847_v8  ;;  %v5991_v28 = vunpack.c.h.b16 %v5847_v8 }
 0x197   : > { %v2257_v63 = vshll.u32 %v8757_v5, 16  ;;  %v4081_v21 = vadd.f32 %v3783_v36, %v2990_v38  ;;  %v8762_v3 = vpop.f32.mrf.mxu3  ;;  %v3415_v38 = vsel %vm3372_vm4, %v3413_v45, %v11092_v56  ;;  %v642_v36 = vunpack.c.l.b16 %v312_v31 }
 0x198   : > { %11091 = vst [vmem:[#allocation21_spill] sm:$0xff] %v8762_v3  ;;  %v6152_v15 = vpack.c.b16 %v5990_v46, %v5990_v46  ;;  %v6153_v55 = vpack.c.b16 %v5991_v28, %v5991_v28  ;;  %v1315_v45 = vsel %vm1234_vm1, %v7967_v44, %v8684_v49  ;;  %v1870_v49 = vshrl.u32 %v8729_v47, 16 }
 0x199   : > { %v2259_v20 = vrot.slane %v2257_v63, 1  ;;  %v4224_v6 = vsel %vm4194_vm6, %v4081_v21, 0.0  ;;  %v4471_v11 = vmul.f32 %v4081_v21, %v4081_v21  ;;  %v4864_v8 = vpack.c.bf16 %v4081_v21, %v4081_v21  ;;  %v7263_v63 = vld [vmem:[%s7553_s7 + $0x134] sm:$0xff] }
 0x19a   : > { %v4225_v54 = vadd.f32 %v4224_v6, %v4223_v42  ;;  %v2523_v41 = vpop.f32.mrf.mxu0  ;;  %6481 = vst.msk [vmem:[%s8328_s11 + $0x50] sm:$0xf] %vm6459_vm10, %v6152_v15  ;;  %v1869_v6 = vsel %vm1723_vm5, %v1865_v13, %v1868_v32  ;;  %v8777_v42 = vpack.c.b16 %v642_v36, %v642_v36  ;;  %1122 = vrot.lane.b32.xlu0 %v7263_v63, %s7463_s9  ;;  %v1028_v31 = vpop.permute.xlu2 %1027 }
 0x19b   : > { %v4613_v43 = vsel %vm4194_vm6, %v4471_v11, 0.0  ;;  %v5120_v10 = vunpack.c.l.b16 %v4864_v8  ;;  %7180 = vmatmul.msk.bf16.gmra.mxu2 %vm2277_vm3, %v3415_v38  ;;  %6482 = vst.msk [vmem:[%s8328_s11 + $0x54] sm:$0xf] %vm6459_vm10, %v6153_v55  ;;  %v2260_v28 = vsel %vm1723_vm5, %v2256_v34, %v2259_v20  ;;  %v2993_v11 = vadd.f32 %v8717_v30, %v2523_v41 }
 0x19c   : > { %v4614_v46 = vadd.f32 %v4613_v43, %v4612_v59  ;;  %7087 = vmatmul.msk.bf16.gmra.mxu3 %vm2277_vm3, %v2260_v28  ;;  %1118 = vrot.lane.b32.xlu2 %v8777_v42, %s7463_s9  ;;  %v1577_v30 = vsel %vm1523_vm2, %v1315_v45, %v8670_v16  ;;  %v1522_v28 = vsel %vm1234_vm1, %v8056_v26, %v1028_v31  ;;  %v892_v45 = vpop.permute.xlu1 %891 }
 0x19d   : > { %v5240_v15 = vpack.c.b16 %v5120_v10, %v5119_v24  ;;  %v8785_v23 = vpop.permute.xlu0 %1096  ;;  %7041 = vmatmul.msk.bf16.gmra.mxu0 %vm2277_vm3, %v1869_v6  ;;  %v8788_v59 = vpop.f32.mrf.mxu1  ;;  %919 = vrot.lane.b32.xlu1 %v8777_v42, %s7462_s8  ;;  %v2261_v24 = vshrl.u32 %v8757_v5, 16  ;;  %v1873_v16 = vshll.u32 %v1577_v30, 16 }
 0x19e   : > { %v3786_v21 = vpop.f32.mrf.mxu2 }
 0x19f   : > { %v5351_v13 = vshrl.u32 %v5240_v15, 16  ;;  %v4082_v34 = vadd.f32 %v3786_v21, %v2993_v11  ;;  %v8793_v44 = vpop.f32.mrf.mxu3  ;;  %v5354_v8 = vshll.u32 %v5240_v15, 16  ;;  %v1872_v11 = vor.u32 %v1870_v49, %v1868_v32 }
 0x1a0   : > { %11093 = vst [vmem:[#allocation22_spill] sm:$0xff] %v8793_v44  ;;  %7110 = vmatmul.msk.bf16.gmra.mxu1 %vm2277_vm3, %v8729_v47 }
 0x1a1   : > { %v5353_v55 = vrot.slane %v5351_v13, 7  ;;  %v4226_v41 = vsel %vm4194_vm6, %v4082_v34, 0.0  ;;  %v4472_v56 = vmul.f32 %v4082_v34, %v4082_v34  ;;  %v4865_v31 = vpack.c.bf16 %v4082_v34, %v4082_v34 }
 0x1a2   : > { %v4227_v38 = vadd.f32 %v4226_v41, %v4225_v54  ;;  %v2525_v36 = vpop.f32.mrf.mxu0  ;;  %v3416_v41 = vrot.slane %v1577_v30, 1 }
 0x1a3   : > { %v5356_v43 = vor.u32 %v5354_v8, %v5353_v55  ;;  %v4615_v10 = vsel %vm4194_vm6, %v4472_v56, 0.0  ;;  %v2995_v21 = vadd.f32 %v8751_v62, %v2525_v36  ;;  %v1875_v62 = vrot.slane %v1873_v16, 1 }
 0x1a4   : > { %v4616_v6 = vadd.f32 %v4615_v10, %v4614_v46  ;;  %v2263_v46 = vor.u32 %v2261_v24, %v2259_v20  ;;  %v7364_v24 = vld [vmem:[%s7553_s7 + $0xb4] sm:$0xff] }
 0x1a5   : > { %v5357_v15 = vsel %vm5297_vm7, %v8734_v19, %v5356_v43  ;;  %v1233_v13 = vpop.permute.xlu0 %1232  ;;  %v8810_v54 = vpop.f32.mrf.mxu1  ;;  %923 = vrot.lane.b32.xlu1 %v7263_v63, %s7462_s8  ;;  %v5879_v43 = vsel %vm8299_vm9, %v5353_v55, 4048220490  ;;  %v11096_v63 = vrot.slane %v8729_v47, 1  ;;  %v5121_v55 = vunpack.c.l.b16 %v4865_v31 }
 0x1a6   : > { %v5992_v44 = vunpack.c.l.b16 %v5357_v15  ;;  %v5993_v8 = vunpack.c.h.b16 %v5357_v15  ;;  %v8813_v56 = vsel %vm1523_vm2, %v1522_v28, %v1233_v13  ;;  %v3788_v26 = vpop.f32.mrf.mxu2  ;;  %v1318_v15 = vsel %vm1234_vm1, %v7364_v24, %v892_v45 }
 0x1a7   : > { %11094 = vst [vmem:[#allocation23_spill] sm:$0xff] %v8813_v56  ;;  %v2264_v32 = vshll.u32 %v8813_v56, 16  ;;  %v4083_v49 = vadd.f32 %v3788_v26, %v2995_v21  ;;  %v8816_v19 = vpop.f32.mrf.mxu3  ;;  %v5994_v47 = vunpack.c.l.b16 %v5879_v43  ;;  %v7376_v56 = vld [vmem:[%s7553_s7 + $0x12c] sm:$0xff] }
 0x1a8   : > { %11095 = vst [vmem:[#allocation24_spill] sm:$0xff] %v8816_v19  ;;  %v6154_v30 = vpack.c.b16 %v5992_v44, %v5992_v44  ;;  %v6155_v36 = vpack.c.b16 %v5993_v8, %v5993_v8  ;;  %v3417_v44 = vsel %vm3372_vm4, %v11096_v63, %v3416_v41 }
 0x1a9   : > { %v2266_v10 = vrot.slane %v2264_v32, 1  ;;  %v4228_v28 = vsel %vm4194_vm6, %v4083_v49, 0.0  ;;  %v4473_v20 = vmul.f32 %v4083_v49, %v4083_v49  ;;  %v4866_v34 = vpack.c.bf16 %v4083_v49, %v4083_v49  ;;  %v7365_v32 = vld [vmem:[%s7553_s7 + $0xbc] sm:$0xff] }
 0x1aa   : > { %6483 = vst.msk [vmem:[%s8328_s11 + $0x58] sm:$0xf] %vm6459_vm10, %v6154_v30  ;;  %v4229_v21 = vadd.f32 %v4228_v28, %v4227_v38  ;;  %v2528_v13 = vpop.f32.mrf.mxu0  ;;  %v1321_v45 = vsel %vm1234_vm1, %v7365_v32, %v8759_v29  ;;  %v1876_v49 = vsel %vm1723_vm5, %v1872_v11, %v1875_v62  ;;  %v6156_v29 = vpack.c.b16 %v5994_v47, %v5994_v47 }
 0x1ab   : > { %6484 = vst.msk [vmem:[%s8328_s11 + $0x5c] sm:$0xf] %vm6459_vm10, %v6155_v36  ;;  %v4617_v16 = vsel %vm4194_vm6, %v4473_v20, 0.0  ;;  %v5122_v8 = vunpack.c.l.b16 %v4866_v34  ;;  %7181 = vmatmul.msk.bf16.gmra.mxu2 %vm2277_vm3, %v3417_v44  ;;  %v2267_v26 = vsel %vm1723_vm5, %v2263_v46, %v2266_v10  ;;  %v2998_v30 = vadd.f32 %v8788_v59, %v2528_v13  ;;  %v1099_v10 = vpop.permute.xlu1 %1098  ;;  %v7262_v13 = vld [vmem:[%s7553_s7 + $0x12c] sm:$0xff] }
 0x1ac   : > { %v4618_v38 = vadd.f32 %v4617_v16, %v4616_v6  ;;  %7088 = vmatmul.msk.bf16.gmra.mxu3 %vm2277_vm3, %v2267_v26  ;;  %v1579_v46 = vsel %vm1523_vm2, %v1318_v15, %v8785_v23  ;;  %v8848_v43 = vsel %vm1523_vm2, %v1321_v45, %v1099_v10  ;;  %6485 = vst.msk [vmem:[%s8328_s11 + $0x60] sm:$0x1] %vm6464_vm11, %v6156_v29 }
 0x1ad   : > { %v5241_v41 = vpack.c.b16 %v5122_v8, %v5121_v55  ;;  %7042 = vmatmul.msk.bf16.gmra.mxu0 %vm2277_vm3, %v1876_v49  ;;  %v8841_v31 = vpop.f32.mrf.mxu1  ;;  %v1879_v59 = vshll.u32 %v1579_v46, 16  ;;  %v1883_v55 = vshll.u32 %v8848_v43, 16  ;;  %v1877_v8 = vshrl.u32 %v1579_v46, 16  ;;  %1120 = vrot.lane.b32.xlu2 %v7262_v13, %s7463_s9 }
 0x1ae   : > { %v3791_v36 = vpop.f32.mrf.mxu2  ;;  %921 = vrot.lane.b32.xlu0 %v7262_v13, %s7462_s8  ;;  %v11035_v49 = vrot.slane %v8848_v43, 1  ;;  %v3418_v47 = vrot.slane %v1579_v46, 1 }
 0x1af   : > { %v5359_v6 = vshrl.u32 %v5241_v41, 16  ;;  %v4084_v11 = vadd.f32 %v3791_v36, %v2998_v30  ;;  %v8845_v62 = vpop.f32.mrf.mxu3  ;;  %v5362_v20 = vshll.u32 %v5241_v41, 16  ;;  %v1881_v26 = vrot.slane %v1879_v59, 1 }
 0x1b0   : > { %11097 = vst [vmem:[#allocation25_spill] sm:$0xff] %v8845_v62  ;;  %7111 = vmatmul.msk.bf16.gmra.mxu1 %vm2277_vm3, %v1579_v46  ;;  %v8870_v10 = vrot.slane %v1883_v55, 1 }
 0x1b1   : > { %v8853_v28 = vrot.slane %v5359_v6, 7  ;;  %v4230_v23 = vsel %vm4194_vm6, %v4084_v11, 0.0  ;;  %v4474_v34 = vmul.f32 %v4084_v11, %v4084_v11  ;;  %v4867_v36 = vpack.c.bf16 %v4084_v11, %v4084_v11 }
 0x1b2   : > { %v4231_v24 = vadd.f32 %v4230_v23, %v4229_v21  ;;  %v2530_v15 = vpop.f32.mrf.mxu0  ;;  %v1882_v59 = vor.u32 %v1881_v26, %v1877_v8  ;;  %v3420_v11 = vsel %vm3372_vm4, %v3418_v47, %v11035_v49 }
 0x1b3   : > { %v5364_v63 = vor.u32 %v5362_v20, %v8853_v28  ;;  %v4619_v44 = vsel %vm4194_vm6, %v4474_v34, 0.0  ;;  %v3000_v32 = vadd.f32 %v8810_v54, %v2530_v15  ;;  %v317_v54 = vld [vmem:[%s7553_s7 + $0x13c] sm:$0x1]  ;;  %v896_v13 = vpop.permute.xlu1 %895  ;;  %v5123_v55 = vunpack.c.l.b16 %v4867_v36 }
 0x1b4   : > { %v4620_v16 = vadd.f32 %v4619_v44, %v4618_v38  ;;  %v1324_v47 = vsel %vm1234_vm1, %v8073_v17, %v896_v13 }
 0x1b5   : > { %v8863_v45 = vpop.f32.mrf.mxu1  ;;  %v5848_v21 = vsel %vm8299_vm9, 4048220490, %v5364_v63 }
 0x1b6   : > { %v3793_v41 = vpop.f32.mrf.mxu2  ;;  %v5995_v30 = vunpack.c.l.b16 %v5848_v21  ;;  %v5996_v38 = vunpack.c.h.b16 %v5848_v21 }
 0x1b7   : > { %v4085_v29 = vadd.f32 %v3793_v41, %v3000_v32  ;;  %v8868_v6 = vpop.f32.mrf.mxu3  ;;  %v647_v32 = vunpack.c.l.b16 %v317_v54 }
 0x1b8   : > { %11098 = vst [vmem:[#allocation26_spill] sm:$0xff] %v8868_v6  ;;  %v6157_v20 = vpack.c.b16 %v5995_v30, %v5995_v30  ;;  %v6158_v23 = vpack.c.b16 %v5996_v38, %v5996_v38  ;;  %v7265_v30 = vld [vmem:[%s7553_s7 + $0x148] sm:$0xff]  ;;  %v1101_v38 = vpop.permute.xlu2 %1100 }
 0x1b9   : > { %v4232_v34 = vsel %vm4194_vm6, %v4085_v29, 0.0  ;;  %v4475_v15 = vmul.f32 %v4085_v29, %v4085_v29  ;;  %v4868_v46 = vpack.c.bf16 %v4085_v29, %v4085_v29  ;;  %v8885_v41 = vpack.c.b16 %v647_v32, %v647_v32  ;;  %1128 = vrot.lane.b32.xlu0 %v7265_v30, %s7463_s9 }
 0x1ba   : > { %v4233_v63 = vadd.f32 %v4232_v34, %v4231_v24  ;;  %v2533_v44 = vpop.f32.mrf.mxu0  ;;  %6486 = vst.msk [vmem:[%s8328_s11 + $0x64] sm:$0xf] %vm6459_vm10, %v6157_v20  ;;  %v1886_v24 = vsel %vm1723_vm5, %v1882_v59, %v8870_v10  ;;  %v1583_v17 = vsel %vm1523_vm2, %v1324_v47, %v1101_v38 }
 0x1bb   : > { %v4621_v8 = vsel %vm4194_vm6, %v4475_v15, 0.0  ;;  %v5124_v26 = vunpack.c.l.b16 %v4868_v46  ;;  %7182 = vmatmul.msk.bf16.gmra.mxu2 %vm2277_vm3, %v3420_v11  ;;  %6487 = vst.msk [vmem:[%s8328_s11 + $0x68] sm:$0xf] %vm6459_vm10, %v6158_v23  ;;  %v3003_v36 = vadd.f32 %v8841_v31, %v2533_v44  ;;  %1124 = vrot.lane.b32.xlu2 %v8885_v41, %s7463_s9  ;;  %v900_v49 = vpop.permute.xlu1 %899 }
 0x1bc   : > { %v4622_v21 = vadd.f32 %v4621_v8, %v4620_v16  ;;  %7141 = vmatmul.msk.bf16.vlgmr.msrb.gmra.mxu3 %vm2277_vm3, %v7838_v52  ;;  %925 = vrot.lane.b32.xlu1 %v8885_v41, %s7462_s8  ;;  %v1887_v8 = vshrl.u32 %v8848_v43, 16 }
 0x1bd   : > { %v5242_v29 = vpack.c.b16 %v5124_v26, %v5123_v55  ;;  %7043 = vmatmul.msk.bf16.gmra.mxu0 %vm2277_vm3, %v1886_v24  ;;  %v3007_v54 = vpop.f32.mrf.mxu1  ;;  %v898_v55 = vpop.permute.xlu0 %897  ;;  %v1890_v26 = vshll.u32 %v1583_v17, 16 }
 0x1be   : > { %v3796_v16 = vpop.f32.mrf.mxu2 }
 0x1bf   : > { %v5366_v59 = vshrl.u32 %v5242_v29, 16  ;;  %v4086_v20 = vadd.f32 %v3796_v16, %v3003_v36  ;;  %v8897_v23 = vpop.f32.mrf.mxu3  ;;  %v5369_v34 = vshll.u32 %v5242_v29, 16  ;;  %v3421_v16 = vrot.slane %v1583_v17, 1 }
 0x1c0   : > { %11099 = vst [vmem:[#allocation27_spill] sm:$0xff] %v8897_v23  ;;  %7112 = vmatmul.msk.bf16.gmra.mxu1 %vm2277_vm3, %v8848_v43 }
 0x1c1   : > { %v5368_v31 = vrot.slane %v5366_v59, 7  ;;  %v4234_v15 = vsel %vm4194_vm6, %v4086_v20, 0.0  ;;  %v4476_v46 = vmul.f32 %v4086_v20, %v4086_v20 }
 0x1c2   : > { %v4235_v13 = vadd.f32 %v4234_v15, %v4233_v63  ;;  %v2535_v44 = vpop.f32.mrf.mxu0 }
 0x1c3   : > { %v5371_v11 = vor.u32 %v5369_v34, %v5368_v31  ;;  %v4623_v32 = vsel %vm4194_vm6, %v4476_v46, 0.0  ;;  %v5880_v47 = vsel %vm8299_vm9, %v5368_v31, 4048220490  ;;  %v3005_v29 = vadd.f32 %v8863_v45, %v2535_v44 }
 0x1c4   : > { %v4624_v24 = vadd.f32 %v4623_v32, %v4622_v21  ;;  %v5999_v63 = vunpack.c.l.b16 %v5880_v47  ;;  %v4869_v46 = vpack.c.bf16 %v4086_v20, %v4086_v20  ;;  %929 = vrot.lane.b32.xlu1 %v7265_v30, %s7462_s8  ;;  %v1892_v45 = vrot.slane %v1890_v26, 1  ;;  %v1103_v26 = vpop.permute.xlu2 %1102 }
 0x1c5   : > { %v5372_v38 = vsel %vm5297_vm7, %v8853_v28, %v5371_v11  ;;  %v8912_v36 = vpop.f32.mrf.mxu1  ;;  %v1889_v28 = vor.u32 %v1887_v8, %v8870_v10  ;;  %v11101_v10 = vrot.slane %v8848_v43, 1 }
 0x1c6   : > { %v5997_v59 = vunpack.c.l.b16 %v5372_v38  ;;  %v5998_v34 = vunpack.c.h.b16 %v5372_v38  ;;  %v3798_v15 = vpop.f32.mrf.mxu2  ;;  %v6161_v31 = vpack.c.b16 %v5999_v63, %v5999_v63 }
 0x1c7   : > { %v4087_v21 = vadd.f32 %v3798_v15, %v3005_v29  ;;  %v8914_v32 = vpop.f32.mrf.mxu3  ;;  %v7366_v29 = vld [vmem:[%s7553_s7 + $0xc8] sm:$0xff]  ;;  %v3422_v8 = vsel %vm3372_vm4, %v11101_v10, %v3421_v16 }
 0x1c8   : > { %11100 = vst [vmem:[#allocation28_spill] sm:$0xff] %v8914_v32  ;;  %v6159_v44 = vpack.c.b16 %v5997_v59, %v5997_v59  ;;  %v6160_v11 = vpack.c.b16 %v5998_v34, %v5998_v34  ;;  %v1327_v30 = vsel %vm1234_vm1, %v7366_v29, %v898_v55  ;;  %v5125_v59 = vunpack.c.l.b16 %v4869_v46  ;;  %v1105_v46 = vpop.permute.xlu0 %1104 }
 0x1c9   : > { %v4236_v17 = vsel %vm4194_vm6, %v4087_v21, 0.0  ;;  %v4477_v47 = vmul.f32 %v4087_v21, %v4087_v21  ;;  %v4870_v38 = vpack.c.bf16 %v4087_v21, %v4087_v21  ;;  %6490 = vst.msk [vmem:[%s8328_s11 + $0x74] sm:$0x1] %vm6464_vm11, %v6161_v31  ;;  %v7367_v31 = vld [vmem:[%s7553_s7 + $0xd0] sm:$0xff]  ;;  %v1893_v55 = vsel %vm1723_vm5, %v1889_v28, %v1892_v45 }
 0x1ca   : > { %6488 = vst.msk [vmem:[%s8328_s11 + $0x6c] sm:$0xf] %vm6459_vm10, %v6159_v44  ;;  %v4237_v20 = vadd.f32 %v4236_v17, %v4235_v13  ;;  %v2538_v63 = vpop.f32.mrf.mxu0  ;;  %v1330_v13 = vsel %vm1234_vm1, %v7367_v31, %v900_v49  ;;  %v1585_v43 = vsel %vm1523_vm2, %v1327_v30, %v1103_v26 }
 0x1cb   : > { %6489 = vst.msk [vmem:[%s8328_s11 + $0x70] sm:$0xf] %vm6459_vm10, %v6160_v11  ;;  %v4625_v34 = vsel %vm4194_vm6, %v4477_v47, 0.0  ;;  %v5126_v15 = vunpack.c.l.b16 %v4870_v38  ;;  %7183 = vmatmul.msk.bf16.gmra.mxu2 %vm2277_vm3, %v3422_v8  ;;  %v3008_v17 = vadd.f32 %v3007_v54, %v2538_v63  ;;  %v1896_v49 = vshll.u32 %v1585_v43, 16  ;;  %v7264_v8 = vld [vmem:[%s7553_s7 + $0x140] sm:$0xff] }
 0x1cc   : > { %v4626_v21 = vadd.f32 %v4625_v34, %v4624_v24  ;;  %7142 = vmatmul.msk.bf16.gmra.mxu3 %vm2277_vm3, %v7863_v60  ;;  %v8942_v28 = vsel %vm1523_vm2, %v1330_v13, %v1105_v46  ;;  %v1894_v34 = vshrl.u32 %v1585_v43, 16  ;;  %1126 = vrot.lane.b32.xlu2 %v7264_v8, %s7463_s9 }
 0x1cd   : > { %v5243_v44 = vpack.c.b16 %v5126_v15, %v5125_v59  ;;  %7044 = vmatmul.msk.bf16.gmra.mxu0 %vm2277_vm3, %v1893_v55  ;;  %v3012_v16 = vpop.f32.mrf.mxu1  ;;  %v1898_v15 = vrot.slane %v1896_v49, 1  ;;  %v1900_v13 = vshll.u32 %v8942_v28, 16  ;;  %927 = vrot.lane.b32.xlu0 %v7264_v8, %s7462_s8 }
 0x1ce   : > { %v3801_v11 = vpop.f32.mrf.mxu2 }
 0x1cf   : > { %v5374_v47 = vshrl.u32 %v5243_v44, 16  ;;  %v4088_v24 = vadd.f32 %v3801_v11, %v3008_v17  ;;  %v8939_v38 = vpop.f32.mrf.mxu3  ;;  %v5377_v45 = vshll.u32 %v5243_v44, 16  ;;  %v3423_v17 = vrot.slane %v1585_v43, 1 }
 0x1d0   : > { %11102 = vst [vmem:[#allocation29_spill] sm:$0xff] %v8939_v38  ;;  %7113 = vmatmul.msk.bf16.gmra.mxu1 %vm2277_vm3, %v1585_v43  ;;  %v8962_v8 = vrot.slane %v1900_v13, 1  ;;  %v902_v38 = vpop.permute.xlu1 %901 }
 0x1d1   : > { %v8945_v54 = vrot.slane %v5374_v47, 7  ;;  %v4238_v29 = vsel %vm4194_vm6, %v4088_v24, 0.0  ;;  %v4478_v30 = vmul.f32 %v4088_v24, %v4088_v24  ;;  %v4871_v49 = vpack.c.bf16 %v4088_v24, %v4088_v24 }
 0x1d2   : > { %v4239_v63 = vadd.f32 %v4238_v29, %v4237_v20  ;;  %v2540_v10 = vpop.f32.mrf.mxu0  ;;  %v11104_v24 = vrot.slane %v8942_v28, 1 }
 0x1d3   : > { %v5379_v26 = vor.u32 %v5377_v45, %v8945_v54  ;;  %v4627_v59 = vsel %vm4194_vm6, %v4478_v30, 0.0  ;;  %v3010_v55 = vadd.f32 %v8912_v36, %v2540_v10  ;;  %v1899_v30 = vor.u32 %v1898_v15, %v1894_v34  ;;  %v322_v36 = vld [vmem:[%s7553_s7 + $0x150] sm:$0x1] }
 0x1d4   : > { %v4628_v31 = vadd.f32 %v4627_v59, %v4626_v21  ;;  %v5127_v34 = vunpack.c.l.b16 %v4871_v49 }
 0x1d5   : > { %v8955_v44 = vpop.f32.mrf.mxu1  ;;  %v5849_v20 = vsel %vm8299_vm9, 4048220490, %v5379_v26 }
 0x1d6   : > { %v3803_v11 = vpop.f32.mrf.mxu2  ;;  %v6000_v47 = vunpack.c.l.b16 %v5849_v20  ;;  %v6001_v21 = vunpack.c.h.b16 %v5849_v20 }
 0x1d7   : > { %v4089_v45 = vadd.f32 %v3803_v11, %v3010_v55  ;;  %v8960_v29 = vpop.f32.mrf.mxu3  ;;  %v3425_v55 = vsel %vm3372_vm4, %v3423_v17, %v11104_v24  ;;  %v652_v11 = vunpack.c.l.b16 %v322_v36  ;;  %v1333_v17 = vsel %vm1234_vm1, %v8179_v18, %v902_v38  ;;  %v1107_v36 = vpop.permute.xlu2 %1106 }
 0x1d8   : > { %11103 = vst [vmem:[#allocation30_spill] sm:$0xff] %v8960_v29  ;;  %v6162_v10 = vpack.c.b16 %v6000_v47, %v6000_v47  ;;  %v6163_v59 = vpack.c.b16 %v6001_v21, %v6001_v21  ;;  %v1589_v18 = vsel %vm1523_vm2, %v1333_v17, %v1107_v36  ;;  %v906_v29 = vpop.permute.xlu1 %905 }
 0x1d9   : > { %v4240_v26 = vsel %vm4194_vm6, %v4089_v45, 0.0  ;;  %v4479_v43 = vmul.f32 %v4089_v45, %v4089_v45  ;;  %v4872_v46 = vpack.c.bf16 %v4089_v45, %v4089_v45  ;;  %v8977_v21 = vpack.c.b16 %v652_v11, %v652_v11  ;;  %v7267_v45 = vld [vmem:[%s7553_s7 + $0x15c] sm:$0xff] }
 0x1da   : > { %v4241_v32 = vadd.f32 %v4240_v26, %v4239_v63  ;;  %v2543_v20 = vpop.f32.mrf.mxu0  ;;  %6491 = vst.msk [vmem:[%s8328_s11 + $0x78] sm:$0xf] %vm6459_vm10, %v6162_v10  ;;  %v1903_v63 = vsel %vm1723_vm5, %v1899_v30, %v8962_v8  ;;  %1134 = vrot.lane.b32.xlu0 %v7267_v45, %s7463_s9 }
 0x1db   : > { %v4629_v15 = vsel %vm4194_vm6, %v4479_v43, 0.0  ;;  %v5128_v13 = vunpack.c.l.b16 %v4872_v46  ;;  %7184 = vmatmul.msk.bf16.gmra.mxu2 %vm2277_vm3, %v3425_v55  ;;  %6492 = vst.msk [vmem:[%s8328_s11 + $0x7c] sm:$0xf] %vm6459_vm10, %v6163_v59  ;;  %v3013_v49 = vadd.f32 %v3012_v16, %v2543_v20  ;;  %1130 = vrot.lane.b32.xlu2 %v8977_v21, %s7463_s9 }
 0x1dc   : > { %v4630_v47 = vadd.f32 %v4629_v15, %v4628_v31  ;;  %7143 = vmatmul.msk.bf16.gmra.mxu3 %vm2277_vm3, %v7948_v50  ;;  %931 = vrot.lane.b32.xlu1 %v8977_v21, %s7462_s8  ;;  %v904_v15 = vpop.permute.xlu0 %903 }
 0x1dd   : > { %v5244_v10 = vpack.c.b16 %v5128_v13, %v5127_v34  ;;  %7045 = vmatmul.msk.bf16.gmra.mxu0 %vm2277_vm3, %v1903_v63  ;;  %v3017_v46 = vpop.f32.mrf.mxu1  ;;  %v1904_v13 = vshrl.u32 %v8942_v28, 16  ;;  %v1907_v63 = vshll.u32 %v1589_v18, 16 }
 0x1de   : > { %v3806_v59 = vpop.f32.mrf.mxu2 }
 0x1df   : > { %v5381_v31 = vshrl.u32 %v5244_v10, 16  ;;  %v4090_v30 = vadd.f32 %v3806_v59, %v3013_v49  ;;  %v8988_v26 = vpop.f32.mrf.mxu3  ;;  %v5384_v38 = vshll.u32 %v5244_v10, 16 }
 0x1e0   : > { %11105 = vst [vmem:[#allocation31_spill] sm:$0xff] %v8988_v26  ;;  %7114 = vmatmul.msk.bf16.gmra.mxu1 %vm2277_vm3, %v8942_v28 }
 0x1e1   : > { %v5383_v16 = vrot.slane %v5381_v31, 7  ;;  %v4242_v43 = vsel %vm4194_vm6, %v4090_v30, 0.0  ;;  %v4480_v20 = vmul.f32 %v4090_v30, %v4090_v30  ;;  %v3426_v31 = vrot.slane %v1589_v18, 1 }
 0x1e2   : > { %v4243_v24 = vadd.f32 %v4242_v43, %v4241_v32  ;;  %v2545_v55 = vpop.f32.mrf.mxu0  ;;  %v4873_v26 = vpack.c.bf16 %v4090_v30, %v4090_v30 }
 0x1e3   : > { %v5386_v11 = vor.u32 %v5384_v38, %v5383_v16  ;;  %v4631_v34 = vsel %vm4194_vm6, %v4480_v20, 0.0  ;;  %v5881_v17 = vsel %vm8299_vm9, %v5383_v16, 4048220490  ;;  %v3015_v10 = vadd.f32 %v8955_v44, %v2545_v55 }
 0x1e4   : > { %v4632_v49 = vadd.f32 %v4631_v34, %v4630_v47  ;;  %v6004_v32 = vunpack.c.l.b16 %v5881_v17  ;;  %935 = vrot.lane.b32.xlu1 %v7267_v45, %s7462_s8  ;;  %v1909_v44 = vrot.slane %v1907_v63, 1  ;;  %v1109_v63 = vpop.permute.xlu2 %1108 }
 0x1e5   : > { %v5387_v36 = vsel %vm5297_vm7, %v8945_v54, %v5386_v11  ;;  %v9003_v59 = vpop.f32.mrf.mxu1  ;;  %v1906_v54 = vor.u32 %v1904_v13, %v8962_v8  ;;  %v11107_v8 = vrot.slane %v8942_v28, 1 }
 0x1e6   : > { %v6002_v38 = vunpack.c.l.b16 %v5387_v36  ;;  %v6003_v43 = vunpack.c.h.b16 %v5387_v36  ;;  %v3808_v20 = vpop.f32.mrf.mxu2  ;;  %v6166_v16 = vpack.c.b16 %v6004_v32, %v6004_v32 }
 0x1e7   : > { %v4091_v47 = vadd.f32 %v3808_v20, %v3015_v10  ;;  %v9005_v34 = vpop.f32.mrf.mxu3  ;;  %v7368_v10 = vld [vmem:[%s7553_s7 + $0xdc] sm:$0xff]  ;;  %v3427_v13 = vsel %vm3372_vm4, %v11107_v8, %v3426_v31  ;;  %v1111_v31 = vpop.permute.xlu0 %1110 }
 0x1e8   : > { %11106 = vst [vmem:[#allocation32_spill] sm:$0xff] %v9005_v34  ;;  %v6164_v55 = vpack.c.b16 %v6002_v38, %v6002_v38  ;;  %v6165_v11 = vpack.c.b16 %v6003_v43, %v6003_v43  ;;  %v1336_v45 = vsel %vm1234_vm1, %v7368_v10, %v904_v15  ;;  %v5129_v38 = vunpack.c.l.b16 %v4873_v26 }
 0x1e9   : > { %v4244_v18 = vsel %vm4194_vm6, %v4091_v47, 0.0  ;;  %v4481_v17 = vmul.f32 %v4091_v47, %v4091_v47  ;;  %v4874_v36 = vpack.c.bf16 %v4091_v47, %v4091_v47  ;;  %6495 = vst.msk [vmem:[%s8328_s11 + $0x88] sm:$0x1] %vm6464_vm11, %v6166_v16  ;;  %v7369_v16 = vld [vmem:[%s7553_s7 + $0xe4] sm:$0xff]  ;;  %v1910_v15 = vsel %vm1723_vm5, %v1906_v54, %v1909_v44 }
 0x1ea   : > { %6493 = vst.msk [vmem:[%s8328_s11 + $0x80] sm:$0xf] %vm6459_vm10, %v6164_v55  ;;  %v4245_v30 = vadd.f32 %v4244_v18, %v4243_v24  ;;  %v2548_v32 = vpop.f32.mrf.mxu0  ;;  %v1339_v24 = vsel %vm1234_vm1, %v7369_v16, %v906_v29  ;;  %v1591_v28 = vsel %vm1523_vm2, %v1336_v45, %v1109_v63 }
 0x1eb   : > { %6494 = vst.msk [vmem:[%s8328_s11 + $0x84] sm:$0xf] %vm6459_vm10, %v6165_v11  ;;  %v4633_v43 = vsel %vm4194_vm6, %v4481_v17, 0.0  ;;  %v5130_v20 = vunpack.c.l.b16 %v4874_v36  ;;  %7185 = vmatmul.msk.bf16.gmra.mxu2 %vm2277_vm3, %v3427_v13  ;;  %v3018_v18 = vadd.f32 %v3017_v46, %v2548_v32  ;;  %v1913_v29 = vshll.u32 %v1591_v28, 16  ;;  %v7266_v13 = vld [vmem:[%s7553_s7 + $0x154] sm:$0xff] }
 0x1ec   : > { %v4634_v47 = vadd.f32 %v4633_v43, %v4632_v49  ;;  %7144 = vmatmul.msk.bf16.gmra.mxu3 %vm2277_vm3, %v7974_v58  ;;  %v9033_v54 = vsel %vm1523_vm2, %v1339_v24, %v1111_v31  ;;  %v1911_v43 = vshrl.u32 %v1591_v28, 16  ;;  %1132 = vrot.lane.b32.xlu2 %v7266_v13, %s7463_s9 }
 0x1ed   : > { %v5245_v55 = vpack.c.b16 %v5130_v20, %v5129_v38  ;;  %7046 = vmatmul.msk.bf16.gmra.mxu0 %vm2277_vm3, %v1910_v15  ;;  %v3022_v26 = vpop.f32.mrf.mxu1  ;;  %v1915_v20 = vrot.slane %v1913_v29, 1  ;;  %v1917_v24 = vshll.u32 %v9033_v54, 16  ;;  %933 = vrot.lane.b32.xlu0 %v7266_v13, %s7462_s8 }
 0x1ee   : > { %v3811_v11 = vpop.f32.mrf.mxu2 }
 0x1ef   : > { %v5389_v17 = vshrl.u32 %v5245_v55, 16  ;;  %v4092_v49 = vadd.f32 %v3811_v11, %v3018_v18  ;;  %v9030_v36 = vpop.f32.mrf.mxu3  ;;  %v5392_v44 = vshll.u32 %v5245_v55, 16  ;;  %v3428_v18 = vrot.slane %v1591_v28, 1 }
 0x1f0   : > { %11108 = vst [vmem:[#allocation33_spill] sm:$0xff] %v9030_v36  ;;  %7115 = vmatmul.msk.bf16.gmra.mxu1 %vm2277_vm3, %v1591_v28  ;;  %v9053_v13 = vrot.slane %v1917_v24, 1  ;;  %v908_v36 = vpop.permute.xlu1 %907 }
 0x1f1   : > { %v9036_v46 = vrot.slane %v5389_v17, 7  ;;  %v4246_v10 = vsel %vm4194_vm6, %v4092_v49, 0.0  ;;  %v4482_v45 = vmul.f32 %v4092_v49, %v4092_v49  ;;  %v4875_v29 = vpack.c.bf16 %v4092_v49, %v4092_v49 }
 0x1f2   : > { %v4247_v32 = vadd.f32 %v4246_v10, %v4245_v30  ;;  %v2550_v8 = vpop.f32.mrf.mxu0  ;;  %v11110_v49 = vrot.slane %v9033_v54, 1 }
 0x1f3   : > { %v5394_v63 = vor.u32 %v5392_v44, %v9036_v46  ;;  %v4635_v38 = vsel %vm4194_vm6, %v4482_v45, 0.0  ;;  %v3020_v15 = vadd.f32 %v9003_v59, %v2550_v8  ;;  %v1916_v45 = vor.u32 %v1915_v20, %v1911_v43  ;;  %v327_v59 = vld [vmem:[%s7553_s7 + $0x164] sm:$0x1] }
 0x1f4   : > { %v4636_v16 = vadd.f32 %v4635_v38, %v4634_v47  ;;  %v5131_v43 = vunpack.c.l.b16 %v4875_v29 }
 0x1f5   : > { %v9046_v55 = vpop.f32.mrf.mxu1  ;;  %v5850_v30 = vsel %vm8299_vm9, 4048220490, %v5394_v63 }
 0x1f6   : > { %v3813_v11 = vpop.f32.mrf.mxu2  ;;  %v6005_v17 = vunpack.c.l.b16 %v5850_v30  ;;  %v6006_v47 = vunpack.c.h.b16 %v5850_v30 }
 0x1f7   : > { %v4093_v44 = vadd.f32 %v3813_v11, %v3020_v15  ;;  %v9051_v10 = vpop.f32.mrf.mxu3  ;;  %v3430_v15 = vsel %vm3372_vm4, %v3428_v18, %v11110_v49  ;;  %v657_v11 = vunpack.c.l.b16 %v327_v59  ;;  %v1342_v18 = vsel %vm1234_vm1, %v8357_v22, %v908_v36  ;;  %v1113_v59 = vpop.permute.xlu2 %1112 }
 0x1f8   : > { %11109 = vst [vmem:[#allocation34_spill] sm:$0xff] %v9051_v10  ;;  %v6167_v8 = vpack.c.b16 %v6005_v17, %v6005_v17  ;;  %v6168_v38 = vpack.c.b16 %v6006_v47, %v6006_v47  ;;  %v1595_v22 = vsel %vm1523_vm2, %v1342_v18, %v1113_v59  ;;  %v912_v10 = vpop.permute.xlu1 %911 }
 0x1f9   : > { %v4248_v63 = vsel %vm4194_vm6, %v4093_v44, 0.0  ;;  %v4483_v28 = vmul.f32 %v4093_v44, %v4093_v44  ;;  %v4876_v31 = vpack.c.bf16 %v4093_v44, %v4093_v44  ;;  %v9068_v47 = vpack.c.b16 %v657_v11, %v657_v11  ;;  %v7269_v44 = vld [vmem:[%s7553_s7 + $0x170] sm:$0xff] }
 0x1fa   : > { %v4249_v34 = vadd.f32 %v4248_v63, %v4247_v32  ;;  %v2553_v30 = vpop.f32.mrf.mxu0  ;;  %6496 = vst.msk [vmem:[%s8328_s11 + $0x8c] sm:$0xf] %vm6459_vm10, %v6167_v8  ;;  %v1920_v32 = vsel %vm1723_vm5, %v1916_v45, %v9053_v13  ;;  %1140 = vrot.lane.b32.xlu0 %v7269_v44, %s7463_s9 }
 0x1fb   : > { %v4637_v20 = vsel %vm4194_vm6, %v4483_v28, 0.0  ;;  %v5132_v24 = vunpack.c.l.b16 %v4876_v31  ;;  %7186 = vmatmul.msk.bf16.gmra.mxu2 %vm2277_vm3, %v3430_v15  ;;  %6497 = vst.msk [vmem:[%s8328_s11 + $0x90] sm:$0xf] %vm6459_vm10, %v6168_v38  ;;  %v3023_v29 = vadd.f32 %v3022_v26, %v2553_v30  ;;  %1136 = vrot.lane.b32.xlu2 %v9068_v47, %s7463_s9 }
 0x1fc   : > { %v4638_v17 = vadd.f32 %v4637_v20, %v4636_v16  ;;  %7145 = vmatmul.msk.bf16.gmra.mxu3 %vm2277_vm3, %v8054_v9  ;;  %937 = vrot.lane.b32.xlu1 %v9068_v47, %s7462_s8  ;;  %v910_v20 = vpop.permute.xlu0 %909 }
 0x1fd   : > { %v5246_v8 = vpack.c.b16 %v5132_v24, %v5131_v43  ;;  %7047 = vmatmul.msk.bf16.gmra.mxu0 %vm2277_vm3, %v1920_v32  ;;  %v3027_v31 = vpop.f32.mrf.mxu1  ;;  %v1921_v24 = vshrl.u32 %v9033_v54, 16  ;;  %v1924_v32 = vshll.u32 %v1595_v22, 16 }
 0x1fe   : > { %v3816_v38 = vpop.f32.mrf.mxu2 }
 0x1ff   : > { %v5396_v16 = vshrl.u32 %v5246_v8, 16  ;;  %v4094_v45 = vadd.f32 %v3816_v38, %v3023_v29  ;;  %v9082_v26 = vpop.f32.mrf.mxu3  ;;  %v5399_v63 = vshll.u32 %v5246_v8, 16 }
 0x200   : > { %11111 = vst [vmem:[#allocation35_spill] sm:$0xff] %v9082_v26  ;;  %7116 = vmatmul.msk.bf16.gmra.mxu1 %vm2277_vm3, %v9033_v54 }
 0x201   : > { %v5398_v36 = vrot.slane %v5396_v16, 7  ;;  %v4250_v28 = vsel %vm4194_vm6, %v4094_v45, 0.0  ;;  %v4484_v30 = vmul.f32 %v4094_v45, %v4094_v45  ;;  %v3431_v16 = vrot.slane %v1595_v22, 1 }
 0x202   : > { %v4251_v49 = vadd.f32 %v4250_v28, %v4249_v34  ;;  %v2555_v15 = vpop.f32.mrf.mxu0  ;;  %v4877_v26 = vpack.c.bf16 %v4094_v45, %v4094_v45  ;;  %v7370_v45 = vld [vmem:[%s7553_s7 + $0xf0] sm:$0xff] }
 0x203   : > { %v5401_v11 = vor.u32 %v5399_v63, %v5398_v36  ;;  %v4639_v43 = vsel %vm4194_vm6, %v4484_v30, 0.0  ;;  %v5882_v59 = vsel %vm8299_vm9, %v5398_v36, 4048220490  ;;  %v3025_v8 = vadd.f32 %v9046_v55, %v2555_v15 }
 0x204   : > { %v4640_v18 = vadd.f32 %v4639_v43, %v4638_v17  ;;  %v6009_v34 = vunpack.c.l.b16 %v5882_v59  ;;  %941 = vrot.lane.b32.xlu1 %v7269_v44, %s7462_s8  ;;  %v1923_v43 = vor.u32 %v1921_v24, %v9053_v13  ;;  %v1345_v13 = vsel %vm1234_vm1, %v7370_v45, %v910_v20 }
 0x205   : > { %v5402_v29 = vsel %vm5297_vm7, %v9036_v46, %v5401_v11  ;;  %v9094_v38 = vpop.f32.mrf.mxu1  ;;  %v1926_v46 = vrot.slane %v1924_v32, 1  ;;  %v11113_v32 = vrot.slane %v9033_v54, 1 }
 0x206   : > { %v6007_v63 = vunpack.c.l.b16 %v5402_v29  ;;  %v6008_v28 = vunpack.c.h.b16 %v5402_v29  ;;  %v3818_v30 = vpop.f32.mrf.mxu2  ;;  %v6171_v36 = vpack.c.b16 %v6009_v34, %v6009_v34  ;;  %v1115_v34 = vpop.permute.xlu2 %1114 }
 0x207   : > { %v4095_v17 = vadd.f32 %v3818_v30, %v3025_v8  ;;  %v9098_v11 = vpop.f32.mrf.mxu3  ;;  %v3432_v8 = vsel %vm3372_vm4, %v11113_v32, %v3431_v16  ;;  %v1927_v20 = vsel %vm1723_vm5, %v1923_v43, %v1926_v46  ;;  %v1597_v54 = vsel %vm1523_vm2, %v1345_v13, %v1115_v34  ;;  %v1117_v16 = vpop.permute.xlu0 %1116 }
 0x208   : > { %v6169_v55 = vpack.c.b16 %v6007_v63, %v6007_v63  ;;  %v6170_v15 = vpack.c.b16 %v6008_v28, %v6008_v28  ;;  %11112 = vst [vmem:[#allocation36_spill] sm:$0xff] %v9098_v11  ;;  %v5133_v63 = vunpack.c.l.b16 %v4877_v26 }
 0x209   : > { %v4252_v22 = vsel %vm4194_vm6, %v4095_v17, 0.0  ;;  %v4485_v59 = vmul.f32 %v4095_v17, %v4095_v17  ;;  %v4878_v29 = vpack.c.bf16 %v4095_v17, %v4095_v17  ;;  %6500 = vst.msk [vmem:[%s8328_s11 + $0x9c] sm:$0x1] %vm6464_vm11, %v6171_v36  ;;  %v7371_v36 = vld [vmem:[%s7553_s7 + $0xf8] sm:$0xff] }
 0x20a   : > { %6498 = vst.msk [vmem:[%s8328_s11 + $0x94] sm:$0xf] %vm6459_vm10, %v6169_v55  ;;  %v4253_v44 = vadd.f32 %v4252_v22, %v4251_v49  ;;  %v2558_v24 = vpop.f32.mrf.mxu0  ;;  %v1348_v49 = vsel %vm1234_vm1, %v7371_v36, %v912_v10 }
 0x20b   : > { %6499 = vst.msk [vmem:[%s8328_s11 + $0x98] sm:$0xf] %vm6459_vm10, %v6170_v15  ;;  %v4641_v28 = vsel %vm4194_vm6, %v4485_v59, 0.0  ;;  %v5134_v30 = vunpack.c.l.b16 %v4878_v29  ;;  %7187 = vmatmul.msk.bf16.gmra.mxu2 %vm2277_vm3, %v3432_v8  ;;  %v3028_v22 = vadd.f32 %v3027_v31, %v2558_v24  ;;  %v1930_v29 = vshll.u32 %v1597_v54, 16  ;;  %v7268_v8 = vld [vmem:[%s7553_s7 + $0x168] sm:$0xff] }
 0x20c   : > { %v4642_v17 = vadd.f32 %v4641_v28, %v4640_v18  ;;  %7146 = vmatmul.msk.bf16.gmra.mxu3 %vm2277_vm3, %v8080_v48  ;;  %v9124_v10 = vsel %vm1523_vm2, %v1348_v49, %v1117_v16  ;;  %v1928_v28 = vshrl.u32 %v1597_v54, 16  ;;  %1138 = vrot.lane.b32.xlu2 %v7268_v8, %s7463_s9 }
 0x20d   : > { %v5247_v55 = vpack.c.b16 %v5134_v30, %v5133_v63  ;;  %7048 = vmatmul.msk.bf16.gmra.mxu0 %vm2277_vm3, %v1927_v20  ;;  %v3032_v26 = vpop.f32.mrf.mxu1  ;;  %v1932_v30 = vrot.slane %v1930_v29, 1  ;;  %v1934_v49 = vshll.u32 %v9124_v10, 16  ;;  %939 = vrot.lane.b32.xlu0 %v7268_v8, %s7462_s8 }
 0x20e   : > { %v3821_v15 = vpop.f32.mrf.mxu2 }
 0x20f   : > { %v5404_v59 = vshrl.u32 %v5247_v55, 16  ;;  %v4096_v18 = vadd.f32 %v3821_v15, %v3028_v22  ;;  %v9121_v45 = vpop.f32.mrf.mxu3  ;;  %v5407_v43 = vshll.u32 %v5247_v55, 16  ;;  %v3433_v22 = vrot.slane %v1597_v54, 1 }
 0x210   : > { %11114 = vst [vmem:[#allocation37_spill] sm:$0xff] %v9121_v45  ;;  %7117 = vmatmul.msk.bf16.gmra.mxu1 %vm2277_vm3, %v1597_v54  ;;  %v914_v45 = vpop.permute.xlu1 %913 }
 0x211   : > { %v9127_v31 = vrot.slane %v5404_v59, 7  ;;  %v4254_v46 = vsel %vm4194_vm6, %v4096_v18, 0.0  ;;  %v4486_v13 = vmul.f32 %v4096_v18, %v4096_v18  ;;  %v4879_v29 = vpack.c.bf16 %v4096_v18, %v4096_v18 }
 0x212   : > { %v4255_v24 = vadd.f32 %v4254_v46, %v4253_v44  ;;  %v2560_v32 = vpop.f32.mrf.mxu0  ;;  %v1933_v46 = vor.u32 %v1932_v30, %v1928_v28  ;;  %v11116_v18 = vrot.slane %v9124_v10, 1 }
 0x213   : > { %v5409_v34 = vor.u32 %v5407_v43, %v9127_v31  ;;  %v4643_v63 = vsel %vm4194_vm6, %v4486_v13, 0.0  ;;  %v3030_v20 = vadd.f32 %v9094_v38, %v2560_v32  ;;  %v9142_v13 = vrot.slane %v1934_v49, 1  ;;  %v332_v38 = vld [vmem:[%s7553_s7 + $0x178] sm:$0x1] }
 0x214   : > { %v4644_v36 = vadd.f32 %v4643_v63, %v4642_v17  ;;  %v3435_v28 = vsel %vm3372_vm4, %v3433_v22, %v11116_v18  ;;  %v662_v30 = vunpack.c.l.b16 %v332_v38  ;;  %v5135_v49 = vunpack.c.l.b16 %v4879_v29  ;;  %v1119_v38 = vpop.permute.xlu2 %1118 }
 0x215   : > { %v9137_v55 = vpop.f32.mrf.mxu1  ;;  %v5851_v44 = vsel %vm8299_vm9, 4048220490, %v5409_v34  ;;  %v1351_v22 = vsel %vm1234_vm1, %v8504_v35, %v914_v45 }
 0x216   : > { %v3823_v15 = vpop.f32.mrf.mxu2  ;;  %v6010_v59 = vunpack.c.l.b16 %v5851_v44  ;;  %v6011_v17 = vunpack.c.h.b16 %v5851_v44  ;;  %v1601_v35 = vsel %vm1523_vm2, %v1351_v22, %v1119_v38 }
 0x217   : > { %v4097_v43 = vadd.f32 %v3823_v15, %v3030_v20  ;;  %v9144_v8 = vpop.f32.mrf.mxu3 }
 0x218   : > { %11115 = vst [vmem:[#allocation38_spill] sm:$0xff] %v9144_v8  ;;  %v6172_v32 = vpack.c.b16 %v6010_v59, %v6010_v59  ;;  %v6173_v63 = vpack.c.b16 %v6011_v17, %v6011_v17  ;;  %v9159_v17 = vpack.c.b16 %v662_v30, %v662_v30  ;;  %v918_v8 = vpop.permute.xlu1 %917 }
 0x219   : > { %v4256_v34 = vsel %vm4194_vm6, %v4097_v43, 0.0  ;;  %v4487_v54 = vmul.f32 %v4097_v43, %v4097_v43  ;;  %v4880_v16 = vpack.c.bf16 %v4097_v43, %v4097_v43  ;;  %v7271_v43 = vld [vmem:[%s7553_s7 + $0x184] sm:$0xff] }
 0x21a   : > { %v4257_v11 = vadd.f32 %v4256_v34, %v4255_v24  ;;  %v2563_v44 = vpop.f32.mrf.mxu0  ;;  %6501 = vst.msk [vmem:[%s8328_s11 + $0xa0] sm:$0xf] %vm6459_vm10, %v6172_v32  ;;  %v1937_v24 = vsel %vm1723_vm5, %v1933_v46, %v9142_v13  ;;  %1142 = vrot.lane.b32.xlu2 %v9159_v17, %s7463_s9  ;;  %1146 = vrot.lane.b32.xlu0 %v7271_v43, %s7463_s9 }
 0x21b   : > { %v4645_v20 = vsel %vm4194_vm6, %v4487_v54, 0.0  ;;  %v5136_v15 = vunpack.c.l.b16 %v4880_v16  ;;  %7188 = vmatmul.msk.bf16.gmra.mxu2 %vm2277_vm3, %v3435_v28  ;;  %6502 = vst.msk [vmem:[%s8328_s11 + $0xa4] sm:$0xf] %vm6459_vm10, %v6173_v63  ;;  %v3033_v29 = vadd.f32 %v3032_v26, %v2563_v44  ;;  %943 = vrot.lane.b32.xlu1 %v9159_v17, %s7462_s8 }
 0x21c   : > { %v4646_v59 = vadd.f32 %v4645_v20, %v4644_v36  ;;  %7147 = vmatmul.msk.bf16.gmra.mxu3 %vm2277_vm3, %v8160_v14  ;;  %v916_v20 = vpop.permute.xlu0 %915 }
 0x21d   : > { %v5248_v32 = vpack.c.b16 %v5136_v15, %v5135_v49  ;;  %7049 = vmatmul.msk.bf16.gmra.mxu0 %vm2277_vm3, %v1937_v24  ;;  %v3037_v16 = vpop.f32.mrf.mxu1  ;;  %v1938_v15 = vshrl.u32 %v9124_v10, 16  ;;  %v1941_v24 = vshll.u32 %v1601_v35, 16 }
 0x21e   : > { %v3826_v63 = vpop.f32.mrf.mxu2 }
 0x21f   : > { %v5411_v36 = vshrl.u32 %v5248_v32, 16  ;;  %v4098_v46 = vadd.f32 %v3826_v63, %v3033_v29  ;;  %v9173_v26 = vpop.f32.mrf.mxu3  ;;  %v5414_v34 = vshll.u32 %v5248_v32, 16 }
 0x220   : > { %11117 = vst [vmem:[#allocation39_spill] sm:$0xff] %v9173_v26  ;;  %7118 = vmatmul.msk.bf16.gmra.mxu1 %vm2277_vm3, %v9124_v10 }
 0x221   : > { %v5413_v45 = vrot.slane %v5411_v36, 7  ;;  %v4258_v54 = vsel %vm4194_vm6, %v4098_v46, 0.0  ;;  %v4488_v44 = vmul.f32 %v4098_v46, %v4098_v46  ;;  %v3436_v36 = vrot.slane %v1601_v35, 1 }
 0x222   : > { %v4259_v18 = vadd.f32 %v4258_v54, %v4257_v11  ;;  %v2565_v28 = vpop.f32.mrf.mxu0  ;;  %v4881_v26 = vpack.c.bf16 %v4098_v46, %v4098_v46  ;;  %v7372_v46 = vld [vmem:[%s7553_s7 + $0x104] sm:$0xff] }
 0x223   : > { %v5416_v30 = vor.u32 %v5414_v34, %v5413_v45  ;;  %v4647_v49 = vsel %vm4194_vm6, %v4488_v44, 0.0  ;;  %v5883_v38 = vsel %vm8299_vm9, %v5413_v45, 4048220490  ;;  %v3035_v32 = vadd.f32 %v9137_v55, %v2565_v28  ;;  %947 = vrot.lane.b32.xlu1 %v7271_v43, %s7462_s8 }
 0x224   : > { %v4648_v22 = vadd.f32 %v4647_v49, %v4646_v59  ;;  %v6014_v11 = vunpack.c.l.b16 %v5883_v38  ;;  %v1940_v49 = vor.u32 %v1938_v15, %v9142_v13  ;;  %v1354_v13 = vsel %vm1234_vm1, %v7372_v46, %v916_v20 }
 0x225   : > { %v5417_v29 = vsel %vm5297_vm7, %v9127_v31, %v5416_v30  ;;  %v9185_v63 = vpop.f32.mrf.mxu1  ;;  %v1943_v31 = vrot.slane %v1941_v24, 1  ;;  %v11119_v24 = vrot.slane %v9124_v10, 1 }
 0x226   : > { %v6012_v34 = vunpack.c.l.b16 %v5417_v29  ;;  %v6013_v54 = vunpack.c.h.b16 %v5417_v29  ;;  %v3828_v44 = vpop.f32.mrf.mxu2  ;;  %v6176_v45 = vpack.c.b16 %v6014_v11, %v6014_v11  ;;  %v1121_v11 = vpop.permute.xlu2 %1120 }
 0x227   : > { %v4099_v59 = vadd.f32 %v3828_v44, %v3035_v32  ;;  %v9189_v30 = vpop.f32.mrf.mxu3  ;;  %v3437_v32 = vsel %vm3372_vm4, %v11119_v24, %v3436_v36  ;;  %v1944_v20 = vsel %vm1723_vm5, %v1940_v49, %v1943_v31  ;;  %v1603_v10 = vsel %vm1523_vm2, %v1354_v13, %v1121_v11  ;;  %v1123_v36 = vpop.permute.xlu0 %1122 }
 0x228   : > { %v6174_v55 = vpack.c.b16 %v6012_v34, %v6012_v34  ;;  %v6175_v28 = vpack.c.b16 %v6013_v54, %v6013_v54  ;;  %11118 = vst [vmem:[#allocation40_spill] sm:$0xff] %v9189_v30  ;;  %v5137_v34 = vunpack.c.l.b16 %v4881_v26 }
 0x229   : > { %v4260_v35 = vsel %vm4194_vm6, %v4099_v59, 0.0  ;;  %v4489_v38 = vmul.f32 %v4099_v59, %v4099_v59  ;;  %v4882_v29 = vpack.c.bf16 %v4099_v59, %v4099_v59  ;;  %6505 = vst.msk [vmem:[%s8328_s11 + $0xb0] sm:$0x1] %vm6464_vm11, %v6176_v45  ;;  %v7373_v45 = vld [vmem:[%s7553_s7 + $0x10c] sm:$0xff] }
 0x22a   : > { %6503 = vst.msk [vmem:[%s8328_s11 + $0xa8] sm:$0xf] %vm6459_vm10, %v6174_v55  ;;  %v4261_v43 = vadd.f32 %v4260_v35, %v4259_v18  ;;  %v2568_v15 = vpop.f32.mrf.mxu0  ;;  %v1357_v18 = vsel %vm1234_vm1, %v7373_v45, %v918_v8 }
 0x22b   : > { %6504 = vst.msk [vmem:[%s8328_s11 + $0xac] sm:$0xf] %vm6459_vm10, %v6175_v28  ;;  %v4649_v54 = vsel %vm4194_vm6, %v4489_v38, 0.0  ;;  %v5138_v44 = vunpack.c.l.b16 %v4882_v29  ;;  %7189 = vmatmul.msk.bf16.gmra.mxu2 %vm2277_vm3, %v3437_v32  ;;  %v3038_v35 = vadd.f32 %v3037_v16, %v2568_v15  ;;  %v1947_v29 = vshll.u32 %v1603_v10, 16 }
 0x22c   : > { %v4650_v59 = vadd.f32 %v4649_v54, %v4648_v22  ;;  %7148 = vmatmul.msk.bf16.gmra.mxu3 %vm2277_vm3, %v8186_v61  ;;  %v9215_v8 = vsel %vm1523_vm2, %v1357_v18, %v1123_v36  ;;  %v1945_v54 = vshrl.u32 %v1603_v10, 16 }
 0x22d   : > { %v5249_v55 = vpack.c.b16 %v5138_v44, %v5137_v34  ;;  %7050 = vmatmul.msk.bf16.gmra.mxu0 %vm2277_vm3, %v1944_v20  ;;  %v3042_v26 = vpop.f32.mrf.mxu1  ;;  %v7270_v34 = vld [vmem:[%s7553_s7 + $0x17c] sm:$0xff]  ;;  %v1949_v44 = vrot.slane %v1947_v29, 1  ;;  %v1951_v18 = vshll.u32 %v9215_v8, 16  ;;  %v11122_v30 = vrot.slane %v9215_v8, 1 }
 0x22e   : > { %v3831_v28 = vpop.f32.mrf.mxu2  ;;  %1144 = vrot.lane.b32.xlu2 %v7270_v34, %s7463_s9  ;;  %945 = vrot.lane.b32.xlu0 %v7270_v34, %s7462_s8  ;;  %v337_v34 = vld [vmem:[%s7553_s7 + $0x18c] sm:$0x1] }
 0x22f   : > { %v5419_v38 = vshrl.u32 %v5249_v55, 16  ;;  %v4100_v22 = vadd.f32 %v3831_v28, %v3038_v35  ;;  %v9212_v46 = vpop.f32.mrf.mxu3  ;;  %v5422_v49 = vshll.u32 %v5249_v55, 16  ;;  %v1950_v29 = vor.u32 %v1949_v44, %v1945_v54 }
 0x230   : > { %11120 = vst [vmem:[#allocation41_spill] sm:$0xff] %v9212_v46  ;;  %7119 = vmatmul.msk.bf16.gmra.mxu1 %vm2277_vm3, %v1603_v10 }
 0x231   : > { %v9218_v16 = vrot.slane %v5419_v38, 7  ;;  %v4262_v31 = vsel %vm4194_vm6, %v4100_v22, 0.0  ;;  %v4490_v13 = vmul.f32 %v4100_v22, %v4100_v22  ;;  %v4883_v38 = vpack.c.bf16 %v4100_v22, %v4100_v22 }
 0x232   : > { %v4263_v15 = vadd.f32 %v4262_v31, %v4261_v43  ;;  %v2570_v24 = vpop.f32.mrf.mxu0  ;;  %v3438_v43 = vrot.slane %v1603_v10, 1  ;;  %v920_v31 = vpop.permute.xlu1 %919 }
 0x233   : > { %v5424_v32 = vor.u32 %v5422_v49, %v9218_v16  ;;  %v4651_v11 = vsel %vm4194_vm6, %v4490_v13, 0.0  ;;  %v3040_v20 = vadd.f32 %v9185_v63, %v2570_v24  ;;  %v9233_v49 = vrot.slane %v1951_v18, 1 }
 0x234   : > { %v4652_v45 = vadd.f32 %v4651_v11, %v4650_v59  ;;  %v5139_v54 = vunpack.c.l.b16 %v4883_v38  ;;  %v7273_v38 = vld [vmem:[%s7553_s7 + $0x198] sm:$0xff] }
 0x235   : > { %v9226_v35 = vpop.f32.mrf.mxu1  ;;  %v5852_v28 = vsel %vm8299_vm9, 4048220490, %v5424_v32  ;;  %v3440_v32 = vsel %vm3372_vm4, %v3438_v43, %v11122_v30 }
 0x236   : > { %v3833_v36 = vpop.f32.mrf.mxu2  ;;  %v6015_v10 = vunpack.c.l.b16 %v5852_v28  ;;  %v6016_v22 = vunpack.c.h.b16 %v5852_v28  ;;  %1152 = vrot.lane.b32.xlu0 %v7273_v38, %s7463_s9 }
 0x237   : > { %v4101_v59 = vadd.f32 %v3833_v36, %v3040_v20  ;;  %v9235_v63 = vpop.f32.mrf.mxu3  ;;  %v667_v20 = vunpack.c.l.b16 %v337_v34  ;;  %v1360_v36 = vsel %vm1234_vm1, %v8642_v51, %v920_v31 }
 0x238   : > { %11121 = vst [vmem:[#allocation42_spill] sm:$0xff] %v9235_v63  ;;  %v6177_v51 = vpack.c.b16 %v6015_v10, %v6015_v10 }
 0x239   : > { %v4264_v13 = vsel %vm4194_vm6, %v4101_v59, 0.0  ;;  %v4491_v24 = vmul.f32 %v4101_v59, %v4101_v59  ;;  %v4884_v11 = vpack.c.bf16 %v4101_v59, %v4101_v59  ;;  %v9253_v28 = vpack.c.b16 %v667_v20, %v667_v20 }
 0x23a   : > { %v4265_v46 = vadd.f32 %v4264_v13, %v4263_v15  ;;  %v2573_v55 = vpop.f32.mrf.mxu0  ;;  %v1954_v15 = vsel %vm1723_vm5, %v1950_v29, %v9233_v49  ;;  %v1125_v13 = vpop.permute.xlu2 %1124  ;;  %6506 = vst.msk [vmem:[%s8328_s11 + $0xb4] sm:$0xf] %vm6459_vm10, %v6177_v51  ;;  %v1955_v20 = vshrl.u32 %v9215_v8, 16 }
 0x23b   : > { %v4653_v44 = vsel %vm4194_vm6, %v4491_v24, 0.0  ;;  %v5140_v18 = vunpack.c.l.b16 %v4884_v11  ;;  %7190 = vmatmul.msk.bf16.gmra.mxu2 %vm2277_vm3, %v3440_v32  ;;  %v3043_v63 = vadd.f32 %v3042_v26, %v2573_v55  ;;  %v6178_v26 = vpack.c.b16 %v6016_v22, %v6016_v22  ;;  %1148 = vrot.lane.b32.xlu2 %v9253_v28, %s7463_s9 }
 0x23c   : > { %v4654_v59 = vadd.f32 %v4653_v44, %v4652_v45  ;;  %7149 = vmatmul.msk.bf16.gmra.mxu3 %vm2277_vm3, %v8277_v37  ;;  %v1607_v29 = vsel %vm1523_vm2, %v1360_v36, %v1125_v13  ;;  %949 = vrot.lane.b32.xlu1 %v9253_v28, %s7462_s8 }
 0x23d   : > { %v5250_v30 = vpack.c.b16 %v5140_v18, %v5139_v54  ;;  %7051 = vmatmul.msk.bf16.gmra.mxu0 %vm2277_vm3, %v1954_v15  ;;  %v9251_v43 = vpop.f32.mrf.mxu1  ;;  %6507 = vst.msk [vmem:[%s8328_s11 + $0xb8] sm:$0xf] %vm6459_vm10, %v6178_v26  ;;  %v922_v18 = vpop.permute.xlu0 %921  ;;  %v1958_v36 = vshll.u32 %v1607_v29, 16  ;;  %v3441_v26 = vrot.slane %v1607_v29, 1 }
 0x23e   : > { %v3836_v45 = vpop.f32.mrf.mxu2 }
 0x23f   : > { %v5426_v55 = vshrl.u32 %v5250_v30, 16  ;;  %v4102_v31 = vadd.f32 %v3836_v45, %v3043_v63  ;;  %v9262_v24 = vpop.f32.mrf.mxu3  ;;  %v5429_v11 = vshll.u32 %v5250_v30, 16  ;;  %v1960_v23 = vrot.slane %v1958_v36, 1 }
 0x240   : > { %7120 = vmatmul.msk.bf16.gmra.mxu1 %vm2277_vm3, %v9215_v8  ;;  %v11123_v36 = vrot.slane %v9215_v8, 1  ;;  %v7375_v8 = vld [vmem:[%s7553_s7 + $0x120] sm:$0xff] }
 0x241   : > { %v5428_v63 = vrot.slane %v5426_v55, 7  ;;  %v4266_v34 = vsel %vm4194_vm6, %v4102_v31, 0.0  ;;  %v4492_v10 = vmul.f32 %v4102_v31, %v4102_v31 }
 0x242   : > { %v4267_v32 = vadd.f32 %v4266_v34, %v4265_v46  ;;  %v2575_v22 = vpop.f32.mrf.mxu0 }
 0x243   : > { %v5431_v54 = vor.u32 %v5429_v11, %v5428_v63  ;;  %v4655_v44 = vsel %vm4194_vm6, %v4492_v10, 0.0  ;;  %v5884_v13 = vsel %vm8299_vm9, %v5428_v63, 4048220490  ;;  %v3045_v30 = vadd.f32 %v9226_v35, %v2575_v22 }
 0x244   : > { %v4656_v15 = vadd.f32 %v4655_v44, %v4654_v59  ;;  %v6019_v46 = vunpack.c.l.b16 %v5884_v13  ;;  %v4885_v10 = vpack.c.bf16 %v4102_v31, %v4102_v31  ;;  %v1957_v63 = vor.u32 %v1955_v20, %v9233_v49  ;;  %953 = vrot.lane.b32.xlu1 %v7273_v38, %s7462_s8  ;;  %v7374_v13 = vld [vmem:[%s7553_s7 + $0x118] sm:$0xff]  ;;  %v924_v38 = vpop.permute.xlu1 %923 }
 0x245   : > { %v5432_v51 = vsel %vm5297_vm7, %v9218_v16, %v5431_v54  ;;  %v9278_v45 = vpop.f32.mrf.mxu1  ;;  %v1363_v31 = vsel %vm1234_vm1, %v7374_v13, %v922_v18 }
 0x246   : > { %v6017_v55 = vunpack.c.l.b16 %v5432_v51  ;;  %v6018_v11 = vunpack.c.h.b16 %v5432_v51  ;;  %v3838_v34 = vpop.f32.mrf.mxu2  ;;  %v6181_v44 = vpack.c.b16 %v6019_v46, %v6019_v46  ;;  %v1127_v51 = vpop.permute.xlu2 %1126  ;;  %v5141_v46 = vunpack.c.l.b16 %v4885_v10 }
 0x247   : > { %v4103_v59 = vadd.f32 %v3838_v34, %v3045_v30  ;;  %v9281_v35 = vpop.f32.mrf.mxu3  ;;  %v3442_v30 = vsel %vm3372_vm4, %v11123_v36, %v3441_v26  ;;  %v1609_v34 = vsel %vm1523_vm2, %v1363_v31, %v1127_v51  ;;  %v1366_v26 = vsel %vm1234_vm1, %v7375_v8, %v924_v38  ;;  %v7272_v38 = vld [vmem:[%s7553_s7 + $0x190] sm:$0xff] }
 0x248   : > { %v6179_v6 = vpack.c.b16 %v6017_v55, %v6017_v55  ;;  %v6180_v16 = vpack.c.b16 %v6018_v11, %v6018_v11  ;;  %6510 = vst.msk [vmem:[%s8328_s11 + $0xc4] sm:$0x1] %vm6464_vm11, %v6181_v44  ;;  %v1129_v44 = vpop.permute.xlu0 %1128  ;;  %1150 = vrot.lane.b32.xlu2 %v7272_v38, %s7463_s9  ;;  %951 = vrot.lane.b32.xlu0 %v7272_v38, %s7462_s8  ;;  %v342_v38 = vld [vmem:[%s7553_s7 + $0x1a0] sm:$0x1] }
 0x249   : > { %v4268_v29 = vsel %vm4194_vm6, %v4103_v59, 0.0  ;;  %v4493_v22 = vmul.f32 %v4103_v59, %v4103_v59  ;;  %v4886_v54 = vpack.c.bf16 %v4103_v59, %v4103_v59 }
 0x24a   : > { %6508 = vst.msk [vmem:[%s8328_s11 + $0xbc] sm:$0xf] %vm6459_vm10, %v6179_v6  ;;  %v4269_v49 = vadd.f32 %v4268_v29, %v4267_v32  ;;  %v2578_v20 = vpop.f32.mrf.mxu0  ;;  %v1961_v6 = vsel %vm1723_vm5, %v1957_v63, %v1960_v23  ;;  %v9309_v23 = vsel %vm1523_vm2, %v1366_v26, %v1129_v44 }
 0x24b   : > { %6509 = vst.msk [vmem:[%s8328_s11 + $0xc0] sm:$0xf] %vm6459_vm10, %v6180_v16  ;;  %v4657_v55 = vsel %vm4194_vm6, %v4493_v22, 0.0  ;;  %v5142_v11 = vunpack.c.l.b16 %v4886_v54  ;;  %7191 = vmatmul.msk.bf16.gmra.mxu2 %vm2277_vm3, %v3442_v30  ;;  %v3048_v59 = vadd.f32 %v9251_v43, %v2578_v20  ;;  %v1964_v22 = vshll.u32 %v1609_v34, 16 }
 0x24c   : > { %v4658_v18 = vadd.f32 %v4657_v55, %v4656_v15  ;;  %7150 = vmatmul.msk.bf16.gmra.mxu3 %vm2277_vm3, %v8319_v27  ;;  %v11036_v26 = vrot.slane %v9309_v23, 1 }
 0x24d   : > { %v5251_v32 = vpack.c.b16 %v5142_v11, %v5141_v46  ;;  %7052 = vmatmul.msk.bf16.gmra.mxu0 %vm2277_vm3, %v1961_v6  ;;  %v3052_v10 = vpop.f32.mrf.mxu1  ;;  %v1962_v46 = vshrl.u32 %v1609_v34, 16  ;;  %v1966_v55 = vrot.slane %v1964_v22, 1  ;;  %v1968_v6 = vshll.u32 %v9309_v23, 16 }
 0x24e   : > { %v3841_v16 = vpop.f32.mrf.mxu2 }
 0x24f   : > { %v5434_v15 = vshrl.u32 %v5251_v32, 16  ;;  %v4104_v29 = vadd.f32 %v3841_v16, %v3048_v59  ;;  %v9306_v54 = vpop.f32.mrf.mxu3  ;;  %v5437_v63 = vshll.u32 %v5251_v32, 16  ;;  %v3443_v32 = vrot.slane %v1609_v34, 1 }
 0x250   : > { %7121 = vmatmul.msk.bf16.gmra.mxu1 %vm2277_vm3, %v1609_v34  ;;  %v9327_v22 = vrot.slane %v1968_v6, 1 }
 0x251   : > { %v9312_v43 = vrot.slane %v5434_v15, 7  ;;  %v4270_v13 = vsel %vm4194_vm6, %v4104_v29, 0.0  ;;  %v4494_v31 = vmul.f32 %v4104_v29, %v4104_v29  ;;  %v4887_v16 = vpack.c.bf16 %v4104_v29, %v4104_v29 }
 0x252   : > { %v4271_v51 = vadd.f32 %v4270_v13, %v4269_v49  ;;  %v2580_v20 = vpop.f32.mrf.mxu0  ;;  %v1967_v15 = vor.u32 %v1966_v55, %v1962_v46  ;;  %v3445_v29 = vsel %vm3372_vm4, %v3443_v32, %v11036_v26  ;;  %v672_v46 = vunpack.c.l.b16 %v342_v38  ;;  %v1131_v32 = vpop.permute.xlu2 %1130 }
 0x253   : > { %v5439_v36 = vor.u32 %v5437_v63, %v9312_v43  ;;  %v4659_v30 = vsel %vm4194_vm6, %v4494_v31, 0.0  ;;  %v3050_v59 = vadd.f32 %v9278_v45, %v2580_v20  ;;  %v926_v45 = vpop.permute.xlu1 %925  ;;  %v5143_v55 = vunpack.c.l.b16 %v4887_v16  ;;  %v7275_v16 = vld [vmem:[%s7553_s7 + $0x1ac] sm:$0xff] }
 0x254   : > { %v4660_v11 = vadd.f32 %v4659_v30, %v4658_v18  ;;  %v1369_v6 = vsel %vm1234_vm1, %v8777_v42, %v926_v45  ;;  %1158 = vrot.lane.b32.xlu0 %v7275_v16, %s7463_s9 }
 0x255   : > { %v9320_v8 = vpop.f32.mrf.mxu1  ;;  %v5853_v49 = vsel %vm8299_vm9, 4048220490, %v5439_v36 }
 0x256   : > { %v3843_v44 = vpop.f32.mrf.mxu2  ;;  %v6020_v13 = vunpack.c.l.b16 %v5853_v49  ;;  %v6021_v62 = vunpack.c.h.b16 %v5853_v49  ;;  %v9342_v49 = vpack.c.b16 %v672_v46, %v672_v46 }
 0x257   : > { %v4105_v18 = vadd.f32 %v3843_v44, %v3050_v59  ;;  %v9329_v63 = vpop.f32.mrf.mxu3 }
 0x258   : > { %v6182_v45 = vpack.c.b16 %v6020_v13, %v6020_v13  ;;  %1154 = vrot.lane.b32.xlu2 %v9342_v49, %s7463_s9  ;;  %955 = vrot.lane.b32.xlu1 %v9342_v49, %s7462_s8 }
 0x259   : > { %v4272_v31 = vsel %vm4194_vm6, %v4105_v18, 0.0  ;;  %v4495_v20 = vmul.f32 %v4105_v18, %v4105_v18  ;;  %v4888_v30 = vpack.c.bf16 %v4105_v18, %v4105_v18 }
 0x25a   : > { %v4273_v36 = vadd.f32 %v4272_v31, %v4271_v51  ;;  %v2583_v34 = vpop.f32.mrf.mxu0  ;;  %v1971_v51 = vsel %vm1723_vm5, %v1967_v15, %v9327_v22  ;;  %6511 = vst.msk [vmem:[%s8328_s11 + $0xc8] sm:$0xf] %vm6459_vm10, %v6182_v45 }
 0x25b   : > { %v4661_v59 = vsel %vm4194_vm6, %v4495_v20, 0.0  ;;  %v5144_v44 = vunpack.c.l.b16 %v4888_v30  ;;  %7192 = vmatmul.msk.bf16.gmra.mxu2 %vm2277_vm3, %v3445_v29  ;;  %v3053_v19 = vadd.f32 %v3052_v10, %v2583_v34  ;;  %v1613_v30 = vsel %vm1523_vm2, %v1369_v6, %v1131_v32 }
 0x25c   : > { %v4662_v18 = vadd.f32 %v4661_v59, %v4660_v11  ;;  %7151 = vmatmul.msk.bf16.gmra.mxu3 %vm2277_vm3, %v8447_v4  ;;  %v6183_v11 = vpack.c.b16 %v6021_v62, %v6021_v62  ;;  %v1972_v6 = vshrl.u32 %v9309_v23, 16 }
 0x25d   : > { %v5252_v31 = vpack.c.b16 %v5144_v44, %v5143_v55  ;;  %7053 = vmatmul.msk.bf16.gmra.mxu0 %vm2277_vm3, %v1971_v51  ;;  %v9347_v42 = vpop.f32.mrf.mxu1  ;;  %v928_v44 = vpop.permute.xlu0 %927  ;;  %v1975_v51 = vshll.u32 %v1613_v30, 16 }
 0x25e   : > { %v3846_v10 = vpop.f32.mrf.mxu2  ;;  %6512 = vst.msk [vmem:[%s8328_s11 + $0xcc] sm:$0xf] %vm6459_vm10, %v6183_v11  ;;  %v1974_v26 = vor.u32 %v1972_v6, %v9327_v22  ;;  %v1372_v3 = vsel %vm1234_vm1, %v7376_v56, %v928_v44  ;;  %v11124_v6 = vrot.slane %v9309_v23, 1 }
 0x25f   : > { %v5441_v15 = vshrl.u32 %v5252_v31, 16  ;;  %v4106_v20 = vadd.f32 %v3846_v10, %v3053_v19  ;;  %v9358_v38 = vpop.f32.mrf.mxu3  ;;  %v5444_v13 = vshll.u32 %v5252_v31, 16 }
 0x260   : > { %7122 = vmatmul.msk.bf16.gmra.mxu1 %vm2277_vm3, %v9309_v23  ;;  %959 = vrot.lane.b32.xlu1 %v7275_v16, %s7462_s8  ;;  %v1133_v16 = vpop.permute.xlu2 %1132  ;;  %v7377_v23 = vld [vmem:[%s7553_s7 + $0x134] sm:$0xff] }
 0x261   : > { %v5443_v62 = vrot.slane %v5441_v15, 7  ;;  %v4274_v34 = vsel %vm4194_vm6, %v4106_v20, 0.0  ;;  %v4496_v29 = vmul.f32 %v4106_v20, %v4106_v20  ;;  %v3446_v15 = vrot.slane %v1613_v30, 1 }
 0x262   : > { %v4275_v46 = vadd.f32 %v4274_v34, %v4273_v36  ;;  %v2585_v19 = vpop.f32.mrf.mxu0  ;;  %v1615_v44 = vsel %vm1523_vm2, %v1372_v3, %v1133_v16 }
 0x263   : > { %v5446_v55 = vor.u32 %v5444_v13, %v5443_v62  ;;  %v4663_v59 = vsel %vm4194_vm6, %v4496_v29, 0.0  ;;  %v5885_v45 = vsel %vm8299_vm9, %v5443_v62, 4048220490  ;;  %v3055_v31 = vadd.f32 %v9320_v8, %v2585_v19 }
 0x264   : > { %v4664_v32 = vadd.f32 %v4663_v59, %v4662_v18  ;;  %v6024_v36 = vunpack.c.l.b16 %v5885_v45  ;;  %v4889_v18 = vpack.c.bf16 %v4106_v20, %v4106_v20  ;;  %v1981_v3 = vshll.u32 %v1615_v44, 16 }
 0x265   : > { %v5447_v11 = vsel %vm5297_vm7, %v9312_v43, %v5446_v55  ;;  %v9372_v10 = vpop.f32.mrf.mxu1  ;;  %v1977_v43 = vrot.slane %v1975_v51, 1  ;;  %v3447_v51 = vsel %vm3372_vm4, %v11124_v6, %v3446_v15 }
 0x266   : > { %v6022_v13 = vunpack.c.l.b16 %v5447_v11  ;;  %v6023_v34 = vunpack.c.h.b16 %v5447_v11  ;;  %v3848_v29 = vpop.f32.mrf.mxu2  ;;  %v6186_v62 = vpack.c.b16 %v6024_v36, %v6024_v36  ;;  %v5145_v36 = vunpack.c.l.b16 %v4889_v18 }
 0x267   : > { %v4107_v59 = vadd.f32 %v3848_v29, %v3055_v31  ;;  %v9376_v55 = vpop.f32.mrf.mxu3  ;;  %v930_v31 = vpop.permute.xlu1 %929  ;;  %v1978_v29 = vsel %vm1723_vm5, %v1974_v26, %v1977_v43 }
 0x268   : > { %v6184_v8 = vpack.c.b16 %v6022_v13, %v6022_v13  ;;  %v6185_v19 = vpack.c.b16 %v6023_v34, %v6023_v34  ;;  %6515 = vst.msk [vmem:[%s8328_s11 + $0xd8] sm:$0x1] %vm6464_vm11, %v6186_v62  ;;  %v1375_v15 = vsel %vm1234_vm1, %v7377_v23, %v930_v31  ;;  %v1135_v62 = vpop.permute.xlu0 %1134  ;;  %v7274_v31 = vld [vmem:[%s7553_s7 + $0x1a4] sm:$0xff] }
 0x269   : > { %v4276_v30 = vsel %vm4194_vm6, %v4107_v59, 0.0  ;;  %v4497_v45 = vmul.f32 %v4107_v59, %v4107_v59  ;;  %v4890_v11 = vpack.c.bf16 %v4107_v59, %v4107_v59  ;;  %v9403_v26 = vsel %vm1523_vm2, %v1375_v15, %v1135_v62  ;;  %1156 = vrot.lane.b32.xlu2 %v7274_v31, %s7463_s9  ;;  %957 = vrot.lane.b32.xlu0 %v7274_v31, %s7462_s8  ;;  %v347_v31 = vld [vmem:[%s7553_s7 + $0x1b4] sm:$0x1] }
 0x26a   : > { %6513 = vst.msk [vmem:[%s8328_s11 + $0xd0] sm:$0xf] %vm6459_vm10, %v6184_v8  ;;  %v4277_v22 = vadd.f32 %v4276_v30, %v4275_v46  ;;  %v2588_v20 = vpop.f32.mrf.mxu0  ;;  %v11039_v15 = vrot.slane %v9403_v26, 1 }
 0x26b   : > { %6514 = vst.msk [vmem:[%s8328_s11 + $0xd4] sm:$0xf] %vm6459_vm10, %v6185_v19  ;;  %v4665_v13 = vsel %vm4194_vm6, %v4497_v45, 0.0  ;;  %v5146_v34 = vunpack.c.l.b16 %v4890_v11  ;;  %7193 = vmatmul.msk.bf16.gmra.mxu2 %vm2277_vm3, %v3447_v51  ;;  %v3058_v59 = vadd.f32 %v9347_v42, %v2588_v20 }
 0x26c   : > { %v4666_v56 = vadd.f32 %v4665_v13, %v4664_v32  ;;  %7152 = vmatmul.msk.bf16.gmra.mxu3 %vm2277_vm3, %v8481_v53  ;;  %v1983_v13 = vrot.slane %v1981_v3, 1 }
 0x26d   : > { %v5253_v46 = vpack.c.b16 %v5146_v34, %v5145_v36  ;;  %7054 = vmatmul.msk.bf16.gmra.mxu0 %vm2277_vm3, %v1978_v29  ;;  %v3062_v18 = vpop.f32.mrf.mxu1  ;;  %v1979_v36 = vshrl.u32 %v1615_v44, 16  ;;  %v1985_v29 = vshll.u32 %v9403_v26, 16 }
 0x26e   : > { %v3851_v8 = vpop.f32.mrf.mxu2 }
 0x26f   : > { %v5449_v32 = vshrl.u32 %v5253_v46, 16  ;;  %v4108_v19 = vadd.f32 %v3851_v8, %v3058_v59  ;;  %v9400_v30 = vpop.f32.mrf.mxu3  ;;  %v5452_v43 = vshll.u32 %v5253_v46, 16  ;;  %v3448_v46 = vrot.slane %v1615_v44, 1 }
 0x270   : > { %11125 = vst [vmem:[#allocation43_spill] sm:$0xff] %v9400_v30  ;;  %7123 = vmatmul.msk.bf16.gmra.mxu1 %vm2277_vm3, %v1615_v44  ;;  %v9421_v3 = vrot.slane %v1985_v29, 1 }
 0x271   : > { %v9406_v42 = vrot.slane %v5449_v32, 7  ;;  %v4278_v45 = vsel %vm4194_vm6, %v4108_v19, 0.0  ;;  %v4498_v11 = vmul.f32 %v4108_v19, %v4108_v19  ;;  %v4891_v8 = vpack.c.bf16 %v4108_v19, %v4108_v19 }
 0x272   : > { %v4279_v16 = vadd.f32 %v4278_v45, %v4277_v22  ;;  %v2590_v20 = vpop.f32.mrf.mxu0  ;;  %v1984_v32 = vor.u32 %v1983_v13, %v1979_v36  ;;  %v3450_v19 = vsel %vm3372_vm4, %v3448_v46, %v11039_v15  ;;  %v677_v36 = vunpack.c.l.b16 %v347_v31  ;;  %v1137_v46 = vpop.permute.xlu2 %1136 }
 0x273   : > { %v5454_v6 = vor.u32 %v5452_v43, %v9406_v42  ;;  %v4667_v51 = vsel %vm4194_vm6, %v4498_v11, 0.0  ;;  %v3060_v59 = vadd.f32 %v9372_v10, %v2590_v20  ;;  %v932_v10 = vpop.permute.xlu1 %931  ;;  %v5147_v13 = vunpack.c.l.b16 %v4891_v8  ;;  %v7277_v8 = vld [vmem:[%s7553_s7 + $0x1c0] sm:$0xff] }
 0x274   : > { %v4668_v34 = vadd.f32 %v4667_v51, %v4666_v56  ;;  %v1378_v29 = vsel %vm1234_vm1, %v8885_v41, %v932_v10  ;;  %1164 = vrot.lane.b32.xlu0 %v7277_v8, %s7463_s9 }
 0x275   : > { %v9414_v23 = vpop.f32.mrf.mxu1  ;;  %v5854_v22 = vsel %vm8299_vm9, 4048220490, %v5454_v6 }
 0x276   : > { %v3853_v62 = vpop.f32.mrf.mxu2  ;;  %v6025_v45 = vunpack.c.l.b16 %v5854_v22  ;;  %v6026_v40 = vunpack.c.h.b16 %v5854_v22  ;;  %v9436_v22 = vpack.c.b16 %v677_v36, %v677_v36 }
 0x277   : > { %v4109_v56 = vadd.f32 %v3853_v62, %v3060_v59  ;;  %v9423_v43 = vpop.f32.mrf.mxu3 }
 0x278   : > { %11126 = vst [vmem:[#allocation44_spill] sm:$0xff] %v9423_v43  ;;  %v6187_v10 = vpack.c.b16 %v6025_v45, %v6025_v45  ;;  %1160 = vrot.lane.b32.xlu2 %v9436_v22, %s7463_s9  ;;  %961 = vrot.lane.b32.xlu1 %v9436_v22, %s7462_s8 }
 0x279   : > { %v4280_v11 = vsel %vm4194_vm6, %v4109_v56, 0.0  ;;  %v4499_v20 = vmul.f32 %v4109_v56, %v4109_v56  ;;  %v4892_v51 = vpack.c.bf16 %v4109_v56, %v4109_v56 }
 0x27a   : > { %v4281_v6 = vadd.f32 %v4280_v11, %v4279_v16  ;;  %v2593_v44 = vpop.f32.mrf.mxu0  ;;  %v1988_v16 = vsel %vm1723_vm5, %v1984_v32, %v9421_v3  ;;  %6516 = vst.msk [vmem:[%s8328_s11 + $0xdc] sm:$0xf] %vm6459_vm10, %v6187_v10 }
 0x27b   : > { %v4669_v59 = vsel %vm4194_vm6, %v4499_v20, 0.0  ;;  %v5148_v62 = vunpack.c.l.b16 %v4892_v51  ;;  %7194 = vmatmul.msk.bf16.gmra.mxu2 %vm2277_vm3, %v3450_v19  ;;  %v3063_v43 = vadd.f32 %v3062_v18, %v2593_v44  ;;  %v1619_v51 = vsel %vm1523_vm2, %v1378_v29, %v1137_v46 }
 0x27c   : > { %v4670_v56 = vadd.f32 %v4669_v59, %v4668_v34  ;;  %7153 = vmatmul.msk.bf16.gmra.mxu3 %vm2277_vm3, %v8589_v57  ;;  %v6188_v34 = vpack.c.b16 %v6026_v40, %v6026_v40  ;;  %v1989_v29 = vshrl.u32 %v9403_v26, 16 }
 0x27d   : > { %v5254_v11 = vpack.c.b16 %v5148_v62, %v5147_v13  ;;  %7055 = vmatmul.msk.bf16.gmra.mxu0 %vm2277_vm3, %v1988_v16  ;;  %v9441_v41 = vpop.f32.mrf.mxu1  ;;  %v934_v62 = vpop.permute.xlu0 %933  ;;  %v1992_v16 = vshll.u32 %v1619_v51, 16 }
 0x27e   : > { %v3856_v18 = vpop.f32.mrf.mxu2  ;;  %6517 = vst.msk [vmem:[%s8328_s11 + $0xe0] sm:$0xf] %vm6459_vm10, %v6188_v34  ;;  %v1991_v15 = vor.u32 %v1989_v29, %v9421_v3  ;;  %v11128_v29 = vrot.slane %v9403_v26, 1 }
 0x27f   : > { %v5456_v32 = vshrl.u32 %v5254_v11, 16  ;;  %v4110_v20 = vadd.f32 %v3856_v18, %v3063_v43  ;;  %v9452_v31 = vpop.f32.mrf.mxu3  ;;  %v5459_v45 = vshll.u32 %v5254_v11, 16 }
 0x280   : > { %11127 = vst [vmem:[#allocation45_spill] sm:$0xff] %v9452_v31  ;;  %7124 = vmatmul.msk.bf16.gmra.mxu1 %vm2277_vm3, %v9403_v26  ;;  %965 = vrot.lane.b32.xlu1 %v7277_v8, %s7462_s8  ;;  %v7378_v31 = vld [vmem:[%s7553_s7 + $0x140] sm:$0xff]  ;;  %v1139_v8 = vpop.permute.xlu2 %1138  ;;  %v7379_v26 = vld [vmem:[%s7553_s7 + $0x148] sm:$0xff] }
 0x281   : > { %v5458_v40 = vrot.slane %v5456_v32, 7  ;;  %v4282_v44 = vsel %vm4194_vm6, %v4110_v20, 0.0  ;;  %v4500_v19 = vmul.f32 %v4110_v20, %v4110_v20  ;;  %v3451_v32 = vrot.slane %v1619_v51, 1 }
 0x282   : > { %v4283_v36 = vadd.f32 %v4282_v44, %v4281_v6  ;;  %v2595_v43 = vpop.f32.mrf.mxu0  ;;  %v1381_v30 = vsel %vm1234_vm1, %v7378_v31, %v934_v62 }
 0x283   : > { %v5461_v13 = vor.u32 %v5459_v45, %v5458_v40  ;;  %v4671_v59 = vsel %vm4194_vm6, %v4500_v19, 0.0  ;;  %v5886_v10 = vsel %vm8299_vm9, %v5458_v40, 4048220490  ;;  %v3065_v11 = vadd.f32 %v9414_v23, %v2595_v43 }
 0x284   : > { %v4672_v46 = vadd.f32 %v4671_v59, %v4670_v56  ;;  %v6029_v6 = vunpack.c.l.b16 %v5886_v10  ;;  %v4893_v56 = vpack.c.bf16 %v4110_v20, %v4110_v20  ;;  %v1621_v62 = vsel %vm1523_vm2, %v1381_v30, %v1139_v8 }
 0x285   : > { %v5462_v34 = vsel %vm5297_vm7, %v9406_v42, %v5461_v13  ;;  %v9466_v18 = vpop.f32.mrf.mxu1  ;;  %v1994_v42 = vrot.slane %v1992_v16, 1  ;;  %v3452_v16 = vsel %vm3372_vm4, %v11128_v29, %v3451_v32  ;;  %v1998_v30 = vshll.u32 %v1621_v62, 16 }
 0x286   : > { %v6027_v45 = vunpack.c.l.b16 %v5462_v34  ;;  %v6028_v44 = vunpack.c.h.b16 %v5462_v34  ;;  %v3858_v19 = vpop.f32.mrf.mxu2  ;;  %v6191_v40 = vpack.c.b16 %v6029_v6, %v6029_v6  ;;  %v5149_v6 = vunpack.c.l.b16 %v4893_v56 }
 0x287   : > { %v4111_v59 = vadd.f32 %v3858_v19, %v3065_v11  ;;  %v9470_v13 = vpop.f32.mrf.mxu3  ;;  %v936_v11 = vpop.permute.xlu1 %935  ;;  %v1995_v19 = vsel %vm1723_vm5, %v1991_v15, %v1994_v42 }
 0x288   : > { %v6189_v23 = vpack.c.b16 %v6027_v45, %v6027_v45  ;;  %v6190_v43 = vpack.c.b16 %v6028_v44, %v6028_v44  ;;  %6520 = vst.msk [vmem:[%s8328_s11 + $0xec] sm:$0x1] %vm6464_vm11, %v6191_v40  ;;  %v1384_v32 = vsel %vm1234_vm1, %v7379_v26, %v936_v11  ;;  %v1141_v40 = vpop.permute.xlu0 %1140  ;;  %v7276_v11 = vld [vmem:[%s7553_s7 + $0x1b8] sm:$0xff] }
 0x289   : > { %v4284_v51 = vsel %vm4194_vm6, %v4111_v59, 0.0  ;;  %v4501_v10 = vmul.f32 %v4111_v59, %v4111_v59  ;;  %v4894_v34 = vpack.c.bf16 %v4111_v59, %v4111_v59  ;;  %v9497_v15 = vsel %vm1523_vm2, %v1384_v32, %v1141_v40  ;;  %1162 = vrot.lane.b32.xlu2 %v7276_v11, %s7463_s9  ;;  %963 = vrot.lane.b32.xlu0 %v7276_v11, %s7462_s8  ;;  %v352_v11 = vld [vmem:[%s7553_s7 + $0x1c8] sm:$0x1] }
 0x28a   : > { %6518 = vst.msk [vmem:[%s8328_s11 + $0xe4] sm:$0xf] %vm6459_vm10, %v6189_v23  ;;  %v4285_v3 = vadd.f32 %v4284_v51, %v4283_v36  ;;  %v2598_v20 = vpop.f32.mrf.mxu0  ;;  %v11040_v32 = vrot.slane %v9497_v15, 1 }
 0x28b   : > { %6519 = vst.msk [vmem:[%s8328_s11 + $0xe8] sm:$0xf] %vm6459_vm10, %v6190_v43  ;;  %v4673_v45 = vsel %vm4194_vm6, %v4501_v10, 0.0  ;;  %v5150_v44 = vunpack.c.l.b16 %v4894_v34  ;;  %7195 = vmatmul.msk.bf16.gmra.mxu2 %vm2277_vm3, %v3452_v16  ;;  %v3068_v59 = vadd.f32 %v9441_v41, %v2598_v20 }
 0x28c   : > { %v4674_v31 = vadd.f32 %v4673_v45, %v4672_v46  ;;  %7154 = vmatmul.msk.bf16.gmra.mxu3 %vm2277_vm3, %v8622_v2  ;;  %v2000_v45 = vrot.slane %v1998_v30, 1 }
 0x28d   : > { %v5255_v36 = vpack.c.b16 %v5150_v44, %v5149_v6  ;;  %7056 = vmatmul.msk.bf16.gmra.mxu0 %vm2277_vm3, %v1995_v19  ;;  %v3072_v56 = vpop.f32.mrf.mxu1  ;;  %v1996_v6 = vshrl.u32 %v1621_v62, 16  ;;  %v2002_v19 = vshll.u32 %v9497_v15, 16 }
 0x28e   : > { %v3861_v23 = vpop.f32.mrf.mxu2 }
 0x28f   : > { %v5464_v46 = vshrl.u32 %v5255_v36, 16  ;;  %v4112_v43 = vadd.f32 %v3861_v23, %v3068_v59  ;;  %v9494_v51 = vpop.f32.mrf.mxu3  ;;  %v5467_v42 = vshll.u32 %v5255_v36, 16  ;;  %v3453_v36 = vrot.slane %v1621_v62, 1 }
 0x290   : > { %11129 = vst [vmem:[#allocation46_spill] sm:$0xff] %v9494_v51  ;;  %7125 = vmatmul.msk.bf16.gmra.mxu1 %vm2277_vm3, %v1621_v62  ;;  %v9515_v30 = vrot.slane %v2002_v19, 1 }
 0x291   : > { %v9500_v41 = vrot.slane %v5464_v46, 7  ;;  %v4286_v10 = vsel %vm4194_vm6, %v4112_v43, 0.0  ;;  %v4502_v34 = vmul.f32 %v4112_v43, %v4112_v43  ;;  %v4895_v23 = vpack.c.bf16 %v4112_v43, %v4112_v43 }
 0x292   : > { %v4287_v8 = vadd.f32 %v4286_v10, %v4285_v3  ;;  %v2600_v20 = vpop.f32.mrf.mxu0  ;;  %v2001_v46 = vor.u32 %v2000_v45, %v1996_v6  ;;  %v3455_v43 = vsel %vm3372_vm4, %v3453_v36, %v11040_v32  ;;  %v682_v6 = vunpack.c.l.b16 %v352_v11  ;;  %v1143_v36 = vpop.permute.xlu2 %1142 }
 0x293   : > { %v5469_v29 = vor.u32 %v5467_v42, %v9500_v41  ;;  %v4675_v16 = vsel %vm4194_vm6, %v4502_v34, 0.0  ;;  %v3070_v59 = vadd.f32 %v9466_v18, %v2600_v20  ;;  %v938_v18 = vpop.permute.xlu1 %937  ;;  %v5151_v45 = vunpack.c.l.b16 %v4895_v23  ;;  %v7279_v23 = vld [vmem:[%s7553_s7 + $0x1d4] sm:$0xff] }
 0x294   : > { %v4676_v44 = vadd.f32 %v4675_v16, %v4674_v31  ;;  %v1387_v19 = vsel %vm1234_vm1, %v8977_v21, %v938_v18  ;;  %1170 = vrot.lane.b32.xlu0 %v7279_v23, %s7463_s9 }
 0x295   : > { %v9508_v26 = vpop.f32.mrf.mxu1  ;;  %v5855_v3 = vsel %vm8299_vm9, 4048220490, %v5469_v29 }
 0x296   : > { %v3863_v40 = vpop.f32.mrf.mxu2  ;;  %v6030_v10 = vunpack.c.l.b16 %v5855_v3  ;;  %v6031_v51 = vunpack.c.h.b16 %v5855_v3  ;;  %v9530_v3 = vpack.c.b16 %v682_v6, %v682_v6 }
 0x297   : > { %v4113_v31 = vadd.f32 %v3863_v40, %v3070_v59  ;;  %v9517_v42 = vpop.f32.mrf.mxu3 }
 0x298   : > { %11130 = vst [vmem:[#allocation47_spill] sm:$0xff] %v9517_v42  ;;  %v6192_v18 = vpack.c.b16 %v6030_v10, %v6030_v10  ;;  %1166 = vrot.lane.b32.xlu2 %v9530_v3, %s7463_s9  ;;  %967 = vrot.lane.b32.xlu1 %v9530_v3, %s7462_s8 }
 0x299   : > { %v4288_v34 = vsel %vm4194_vm6, %v4113_v31, 0.0  ;;  %v4503_v20 = vmul.f32 %v4113_v31, %v4113_v31  ;;  %v4896_v16 = vpack.c.bf16 %v4113_v31, %v4113_v31 }
 0x29a   : > { %v4289_v29 = vadd.f32 %v4288_v34, %v4287_v8  ;;  %v2603_v62 = vpop.f32.mrf.mxu0  ;;  %v2005_v8 = vsel %vm1723_vm5, %v2001_v46, %v9515_v30  ;;  %6521 = vst.msk [vmem:[%s8328_s11 + $0xf0] sm:$0xf] %vm6459_vm10, %v6192_v18 }
 0x29b   : > { %v4677_v59 = vsel %vm4194_vm6, %v4503_v20, 0.0  ;;  %v5152_v40 = vunpack.c.l.b16 %v4896_v16  ;;  %7196 = vmatmul.msk.bf16.gmra.mxu2 %vm2277_vm3, %v3455_v43  ;;  %v3073_v42 = vadd.f32 %v3072_v56, %v2603_v62  ;;  %v1625_v16 = vsel %vm1523_vm2, %v1387_v19, %v1143_v36 }
 0x29c   : > { %v4678_v31 = vadd.f32 %v4677_v59, %v4676_v44  ;;  %7155 = vmatmul.msk.bf16.gmra.mxu3 %vm2277_vm3, %v8725_v1  ;;  %v6193_v44 = vpack.c.b16 %v6031_v51, %v6031_v51  ;;  %v2006_v19 = vshrl.u32 %v9497_v15, 16 }
 0x29d   : > { %v5256_v34 = vpack.c.b16 %v5152_v40, %v5151_v45  ;;  %7057 = vmatmul.msk.bf16.gmra.mxu0 %vm2277_vm3, %v2005_v8  ;;  %v9535_v21 = vpop.f32.mrf.mxu1  ;;  %v940_v40 = vpop.permute.xlu0 %939  ;;  %v2009_v8 = vshll.u32 %v1625_v16, 16 }
 0x29e   : > { %v3866_v56 = vpop.f32.mrf.mxu2  ;;  %6522 = vst.msk [vmem:[%s8328_s11 + $0xf4] sm:$0xf] %vm6459_vm10, %v6193_v44  ;;  %v2008_v32 = vor.u32 %v2006_v19, %v9515_v30  ;;  %v11132_v19 = vrot.slane %v9497_v15, 1 }
 0x29f   : > { %v5471_v46 = vshrl.u32 %v5256_v34, 16  ;;  %v4114_v20 = vadd.f32 %v3866_v56, %v3073_v42  ;;  %v9546_v11 = vpop.f32.mrf.mxu3  ;;  %v5474_v10 = vshll.u32 %v5256_v34, 16 }
 0x2a0   : > { %11131 = vst [vmem:[#allocation48_spill] sm:$0xff] %v9546_v11  ;;  %7126 = vmatmul.msk.bf16.gmra.mxu1 %vm2277_vm3, %v9497_v15  ;;  %971 = vrot.lane.b32.xlu1 %v7279_v23, %s7462_s8  ;;  %v7380_v11 = vld [vmem:[%s7553_s7 + $0x154] sm:$0xff]  ;;  %v1145_v23 = vpop.permute.xlu2 %1144  ;;  %v7381_v15 = vld [vmem:[%s7553_s7 + $0x15c] sm:$0xff] }
 0x2a1   : > { %v5473_v51 = vrot.slane %v5471_v46, 7  ;;  %v4290_v62 = vsel %vm4194_vm6, %v4114_v20, 0.0  ;;  %v4504_v43 = vmul.f32 %v4114_v20, %v4114_v20  ;;  %v3456_v46 = vrot.slane %v1625_v16, 1 }
 0x2a2   : > { %v4291_v6 = vadd.f32 %v4290_v62, %v4289_v29  ;;  %v2605_v42 = vpop.f32.mrf.mxu0  ;;  %v1390_v1 = vsel %vm1234_vm1, %v7380_v11, %v940_v40 }
 0x2a3   : > { %v5476_v45 = vor.u32 %v5474_v10, %v5473_v51  ;;  %v4679_v59 = vsel %vm4194_vm6, %v4504_v43, 0.0  ;;  %v5887_v18 = vsel %vm8299_vm9, %v5473_v51, 4048220490  ;;  %v3075_v34 = vadd.f32 %v9508_v26, %v2605_v42 }
 0x2a4   : > { %v4680_v36 = vadd.f32 %v4679_v59, %v4678_v31  ;;  %v6034_v29 = vunpack.c.l.b16 %v5887_v18  ;;  %v4897_v31 = vpack.c.bf16 %v4114_v20, %v4114_v20  ;;  %v1627_v40 = vsel %vm1523_vm2, %v1390_v1, %v1145_v23 }
 0x2a5   : > { %v5477_v44 = vsel %vm5297_vm7, %v9500_v41, %v5476_v45  ;;  %v9560_v56 = vpop.f32.mrf.mxu1  ;;  %v2011_v41 = vrot.slane %v2009_v8, 1  ;;  %v3457_v8 = vsel %vm3372_vm4, %v11132_v19, %v3456_v46  ;;  %v2015_v1 = vshll.u32 %v1627_v40, 16 }
 0x2a6   : > { %v6032_v10 = vunpack.c.l.b16 %v5477_v44  ;;  %v6033_v62 = vunpack.c.h.b16 %v5477_v44  ;;  %v3868_v43 = vpop.f32.mrf.mxu2  ;;  %v6196_v51 = vpack.c.b16 %v6034_v29, %v6034_v29  ;;  %v5153_v29 = vunpack.c.l.b16 %v4897_v31 }
 0x2a7   : > { %v4115_v59 = vadd.f32 %v3868_v43, %v3075_v34  ;;  %v9564_v45 = vpop.f32.mrf.mxu3  ;;  %v942_v34 = vpop.permute.xlu1 %941  ;;  %v2012_v43 = vsel %vm1723_vm5, %v2008_v32, %v2011_v41 }
 0x2a8   : > { %v6194_v26 = vpack.c.b16 %v6032_v10, %v6032_v10  ;;  %v6195_v42 = vpack.c.b16 %v6033_v62, %v6033_v62  ;;  %6525 = vst.msk [vmem:[%s8328_s11 + $0x100] sm:$0x1] %vm6464_vm11, %v6196_v51  ;;  %v1393_v46 = vsel %vm1234_vm1, %v7381_v15, %v942_v34  ;;  %v1147_v51 = vpop.permute.xlu0 %1146  ;;  %v7278_v34 = vld [vmem:[%s7553_s7 + $0x1cc] sm:$0xff] }
 0x2a9   : > { %v4292_v16 = vsel %vm4194_vm6, %v4115_v59, 0.0  ;;  %v4505_v18 = vmul.f32 %v4115_v59, %v4115_v59  ;;  %v4898_v44 = vpack.c.bf16 %v4115_v59, %v4115_v59  ;;  %v9591_v32 = vsel %vm1523_vm2, %v1393_v46, %v1147_v51  ;;  %1168 = vrot.lane.b32.xlu2 %v7278_v34, %s7463_s9  ;;  %969 = vrot.lane.b32.xlu0 %v7278_v34, %s7462_s8 }
 0x2aa   : > { %6523 = vst.msk [vmem:[%s8328_s11 + $0xf8] sm:$0xf] %vm6459_vm10, %v6194_v26  ;;  %v4293_v30 = vadd.f32 %v4292_v16, %v4291_v6  ;;  %v2608_v20 = vpop.f32.mrf.mxu0  ;;  %v3458_v51 = vrot.slane %v1627_v40, 1 }
 0x2ab   : > { %6524 = vst.msk [vmem:[%s8328_s11 + $0xfc] sm:$0xf] %vm6459_vm10, %v6195_v42  ;;  %v4681_v10 = vsel %vm4194_vm6, %v4505_v18, 0.0  ;;  %v5154_v62 = vunpack.c.l.b16 %v4898_v44  ;;  %7197 = vmatmul.msk.bf16.gmra.mxu2 %vm2277_vm3, %v3457_v8  ;;  %v3078_v59 = vadd.f32 %v9535_v21, %v2608_v20 }
 0x2ac   : > { %v4682_v11 = vadd.f32 %v4681_v10, %v4680_v36  ;;  %7156 = vmatmul.msk.bf16.gmra.mxu3 %vm2277_vm3, %v8757_v5  ;;  %v2017_v10 = vrot.slane %v2015_v1, 1 }
 0x2ad   : > { %v5257_v6 = vpack.c.b16 %v5154_v62, %v5153_v29  ;;  %7058 = vmatmul.msk.bf16.gmra.mxu0 %vm2277_vm3, %v2012_v43  ;;  %v3082_v31 = vpop.f32.mrf.mxu1  ;;  %v2013_v29 = vshrl.u32 %v1627_v40, 16  ;;  %v2019_v43 = vshll.u32 %v9591_v32, 16 }
 0x2ae   : > { %v3871_v26 = vpop.f32.mrf.mxu2 }
 0x2af   : > { %v5479_v36 = vshrl.u32 %v5257_v6, 16  ;;  %v4116_v42 = vadd.f32 %v3871_v26, %v3078_v59  ;;  %v9588_v16 = vpop.f32.mrf.mxu3  ;;  %v5482_v41 = vshll.u32 %v5257_v6, 16  ;;  %v3493_v6 = vrot.slane %v7838_v52, 1  ;;  %v357_v52 = vld [vmem:[%s7553_s7 + $0x1dc] sm:$0x1] }
 0x2b0   : > { %11133 = vst [vmem:[#allocation49_spill] sm:$0xff] %v9588_v16  ;;  %7127 = vmatmul.msk.bf16.gmra.mxu1 %vm2277_vm3, %v1627_v40  ;;  %v2018_v1 = vor.u32 %v2017_v10, %v2013_v29  ;;  %v11135_v29 = vrot.slane %v7863_v60, 1 }
 0x2b1   : > { %v9594_v21 = vrot.slane %v5479_v36, 7  ;;  %v4294_v18 = vsel %vm4194_vm6, %v4116_v42, 0.0  ;;  %v4506_v44 = vmul.f32 %v4116_v42, %v4116_v42  ;;  %v4899_v36 = vpack.c.bf16 %v4116_v42, %v4116_v42 }
 0x2b2   : > { %v4295_v23 = vadd.f32 %v4294_v18, %v4293_v30  ;;  %v2610_v20 = vpop.f32.mrf.mxu0  ;;  %v944_v18 = vpop.permute.xlu1 %943  ;;  %v3495_v10 = vsel %vm3372_vm4, %v3493_v6, %v11135_v29 }
 0x2b3   : > { %v5484_v19 = vor.u32 %v5482_v41, %v9594_v21  ;;  %v4683_v8 = vsel %vm4194_vm6, %v4506_v44, 0.0  ;;  %v3080_v59 = vadd.f32 %v9560_v56, %v2610_v20  ;;  %v9611_v41 = vrot.slane %v2019_v43, 1  ;;  %v1149_v6 = vpop.permute.xlu2 %1148 }
 0x2b4   : > { %v4684_v62 = vadd.f32 %v4683_v8, %v4682_v11  ;;  %v11042_v11 = vrot.slane %v9591_v32, 1  ;;  %v687_v43 = vunpack.c.l.b16 %v357_v52 }
 0x2b5   : > { %v9602_v15 = vpop.f32.mrf.mxu1  ;;  %v5856_v30 = vsel %vm8299_vm9, 4048220490, %v5484_v19 }
 0x2b6   : > { %v3873_v26 = vpop.f32.mrf.mxu2  ;;  %v6035_v20 = vunpack.c.l.b16 %v5856_v30  ;;  %v6036_v16 = vunpack.c.h.b16 %v5856_v30  ;;  %v3460_v42 = vsel %vm3372_vm4, %v3458_v51, %v11042_v11  ;;  %v2022_v51 = vsel %vm1723_vm5, %v2018_v1, %v9611_v41 }
 0x2b7   : > { %v4117_v56 = vadd.f32 %v3873_v26, %v3080_v59  ;;  %v9613_v44 = vpop.f32.mrf.mxu3  ;;  %v5155_v59 = vunpack.c.l.b16 %v4899_v36  ;;  %v1396_v26 = vsel %vm1234_vm1, %v9068_v47, %v944_v18 }
 0x2b8   : > { %11134 = vst [vmem:[#allocation50_spill] sm:$0xff] %v9613_v44  ;;  %v6197_v36 = vpack.c.b16 %v6035_v20, %v6035_v20  ;;  %v6198_v18 = vpack.c.b16 %v6036_v16, %v6036_v16 }
 0x2b9   : > { %v4296_v19 = vsel %vm4194_vm6, %v4117_v56, 0.0  ;;  %v4507_v8 = vmul.f32 %v4117_v56, %v4117_v56  ;;  %v4900_v34 = vpack.c.bf16 %v4117_v56, %v4117_v56 }
 0x2ba   : > { %v4297_v46 = vadd.f32 %v4296_v19, %v4295_v23  ;;  %v2613_v40 = vpop.f32.mrf.mxu0  ;;  %v9629_v19 = vpack.c.b16 %v687_v43, %v687_v43  ;;  %6526 = vst.msk [vmem:[%s8328_s11 + $0x104] sm:$0xf] %vm6459_vm10, %v6197_v36 }
 0x2bb   : > { %v4685_v44 = vsel %vm4194_vm6, %v4507_v8, 0.0  ;;  %v5156_v56 = vunpack.c.l.b16 %v4900_v34  ;;  %7198 = vmatmul.msk.bf16.gmra.mxu2 %vm2277_vm3, %v3460_v42  ;;  %v3083_v30 = vadd.f32 %v3082_v31, %v2613_v40  ;;  %v7382_v31 = vld [vmem:[%s7553_s7 + $0x1e8] sm:$0xff]  ;;  %6527 = vst.msk [vmem:[%s8328_s11 + $0x108] sm:$0xf] %vm6459_vm10, %v6198_v18 }
 0x2bc   : > { %v4686_v23 = vadd.f32 %v4685_v44, %v4684_v62  ;;  %7212 = vmatmul.msk.bf16.vlgmr.msra.gmra.mxu3 %vm2277_vm3, %v3495_v10  ;;  %1172 = vrot.lane.b32.xlu2 %v9629_v19, %s7463_s9  ;;  %v1631_v44 = vsel %vm1523_vm2, %v1396_v26, %v1149_v6  ;;  %v2023_v26 = vshrl.u32 %v9591_v32, 16 }
 0x2bd   : > { %v5258_v52 = vpack.c.b16 %v5156_v56, %v5155_v59  ;;  %7059 = vmatmul.msk.bf16.gmra.mxu0 %vm2277_vm3, %v2022_v51  ;;  %v9633_v47 = vpop.f32.mrf.mxu1  ;;  %1176 = vrot.lane.b32.xlu0 %v7382_v31, %s7463_s9  ;;  %v946_v56 = vpop.permute.xlu0 %945 }
 0x2be   : > { %v3876_v8 = vpop.f32.mrf.mxu2  ;;  %973 = vrot.lane.b32.xlu1 %v9629_v19, %s7462_s8 }
 0x2bf   : > { %v5486_v62 = vshrl.u32 %v5258_v52, 16  ;;  %v4118_v1 = vadd.f32 %v3876_v8, %v3083_v30  ;;  %v9644_v34 = vpop.f32.mrf.mxu3  ;;  %v5489_v20 = vshll.u32 %v5258_v52, 16  ;;  %v2026_v30 = vshll.u32 %v1631_v44, 16 }
 0x2c0   : > { %11136 = vst [vmem:[#allocation51_spill] sm:$0xff] %v9644_v34  ;;  %7128 = vmatmul.msk.bf16.gmra.mxu1 %vm2277_vm3, %v9591_v32  ;;  %v3461_v8 = vrot.slane %v1631_v44, 1  ;;  %v2025_v44 = vor.u32 %v2023_v26, %v9611_v41  ;;  %v1151_v34 = vpop.permute.xlu2 %1150  ;;  %v11137_v26 = vrot.slane %v9591_v32, 1 }
 0x2c1   : > { %v5488_v16 = vrot.slane %v5486_v62, 7  ;;  %v4298_v40 = vsel %vm4194_vm6, %v4118_v1, 0.0  ;;  %v4508_v42 = vmul.f32 %v4118_v1, %v4118_v1 }
 0x2c2   : > { %v4299_v29 = vadd.f32 %v4298_v40, %v4297_v46  ;;  %v2615_v10 = vpop.f32.mrf.mxu0 }
 0x2c3   : > { %v5491_v43 = vor.u32 %v5489_v20, %v5488_v16  ;;  %v4687_v59 = vsel %vm4194_vm6, %v4508_v42, 0.0  ;;  %v5888_v6 = vsel %vm8299_vm9, %v5488_v16, 4048220490  ;;  %v3085_v36 = vadd.f32 %v9602_v15, %v2615_v10  ;;  %v7383_v42 = vld [vmem:[%s7553_s7 + $0x1e0] sm:$0xff] }
 0x2c4   : > { %v4688_v51 = vadd.f32 %v4687_v59, %v4686_v23  ;;  %v6039_v46 = vunpack.c.l.b16 %v5888_v6  ;;  %1174 = vrot.lane.b32.xlu2 %v7383_v42, %s7463_s9  ;;  %v3496_v23 = vrot.slane %v7914_v39, 1  ;;  %v4901_v16 = vpack.c.bf16 %v4118_v1, %v4118_v1  ;;  %v7384_v39 = vld [vmem:[%s7553_s7 + $0x168] sm:$0xff] }
 0x2c5   : > { %v5492_v52 = vsel %vm5297_vm7, %v9594_v21, %v5491_v43  ;;  %v9658_v18 = vpop.f32.mrf.mxu1  ;;  %975 = vrot.lane.b32.xlu0 %v7383_v42, %s7462_s8  ;;  %v2028_v10 = vrot.slane %v2026_v30, 1  ;;  %v1399_v1 = vsel %vm1234_vm1, %v7384_v39, %v946_v56  ;;  %v3462_v30 = vsel %vm3372_vm4, %v11137_v26, %v3461_v8 }
 0x2c6   : > { %v6037_v62 = vunpack.c.l.b16 %v5492_v52  ;;  %v6038_v20 = vunpack.c.h.b16 %v5492_v52  ;;  %v3878_v40 = vpop.f32.mrf.mxu2  ;;  %977 = vrot.lane.b32.xlu1 %v7382_v31, %s7462_s8  ;;  %v6201_v15 = vpack.c.b16 %v6039_v46, %v6039_v46  ;;  %v5157_v46 = vunpack.c.l.b16 %v4901_v16  ;;  %v7385_v16 = vld [vmem:[%s7553_s7 + $0x170] sm:$0xff] }
 0x2c7   : > { %v4119_v21 = vadd.f32 %v3878_v40, %v3085_v36  ;;  %v9666_v6 = vpop.f32.mrf.mxu3  ;;  %v948_v36 = vpop.permute.xlu1 %947  ;;  %v11138_v40 = vrot.slane %v7863_v60, 1  ;;  %v2029_v32 = vsel %vm1723_vm5, %v2025_v44, %v2028_v10  ;;  %v7386_v60 = vld [vmem:[%s7553_s7 + $0x1fc] sm:$0xff] }
 0x2c8   : > { %v6199_v43 = vpack.c.b16 %v6037_v62, %v6037_v62  ;;  %v6200_v59 = vpack.c.b16 %v6038_v20, %v6038_v20  ;;  %6530 = vst.msk [vmem:[%s8328_s11 + $0x114] sm:$0x1] %vm6464_vm11, %v6201_v15 }
 0x2c9   : > { %v4300_v52 = vsel %vm4194_vm6, %v4119_v21, 0.0  ;;  %v4509_v42 = vmul.f32 %v4119_v21, %v4119_v21  ;;  %v4902_v11 = vpack.c.bf16 %v4119_v21, %v4119_v21  ;;  %v1633_v21 = vsel %vm1523_vm2, %v1399_v1, %v1151_v34 }
 0x2ca   : > { %6528 = vst.msk [vmem:[%s8328_s11 + $0x10c] sm:$0xf] %vm6459_vm10, %v6199_v43  ;;  %v4301_v31 = vadd.f32 %v4300_v52, %v4299_v29  ;;  %v2618_v41 = vpop.f32.mrf.mxu0  ;;  %v3497_v29 = vsel %vm3372_vm4, %v11138_v40, %v3496_v23 }
 0x2cb   : > { %6529 = vst.msk [vmem:[%s8328_s11 + $0x110] sm:$0xf] %vm6459_vm10, %v6200_v59  ;;  %v4689_v62 = vsel %vm4194_vm6, %v4509_v42, 0.0  ;;  %v5158_v20 = vunpack.c.l.b16 %v4902_v11  ;;  %7199 = vmatmul.msk.bf16.gmra.mxu2 %vm2277_vm3, %v3462_v30  ;;  %v3088_v15 = vadd.f32 %v9633_v47, %v2618_v41  ;;  %v1402_v11 = vsel %vm1234_vm1, %v7385_v16, %v948_v36  ;;  %v7387_v16 = vld [vmem:[%s7553_s7 + $0x1f4] sm:$0xff] }
 0x2cc   : > { %v4690_v56 = vadd.f32 %v4689_v62, %v4688_v51  ;;  %7213 = vmatmul.msk.bf16.gmra.mxu3 %vm2277_vm3, %v3497_v29  ;;  %v1153_v51 = vpop.permute.xlu0 %1152  ;;  %1178 = vrot.lane.b32.xlu2 %v7891_v33, %s7463_s9  ;;  %v2032_v47 = vshll.u32 %v1633_v21, 16  ;;  %v2030_v36 = vshrl.u32 %v1633_v21, 16 }
 0x2cd   : > { %v5259_v8 = vpack.c.b16 %v5158_v20, %v5157_v46  ;;  %7060 = vmatmul.msk.bf16.gmra.mxu0 %vm2277_vm3, %v2029_v32  ;;  %v3092_v43 = vpop.f32.mrf.mxu1  ;;  %1182 = vrot.lane.b32.xlu0 %v7386_v60, %s7463_s9  ;;  %v9701_v10 = vsel %vm1523_vm2, %v1402_v11, %v1153_v51  ;;  %v3498_v11 = vrot.slane %v7948_v50, 1 }
 0x2ce   : > { %v3881_v59 = vpop.f32.mrf.mxu2  ;;  %979 = vrot.lane.b32.xlu1 %v7891_v33, %s7462_s8  ;;  %v2034_v46 = vrot.slane %v2032_v47, 1  ;;  %v2036_v20 = vshll.u32 %v9701_v10, 16 }
 0x2cf   : > { %v5494_v34 = vshrl.u32 %v5259_v8, 16  ;;  %v4120_v23 = vadd.f32 %v3881_v59, %v3088_v15  ;;  %v9698_v44 = vpop.f32.mrf.mxu3  ;;  %v5497_v42 = vshll.u32 %v5259_v8, 16  ;;  %v3463_v8 = vrot.slane %v1633_v21, 1 }
 0x2d0   : > { %7129 = vmatmul.msk.bf16.gmra.mxu1 %vm2277_vm3, %v1633_v21  ;;  %v2035_v60 = vor.u32 %v2034_v46, %v2030_v36 }
 0x2d1   : > { %v9704_v52 = vrot.slane %v5494_v34, 7  ;;  %v4302_v39 = vsel %vm4194_vm6, %v4120_v23, 0.0  ;;  %v4510_v1 = vmul.f32 %v4120_v23, %v4120_v23  ;;  %v4903_v51 = vpack.c.bf16 %v4120_v23, %v4120_v23 }
 0x2d2   : > { %v4303_v41 = vadd.f32 %v4302_v39, %v4301_v31  ;;  %v2620_v26 = vpop.f32.mrf.mxu0  ;;  %v11044_v31 = vrot.slane %v9701_v10, 1 }
 0x2d3   : > { %v5499_v30 = vor.u32 %v5497_v42, %v9704_v52  ;;  %v4691_v33 = vsel %vm4194_vm6, %v4510_v1, 0.0  ;;  %v3090_v40 = vadd.f32 %v9658_v18, %v2620_v26  ;;  %v2038_v18 = vrot.slane %v2036_v20, 1  ;;  %v950_v26 = vpop.permute.xlu1 %949 }
 0x2d4   : > { %v4692_v62 = vadd.f32 %v4691_v33, %v4690_v56  ;;  %1180 = vrot.lane.b32.xlu2 %v7387_v16, %s7463_s9  ;;  %v11043_v56 = vrot.slane %v7974_v58, 1  ;;  %v3465_v50 = vsel %vm3372_vm4, %v3463_v8, %v11044_v31  ;;  %v5159_v16 = vunpack.c.l.b16 %v4903_v51 }
 0x2d5   : > { %v9711_v29 = vpop.f32.mrf.mxu1  ;;  %v5857_v32 = vsel %vm8299_vm9, 4048220490, %v5499_v30  ;;  %v1405_v8 = vsel %vm1234_vm1, %v9159_v17, %v950_v26 }
 0x2d6   : > { %v3883_v15 = vpop.f32.mrf.mxu2  ;;  %v6040_v47 = vunpack.c.l.b16 %v5857_v32  ;;  %v6041_v42 = vunpack.c.h.b16 %v5857_v32  ;;  %v3500_v46 = vsel %vm3372_vm4, %v3498_v11, %v11043_v56 }
 0x2d7   : > { %v4121_v59 = vadd.f32 %v3883_v15, %v3090_v40  ;;  %v9720_v34 = vpop.f32.mrf.mxu3  ;;  %v1155_v15 = vpop.permute.xlu2 %1154 }
 0x2d8   : > { %v6202_v40 = vpack.c.b16 %v6040_v47, %v6040_v47  ;;  %v6203_v32 = vpack.c.b16 %v6041_v42, %v6041_v42  ;;  %v1637_v17 = vsel %vm1523_vm2, %v1405_v8, %v1155_v15 }
 0x2d9   : > { %v4304_v21 = vsel %vm4194_vm6, %v4121_v59, 0.0  ;;  %v4511_v39 = vmul.f32 %v4121_v59, %v4121_v59  ;;  %v4904_v1 = vpack.c.bf16 %v4121_v59, %v4121_v59  ;;  %v3466_v15 = vrot.slane %v1637_v17, 1 }
 0x2da   : > { %v4305_v30 = vadd.f32 %v4304_v21, %v4303_v41  ;;  %v2623_v33 = vpop.f32.mrf.mxu0  ;;  %v2039_v41 = vsel %vm1723_vm5, %v2035_v60, %v2038_v18  ;;  %6531 = vst.msk [vmem:[%s8328_s11 + $0x118] sm:$0xf] %vm6459_vm10, %v6202_v40 }
 0x2db   : > { %v4693_v23 = vsel %vm4194_vm6, %v4511_v39, 0.0  ;;  %v5160_v36 = vunpack.c.l.b16 %v4904_v1  ;;  %7200 = vmatmul.msk.bf16.gmra.mxu2 %vm2277_vm3, %v3465_v50  ;;  %v3093_v59 = vadd.f32 %v3092_v43, %v2623_v33  ;;  %6532 = vst.msk [vmem:[%s8328_s11 + $0x11c] sm:$0xf] %vm6459_vm10, %v6203_v32 }
 0x2dc   : > { %v4694_v20 = vadd.f32 %v4693_v23, %v4692_v62  ;;  %7214 = vmatmul.msk.bf16.gmra.mxu3 %vm2277_vm3, %v3500_v46  ;;  %1184 = vrot.lane.b32.xlu2 %v7642_v25, %s7463_s9  ;;  %v2040_v23 = vshrl.u32 %v9701_v10, 16 }
 0x2dd   : > { %v5260_v51 = vpack.c.b16 %v5160_v36, %v5159_v16  ;;  %7061 = vmatmul.msk.bf16.gmra.mxu0 %vm2277_vm3, %v2039_v41  ;;  %v3097_v21 = vpop.f32.mrf.mxu1  ;;  %v952_v16 = vpop.permute.xlu0 %951  ;;  %v2043_v36 = vshll.u32 %v1637_v17, 16 }
 0x2de   : > { %v3886_v39 = vpop.f32.mrf.mxu2 }
 0x2df   : > { %v5501_v62 = vshrl.u32 %v5260_v51, 16  ;;  %v4122_v11 = vadd.f32 %v3886_v39, %v3093_v59  ;;  %v9743_v60 = vpop.f32.mrf.mxu3  ;;  %v5504_v47 = vshll.u32 %v5260_v51, 16  ;;  %v1157_v31 = vpop.permute.xlu2 %1156 }
 0x2e0   : > { %7130 = vmatmul.msk.bf16.gmra.mxu1 %vm2277_vm3, %v9701_v10 }
 0x2e1   : > { %v5503_v43 = vrot.slane %v5501_v62, 7  ;;  %v4306_v42 = vsel %vm4194_vm6, %v4122_v11, 0.0  ;;  %v4512_v1 = vmul.f32 %v4122_v11, %v4122_v11  ;;  %v11139_v62 = vld [vmem:[#allocation5_spill] sm:$0xff] }
 0x2e2   : > { %v4307_v26 = vadd.f32 %v4306_v42, %v4305_v30  ;;  %v2625_v25 = vpop.f32.mrf.mxu0 }
 0x2e3   : > { %v5506_v33 = vor.u32 %v5504_v47, %v5503_v43  ;;  %v4695_v50 = vsel %vm4194_vm6, %v4512_v1, 0.0  ;;  %v5889_v41 = vsel %vm8299_vm9, %v5503_v43, 4048220490  ;;  %v3095_v32 = vadd.f32 %v9711_v29, %v2625_v25 }
 0x2e4   : > { %v4696_v46 = vadd.f32 %v4695_v50, %v4694_v20  ;;  %v6044_v30 = vunpack.c.l.b16 %v5889_v41  ;;  %v3501_v47 = vrot.slane %v11139_v62, 1  ;;  %v4905_v20 = vpack.c.bf16 %v4122_v11, %v4122_v11 }
 0x2e5   : > { %v5507_v40 = vsel %vm5297_vm7, %v9704_v52, %v5506_v33  ;;  %v9755_v8 = vpop.f32.mrf.mxu1  ;;  %v2042_v1 = vor.u32 %v2040_v23, %v2038_v18  ;;  %v2045_v50 = vrot.slane %v2043_v36, 1  ;;  %v11140_v23 = vrot.slane %v9701_v10, 1 }
 0x2e6   : > { %v6042_v51 = vunpack.c.l.b16 %v5507_v40  ;;  %v6043_v59 = vunpack.c.h.b16 %v5507_v40  ;;  %v3888_v39 = vpop.f32.mrf.mxu2  ;;  %v6206_v43 = vpack.c.b16 %v6044_v30, %v6044_v30  ;;  %v7388_v40 = vld [vmem:[%s7553_s7 + $0x17c] sm:$0xff]  ;;  %v5161_v30 = vunpack.c.l.b16 %v4905_v20 }
 0x2e7   : > { %v4123_v42 = vadd.f32 %v3888_v39, %v3095_v32  ;;  %v9758_v25 = vpop.f32.mrf.mxu3  ;;  %v1408_v56 = vsel %vm1234_vm1, %v7388_v40, %v952_v16  ;;  %v3467_v36 = vsel %vm3372_vm4, %v11140_v23, %v3466_v15  ;;  %v954_v32 = vpop.permute.xlu1 %953  ;;  %v11141_v39 = vrot.slane %v7974_v58, 1 }
 0x2e8   : > { %v6204_v52 = vpack.c.b16 %v6042_v51, %v6042_v51  ;;  %v6205_v29 = vpack.c.b16 %v6043_v59, %v6043_v59  ;;  %6535 = vst.msk [vmem:[%s8328_s11 + $0x128] sm:$0x1] %vm6464_vm11, %v6206_v43  ;;  %v1639_v62 = vsel %vm1523_vm2, %v1408_v56, %v1157_v31  ;;  %v2046_v10 = vsel %vm1723_vm5, %v2042_v1, %v2045_v50  ;;  %v7389_v43 = vld [vmem:[%s7553_s7 + $0x184] sm:$0xff] }
 0x2e9   : > { %v4308_v17 = vsel %vm4194_vm6, %v4123_v42, 0.0  ;;  %v4513_v33 = vmul.f32 %v4123_v42, %v4123_v42  ;;  %v4906_v41 = vpack.c.bf16 %v4123_v42, %v4123_v42  ;;  %v1411_v20 = vsel %vm1234_vm1, %v7389_v43, %v954_v32 }
 0x2ea   : > { %6533 = vst.msk [vmem:[%s8328_s11 + $0x120] sm:$0xf] %vm6459_vm10, %v6204_v52  ;;  %v4309_v11 = vadd.f32 %v4308_v17, %v4307_v26  ;;  %v2628_v18 = vpop.f32.mrf.mxu0  ;;  %v3502_v26 = vsel %vm3372_vm4, %v11141_v39, %v3501_v47  ;;  %v11045_v43 = vrot.slane %v8080_v48, 1 }
 0x2eb   : > { %6534 = vst.msk [vmem:[%s8328_s11 + $0x124] sm:$0xf] %vm6459_vm10, %v6205_v29  ;;  %v4697_v51 = vsel %vm4194_vm6, %v4513_v33, 0.0  ;;  %v5162_v59 = vunpack.c.l.b16 %v4906_v41  ;;  %7201 = vmatmul.msk.bf16.gmra.mxu2 %vm2277_vm3, %v3467_v36  ;;  %v3098_v15 = vadd.f32 %v3097_v21, %v2628_v18  ;;  %v1159_v29 = vpop.permute.xlu0 %1158  ;;  %v2049_v33 = vshll.u32 %v1639_v62, 16 }
 0x2ec   : > { %v4698_v16 = vadd.f32 %v4697_v51, %v4696_v46  ;;  %7215 = vmatmul.msk.bf16.gmra.mxu3 %vm2277_vm3, %v3502_v26  ;;  %v9786_v31 = vsel %vm1523_vm2, %v1411_v20, %v1159_v29  ;;  %v2047_v36 = vshrl.u32 %v1639_v62, 16 }
 0x2ed   : > { %v5261_v42 = vpack.c.b16 %v5162_v59, %v5161_v30  ;;  %7062 = vmatmul.msk.bf16.gmra.mxu0 %vm2277_vm3, %v2046_v10  ;;  %v3102_v52 = vpop.f32.mrf.mxu1  ;;  %v2051_v32 = vrot.slane %v2049_v33, 1  ;;  %v2053_v51 = vshll.u32 %v9786_v31, 16  ;;  %v3468_v10 = vrot.slane %v1639_v62, 1 }
 0x2ee   : > { %v3891_v46 = vpop.f32.mrf.mxu2 }
 0x2ef   : > { %v5509_v17 = vshrl.u32 %v5261_v42, 16  ;;  %v4124_v58 = vadd.f32 %v3891_v46, %v3098_v15  ;;  %v9783_v47 = vpop.f32.mrf.mxu3  ;;  %v5512_v21 = vshll.u32 %v5261_v42, 16  ;;  %v11046_v42 = vrot.slane %v9786_v31, 1 }
 0x2f0   : > { %7131 = vmatmul.msk.bf16.gmra.mxu1 %vm2277_vm3, %v1639_v62  ;;  %v3503_v15 = vrot.slane %v8054_v9, 1  ;;  %v2052_v46 = vor.u32 %v2051_v32, %v2047_v36  ;;  %v956_v62 = vpop.permute.xlu1 %955 }
 0x2f1   : > { %v9789_v56 = vrot.slane %v5509_v17, 7  ;;  %v4310_v1 = vsel %vm4194_vm6, %v4124_v58, 0.0  ;;  %v4514_v50 = vmul.f32 %v4124_v58, %v4124_v58  ;;  %v4907_v20 = vpack.c.bf16 %v4124_v58, %v4124_v58 }
 0x2f2   : > { %v4311_v41 = vadd.f32 %v4310_v1, %v4309_v11  ;;  %v2630_v40 = vpop.f32.mrf.mxu0  ;;  %v3470_v9 = vsel %vm3372_vm4, %v3468_v10, %v11046_v42  ;;  %v3505_v32 = vsel %vm3372_vm4, %v3503_v15, %v11045_v43  ;;  %v1414_v10 = vsel %vm1234_vm1, %v9253_v28, %v956_v62 }
 0x2f3   : > { %v5514_v18 = vor.u32 %v5512_v21, %v9789_v56  ;;  %v4699_v23 = vsel %vm4194_vm6, %v4514_v50, 0.0  ;;  %v3100_v59 = vadd.f32 %v9755_v8, %v2630_v40 }
 0x2f4   : > { %v4700_v30 = vadd.f32 %v4699_v23, %v4698_v16  ;;  %v2055_v16 = vrot.slane %v2053_v51, 1  ;;  %v5163_v23 = vunpack.c.l.b16 %v4907_v20 }
 0x2f5   : > { %v3104_v39 = vpop.f32.mrf.mxu1  ;;  %v5858_v26 = vsel %vm8299_vm9, 4048220490, %v5514_v18 }
 0x2f6   : > { %v3893_v11 = vpop.f32.mrf.mxu2  ;;  %v6045_v33 = vunpack.c.l.b16 %v5858_v26  ;;  %v6046_v8 = vunpack.c.h.b16 %v5858_v26 }
 0x2f7   : > { %v4125_v29 = vadd.f32 %v3893_v11, %v3100_v59  ;;  %v9801_v17 = vpop.f32.mrf.mxu3  ;;  %v1161_v11 = vpop.permute.xlu2 %1160 }
 0x2f8   : > { %v6207_v59 = vpack.c.b16 %v6045_v33, %v6045_v33  ;;  %v6208_v26 = vpack.c.b16 %v6046_v8, %v6046_v8 }
 0x2f9   : > { %v4312_v21 = vsel %vm4194_vm6, %v4125_v29, 0.0  ;;  %v4515_v1 = vmul.f32 %v4125_v29, %v4125_v29  ;;  %v4908_v50 = vpack.c.bf16 %v4125_v29, %v4125_v29 }
 0x2fa   : > { %v4313_v40 = vadd.f32 %v4312_v21, %v4311_v41  ;;  %v2633_v18 = vpop.f32.mrf.mxu0  ;;  %v2056_v41 = vsel %vm1723_vm5, %v2052_v46, %v2055_v16  ;;  %6536 = vst.msk [vmem:[%s8328_s11 + $0x12c] sm:$0xf] %vm6459_vm10, %v6207_v59  ;;  %v1643_v46 = vsel %vm1523_vm2, %v1414_v10, %v1161_v11 }
 0x2fb   : > { %v4701_v58 = vsel %vm4194_vm6, %v4515_v1, 0.0  ;;  %v5164_v36 = vunpack.c.l.b16 %v4908_v50  ;;  %7202 = vmatmul.msk.bf16.gmra.mxu2 %vm2277_vm3, %v3470_v9  ;;  %v3103_v29 = vadd.f32 %v3102_v52, %v2633_v18  ;;  %6537 = vst.msk [vmem:[%s8328_s11 + $0x130] sm:$0xf] %vm6459_vm10, %v6208_v26 }
 0x2fc   : > { %v4702_v51 = vadd.f32 %v4701_v58, %v4700_v30  ;;  %7216 = vmatmul.msk.bf16.gmra.mxu3 %vm2277_vm3, %v3505_v32  ;;  %v958_v58 = vpop.permute.xlu0 %957  ;;  %v2060_v32 = vshll.u32 %v1643_v46, 16 }
 0x2fd   : > { %v5262_v20 = vpack.c.b16 %v5164_v36, %v5163_v23  ;;  %7063 = vmatmul.msk.bf16.gmra.mxu0 %vm2277_vm3, %v2056_v41  ;;  %v3107_v21 = vpop.f32.mrf.mxu1  ;;  %v2057_v36 = vshrl.u32 %v9786_v31, 16 }
 0x2fe   : > { %v3896_v1 = vpop.f32.mrf.mxu2  ;;  %v2062_v43 = vrot.slane %v2060_v32, 1 }
 0x2ff   : > { %v5516_v15 = vshrl.u32 %v5262_v20, 16  ;;  %v4126_v30 = vadd.f32 %v3896_v1, %v3103_v29  ;;  %v9822_v33 = vpop.f32.mrf.mxu3  ;;  %v5519_v52 = vshll.u32 %v5262_v20, 16 }
 0x300   : > { %11142 = vst [vmem:[#allocation5_spill] sm:$0xff] %v9822_v33  ;;  %7132 = vmatmul.msk.bf16.gmra.mxu1 %vm2277_vm3, %v9786_v31  ;;  %v1163_v33 = vpop.permute.xlu2 %1162 }
 0x301   : > { %v5518_v28 = vrot.slane %v5516_v15, 7  ;;  %v4314_v8 = vsel %vm4194_vm6, %v4126_v30, 0.0  ;;  %v4516_v50 = vmul.f32 %v4126_v30, %v4126_v30 }
 0x302   : > { %v4315_v62 = vadd.f32 %v4314_v8, %v4313_v40  ;;  %v2635_v18 = vpop.f32.mrf.mxu0  ;;  %v3471_v40 = vrot.slane %v1643_v46, 1 }
 0x303   : > { %v5521_v9 = vor.u32 %v5519_v52, %v5518_v28  ;;  %v4703_v23 = vsel %vm4194_vm6, %v4516_v50, 0.0  ;;  %v5890_v59 = vsel %vm8299_vm9, %v5518_v28, 4048220490  ;;  %v3105_v10 = vadd.f32 %v3104_v39, %v2635_v18  ;;  %v11143_v52 = vld [vmem:[#allocation6_spill] sm:$0xff] }
 0x304   : > { %v4704_v41 = vadd.f32 %v4703_v23, %v4702_v51  ;;  %v6049_v20 = vunpack.c.l.b16 %v5890_v59  ;;  %v3506_v8 = vrot.slane %v11143_v52, 1  ;;  %v4909_v51 = vpack.c.bf16 %v4126_v30, %v4126_v30 }
 0x305   : > { %v5522_v26 = vsel %vm5297_vm7, %v9789_v56, %v5521_v9  ;;  %v9833_v11 = vpop.f32.mrf.mxu1  ;;  %v2059_v28 = vor.u32 %v2057_v36, %v2055_v16  ;;  %v11144_v36 = vrot.slane %v9786_v31, 1 }
 0x306   : > { %v6047_v29 = vunpack.c.l.b16 %v5522_v26  ;;  %v6048_v1 = vunpack.c.h.b16 %v5522_v26  ;;  %v3898_v15 = vpop.f32.mrf.mxu2  ;;  %v6211_v23 = vpack.c.b16 %v6049_v20, %v6049_v20  ;;  %v7390_v26 = vld [vmem:[%s7553_s7 + $0x190] sm:$0xff]  ;;  %v5165_v20 = vunpack.c.l.b16 %v4909_v51 }
 0x307   : > { %v4127_v50 = vadd.f32 %v3898_v15, %v3105_v10  ;;  %v9836_v18 = vpop.f32.mrf.mxu3  ;;  %v1417_v42 = vsel %vm1234_vm1, %v7390_v26, %v958_v58  ;;  %v3472_v32 = vsel %vm3372_vm4, %v11144_v36, %v3471_v40  ;;  %v960_v10 = vpop.permute.xlu1 %959  ;;  %v11145_v15 = vrot.slane %v8080_v48, 1 }
 0x308   : > { %v6209_v56 = vpack.c.b16 %v6047_v29, %v6047_v29  ;;  %v6210_v39 = vpack.c.b16 %v6048_v1, %v6048_v1  ;;  %6540 = vst.msk [vmem:[%s8328_s11 + $0x13c] sm:$0x1] %vm6464_vm11, %v6211_v23  ;;  %v1645_v52 = vsel %vm1523_vm2, %v1417_v42, %v1163_v33  ;;  %v2063_v31 = vsel %vm1723_vm5, %v2059_v28, %v2062_v43  ;;  %v7391_v23 = vld [vmem:[%s7553_s7 + $0x198] sm:$0xff] }
 0x309   : > { %v4316_v46 = vsel %vm4194_vm6, %v4127_v50, 0.0  ;;  %v4517_v9 = vmul.f32 %v4127_v50, %v4127_v50  ;;  %v4910_v59 = vpack.c.bf16 %v4127_v50, %v4127_v50  ;;  %v1420_v51 = vsel %vm1234_vm1, %v7391_v23, %v960_v10 }
 0x30a   : > { %6538 = vst.msk [vmem:[%s8328_s11 + $0x134] sm:$0xf] %vm6459_vm10, %v6209_v56  ;;  %v4317_v30 = vadd.f32 %v4316_v46, %v4315_v62  ;;  %v2638_v16 = vpop.f32.mrf.mxu0  ;;  %v3507_v62 = vsel %vm3372_vm4, %v11145_v15, %v3506_v8  ;;  %v11047_v23 = vrot.slane %v8186_v61, 1 }
 0x30b   : > { %6539 = vst.msk [vmem:[%s8328_s11 + $0x138] sm:$0xf] %vm6459_vm10, %v6210_v39  ;;  %v4705_v29 = vsel %vm4194_vm6, %v4517_v9, 0.0  ;;  %v5166_v1 = vunpack.c.l.b16 %v4910_v59  ;;  %7203 = vmatmul.msk.bf16.gmra.mxu2 %vm2277_vm3, %v3472_v32  ;;  %v3108_v40 = vadd.f32 %v3107_v21, %v2638_v16  ;;  %v1165_v39 = vpop.permute.xlu0 %1164  ;;  %v2066_v9 = vshll.u32 %v1645_v52, 16 }
 0x30c   : > { %v4706_v58 = vadd.f32 %v4705_v29, %v4704_v41  ;;  %7217 = vmatmul.msk.bf16.gmra.mxu3 %vm2277_vm3, %v3507_v62  ;;  %v9864_v42 = vsel %vm1523_vm2, %v1420_v51, %v1165_v39  ;;  %v2064_v32 = vshrl.u32 %v1645_v52, 16 }
 0x30d   : > { %v5263_v50 = vpack.c.b16 %v5166_v1, %v5165_v20  ;;  %7064 = vmatmul.msk.bf16.gmra.mxu0 %vm2277_vm3, %v2063_v31  ;;  %v3112_v56 = vpop.f32.mrf.mxu1  ;;  %v2068_v10 = vrot.slane %v2066_v9, 1  ;;  %v2070_v29 = vshll.u32 %v9864_v42, 16  ;;  %v3473_v31 = vrot.slane %v1645_v52, 1 }
 0x30e   : > { %v3901_v41 = vpop.f32.mrf.mxu2 }
 0x30f   : > { %v5524_v46 = vshrl.u32 %v5263_v50, 16  ;;  %v4128_v48 = vadd.f32 %v3901_v41, %v3108_v40  ;;  %v9861_v8 = vpop.f32.mrf.mxu3  ;;  %v5527_v21 = vshll.u32 %v5263_v50, 16  ;;  %v11048_v50 = vrot.slane %v9864_v42, 1 }
 0x310   : > { %7133 = vmatmul.msk.bf16.gmra.mxu1 %vm2277_vm3, %v1645_v52  ;;  %v3508_v40 = vrot.slane %v8160_v14, 1  ;;  %v2069_v41 = vor.u32 %v2068_v10, %v2064_v32  ;;  %v962_v52 = vpop.permute.xlu1 %961 }
 0x311   : > { %v9867_v43 = vrot.slane %v5524_v46, 7  ;;  %v4318_v33 = vsel %vm4194_vm6, %v4128_v48, 0.0  ;;  %v4518_v28 = vmul.f32 %v4128_v48, %v4128_v48  ;;  %v4911_v51 = vpack.c.bf16 %v4128_v48, %v4128_v48 }
 0x312   : > { %v4319_v59 = vadd.f32 %v4318_v33, %v4317_v30  ;;  %v2640_v26 = vpop.f32.mrf.mxu0  ;;  %v3475_v14 = vsel %vm3372_vm4, %v3473_v31, %v11048_v50  ;;  %v3510_v10 = vsel %vm3372_vm4, %v3508_v40, %v11047_v23  ;;  %v1423_v31 = vsel %vm1234_vm1, %v9342_v49, %v962_v52 }
 0x313   : > { %v5529_v16 = vor.u32 %v5527_v21, %v9867_v43  ;;  %v4707_v36 = vsel %vm4194_vm6, %v4518_v28, 0.0  ;;  %v3110_v1 = vadd.f32 %v9833_v11, %v2640_v26 }
 0x314   : > { %v4708_v20 = vadd.f32 %v4707_v36, %v4706_v58  ;;  %v2072_v58 = vrot.slane %v2070_v29, 1  ;;  %v5167_v36 = vunpack.c.l.b16 %v4911_v51 }
 0x315   : > { %v3114_v15 = vpop.f32.mrf.mxu1  ;;  %v5859_v62 = vsel %vm8299_vm9, 4048220490, %v5529_v16 }
 0x316   : > { %v3903_v30 = vpop.f32.mrf.mxu2  ;;  %v6050_v9 = vunpack.c.l.b16 %v5859_v62  ;;  %v6051_v11 = vunpack.c.h.b16 %v5859_v62 }
 0x317   : > { %v4129_v39 = vadd.f32 %v3903_v30, %v3110_v1  ;;  %v9879_v46 = vpop.f32.mrf.mxu3  ;;  %v1167_v30 = vpop.permute.xlu2 %1166 }
 0x318   : > { %v6212_v1 = vpack.c.b16 %v6050_v9, %v6050_v9  ;;  %v6213_v62 = vpack.c.b16 %v6051_v11, %v6051_v11 }
 0x319   : > { %v4320_v21 = vsel %vm4194_vm6, %v4129_v39, 0.0  ;;  %v4519_v33 = vmul.f32 %v4129_v39, %v4129_v39  ;;  %v4912_v28 = vpack.c.bf16 %v4129_v39, %v4129_v39 }
 0x31a   : > { %v4321_v26 = vadd.f32 %v4320_v21, %v4319_v59  ;;  %v2643_v16 = vpop.f32.mrf.mxu0  ;;  %v2073_v59 = vsel %vm1723_vm5, %v2069_v41, %v2072_v58  ;;  %6541 = vst.msk [vmem:[%s8328_s11 + $0x140] sm:$0xf] %vm6459_vm10, %v6212_v1  ;;  %v1649_v41 = vsel %vm1523_vm2, %v1423_v31, %v1167_v30 }
 0x31b   : > { %v4709_v48 = vsel %vm4194_vm6, %v4519_v33, 0.0  ;;  %v5168_v32 = vunpack.c.l.b16 %v4912_v28  ;;  %7204 = vmatmul.msk.bf16.gmra.mxu2 %vm2277_vm3, %v3475_v14  ;;  %v3113_v39 = vadd.f32 %v3112_v56, %v2643_v16  ;;  %6542 = vst.msk [vmem:[%s8328_s11 + $0x144] sm:$0xf] %vm6459_vm10, %v6213_v62 }
 0x31c   : > { %v4710_v29 = vadd.f32 %v4709_v48, %v4708_v20  ;;  %7218 = vmatmul.msk.bf16.gmra.mxu3 %vm2277_vm3, %v3510_v10  ;;  %v964_v48 = vpop.permute.xlu0 %963  ;;  %v2077_v10 = vshll.u32 %v1649_v41, 16 }
 0x31d   : > { %v5264_v51 = vpack.c.b16 %v5168_v32, %v5167_v36  ;;  %7065 = vmatmul.msk.bf16.gmra.mxu0 %vm2277_vm3, %v2073_v59  ;;  %v3117_v21 = vpop.f32.mrf.mxu1  ;;  %v2074_v32 = vshrl.u32 %v9864_v42, 16 }
 0x31e   : > { %v3906_v33 = vpop.f32.mrf.mxu2  ;;  %v2079_v23 = vrot.slane %v2077_v10, 1 }
 0x31f   : > { %v5531_v40 = vshrl.u32 %v5264_v51, 16  ;;  %v4130_v20 = vadd.f32 %v3906_v33, %v3113_v39  ;;  %v9900_v9 = vpop.f32.mrf.mxu3  ;;  %v5534_v56 = vshll.u32 %v5264_v51, 16 }
 0x320   : > { %11146 = vst [vmem:[#allocation6_spill] sm:$0xff] %v9900_v9  ;;  %7134 = vmatmul.msk.bf16.gmra.mxu1 %vm2277_vm3, %v9864_v42  ;;  %v1169_v9 = vpop.permute.xlu2 %1168 }
 0x321   : > { %v5533_v49 = vrot.slane %v5531_v40, 7  ;;  %v4322_v11 = vsel %vm4194_vm6, %v4130_v20, 0.0  ;;  %v4520_v28 = vmul.f32 %v4130_v20, %v4130_v20 }
 0x322   : > { %v4323_v52 = vadd.f32 %v4322_v11, %v4321_v26  ;;  %v2645_v16 = vpop.f32.mrf.mxu0  ;;  %v3476_v26 = vrot.slane %v1649_v41, 1 }
 0x323   : > { %v5536_v14 = vor.u32 %v5534_v56, %v5533_v49  ;;  %v4711_v36 = vsel %vm4194_vm6, %v4520_v28, 0.0  ;;  %v5891_v1 = vsel %vm8299_vm9, %v5533_v49, 4048220490  ;;  %v3115_v31 = vadd.f32 %v3114_v15, %v2645_v16  ;;  %v11147_v56 = vld [vmem:[#allocation7_spill] sm:$0xff] }
 0x324   : > { %v4712_v59 = vadd.f32 %v4711_v36, %v4710_v29  ;;  %v6054_v51 = vunpack.c.l.b16 %v5891_v1  ;;  %v3511_v11 = vrot.slane %v11147_v56, 1  ;;  %v4913_v29 = vpack.c.bf16 %v4130_v20, %v4130_v20 }
 0x325   : > { %v5537_v62 = vsel %vm5297_vm7, %v9867_v43, %v5536_v14  ;;  %v9911_v30 = vpop.f32.mrf.mxu1  ;;  %v2076_v49 = vor.u32 %v2074_v32, %v2072_v58  ;;  %v11148_v32 = vrot.slane %v9864_v42, 1 }
 0x326   : > { %v6052_v39 = vunpack.c.l.b16 %v5537_v62  ;;  %v6053_v33 = vunpack.c.h.b16 %v5537_v62  ;;  %v3908_v40 = vpop.f32.mrf.mxu2  ;;  %v6216_v36 = vpack.c.b16 %v6054_v51, %v6054_v51  ;;  %v7392_v62 = vld [vmem:[%s7553_s7 + $0x1a4] sm:$0xff]  ;;  %v5169_v51 = vunpack.c.l.b16 %v4913_v29 }
 0x327   : > { %v4131_v28 = vadd.f32 %v3908_v40, %v3115_v31  ;;  %v9914_v16 = vpop.f32.mrf.mxu3  ;;  %v1426_v50 = vsel %vm1234_vm1, %v7392_v62, %v964_v48  ;;  %v3477_v10 = vsel %vm3372_vm4, %v11148_v32, %v3476_v26  ;;  %v966_v31 = vpop.permute.xlu1 %965  ;;  %v11149_v40 = vrot.slane %v8186_v61, 1 }
 0x328   : > { %v6214_v43 = vpack.c.b16 %v6052_v39, %v6052_v39  ;;  %v6215_v15 = vpack.c.b16 %v6053_v33, %v6053_v33  ;;  %6545 = vst.msk [vmem:[%s8328_s11 + $0x150] sm:$0x1] %vm6464_vm11, %v6216_v36  ;;  %v1651_v56 = vsel %vm1523_vm2, %v1426_v50, %v1169_v9  ;;  %v2080_v42 = vsel %vm1723_vm5, %v2076_v49, %v2079_v23  ;;  %v7393_v36 = vld [vmem:[%s7553_s7 + $0x1ac] sm:$0xff] }
 0x329   : > { %v4324_v41 = vsel %vm4194_vm6, %v4131_v28, 0.0  ;;  %v4521_v14 = vmul.f32 %v4131_v28, %v4131_v28  ;;  %v4914_v1 = vpack.c.bf16 %v4131_v28, %v4131_v28  ;;  %v1429_v29 = vsel %vm1234_vm1, %v7393_v36, %v966_v31 }
 0x32a   : > { %6543 = vst.msk [vmem:[%s8328_s11 + $0x148] sm:$0xf] %vm6459_vm10, %v6214_v43  ;;  %v4325_v20 = vadd.f32 %v4324_v41, %v4323_v52  ;;  %v2648_v58 = vpop.f32.mrf.mxu0  ;;  %v3512_v52 = vsel %vm3372_vm4, %v11149_v40, %v3511_v11  ;;  %v3513_v36 = vrot.slane %v8277_v37, 1 }
 0x32b   : > { %6544 = vst.msk [vmem:[%s8328_s11 + $0x14c] sm:$0xf] %vm6459_vm10, %v6215_v15  ;;  %v4713_v39 = vsel %vm4194_vm6, %v4521_v14, 0.0  ;;  %v5170_v33 = vunpack.c.l.b16 %v4914_v1  ;;  %7205 = vmatmul.msk.bf16.gmra.mxu2 %vm2277_vm3, %v3477_v10  ;;  %v3118_v26 = vadd.f32 %v3117_v21, %v2648_v58  ;;  %v1171_v15 = vpop.permute.xlu0 %1170  ;;  %v2083_v14 = vshll.u32 %v1651_v56, 16 }
 0x32c   : > { %v4714_v48 = vadd.f32 %v4713_v39, %v4712_v59  ;;  %7219 = vmatmul.msk.bf16.gmra.mxu3 %vm2277_vm3, %v3512_v52  ;;  %v9942_v50 = vsel %vm1523_vm2, %v1429_v29, %v1171_v15  ;;  %v2081_v10 = vshrl.u32 %v1651_v56, 16  ;;  %v3514_v29 = vrot.slane %v8319_v27, 1 }
 0x32d   : > { %v5265_v28 = vpack.c.b16 %v5170_v33, %v5169_v51  ;;  %7066 = vmatmul.msk.bf16.gmra.mxu0 %vm2277_vm3, %v2080_v42  ;;  %v3122_v43 = vpop.f32.mrf.mxu1  ;;  %v2085_v31 = vrot.slane %v2083_v14, 1  ;;  %v2087_v39 = vshll.u32 %v9942_v50, 16  ;;  %v3478_v42 = vrot.slane %v1651_v56, 1 }
 0x32e   : > { %v3911_v59 = vpop.f32.mrf.mxu2 }
 0x32f   : > { %v5539_v41 = vshrl.u32 %v5265_v28, 16  ;;  %v4132_v61 = vadd.f32 %v3911_v59, %v3118_v26  ;;  %v9939_v11 = vpop.f32.mrf.mxu3  ;;  %v5542_v21 = vshll.u32 %v5265_v28, 16  ;;  %v2086_v59 = vor.u32 %v2085_v31, %v2081_v10 }
 0x330   : > { %7135 = vmatmul.msk.bf16.gmra.mxu1 %vm2277_vm3, %v1651_v56 }
 0x331   : > { %v9945_v23 = vrot.slane %v5539_v41, 7  ;;  %v4326_v9 = vsel %vm4194_vm6, %v4132_v61, 0.0  ;;  %v4522_v49 = vmul.f32 %v4132_v61, %v4132_v61  ;;  %v2089_v41 = vrot.slane %v2087_v39, 1 }
 0x332   : > { %v4327_v1 = vadd.f32 %v4326_v9, %v4325_v20  ;;  %v2650_v62 = vpop.f32.mrf.mxu0  ;;  %v3479_v20 = vrot.slane %v9942_v50, 1 }
 0x333   : > { %v5544_v58 = vor.u32 %v5542_v21, %v9945_v23  ;;  %v4715_v32 = vsel %vm4194_vm6, %v4522_v49, 0.0  ;;  %v3120_v33 = vadd.f32 %v9911_v30, %v2650_v62  ;;  %v968_v62 = vpop.permute.xlu1 %967 }
 0x334   : > { %v4716_v51 = vadd.f32 %v4715_v32, %v4714_v48  ;;  %v4915_v48 = vpack.c.bf16 %v4132_v61, %v4132_v61  ;;  %v3480_v37 = vsel %vm3372_vm4, %v3478_v42, %v3479_v20  ;;  %v1432_v42 = vsel %vm1234_vm1, %v9436_v22, %v968_v62 }
 0x335   : > { %v9952_v40 = vpop.f32.mrf.mxu1  ;;  %v5860_v52 = vsel %vm8299_vm9, 4048220490, %v5544_v58 }
 0x336   : > { %v3913_v28 = vpop.f32.mrf.mxu2  ;;  %v6055_v26 = vunpack.c.l.b16 %v5860_v52  ;;  %v6056_v14 = vunpack.c.h.b16 %v5860_v52  ;;  %v5171_v61 = vunpack.c.l.b16 %v4915_v48 }
 0x337   : > { %v4133_v15 = vadd.f32 %v3913_v28, %v3120_v33  ;;  %v9959_v30 = vpop.f32.mrf.mxu3  ;;  %v3515_v33 = vsel %vm3372_vm4, %v3513_v36, %v3514_v29  ;;  %v1173_v28 = vpop.permute.xlu2 %1172 }
 0x338   : > { %v6217_v21 = vpack.c.b16 %v6055_v26, %v6055_v26  ;;  %v6218_v52 = vpack.c.b16 %v6056_v14, %v6056_v14 }
 0x339   : > { %v4328_v9 = vsel %vm4194_vm6, %v4133_v15, 0.0  ;;  %v4523_v56 = vmul.f32 %v4133_v15, %v4133_v15  ;;  %v4916_v49 = vpack.c.bf16 %v4133_v15, %v4133_v15 }
 0x33a   : > { %v4329_v58 = vadd.f32 %v4328_v9, %v4327_v1  ;;  %v2653_v32 = vpop.f32.mrf.mxu0  ;;  %6546 = vst.msk [vmem:[%s8328_s11 + $0x154] sm:$0xf] %vm6459_vm10, %v6217_v21  ;;  %v2090_v1 = vsel %vm1723_vm5, %v2086_v59, %v2089_v41  ;;  %v1655_v59 = vsel %vm1523_vm2, %v1432_v42, %v1173_v28  ;;  %v11150_v28 = vld [vmem:[#allocation8_spill] sm:$0xff] }
 0x33b   : > { %v4717_v10 = vsel %vm4194_vm6, %v4523_v56, 0.0  ;;  %v5172_v31 = vunpack.c.l.b16 %v4916_v49  ;;  %7206 = vmatmul.msk.bf16.gmra.mxu2 %vm2277_vm3, %v3480_v37  ;;  %v3123_v48 = vadd.f32 %v3122_v43, %v2653_v32  ;;  %6547 = vst.msk [vmem:[%s8328_s11 + $0x158] sm:$0xf] %vm6459_vm10, %v6218_v52  ;;  %v970_v32 = vpop.permute.xlu0 %969  ;;  %v2091_v37 = vshrl.u32 %v9942_v50, 16 }
 0x33c   : > { %v4718_v39 = vadd.f32 %v4717_v10, %v4716_v51  ;;  %7220 = vmatmul.msk.bf16.gmra.mxu3 %vm2277_vm3, %v3515_v33  ;;  %v3516_v33 = vrot.slane %v8400_v7, 1  ;;  %v3481_v52 = vrot.slane %v1655_v59, 1 }
 0x33d   : > { %v5266_v26 = vpack.c.b16 %v5172_v31, %v5171_v61  ;;  %7067 = vmatmul.msk.bf16.gmra.mxu0 %vm2277_vm3, %v2090_v1  ;;  %v9977_v15 = vpop.f32.mrf.mxu1  ;;  %v2094_v61 = vshll.u32 %v1655_v59, 16  ;;  %v3193_v1 = vadd.f32 %v9262_v24, %v8372_v12  ;;  %v7394_v24 = vld [vmem:[%s7553_s7 + $0x1b8] sm:$0xff]  ;;  %v2093_v59 = vor.u32 %v2091_v37, %v2089_v41 }
 0x33e   : > { %v3916_v51 = vpop.f32.mrf.mxu2 }
 0x33f   : > { %v5546_v21 = vshrl.u32 %v5266_v26, 16  ;;  %v9981_v36 = vadd.f32 %v3916_v51, %v3123_v48  ;;  %v3986_v14 = vpop.f32.mrf.mxu3  ;;  %v5549_v43 = vshll.u32 %v5266_v26, 16  ;;  %v3195_v26 = vadd.f32 %v9281_v35, %v11150_v28 }
 0x340   : > { %7136 = vmatmul.msk.bf16.gmra.mxu1 %vm2277_vm3, %v9942_v50  ;;  %v1435_v35 = vsel %vm1234_vm1, %v7394_v24, %v970_v32 }
 0x341   : > { %v5548_v22 = vrot.slane %v5546_v21, 7  ;;  %v4330_v9 = vsel %vm4194_vm6, %v9981_v36, 0.0  ;;  %v4524_v56 = vmul.f32 %v9981_v36, %v9981_v36  ;;  %v972_v21 = vpop.permute.xlu1 %971 }
 0x342   : > { %v4331_v49 = vadd.f32 %v4330_v9, %v4329_v58  ;;  %v2655_v62 = vpop.f32.mrf.mxu0 }
 0x343   : > { %v5551_v10 = vor.u32 %v5549_v43, %v5548_v22  ;;  %v4719_v31 = vsel %vm4194_vm6, %v4524_v56, 0.0  ;;  %v3125_v48 = vadd.f32 %v9952_v40, %v2655_v62  ;;  %v5892_v43 = vsel %vm8299_vm9, %v5548_v22, 4048220490  ;;  %v1177_v24 = vpop.permute.xlu0 %1176 }
 0x344   : > { %v4720_v42 = vadd.f32 %v4719_v31, %v4718_v39  ;;  %v10004_v56 = vadd.f32 %v3986_v14, %v3193_v1  ;;  %v1175_v39 = vpop.permute.xlu2 %1174  ;;  %v6059_v40 = vunpack.c.l.b16 %v5892_v43  ;;  %v3482_v22 = vsel %vm3372_vm4, %v3479_v20, %v3481_v52 }
 0x345   : > { %v5552_v58 = vsel %vm5297_vm7, %v9945_v23, %v5551_v10  ;;  %v10000_v51 = vpop.f32.mrf.mxu1  ;;  %v2096_v23 = vrot.slane %v2094_v61, 1  ;;  %v10015_v32 = vsel %vm1523_vm2, %v1435_v35, %v1175_v39  ;;  %v3517_v52 = vsel %vm3372_vm4, %v3514_v29, %v3516_v33 }
 0x346   : > { %v6057_v7 = vunpack.c.l.b16 %v5552_v58  ;;  %v6058_v9 = vunpack.c.h.b16 %v5552_v58  ;;  %v3918_v12 = vpop.f32.mrf.mxu2  ;;  %v4945_v41 = vpack.c.bf16 %v10004_v56, %v10004_v56  ;;  %v4917_v43 = vpack.c.bf16 %v9981_v36, %v9981_v36 }
 0x347   : > { %v4135_v10 = vadd.f32 %v3918_v12, %v3125_v48  ;;  %v3988_v28 = vpop.f32.mrf.mxu3  ;;  %v6221_v48 = vpack.c.b16 %v6059_v40, %v6059_v40  ;;  %v2100_v27 = vshll.u32 %v10015_v32, 16  ;;  %v3518_v36 = vrot.slane %v8447_v4, 1 }
 0x348   : > { %v6219_v62 = vpack.c.b16 %v6057_v7, %v6057_v7  ;;  %v6220_v31 = vpack.c.b16 %v6058_v9, %v6058_v9  ;;  %v10012_v58 = vadd.f32 %v3988_v28, %v3195_v26  ;;  %v2097_v26 = vsel %vm1723_vm5, %v2093_v59, %v2096_v23  ;;  %v7395_v9 = vld [vmem:[%s7553_s7 + $0x1c0] sm:$0xff] }
 0x349   : > { %v4332_v14 = vsel %vm4194_vm6, %v4135_v10, 0.0  ;;  %v4525_v1 = vmul.f32 %v4135_v10, %v4135_v10  ;;  %v4918_v61 = vpack.c.bf16 %v4135_v10, %v4135_v10  ;;  %v1438_v12 = vsel %vm1234_vm1, %v7395_v9, %v972_v21  ;;  %6550 = vst.msk [vmem:[%s8328_s11 + $0x164] sm:$0x1] %vm6464_vm11, %v6221_v48  ;;  %v11151_v23 = vld [vmem:[#allocation12_spill] sm:$0xff] }
 0x34a   : > { %6548 = vst.msk [vmem:[%s8328_s11 + $0x15c] sm:$0xf] %vm6459_vm10, %v6219_v62  ;;  %v4333_v37 = vadd.f32 %v4332_v14, %v4331_v49  ;;  %v2658_v50 = vpop.f32.mrf.mxu0  ;;  %v4946_v49 = vpack.c.bf16 %v10012_v58, %v10012_v58  ;;  %v5201_v33 = vunpack.c.l.b16 %v4945_v41  ;;  %v3519_v21 = vrot.slane %v8481_v53, 1  ;;  %v974_v62 = vpop.permute.xlu1 %973 }
 0x34b   : > { %6549 = vst.msk [vmem:[%s8328_s11 + $0x160] sm:$0xf] %vm6459_vm10, %v6220_v31  ;;  %v4721_v20 = vsel %vm4194_vm6, %v4525_v1, 0.0  ;;  %7207 = vmatmul.msk.bf16.gmra.mxu2 %vm2277_vm3, %v3482_v22  ;;  %v3128_v35 = vadd.f32 %v9977_v15, %v2658_v50  ;;  %v3521_v10 = vrot.slane %v11151_v23, 1  ;;  %v10047_v15 = vsel %vm1523_vm2, %v1438_v12, %v1177_v24  ;;  %v11153_v23 = vld [vmem:[#allocation10_spill] sm:$0xff] }
 0x34c   : > { %v4722_v7 = vadd.f32 %v4721_v20, %v4720_v42  ;;  %7221 = vmatmul.msk.bf16.gmra.mxu3 %vm2277_vm3, %v3517_v52  ;;  %v5174_v42 = vunpack.c.l.b16 %v4918_v61  ;;  %v5202_v39 = vunpack.c.l.b16 %v4946_v49  ;;  %v5173_v31 = vunpack.c.l.b16 %v4917_v43  ;;  %v1179_v52 = vpop.permute.xlu2 %1178 }
 0x34d   : > { %7068 = vmatmul.msk.bf16.gmra.mxu0 %vm2277_vm3, %v2097_v26  ;;  %v10041_v29 = vpop.f32.mrf.mxu1  ;;  %v2098_v4 = vshrl.u32 %v10015_v32, 16  ;;  %v2102_v14 = vrot.slane %v2100_v27, 1  ;;  %v2104_v50 = vshll.u32 %v10047_v15, 16  ;;  %v1441_v20 = vsel %vm1234_vm1, %v9530_v3, %v974_v62  ;;  %v11152_v26 = vld [vmem:[#allocation9_spill] sm:$0xff]  ;;  %v11154_v62 = vld [vmem:[#allocation11_spill] sm:$0xff] }
 0x34e   : > { %v3921_v59 = vpop.f32.mrf.mxu2  ;;  %v10049_v28 = vpack.c.b16 %v5202_v39, %v5201_v33  ;;  %v10055_v41 = vpack.c.b16 %v5174_v42, %v5173_v31  ;;  %v3198_v43 = vadd.f32 %v9306_v54, %v11152_v26  ;;  %v3520_v9 = vsel %vm3372_vm4, %v3518_v36, %v3519_v21 }
 0x34f   : > { %v4136_v40 = vadd.f32 %v3921_v59, %v3128_v35  ;;  %v3991_v22 = vpop.f32.mrf.mxu3  ;;  %v10065_v12 = vsel %vm3372_vm4, %v3519_v21, %v3521_v10  ;;  %v3483_v24 = vrot.slane %v10015_v32, 1  ;;  %v2108_v35 = vshrl.u32 %v10047_v15, 16 }
 0x350   : > { %7137 = vmatmul.msk.bf16.gmra.mxu1 %vm2277_vm3, %v10015_v32  ;;  %v3484_v27 = vrot.slane %v10047_v15, 1  ;;  %v3523_v3 = vrot.slane %v8589_v57, 1  ;;  %v3524_v33 = vrot.slane %v8622_v2, 1  ;;  %v1661_v36 = vsel %vm1523_vm2, %v1441_v20, %v1179_v52 }
 0x351   : > { %v4334_v1 = vsel %vm4194_vm6, %v4136_v40, 0.0  ;;  %v4526_v53 = vmul.f32 %v4136_v40, %v4136_v40  ;;  %v5554_v39 = vshrl.u32 %v10055_v41, 16  ;;  %v2103_v59 = vor.u32 %v2102_v14, %v2098_v4 }
 0x352   : > { %v4335_v61 = vadd.f32 %v4334_v1, %v4333_v37  ;;  %v2660_v48 = vpop.f32.mrf.mxu0  ;;  %v10077_v21 = vadd.f32 %v3991_v22, %v3198_v43  ;;  %v2106_v32 = vrot.slane %v2104_v50, 1  ;;  %v3200_v10 = vadd.f32 %v9329_v63, %v11153_v23 }
 0x353   : > { %v4723_v49 = vsel %vm4194_vm6, %v4526_v53, 0.0  ;;  %v3130_v54 = vadd.f32 %v10000_v51, %v2660_v48  ;;  %v10083_v31 = vadd.f32 %v9358_v38, %v11154_v62  ;;  %v4919_v1 = vpack.c.bf16 %v4136_v40, %v4136_v40  ;;  %v976_v53 = vpop.permute.xlu0 %975 }
 0x354   : > { %v4724_v37 = vadd.f32 %v4723_v49, %v4722_v7  ;;  %v5659_v48 = vshrl.u32 %v10049_v28, 16  ;;  %v2110_v20 = vor.u32 %v2108_v35, %v2106_v32  ;;  %v2111_v52 = vshll.u32 %v1661_v36, 16 }
 0x355   : > { %v10073_v42 = vpop.f32.mrf.mxu1  ;;  %v3485_v22 = vsel %vm3372_vm4, %v3483_v24, %v3484_v27  ;;  %v5556_v63 = vrot.slane %v5554_v39, 7  ;;  %v4947_v38 = vpack.c.bf16 %v10077_v21, %v10077_v21  ;;  %v3486_v35 = vrot.slane %v1661_v36, 1 }
 0x356   : > { %v3923_v7 = vpop.f32.mrf.mxu2  ;;  %v5557_v62 = vshll.u32 %v10055_v41, 16 }
 0x357   : > { %v4137_v51 = vadd.f32 %v3923_v7, %v3130_v54  ;;  %v3993_v26 = vpop.f32.mrf.mxu3  ;;  %v2107_v54 = vsel %vm1723_vm5, %v2103_v59, %v2106_v32  ;;  %v5175_v7 = vunpack.c.l.b16 %v4919_v1  ;;  %v7396_v32 = vld [vmem:[%s7553_s7 + $0x1cc] sm:$0xff]  ;;  %v1181_v1 = vpop.permute.xlu2 %1180 }
 0x358   : > { %v10088_v43 = vadd.f32 %v3993_v26, %v3200_v10  ;;  %v10096_v10 = vrot.slane %v5659_v48, 7  ;;  %v2113_v26 = vrot.slane %v2111_v52, 1  ;;  %v1444_v41 = vsel %vm1234_vm1, %v7396_v32, %v976_v53  ;;  %v7397_v53 = vld [vmem:[%s7553_s7 + $0x1d4] sm:$0xff]  ;;  %s7229_s7 = sshll.u32 %s7516_s2, 1  ;;  %s6637_s2 = scalar_lea.sflag [#allocation3], %s223_s28 }
 0x359   : > { %v4336_v4 = vsel %vm4194_vm6, %v4137_v51, 0.0  ;;  %v4527_v14 = vmul.f32 %v4137_v51, %v4137_v51  ;;  %v4920_v50 = vpack.c.bf16 %v4137_v51, %v4137_v51  ;;  %v5662_v48 = vshll.u32 %v10049_v28, 16  ;;  %s6650_s12 = scalar_lea.hbm %s11030_s5, %s7229_s7 }
 0x35a   : > { %v4337_v40 = vadd.f32 %v4336_v4, %v4335_v61  ;;  %v2663_v49 = vpop.f32.mrf.mxu0  ;;  %v4948_v51 = vpack.c.bf16 %v10088_v43, %v10088_v43  ;;  %v978_v61 = vpop.permute.xlu1 %977  ;;  %s6654_s15 = sshll.u32 %s6650_s12, 4  ;;  %s6655_s15 = int_to_ptr.hbm [resolvable:$true] %s6654_s15 }
 0x35b   : > { %v4725_v23 = vsel %vm4194_vm6, %v4527_v14, 0.0  ;;  %v5176_v24 = vunpack.c.l.b16 %v4920_v50  ;;  %7208 = vmatmul.msk.bf16.gmra.mxu2 %vm2277_vm3, %v3485_v22  ;;  %v3133_v59 = vadd.f32 %v10041_v29, %v2663_v49  ;;  %v5203_v22 = vunpack.c.l.b16 %v4947_v38  ;;  %v11155_v50 = vld [vmem:[#allocation13_spill] sm:$0xff]  ;;  %v1183_v32 = vpop.permute.xlu0 %1182  ;;  %s7412_s16 = sshra.s32 %s6655_s15, 4  ;;  %s7413_s16 = int_to_ptr.hbm [resolvable:$true] %s7412_s16 }
 0x35c   : > { %v4726_v39 = vadd.f32 %v4725_v23, %v4724_v37  ;;  %7222 = vmatmul.msk.bf16.gmra.mxu3 %vm2277_vm3, %v3520_v9  ;;  %v5559_v37 = vor.u32 %v5557_v62, %v5556_v63  ;;  %v5204_v14 = vunpack.c.l.b16 %v4948_v51  ;;  %v3205_v29 = vadd.f32 %v9376_v55, %v11155_v50  ;;  %s7414_s17 = scalar_lea.hbm %s7413_s16, 2  ;;  %p7419_p0 = scmp.lt.s32.totalorder %s7413_s16, %s11030_s5 }
 0x35d   : > { %v5268_v4 = vpack.c.b16 %v5176_v24, %v5175_v7  ;;  %7069 = vmatmul.msk.bf16.gmra.mxu0 %vm2277_vm3, %v2107_v54  ;;  %v10103_v36 = vpop.f32.mrf.mxu1  ;;  %v3487_v54 = vsel %vm3372_vm4, %v3484_v27, %v3486_v35  ;;  %v5664_v7 = vor.u32 %v5662_v48, %v10096_v10  ;;  %v1447_v28 = vsel %vm1234_vm1, %v7397_v53, %v978_v61  ;;  %p7415_p11 = scmp.ne.s32.totalorder %s7413_s16, %s7414_s17  ;;  %p7420_p1 = scmp.lt.s32.totalorder %s7418_s24, %s7414_s17 }
 0x35e   : > { %v3926_v52 = vpop.f32.mrf.mxu2  ;;  %v5282_v23 = vpack.c.b16 %v5204_v14, %v5203_v22  ;;  %v10117_v38 = vsel %vm1523_vm2, %v1444_v41, %v1181_v1  ;;  %v2114_v22 = vsel %vm1723_vm5, %v2110_v20, %v2113_v26 }
 0x35f   : > { %v5561_v49 = vshrl.u32 %v5268_v4, 16  ;;  %v4138_v9 = vadd.f32 %v3926_v52, %v3133_v59  ;;  %v3996_v24 = vpop.f32.mrf.mxu3  ;;  %v5564_v51 = vshll.u32 %v5268_v4, 16  ;;  %v2117_v4 = vshll.u32 %v10117_v38, 16  ;;  %p7416_p12 = pnand %p7415_p11, %p7533_p5  ;;  %p7421_p2 = por %p7420_p1, %p7419_p0 }
 0x360   : > { %7138 = vmatmul.msk.bf16.gmra.mxu1 %vm2277_vm3, %v10047_v15  ;;  %v5666_v27 = vshrl.u32 %v5282_v23, 16  ;;  %v5861_v15 = vsel %vm8299_vm9, 4048220490, %v5559_v37  ;;  %v10125_v41 = vadd.f32 %v3996_v24, %v10083_v31  ;;  %v5669_v52 = vshll.u32 %v5282_v23, 16 }
 0x361   : > { %v5563_v62 = vrot.slane %v5561_v49, 7  ;;  %v4338_v55 = vsel %vm4194_vm6, %v4138_v9, 0.0  ;;  %v4528_v59 = vmul.f32 %v4138_v9, %v4138_v9  ;;  %v10129_v49 = vsel %vm1523_vm2, %v1447_v28, %v1183_v32  ;;  %p7417_p13 = pneg %p7416_p12 }
 0x362   : > { %v4339_v35 = vadd.f32 %v4338_v55, %v4337_v40  ;;  %v2665_v48 = vpop.f32.mrf.mxu0  ;;  %v5668_v1 = vrot.slane %v5666_v27, 7  ;;  %v5868_v37 = vsel %vm8299_vm9, 4048220490, %v5664_v7  ;;  %v6060_v53 = vunpack.c.l.b16 %v5861_v15 }
 0x363   : > { %v5566_v14 = vor.u32 %v5564_v51, %v5563_v62  ;;  %v4727_v61 = vsel %vm4194_vm6, %v4528_v59, 0.0  ;;  %v3135_v20 = vadd.f32 %v10073_v42, %v2665_v48  ;;  %v4921_v55 = vpack.c.bf16 %v4138_v9, %v4138_v9  ;;  %p7422_p3 = pnand %p7421_p2, %p7417_p13 }
 0x364   : > { %v4728_v50 = vadd.f32 %v4727_v61, %v4726_v39  ;;  %v5671_v51 = vor.u32 %v5669_v52, %v5668_v1  ;;  %v4949_v39 = vpack.c.bf16 %v10125_v41, %v10125_v41  ;;  %v5900_v42 = vsel %vm8299_vm9, %v5668_v1, 4048220490 }
 0x365   : > { %v5567_v40 = vsel %vm5297_vm7, %v5556_v63, %v5566_v14  ;;  %v10133_v26 = vpop.f32.mrf.mxu1  ;;  %v5893_v63 = vsel %vm8299_vm9, %v5563_v62, 4048220490  ;;  %v6061_v48 = vunpack.c.h.b16 %v5861_v15 }
 0x366   : > { %v6062_v31 = vunpack.c.l.b16 %v5567_v40  ;;  %v6063_v24 = vunpack.c.h.b16 %v5567_v40  ;;  %v3928_v23 = vpop.f32.mrf.mxu2  ;;  %v5672_v32 = vsel %vm5297_vm7, %v10096_v10, %v5671_v51  ;;  %v6095_v51 = vunpack.c.l.b16 %v5868_v37 }
 0x367   : > { %v4139_v28 = vadd.f32 %v3928_v23, %v3135_v20  ;;  %v3998_v27 = vpop.f32.mrf.mxu3  ;;  %v6097_v9 = vunpack.c.l.b16 %v5672_v32  ;;  %v6098_v14 = vunpack.c.h.b16 %v5672_v32  ;;  %v5177_v23 = vunpack.c.l.b16 %v4921_v55 }
 0x368   : > { %v6224_v59 = vpack.c.b16 %v6062_v31, %v6062_v31  ;;  %v6225_v7 = vpack.c.b16 %v6063_v24, %v6063_v24  ;;  %v10148_v20 = vadd.f32 %v3998_v27, %v3205_v29  ;;  %v6064_v31 = vunpack.c.l.b16 %v5893_v63 }
 0x369   : > { %v4340_v61 = vsel %vm4194_vm6, %v4139_v28, 0.0  ;;  %v4529_v52 = vmul.f32 %v4139_v28, %v4139_v28  ;;  %v4922_v40 = vpack.c.bf16 %v4139_v28, %v4139_v28  ;;  %v6259_v24 = vpack.c.b16 %v6097_v9, %v6097_v9 }
 0x36a   : > { %6553 = vst.msk [vmem:[%s8328_s11 + $0x170] sm:$0xf] %vm6459_vm10, %v6224_v59  ;;  %v4341_v62 = vadd.f32 %v4340_v61, %v4339_v35  ;;  %v2668_v1 = vpop.f32.mrf.mxu0  ;;  %v6260_v10 = vpack.c.b16 %v6098_v14, %v6098_v14  ;;  %v4950_v29 = vpack.c.bf16 %v10148_v20, %v10148_v20  ;;  %v6099_v63 = vunpack.c.l.b16 %v5900_v42 }
 0x36b   : > { %6554 = vst.msk [vmem:[%s8328_s11 + $0x174] sm:$0xf] %vm6459_vm10, %v6225_v7  ;;  %v4729_v15 = vsel %vm4194_vm6, %v4529_v52, 0.0  ;;  %7209 = vmatmul.msk.bf16.gmra.mxu2 %vm2277_vm3, %v3487_v54  ;;  %v5178_v59 = vunpack.c.l.b16 %v4922_v40  ;;  %v3138_v35 = vadd.f32 %v10103_v36, %v2668_v1  ;;  %v6096_v54 = vunpack.c.h.b16 %v5868_v37  ;;  %v11157_v40 = vld [vmem:[#allocation43_spill] sm:$0xff] }
 0x36c   : > { %v4730_v32 = vadd.f32 %v4729_v15, %v4728_v50  ;;  %6588 = vst.msk [vmem:[%s8328_s11 + $0x1fc] sm:$0xf] %vm6459_vm10, %v6259_v24  ;;  %7223 = vmatmul.msk.bf16.gmra.mxu3 %vm2277_vm3, %v10065_v12  ;;  %v6222_v55 = vpack.c.b16 %v6060_v53, %v6060_v53  ;;  %v5205_v50 = vunpack.c.l.b16 %v4949_v39  ;;  %v6223_v27 = vpack.c.b16 %v6061_v48, %v6061_v48 }
 0x36d   : > { %7070 = vmatmul.msk.bf16.gmra.mxu0 %vm2277_vm3, %v2114_v22  ;;  %v10162_v28 = vpop.f32.mrf.mxu1  ;;  %6589 = vst.msk [vmem:[%s8328_s11 + $0x200] sm:$0xf] %vm6459_vm10, %v6260_v10  ;;  %v5269_v36 = vpack.c.b16 %v5178_v59, %v5177_v23  ;;  %v6226_v9 = vpack.c.b16 %v6064_v31, %v6064_v31  ;;  %v5206_v14 = vunpack.c.l.b16 %v4950_v29  ;;  %v6257_v12 = vpack.c.b16 %v6095_v51, %v6095_v51  ;;  %v11156_v22 = vld [vmem:[#allocation14_spill] sm:$0xff] }
 0x36e   : > { %v3931_v7 = vpop.f32.mrf.mxu2  ;;  %v6258_v52 = vpack.c.b16 %v6096_v54, %v6096_v54  ;;  %6551 = vst.msk [vmem:[%s8328_s11 + $0x168] sm:$0xf] %vm6459_vm10, %v6222_v55  ;;  %v3208_v37 = vadd.f32 %v11157_v40, %v11156_v22  ;;  %v2115_v53 = vshrl.u32 %v10117_v38, 16  ;;  %v6261_v48 = vpack.c.b16 %v6099_v63, %v6099_v63 }
 0x36f   : > { %v4140_v61 = vadd.f32 %v3931_v7, %v3138_v35  ;;  %v5569_v42 = vshrl.u32 %v5269_v36, 16  ;;  %v4001_v39 = vpop.f32.mrf.mxu3  ;;  %6552 = vst.msk [vmem:[%s8328_s11 + $0x16c] sm:$0xf] %vm6459_vm10, %v6223_v27  ;;  %v5283_v1 = vpack.c.b16 %v5206_v14, %v5205_v50  ;;  %v2119_v31 = vrot.slane %v2117_v4, 1  ;;  %v11158_v14 = vld [vmem:[#allocation15_spill] sm:$0xff] }
 0x370   : > { %7139 = vmatmul.msk.bf16.gmra.mxu1 %vm2277_vm3, %v10117_v38  ;;  %6555 = vst.msk [vmem:[%s8328_s11 + $0x178] sm:$0x1] %vm6464_vm11, %v6226_v9  ;;  %v5572_v51 = vshll.u32 %v5269_v36, 16  ;;  %v2121_v59 = vshll.u32 %v10129_v49, 16  ;;  %v3488_v54 = vrot.slane %v10117_v38, 1  ;;  %v10190_v50 = vadd.f32 %v4001_v39, %v3208_v37  ;;  %v980_v9 = vpop.permute.xlu1 %979 }
 0x371   : > { %v4342_v24 = vsel %vm4194_vm6, %v4140_v61, 0.0  ;;  %v4530_v10 = vmul.f32 %v4140_v61, %v4140_v61  ;;  %v10180_v15 = vrot.slane %v5569_v42, 7  ;;  %6586 = vst.msk [vmem:[%s8328_s11 + $0x1f4] sm:$0xf] %vm6459_vm10, %v6257_v12  ;;  %v5674_v29 = vshrl.u32 %v5283_v1, 16  ;;  %v11159_v12 = vld [vmem:[#allocation44_spill] sm:$0xff] }
 0x372   : > { %v4343_v23 = vadd.f32 %v4342_v24, %v4341_v62  ;;  %v2670_v35 = vpop.f32.mrf.mxu0  ;;  %6587 = vst.msk [vmem:[%s8328_s11 + $0x1f8] sm:$0xf] %vm6459_vm10, %v6258_v52  ;;  %v3489_v36 = vrot.slane %v10129_v49, 1  ;;  %v5677_v7 = vshll.u32 %v5283_v1, 16  ;;  %v3210_v52 = vadd.f32 %v11159_v12, %v11158_v14  ;;  %v1185_v24 = vpop.permute.xlu2 %1184 }
 0x373   : > { %v4731_v4 = vsel %vm4194_vm6, %v4530_v10, 0.0  ;;  %v5574_v63 = vor.u32 %v5572_v51, %v10180_v15  ;;  %6590 = vst.msk [vmem:[%s8328_s11 + $0x204] sm:$0x1] %vm6464_vm11, %v6261_v48  ;;  %v10195_v62 = vrot.slane %v5674_v29, 7  ;;  %v3140_v27 = vadd.f32 %v10133_v26, %v2670_v35 }
 0x374   : > { %v4732_v55 = vadd.f32 %v4731_v4, %v4730_v32  ;;  %v3525_v32 = vsel %vm3372_vm4, %v3523_v3, %v3524_v33  ;;  %v2120_v22 = vor.u32 %v2119_v31, %v2115_v53  ;;  %v10207_v40 = vrot.slane %v2121_v59, 1 }
 0x375   : > { %v10198_v38 = vpop.f32.mrf.mxu1  ;;  %v5862_v42 = vsel %vm8299_vm9, 4048220490, %v5574_v63  ;;  %v5679_v26 = vor.u32 %v5677_v7, %v10195_v62  ;;  %v4923_v39 = vpack.c.bf16 %v4140_v61, %v4140_v61  ;;  %v4951_v57 = vpack.c.bf16 %v10190_v50, %v10190_v50 }
 0x376   : > { %v3933_v37 = vpop.f32.mrf.mxu2  ;;  %v6065_v1 = vunpack.c.l.b16 %v5862_v42  ;;  %v1450_v3 = vsel %vm1234_vm1, %v9629_v19, %v980_v9  ;;  %v3490_v53 = vsel %vm3372_vm4, %v3488_v54, %v3489_v36  ;;  %v6066_v31 = vunpack.c.h.b16 %v5862_v42 }
 0x377   : > { %v4141_v48 = vadd.f32 %v3933_v37, %v3140_v27  ;;  %v4003_v10 = vpop.f32.mrf.mxu3  ;;  %v5869_v63 = vsel %vm8299_vm9, 4048220490, %v5679_v26  ;;  %v5179_v27 = vunpack.c.l.b16 %v4923_v39  ;;  %v1667_v9 = vsel %vm1523_vm2, %v1450_v3, %v1185_v24 }
 0x378   : > { %v10220_v61 = vadd.f32 %v4003_v10, %v3210_v52  ;;  %v6227_v19 = vpack.c.b16 %v6065_v1, %v6065_v1  ;;  %v6228_v7 = vpack.c.b16 %v6066_v31, %v6066_v31  ;;  %v6100_v37 = vunpack.c.l.b16 %v5869_v63 }
 0x379   : > { %v4344_v51 = vsel %vm4194_vm6, %v4141_v48, 0.0  ;;  %v4531_v59 = vmul.f32 %v4141_v48, %v4141_v48  ;;  %v4924_v35 = vpack.c.bf16 %v4141_v48, %v4141_v48  ;;  %v6101_v48 = vunpack.c.h.b16 %v5869_v63 }
 0x37a   : > { %v4345_v29 = vadd.f32 %v4344_v51, %v4343_v23  ;;  %v2673_v4 = vpop.f32.mrf.mxu0  ;;  %v4952_v52 = vpack.c.bf16 %v10220_v61, %v10220_v61  ;;  %v2124_v23 = vsel %vm1723_vm5, %v2120_v22, %v10207_v40  ;;  %6556 = vst.msk [vmem:[%s8328_s11 + $0x17c] sm:$0xf] %vm6459_vm10, %v6227_v19  ;;  %v5207_v3 = vunpack.c.l.b16 %v4951_v57 }
 0x37b   : > { %v4733_v54 = vsel %vm4194_vm6, %v4531_v59, 0.0  ;;  %v5180_v14 = vunpack.c.l.b16 %v4924_v35  ;;  %7210 = vmatmul.msk.bf16.gmra.mxu2 %vm2277_vm3, %v3490_v53  ;;  %v3143_v26 = vadd.f32 %v10162_v28, %v2673_v4  ;;  %6557 = vst.msk [vmem:[%s8328_s11 + $0x180] sm:$0xf] %vm6459_vm10, %v6228_v7  ;;  %v6262_v10 = vpack.c.b16 %v6100_v37, %v6100_v37 }
 0x37c   : > { %v4734_v12 = vadd.f32 %v4733_v54, %v4732_v55  ;;  %7224 = vmatmul.msk.bf16.gmra.mxu3 %vm2277_vm3, %v3525_v32  ;;  %v11160_v55 = vld [vmem:[#allocation17_spill] sm:$0xff]  ;;  %v5208_v22 = vunpack.c.l.b16 %v4952_v52  ;;  %v2125_v53 = vshrl.u32 %v10129_v49, 16  ;;  %v6263_v32 = vpack.c.b16 %v6101_v48, %v6101_v48 }
 0x37d   : > { %v5270_v42 = vpack.c.b16 %v5180_v14, %v5179_v27  ;;  %7071 = vmatmul.msk.bf16.gmra.mxu0 %vm2277_vm3, %v2124_v23  ;;  %v10236_v39 = vpop.f32.mrf.mxu1  ;;  %v3526_v1 = vrot.slane %v11160_v55, 1  ;;  %v2128_v51 = vshll.u32 %v1667_v9, 16  ;;  %v3491_v59 = vrot.slane %v1667_v9, 1  ;;  %6591 = vst.msk [vmem:[%s8328_s11 + $0x208] sm:$0xf] %vm6459_vm10, %v6262_v10  ;;  %v11161_v27 = vld [vmem:[#allocation16_spill] sm:$0xff] }
 0x37e   : > { %v3936_v24 = vpop.f32.mrf.mxu2  ;;  %v5284_v35 = vpack.c.b16 %v5208_v22, %v5207_v3  ;;  %6592 = vst.msk [vmem:[%s8328_s11 + $0x20c] sm:$0xf] %vm6459_vm10, %v6263_v32  ;;  %v11162_v54 = vld [vmem:[#allocation45_spill] sm:$0xff] }
 0x37f   : > { %v5576_v28 = vshrl.u32 %v5270_v42, 16  ;;  %v4142_v31 = vadd.f32 %v3936_v24, %v3143_v26  ;;  %v4006_v4 = vpop.f32.mrf.mxu3  ;;  %v5579_v57 = vshll.u32 %v5270_v42, 16  ;;  %v3213_v14 = vadd.f32 %v11162_v54, %v11161_v27  ;;  %v11163_v26 = vld [vmem:[#allocation18_spill] sm:$0xff] }
 0x380   : > { %7140 = vmatmul.msk.bf16.gmra.mxu1 %vm2277_vm3, %v10129_v49  ;;  %v5681_v52 = vshrl.u32 %v5284_v35, 16  ;;  %v3527_v37 = vsel %vm3372_vm4, %v3524_v33, %v3526_v1  ;;  %v3215_v48 = vadd.f32 %v9470_v13, %v11163_v26  ;;  %v2127_v42 = vor.u32 %v2125_v53, %v10207_v40 }
 0x381   : > { %v5578_v63 = vrot.slane %v5576_v28, 7  ;;  %v4346_v19 = vsel %vm4194_vm6, %v4142_v31, 0.0  ;;  %v4532_v7 = vmul.f32 %v4142_v31, %v4142_v31  ;;  %v2130_v22 = vrot.slane %v2128_v51, 1 }
 0x382   : > { %v4347_v23 = vadd.f32 %v4346_v19, %v4345_v29  ;;  %v2675_v9 = vpop.f32.mrf.mxu0  ;;  %v5683_v24 = vrot.slane %v5681_v52, 7  ;;  %v5684_v10 = vshll.u32 %v5284_v35, 16  ;;  %v3492_v13 = vsel %vm3372_vm4, %v3489_v36, %v3491_v59 }
 0x383   : > { %v5581_v55 = vor.u32 %v5579_v57, %v5578_v63  ;;  %v4735_v3 = vsel %vm4194_vm6, %v4532_v7, 0.0  ;;  %v3145_v32 = vadd.f32 %v10198_v38, %v2675_v9  ;;  %v5894_v33 = vsel %vm8299_vm9, %v5578_v63, 4048220490 }
 0x384   : > { %v4736_v28 = vadd.f32 %v4735_v3, %v4734_v12  ;;  %v5686_v53 = vor.u32 %v5684_v10, %v5683_v24  ;;  %v4925_v51 = vpack.c.bf16 %v4142_v31, %v4142_v31  ;;  %v10268_v35 = vadd.f32 %v4006_v4, %v3213_v14 }
 0x385   : > { %v5582_v29 = vsel %vm5297_vm7, %v10180_v15, %v5581_v55  ;;  %v10261_v2 = vpop.f32.mrf.mxu1  ;;  %v5901_v38 = vsel %vm8299_vm9, %v5683_v24, 4048220490  ;;  %v6069_v57 = vunpack.c.l.b16 %v5894_v33 }
 0x386   : > { %v6067_v40 = vunpack.c.l.b16 %v5582_v29  ;;  %v6068_v1 = vunpack.c.h.b16 %v5582_v29  ;;  %v3938_v12 = vpop.f32.mrf.mxu2  ;;  %v5687_v36 = vsel %vm5297_vm7, %v10195_v62, %v5686_v53  ;;  %v6104_v63 = vunpack.c.l.b16 %v5901_v38 }
 0x387   : > { %v4143_v15 = vadd.f32 %v3938_v12, %v3145_v32  ;;  %v4008_v59 = vpop.f32.mrf.mxu3  ;;  %v6102_v7 = vunpack.c.l.b16 %v5687_v36  ;;  %v6103_v27 = vunpack.c.h.b16 %v5687_v36  ;;  %v6231_v26 = vpack.c.b16 %v6069_v57, %v6069_v57  ;;  %v11165_v57 = vld [vmem:[#allocation46_spill] sm:$0xff] }
 0x388   : > { %v6229_v49 = vpack.c.b16 %v6067_v40, %v6067_v40  ;;  %v6230_v19 = vpack.c.b16 %v6068_v1, %v6068_v1  ;;  %v10277_v52 = vadd.f32 %v4008_v59, %v3215_v48  ;;  %v4953_v3 = vpack.c.bf16 %v10268_v35, %v10268_v35 }
 0x389   : > { %v4348_v31 = vsel %vm4194_vm6, %v4143_v15, 0.0  ;;  %v4533_v54 = vmul.f32 %v4143_v15, %v4143_v15  ;;  %v4926_v14 = vpack.c.bf16 %v4143_v15, %v4143_v15  ;;  %v6264_v62 = vpack.c.b16 %v6102_v7, %v6102_v7  ;;  %6560 = vst.msk [vmem:[%s8328_s11 + $0x18c] sm:$0x1] %vm6464_vm11, %v6231_v26 }
 0x38a   : > { %6558 = vst.msk [vmem:[%s8328_s11 + $0x184] sm:$0xf] %vm6459_vm10, %v6229_v49  ;;  %v4349_v4 = vadd.f32 %v4348_v31, %v4347_v23  ;;  %v2678_v9 = vpop.f32.mrf.mxu0  ;;  %v6265_v55 = vpack.c.b16 %v6103_v27, %v6103_v27  ;;  %v5181_v10 = vunpack.c.l.b16 %v4925_v51  ;;  %v2131_v48 = vsel %vm1723_vm5, %v2127_v42, %v2130_v22 }
 0x38b   : > { %6559 = vst.msk [vmem:[%s8328_s11 + $0x188] sm:$0xf] %vm6459_vm10, %v6230_v19  ;;  %v4737_v24 = vsel %vm4194_vm6, %v4533_v54, 0.0  ;;  %7211 = vmatmul.msk.bf16.gmra.mxu2 %vm2277_vm3, %v3492_v13  ;;  %v5182_v29 = vunpack.c.l.b16 %v4926_v14  ;;  %v4954_v32 = vpack.c.bf16 %v10277_v52, %v10277_v52  ;;  %v3148_v33 = vadd.f32 %v10236_v39, %v2678_v9 }
 0x38c   : > { %v4738_v23 = vadd.f32 %v4737_v24, %v4736_v28  ;;  %6593 = vst.msk [vmem:[%s8328_s11 + $0x210] sm:$0xf] %vm6459_vm10, %v6264_v62  ;;  %7225 = vmatmul.msk.bf16.gmra.mxu3 %vm2277_vm3, %v3527_v37  ;;  %v6266_v40 = vpack.c.b16 %v6104_v63, %v6104_v63  ;;  %v5209_v42 = vunpack.c.l.b16 %v4953_v3  ;;  %v11164_v37 = vld [vmem:[#allocation19_spill] sm:$0xff]  ;;  %v11166_v3 = vld [vmem:[#allocation21_spill] sm:$0xff] }
 0x38d   : > { %7072 = vmatmul.msk.bf16.gmra.mxu0 %vm2277_vm3, %v2131_v48  ;;  %v3152_v13 = vpop.f32.mrf.mxu1  ;;  %6594 = vst.msk [vmem:[%s8328_s11 + $0x214] sm:$0xf] %vm6459_vm10, %v6265_v55  ;;  %v5271_v28 = vpack.c.b16 %v5182_v29, %v5181_v10  ;;  %v5210_v22 = vunpack.c.l.b16 %v4954_v32  ;;  %v3218_v49 = vadd.f32 %v11165_v57, %v11164_v37  ;;  %v11167_v24 = vld [vmem:[#allocation47_spill] sm:$0xff] }
 0x38e   : > { %v3941_v1 = vpop.f32.mrf.mxu2  ;;  %6595 = vst.msk [vmem:[%s8328_s11 + $0x218] sm:$0x1] %vm6464_vm11, %v6266_v40  ;;  %v3220_v10 = vadd.f32 %v11167_v24, %v11166_v3  ;;  %v11168_v40 = vld [vmem:[#allocation20_spill] sm:$0xff] }
 0x38f   : > { %v4144_v53 = vadd.f32 %v3941_v1, %v3148_v33  ;;  %v5584_v51 = vshrl.u32 %v5271_v28, 16  ;;  %v4011_v12 = vpop.f32.mrf.mxu3  ;;  %v5285_v15 = vpack.c.b16 %v5210_v22, %v5209_v42  ;;  %v5587_v36 = vshll.u32 %v5271_v28, 16 }
 0x390   : > { %v10306_v14 = vadd.f32 %v4011_v12, %v3218_v49  ;;  %v3528_v28 = vrot.slane %v11168_v40, 1  ;;  %v3529_v1 = vrot.slane %v8757_v5, 1 }
 0x391   : > { %v4350_v39 = vsel %vm4194_vm6, %v4144_v53, 0.0  ;;  %v4534_v38 = vmul.f32 %v4144_v53, %v4144_v53  ;;  %v10302_v19 = vrot.slane %v5584_v51, 7  ;;  %v5689_v7 = vshrl.u32 %v5285_v15, 16 }
 0x392   : > { %v4351_v59 = vadd.f32 %v4350_v39, %v4349_v4  ;;  %v2680_v63 = vpop.f32.mrf.mxu0  ;;  %v5692_v26 = vshll.u32 %v5285_v15, 16  ;;  %v4927_v32 = vpack.c.bf16 %v4144_v53, %v4144_v53 }
 0x393   : > { %v4739_v27 = vsel %vm4194_vm6, %v4534_v38, 0.0  ;;  %v5589_v31 = vor.u32 %v5587_v36, %v10302_v19  ;;  %v10308_v9 = vrot.slane %v5689_v7, 7  ;;  %v3150_v62 = vadd.f32 %v10261_v2, %v2680_v63 }
 0x394   : > { %v4740_v54 = vadd.f32 %v4739_v27, %v4738_v23  ;;  %v4955_v2 = vpack.c.bf16 %v10306_v14, %v10306_v14  ;;  %v5183_v36 = vunpack.c.l.b16 %v4927_v32 }
 0x395   : > { %v10311_v55 = vpop.f32.mrf.mxu1  ;;  %v5863_v29 = vsel %vm8299_vm9, 4048220490, %v5589_v31  ;;  %v5694_v48 = vor.u32 %v5692_v26, %v10308_v9  ;;  %v3530_v26 = vsel %vm3372_vm4, %v3528_v28, %v3529_v1 }
 0x396   : > { %v3943_v4 = vpop.f32.mrf.mxu2  ;;  %v6070_v33 = vunpack.c.l.b16 %v5863_v29  ;;  %v6071_v22 = vunpack.c.h.b16 %v5863_v29 }
 0x397   : > { %v4145_v23 = vadd.f32 %v3943_v4, %v3150_v62  ;;  %v4013_v42 = vpop.f32.mrf.mxu3  ;;  %v5870_v37 = vsel %vm8299_vm9, 4048220490, %v5694_v48 }
 0x398   : > { %v10323_v39 = vadd.f32 %v4013_v42, %v3220_v10  ;;  %v6232_v57 = vpack.c.b16 %v6070_v33, %v6070_v33  ;;  %v6233_v49 = vpack.c.b16 %v6071_v22, %v6071_v22  ;;  %v6106_v10 = vunpack.c.h.b16 %v5870_v37 }
 0x399   : > { %v4352_v51 = vsel %vm4194_vm6, %v4145_v23, 0.0  ;;  %v4535_v12 = vmul.f32 %v4145_v23, %v4145_v23  ;;  %v4928_v15 = vpack.c.bf16 %v4145_v23, %v4145_v23 }
 0x39a   : > { %v4353_v38 = vadd.f32 %v4352_v51, %v4351_v59  ;;  %v2683_v53 = vpop.f32.mrf.mxu0  ;;  %v4956_v31 = vpack.c.bf16 %v10323_v39, %v10323_v39  ;;  %v6105_v59 = vunpack.c.l.b16 %v5870_v37  ;;  %6561 = vst.msk [vmem:[%s8328_s11 + $0x190] sm:$0xf] %vm6459_vm10, %v6232_v57  ;;  %v6268_v33 = vpack.c.b16 %v6106_v10, %v6106_v10 }
 0x39b   : > { %v4741_v63 = vsel %vm4194_vm6, %v4535_v12, 0.0  ;;  %v5184_v7 = vunpack.c.l.b16 %v4928_v15  ;;  %v3153_v3 = vadd.f32 %v3152_v13, %v2683_v53  ;;  %6562 = vst.msk [vmem:[%s8328_s11 + $0x194] sm:$0xf] %vm6459_vm10, %v6233_v49  ;;  %v11169_v53 = vld [vmem:[#allocation23_spill] sm:$0xff] }
 0x39c   : > { %v4742_v27 = vadd.f32 %v4741_v63, %v4740_v54  ;;  %7226 = vmatmul.msk.bf16.gmra.mxu3 %vm2277_vm3, %v3530_v26  ;;  %v5211_v54 = vunpack.c.l.b16 %v4955_v2  ;;  %v5212_v4 = vunpack.c.l.b16 %v4956_v31  ;;  %v6267_v48 = vpack.c.b16 %v6105_v59, %v6105_v59  ;;  %6597 = vst.msk [vmem:[%s8328_s11 + $0x220] sm:$0xf] %vm6459_vm10, %v6268_v33  ;;  %v11171_v63 = vld [vmem:[#allocation48_spill] sm:$0xff] }
 0x39d   : > { %v5272_v62 = vpack.c.b16 %v5184_v7, %v5183_v36  ;;  %v10336_v24 = vpop.f32.mrf.mxu1  ;;  %v3531_v37 = vrot.slane %v11169_v53, 1  ;;  %v11170_v36 = vld [vmem:[#allocation22_spill] sm:$0xff] }
 0x39e   : > { %v3946_v29 = vpop.f32.mrf.mxu2  ;;  %v5286_v40 = vpack.c.b16 %v5212_v4, %v5211_v54  ;;  %6596 = vst.msk [vmem:[%s8328_s11 + $0x21c] sm:$0xf] %vm6459_vm10, %v6267_v48  ;;  %v3223_v7 = vadd.f32 %v11171_v63, %v11170_v36 }
 0x39f   : > { %v5591_v32 = vshrl.u32 %v5272_v62, 16  ;;  %v4146_v23 = vadd.f32 %v3946_v29, %v3153_v3  ;;  %v4016_v28 = vpop.f32.mrf.mxu3  ;;  %v5594_v42 = vshll.u32 %v5272_v62, 16  ;;  %v11172_v62 = vld [vmem:[#allocation24_spill] sm:$0xff] }
 0x3a0   : > { %v5696_v12 = vshrl.u32 %v5286_v40, 16  ;;  %v5699_v26 = vshll.u32 %v5286_v40, 16  ;;  %v3225_v3 = vadd.f32 %v9564_v45, %v11172_v62 }
 0x3a1   : > { %v5593_v13 = vrot.slane %v5591_v32, 7  ;;  %v4354_v22 = vsel %vm4194_vm6, %v4146_v23, 0.0  ;;  %v4536_v51 = vmul.f32 %v4146_v23, %v4146_v23  ;;  %v4929_v33 = vpack.c.bf16 %v4146_v23, %v4146_v23 }
 0x3a2   : > { %v4355_v15 = vadd.f32 %v4354_v22, %v4353_v38  ;;  %v2685_v2 = vpop.f32.mrf.mxu0  ;;  %v5698_v31 = vrot.slane %v5696_v12, 7 }
 0x3a3   : > { %v5596_v57 = vor.u32 %v5594_v42, %v5593_v13  ;;  %v4743_v49 = vsel %vm4194_vm6, %v4536_v51, 0.0  ;;  %v3155_v38 = vadd.f32 %v10311_v55, %v2685_v2  ;;  %v5895_v4 = vsel %vm8299_vm9, %v5593_v13, 4048220490 }
 0x3a4   : > { %v4744_v59 = vadd.f32 %v4743_v49, %v4742_v27  ;;  %v5701_v32 = vor.u32 %v5699_v26, %v5698_v31  ;;  %v10358_v27 = vadd.f32 %v4016_v28, %v3223_v7  ;;  %v5902_v45 = vsel %vm8299_vm9, %v5698_v31, 4048220490 }
 0x3a5   : > { %v5597_v10 = vsel %vm5297_vm7, %v10302_v19, %v5596_v57  ;;  %v10354_v54 = vpop.f32.mrf.mxu1  ;;  %v6074_v19 = vunpack.c.l.b16 %v5895_v4  ;;  %v6109_v12 = vunpack.c.l.b16 %v5902_v45 }
 0x3a6   : > { %v6072_v29 = vunpack.c.l.b16 %v5597_v10  ;;  %v6073_v48 = vunpack.c.h.b16 %v5597_v10  ;;  %v3948_v40 = vpop.f32.mrf.mxu2  ;;  %v5702_v51 = vsel %vm5297_vm7, %v10308_v9, %v5701_v32  ;;  %v4957_v26 = vpack.c.bf16 %v10358_v27, %v10358_v27 }
 0x3a7   : > { %v4147_v42 = vadd.f32 %v3948_v40, %v3155_v38  ;;  %v4018_v13 = vpop.f32.mrf.mxu3  ;;  %v6107_v2 = vunpack.c.l.b16 %v5702_v51  ;;  %v6108_v53 = vunpack.c.h.b16 %v5702_v51  ;;  %v6236_v7 = vpack.c.b16 %v6074_v19, %v6074_v19 }
 0x3a8   : > { %v6234_v55 = vpack.c.b16 %v6072_v29, %v6072_v29  ;;  %v6235_v22 = vpack.c.b16 %v6073_v48, %v6073_v48  ;;  %v10367_v36 = vadd.f32 %v4018_v13, %v3225_v3  ;;  %v5185_v10 = vunpack.c.l.b16 %v4929_v33 }
 0x3a9   : > { %v4356_v23 = vsel %vm4194_vm6, %v4147_v42, 0.0  ;;  %v4537_v57 = vmul.f32 %v4147_v42, %v4147_v42  ;;  %v4930_v49 = vpack.c.bf16 %v4147_v42, %v4147_v42  ;;  %v6269_v9 = vpack.c.b16 %v6107_v2, %v6107_v2  ;;  %6565 = vst.msk [vmem:[%s8328_s11 + $0x1a0] sm:$0x1] %vm6464_vm11, %v6236_v7 }
 0x3aa   : > { %6563 = vst.msk [vmem:[%s8328_s11 + $0x198] sm:$0xf] %vm6459_vm10, %v6234_v55  ;;  %v4357_v28 = vadd.f32 %v4356_v23, %v4355_v15  ;;  %v2688_v63 = vpop.f32.mrf.mxu0  ;;  %v6270_v31 = vpack.c.b16 %v6108_v53, %v6108_v53  ;;  %v3532_v15 = vsel %vm3372_vm4, %v3529_v1, %v3531_v37  ;;  %v4958_v3 = vpack.c.bf16 %v10367_v36, %v10367_v36  ;;  %v11173_v55 = vld [vmem:[#allocation25_spill] sm:$0xff] }
 0x3ab   : > { %6564 = vst.msk [vmem:[%s8328_s11 + $0x19c] sm:$0xf] %vm6459_vm10, %v6235_v22  ;;  %v4745_v62 = vsel %vm4194_vm6, %v4537_v57, 0.0  ;;  %v5186_v4 = vunpack.c.l.b16 %v4930_v49  ;;  %v3158_v29 = vadd.f32 %v10336_v24, %v2688_v63  ;;  %v5213_v33 = vunpack.c.l.b16 %v4957_v26  ;;  %v11174_v22 = vld [vmem:[#allocation49_spill] sm:$0xff] }
 0x3ac   : > { %v4746_v38 = vadd.f32 %v4745_v62, %v4744_v59  ;;  %6598 = vst.msk [vmem:[%s8328_s11 + $0x224] sm:$0xf] %vm6459_vm10, %v6269_v9  ;;  %7227 = vmatmul.msk.bf16.gmra.mxu3 %vm2277_vm3, %v3532_v15  ;;  %v6271_v59 = vpack.c.b16 %v6109_v12, %v6109_v12  ;;  %v5214_v1 = vunpack.c.l.b16 %v4958_v3  ;;  %v3228_v51 = vadd.f32 %v11174_v22, %v11173_v55 }
 0x3ad   : > { %v10385_v48 = vpop.f32.mrf.mxu1  ;;  %6599 = vst.msk [vmem:[%s8328_s11 + $0x228] sm:$0xf] %vm6459_vm10, %v6270_v31  ;;  %v5273_v32 = vpack.c.b16 %v5186_v4, %v5185_v10  ;;  %v11175_v10 = vld [vmem:[#allocation26_spill] sm:$0xff] }
 0x3ae   : > { %v3951_v5 = vpop.f32.mrf.mxu2  ;;  %6600 = vst.msk [vmem:[%s8328_s11 + $0x22c] sm:$0x1] %vm6464_vm11, %v6271_v59  ;;  %v5287_v45 = vpack.c.b16 %v5214_v1, %v5213_v33  ;;  %v11176_v4 = vld [vmem:[#allocation50_spill] sm:$0xff] }
 0x3af   : > { %v4148_v37 = vadd.f32 %v3951_v5, %v3158_v29  ;;  %v5599_v40 = vshrl.u32 %v5273_v32, 16  ;;  %v4021_v42 = vpop.f32.mrf.mxu3  ;;  %v5602_v12 = vshll.u32 %v5273_v32, 16  ;;  %v3230_v15 = vadd.f32 %v11176_v4, %v11175_v10 }
 0x3b0   : > { %v5704_v23 = vshrl.u32 %v5287_v45, 16  ;;  %v10398_v7 = vadd.f32 %v4021_v42, %v3228_v51  ;;  %v5707_v31 = vshll.u32 %v5287_v45, 16 }
 0x3b1   : > { %v4358_v19 = vsel %vm4194_vm6, %v4148_v37, 0.0  ;;  %v4538_v24 = vmul.f32 %v4148_v37, %v4148_v37  ;;  %v10394_v13 = vrot.slane %v5599_v40, 7  ;;  %v4931_v59 = vpack.c.bf16 %v4148_v37, %v4148_v37 }
 0x3b2   : > { %v4359_v2 = vadd.f32 %v4358_v19, %v4357_v28  ;;  %v2690_v53 = vpop.f32.mrf.mxu0  ;;  %v10400_v9 = vrot.slane %v5704_v23, 7  ;;  %v4959_v5 = vpack.c.bf16 %v10398_v7, %v10398_v7 }
 0x3b3   : > { %v4747_v57 = vsel %vm4194_vm6, %v4538_v24, 0.0  ;;  %v5604_v49 = vor.u32 %v5602_v12, %v10394_v13  ;;  %v3160_v26 = vadd.f32 %v10354_v54, %v2690_v53  ;;  %v5187_v51 = vunpack.c.l.b16 %v4931_v59 }
 0x3b4   : > { %v4748_v63 = vadd.f32 %v4747_v57, %v4746_v38  ;;  %v5709_v29 = vor.u32 %v5707_v31, %v10400_v9  ;;  %v5215_v10 = vunpack.c.l.b16 %v4959_v5 }
 0x3b5   : > { %v3164_v62 = vpop.f32.mrf.mxu1  ;;  %v5864_v28 = vsel %vm8299_vm9, 4048220490, %v5604_v49 }
 0x3b6   : > { %v3953_v3 = vpop.f32.mrf.mxu2  ;;  %v6075_v38 = vunpack.c.l.b16 %v5864_v28  ;;  %v6076_v1 = vunpack.c.h.b16 %v5864_v28  ;;  %v5871_v37 = vsel %vm8299_vm9, 4048220490, %v5709_v29 }
 0x3b7   : > { %v4149_v32 = vadd.f32 %v3953_v3, %v3160_v26  ;;  %v4023_v33 = vpop.f32.mrf.mxu3  ;;  %v6110_v49 = vunpack.c.l.b16 %v5871_v37  ;;  %v6111_v26 = vunpack.c.h.b16 %v5871_v37 }
 0x3b8   : > { %v10411_v45 = vadd.f32 %v4023_v33, %v3230_v15  ;;  %v6237_v55 = vpack.c.b16 %v6075_v38, %v6075_v38  ;;  %v6238_v22 = vpack.c.b16 %v6076_v1, %v6076_v1 }
 0x3b9   : > { %v4360_v54 = vsel %vm4194_vm6, %v4149_v32, 0.0  ;;  %v4539_v40 = vmul.f32 %v4149_v32, %v4149_v32  ;;  %v4932_v42 = vpack.c.bf16 %v4149_v32, %v4149_v32  ;;  %v6272_v3 = vpack.c.b16 %v6110_v49, %v6110_v49 }
 0x3ba   : > { %v10413_v19 = vadd.f32 %v4360_v54, %v4359_v2  ;;  %v2693_v24 = vpop.f32.mrf.mxu0  ;;  %v4960_v57 = vpack.c.bf16 %v10411_v45, %v10411_v45  ;;  %6566 = vst.msk [vmem:[%s8328_s11 + $0x1a4] sm:$0xf] %vm6459_vm10, %v6237_v55  ;;  %v6273_v28 = vpack.c.b16 %v6111_v26, %v6111_v26  ;;  %v11177_v55 = vld [vmem:[#allocation27_spill] sm:$0xff] }
 0x3bb   : > { %v4749_v12 = vsel %vm4194_vm6, %v4539_v40, 0.0  ;;  %v5188_v53 = vunpack.c.l.b16 %v4932_v42  ;;  %6567 = vst.msk [vmem:[%s8328_s11 + $0x1a8] sm:$0xf] %vm6459_vm10, %v6238_v22  ;;  %v3163_v1 = vadd.f32 %v10385_v48, %v2693_v24  ;;  %v11178_v22 = vld [vmem:[#allocation51_spill] sm:$0xff] }
 0x3bc   : > { %v10418_v23 = vadd.f32 %v4749_v12, %v4748_v63  ;;  %v5216_v4 = vunpack.c.l.b16 %v4960_v57  ;;  %6601 = vst.msk [vmem:[%s8328_s11 + $0x230] sm:$0xf] %vm6459_vm10, %v6272_v3 }
 0x3bd   : > { %v5274_v2 = vpack.c.b16 %v5188_v53, %v5187_v51  ;;  %v10424_v31 = vpop.f32.mrf.mxu1  ;;  %6602 = vst.msk [vmem:[%s8328_s11 + $0x234] sm:$0xf] %vm6459_vm10, %v6273_v28  ;;  %v3233_v51 = vadd.f32 %v11178_v22, %v11177_v55 }
 0x3be   : > { %v3956_v15 = vpop.f32.mrf.mxu2  ;;  %v5288_v29 = vpack.c.b16 %v5216_v4, %v5215_v10 }
 0x3bf   : > { %v5606_v63 = vshrl.u32 %v5274_v2, 16  ;;  %v4026_v59 = vpop.f32.mrf.mxu3  ;;  %v5609_v38 = vshll.u32 %v5274_v2, 16  ;;  %v10433_v37 = vadd.f32 %v3956_v15, %v3163_v1  ;;  %v11179_v2 = vld [vmem:[#allocation28_spill] sm:$0xff] }
 0x3c0   : > { %v5711_v33 = vshrl.u32 %v5288_v29, 16  ;;  %v5714_v5 = vshll.u32 %v5288_v29, 16  ;;  %v3235_v48 = vadd.f32 %v9666_v6, %v11179_v2  ;;  %v10443_v15 = vadd.f32 %v4026_v59, %v3233_v51 }
 0x3c1   : > { %v5608_v32 = vrot.slane %v5606_v63, 7  ;;  %v4933_v6 = vpack.c.bf16 %v10433_v37, %v10433_v37 }
 0x3c2   : > { %v2695_v54 = vpop.f32.mrf.mxu0  ;;  %v5713_v42 = vrot.slane %v5711_v33, 7  ;;  %11180 = vst [vmem:[#allocation7_spill] sm:$0xff] %v10443_v15  ;;  %v4961_v55 = vpack.c.bf16 %v10443_v15, %v10443_v15 }
 0x3c3   : > { %v5611_v40 = vor.u32 %v5609_v38, %v5608_v32  ;;  %v3165_v53 = vadd.f32 %v3164_v62, %v2695_v54  ;;  %v5896_v49 = vsel %vm8299_vm9, %v5608_v32, 4048220490  ;;  %v5189_v22 = vunpack.c.l.b16 %v4933_v6 }
 0x3c4   : > { %v5716_v10 = vor.u32 %v5714_v5, %v5713_v42  ;;  %v6079_v62 = vunpack.c.l.b16 %v5896_v49 }
 0x3c5   : > { %v5612_v12 = vsel %vm5297_vm7, %v10394_v13, %v5611_v40  ;;  %v3169_v57 = vpop.f32.mrf.mxu1  ;;  %v5903_v13 = vsel %vm8299_vm9, %v5713_v42, 4048220490 }
 0x3c6   : > { %v6077_v24 = vunpack.c.l.b16 %v5612_v12  ;;  %v6078_v26 = vunpack.c.h.b16 %v5612_v12  ;;  %v3958_v4 = vpop.f32.mrf.mxu2  ;;  %v5717_v29 = vsel %vm5297_vm7, %v10400_v9, %v5716_v10  ;;  %v6114_v33 = vunpack.c.l.b16 %v5903_v13 }
 0x3c7   : > { %v10445_v3 = vadd.f32 %v3958_v4, %v3165_v53  ;;  %v4028_v32 = vpop.f32.mrf.mxu3  ;;  %v6112_v59 = vunpack.c.l.b16 %v5717_v29  ;;  %v6113_v38 = vunpack.c.h.b16 %v5717_v29  ;;  %v6241_v42 = vpack.c.b16 %v6079_v62, %v6079_v62 }
 0x3c8   : > { %v6239_v63 = vpack.c.b16 %v6077_v24, %v6077_v24  ;;  %v6240_v28 = vpack.c.b16 %v6078_v26, %v6078_v26  ;;  %v10457_v54 = vadd.f32 %v4028_v32, %v3235_v48  ;;  %v6276_v53 = vpack.c.b16 %v6114_v33, %v6114_v33 }
 0x3c9   : > { %v4934_v1 = vpack.c.bf16 %v10445_v3, %v10445_v3  ;;  %v6274_v9 = vpack.c.b16 %v6112_v59, %v6112_v59  ;;  %v6275_v5 = vpack.c.b16 %v6113_v38, %v6113_v38  ;;  %6570 = vst.msk [vmem:[%s8328_s11 + $0x1b4] sm:$0x1] %vm6464_vm11, %v6241_v42  ;;  %v5217_v24 = vunpack.c.l.b16 %v4961_v55  ;;  %v11182_v59 = vld [vmem:[#allocation29_spill] sm:$0xff] }
 0x3ca   : > { %6568 = vst.msk [vmem:[%s8328_s11 + $0x1ac] sm:$0xf] %vm6459_vm10, %v6239_v63  ;;  %v2698_v40 = vpop.f32.mrf.mxu0  ;;  %v4962_v12 = vpack.c.bf16 %v10457_v54, %v10457_v54  ;;  %v3238_v38 = vadd.f32 %v9698_v44, %v11182_v59 }
 0x3cb   : > { %11181 = vst [vmem:[#allocation8_spill] sm:$0xff] %v10457_v54  ;;  %v5190_v51 = vunpack.c.l.b16 %v4934_v1  ;;  %v3168_v62 = vadd.f32 %v10424_v31, %v2698_v40 }
 0x3cc   : > { %6569 = vst.msk [vmem:[%s8328_s11 + $0x1b0] sm:$0xf] %vm6459_vm10, %v6240_v28  ;;  %v5218_v26 = vunpack.c.l.b16 %v4962_v12 }
 0x3cd   : > { %6603 = vst.msk [vmem:[%s8328_s11 + $0x238] sm:$0xf] %vm6459_vm10, %v6274_v9  ;;  %v5275_v49 = vpack.c.b16 %v5190_v51, %v5189_v22  ;;  %v3172_v2 = vpop.f32.mrf.mxu1 }
 0x3ce   : > { %6604 = vst.msk [vmem:[%s8328_s11 + $0x23c] sm:$0xf] %vm6459_vm10, %v6275_v5  ;;  %v3961_v48 = vpop.f32.mrf.mxu2  ;;  %v5289_v13 = vpack.c.b16 %v5218_v26, %v5217_v24  ;;  %v11183_v5 = vld [vmem:[#allocation30_spill] sm:$0xff] }
 0x3cf   : > { %6605 = vst.msk [vmem:[%s8328_s11 + $0x240] sm:$0x1] %vm6464_vm11, %v6276_v53  ;;  %v5614_v10 = vshrl.u32 %v5275_v49, 16  ;;  %v4031_v4 = vpop.f32.mrf.mxu3  ;;  %v5617_v28 = vshll.u32 %v5275_v49, 16  ;;  %v10474_v32 = vadd.f32 %v3961_v48, %v3168_v62  ;;  %v3240_v55 = vadd.f32 %v9720_v34, %v11183_v5 }
 0x3d0   : > { %v5719_v6 = vshrl.u32 %v5289_v13, 16  ;;  %v5722_v42 = vshll.u32 %v5289_v13, 16  ;;  %v10482_v22 = vadd.f32 %v4031_v4, %v3238_v38 }
 0x3d1   : > { %v5616_v63 = vrot.slane %v5614_v10, 7  ;;  %v4935_v12 = vpack.c.bf16 %v10474_v32, %v10474_v32 }
 0x3d2   : > { %v2700_v29 = vpop.f32.mrf.mxu0  ;;  %v10478_v1 = vrot.slane %v5719_v6, 7  ;;  %11184 = vst [vmem:[#allocation12_spill] sm:$0xff] %v10482_v22  ;;  %v4963_v26 = vpack.c.bf16 %v10482_v22, %v10482_v22 }
 0x3d3   : > { %v5619_v33 = vor.u32 %v5617_v28, %v5616_v63  ;;  %v3170_v9 = vadd.f32 %v3169_v57, %v2700_v29  ;;  %v5191_v28 = vunpack.c.l.b16 %v4935_v12 }
 0x3d4   : > { %v5724_v51 = vor.u32 %v5722_v42, %v10478_v1  ;;  %v5219_v42 = vunpack.c.l.b16 %v4963_v26 }
 0x3d5   : > { %v5865_v40 = vsel %vm8299_vm9, 4048220490, %v5619_v33  ;;  %v3174_v49 = vpop.f32.mrf.mxu1 }
 0x3d6   : > { %v3963_v31 = vpop.f32.mrf.mxu2  ;;  %v6080_v53 = vunpack.c.l.b16 %v5865_v40  ;;  %v6081_v48 = vunpack.c.h.b16 %v5865_v40  ;;  %v5872_v4 = vsel %vm8299_vm9, 4048220490, %v5724_v51 }
 0x3d7   : > { %v10489_v44 = vadd.f32 %v3963_v31, %v3170_v9  ;;  %v4033_v57 = vpop.f32.mrf.mxu3  ;;  %v6115_v59 = vunpack.c.l.b16 %v5872_v4  ;;  %v6116_v33 = vunpack.c.h.b16 %v5872_v4 }
 0x3d8   : > { %v10493_v24 = vadd.f32 %v4033_v57, %v3240_v55  ;;  %v6242_v13 = vpack.c.b16 %v6080_v53, %v6080_v53  ;;  %v6243_v62 = vpack.c.b16 %v6081_v48, %v6081_v48 }
 0x3d9   : > { %v4936_v34 = vpack.c.bf16 %v10489_v44, %v10489_v44  ;;  %v6277_v55 = vpack.c.b16 %v6115_v59, %v6115_v59  ;;  %v6278_v40 = vpack.c.b16 %v6116_v33, %v6116_v33 }
 0x3da   : > { %11185 = vst [vmem:[#allocation9_spill] sm:$0xff] %v10493_v24  ;;  %v2703_v10 = vpop.f32.mrf.mxu0  ;;  %v4964_v6 = vpack.c.bf16 %v10493_v24, %v10493_v24 }
 0x3db   : > { %v5192_v29 = vunpack.c.l.b16 %v4936_v34  ;;  %6571 = vst.msk [vmem:[%s8328_s11 + $0x1b8] sm:$0xf] %vm6459_vm10, %v6242_v13  ;;  %v3173_v34 = vadd.f32 %v3172_v2, %v2703_v10 }
 0x3dc   : > { %6572 = vst.msk [vmem:[%s8328_s11 + $0x1bc] sm:$0xf] %vm6459_vm10, %v6243_v62  ;;  %v5220_v9 = vunpack.c.l.b16 %v4964_v6  ;;  %v11186_v6 = vld [vmem:[#allocation31_spill] sm:$0xff] }
 0x3dd   : > { %v5276_v38 = vpack.c.b16 %v5192_v29, %v5191_v28  ;;  %6606 = vst.msk [vmem:[%s8328_s11 + $0x244] sm:$0xf] %vm6459_vm10, %v6277_v55  ;;  %v10509_v13 = vpop.f32.mrf.mxu1  ;;  %v3243_v59 = vadd.f32 %v9743_v60, %v11186_v6 }
 0x3de   : > { %v3966_v5 = vpop.f32.mrf.mxu2  ;;  %v5290_v51 = vpack.c.b16 %v5220_v9, %v5219_v42  ;;  %6607 = vst.msk [vmem:[%s8328_s11 + $0x248] sm:$0xf] %vm6459_vm10, %v6278_v40  ;;  %v11187_v9 = vld [vmem:[#allocation32_spill] sm:$0xff] }
 0x3df   : > { %v5621_v31 = vshrl.u32 %v5276_v38, 16  ;;  %v4036_v12 = vpop.f32.mrf.mxu3  ;;  %v5624_v57 = vshll.u32 %v5276_v38, 16  ;;  %v10511_v29 = vadd.f32 %v3966_v5, %v3173_v34  ;;  %v3245_v2 = vadd.f32 %v9758_v25, %v11187_v9 }
 0x3e0   : > { %v5726_v48 = vshrl.u32 %v5290_v51, 16  ;;  %v5729_v28 = vshll.u32 %v5290_v51, 16  ;;  %v10520_v51 = vadd.f32 %v4036_v12, %v3243_v59 }
 0x3e1   : > { %v5623_v53 = vrot.slane %v5621_v31, 7  ;;  %v4937_v25 = vpack.c.bf16 %v10511_v29, %v10511_v29 }
 0x3e2   : > { %v2705_v4 = vpop.f32.mrf.mxu0  ;;  %v5728_v26 = vrot.slane %v5726_v48, 7  ;;  %11188 = vst [vmem:[#allocation10_spill] sm:$0xff] %v10520_v51 }
 0x3e3   : > { %v5626_v62 = vor.u32 %v5624_v57, %v5623_v53  ;;  %v3175_v42 = vadd.f32 %v3174_v49, %v2705_v4  ;;  %v5897_v38 = vsel %vm8299_vm9, %v5623_v53, 4048220490 }
 0x3e4   : > { %v5731_v31 = vor.u32 %v5729_v28, %v5728_v26  ;;  %v5904_v60 = vsel %vm8299_vm9, %v5728_v26, 4048220490 }
 0x3e5   : > { %v5627_v33 = vsel %vm5297_vm7, %v5616_v63, %v5626_v62  ;;  %v6084_v63 = vunpack.c.l.b16 %v5897_v38  ;;  %v6119_v4 = vunpack.c.l.b16 %v5904_v60  ;;  %v3179_v38 = vpop.f32.mrf.mxu1 }
 0x3e6   : > { %v6082_v10 = vunpack.c.l.b16 %v5627_v33  ;;  %v6083_v55 = vunpack.c.h.b16 %v5627_v33  ;;  %v3968_v40 = vpop.f32.mrf.mxu2  ;;  %v5732_v53 = vsel %vm5297_vm7, %v10478_v1, %v5731_v31  ;;  %v4965_v33 = vpack.c.bf16 %v10520_v51, %v10520_v51 }
 0x3e7   : > { %v10522_v5 = vadd.f32 %v3968_v40, %v3175_v42  ;;  %v4038_v48 = vpop.f32.mrf.mxu3  ;;  %v6117_v34 = vunpack.c.l.b16 %v5732_v53  ;;  %v6118_v12 = vunpack.c.h.b16 %v5732_v53  ;;  %v6246_v6 = vpack.c.b16 %v6084_v63, %v6084_v63  ;;  %v11191_v40 = vld [vmem:[#allocation34_spill] sm:$0xff]  ;;  %v11192_v63 = vld [vmem:[#allocation35_spill] sm:$0xff] }
 0x3e8   : > { %v6244_v49 = vpack.c.b16 %v6082_v10, %v6082_v10  ;;  %v6245_v57 = vpack.c.b16 %v6083_v55, %v6083_v55  ;;  %v10534_v26 = vadd.f32 %v4038_v48, %v3245_v2  ;;  %v5193_v42 = vunpack.c.l.b16 %v4937_v25  ;;  %v11190_v10 = vld [vmem:[#allocation33_spill] sm:$0xff]  ;;  %v11194_v48 = vld [vmem:[#allocation36_spill] sm:$0xff] }
 0x3e9   : > { %v4938_v62 = vpack.c.bf16 %v10522_v5, %v10522_v5  ;;  %v6279_v1 = vpack.c.b16 %v6117_v34, %v6117_v34  ;;  %v6280_v59 = vpack.c.b16 %v6118_v12, %v6118_v12  ;;  %6575 = vst.msk [vmem:[%s8328_s11 + $0x1c8] sm:$0x1] %vm6464_vm11, %v6246_v6  ;;  %v3248_v2 = vadd.f32 %v9783_v47, %v11190_v10  ;;  %v11195_v12 = vld [vmem:[#allocation37_spill] sm:$0xff]  ;;  %v11196_v6 = vld [vmem:[#allocation38_spill] sm:$0xff]  ;;  %v11197_v10 = vld [vmem:[#allocation39_spill] sm:$0xff] }
 0x3ea   : > { %6573 = vst.msk [vmem:[%s8328_s11 + $0x1c0] sm:$0xf] %vm6459_vm10, %v6244_v49  ;;  %v2708_v28 = vpop.f32.mrf.mxu0  ;;  %v4966_v55 = vpack.c.bf16 %v10534_v26, %v10534_v26  ;;  %v6281_v31 = vpack.c.b16 %v6119_v4, %v6119_v4  ;;  %v3250_v60 = vadd.f32 %v9801_v17, %v11191_v40  ;;  %v11193_v49 = vld [vmem:[#allocation5_spill] sm:$0xff]  ;;  %v4552_v53 = vmul.f32 %v10004_v56, %v10004_v56  ;;  %v11198_v40 = vld [vmem:[#allocation6_spill] sm:$0xff] }
 0x3eb   : > { %11189 = vst [vmem:[#allocation11_spill] sm:$0xff] %v10534_v26  ;;  %v5194_v9 = vunpack.c.l.b16 %v4938_v62  ;;  %v10560_v34 = vadd.f32 %v9836_v18, %v11194_v48  ;;  %v10564_v4 = vadd.f32 %v9861_v8, %v11195_v12  ;;  %v5221_v17 = vunpack.c.l.b16 %v4965_v33  ;;  %v11199_v33 = vld [vmem:[#allocation40_spill] sm:$0xff] }
 0x3ec   : > { %6574 = vst.msk [vmem:[%s8328_s11 + $0x1c4] sm:$0xf] %vm6459_vm10, %v6245_v57  ;;  %v10552_v57 = vadd.f32 %v11193_v49, %v11192_v63  ;;  %v5222_v62 = vunpack.c.l.b16 %v4966_v55  ;;  %v10578_v8 = vadd.f32 %v11198_v40, %v11197_v10  ;;  %v10582_v55 = vadd.f32 %v9914_v16, %v11199_v33 }
 0x3ed   : > { %6608 = vst.msk [vmem:[%s8328_s11 + $0x24c] sm:$0xf] %vm6459_vm10, %v6279_v1  ;;  %v5277_v25 = vpack.c.b16 %v5194_v9, %v5193_v42  ;;  %v10570_v1 = vadd.f32 %v9879_v46, %v11196_v6  ;;  %v4540_v42 = vmul.f32 %v10433_v37, %v10433_v37  ;;  %v3178_v46 = vadd.f32 %v10509_v13, %v2708_v28  ;;  %v3182_v40 = vpop.f32.mrf.mxu1 }
 0x3ee   : > { %6609 = vst.msk [vmem:[%s8328_s11 + $0x250] sm:$0xf] %vm6459_vm10, %v6280_v59  ;;  %v3971_v47 = vpop.f32.mrf.mxu2  ;;  %v4553_v59 = vmul.f32 %v10012_v58, %v10012_v58  ;;  %v10587_v63 = vsel %vm4194_vm6, %v10004_v56, 0.0  ;;  %v10590_v49 = vsel %vm4194_vm6, %v4552_v53, 0.0  ;;  %v10596_v10 = vsel %vm4194_vm6, %v10012_v58, 0.0 }
 0x3ef   : > { %6610 = vst.msk [vmem:[%s8328_s11 + $0x254] sm:$0x1] %vm6464_vm11, %v6281_v31  ;;  %v5629_v18 = vshrl.u32 %v5277_v25, 16  ;;  %v4041_v9 = vpop.f32.mrf.mxu3  ;;  %v5291_v31 = vpack.c.b16 %v5222_v62, %v5221_v17  ;;  %v5632_v12 = vshll.u32 %v5277_v25, 16  ;;  %v4362_v16 = vsel %vm4194_vm6, %v10433_v37, 0.0 }
 0x3f0   : > { %v10600_v13 = vadd.f32 %v3971_v47, %v3178_v46  ;;  %v10603_v56 = vsel %vm4194_vm6, %v4553_v59, 0.0  ;;  %v10607_v28 = vsel %vm4194_vm6, %v10077_v21, 0.0  ;;  %v4751_v53 = vsel %vm4194_vm6, %v4540_v42, 0.0 }
 0x3f1   : > { %v10592_v48 = vrot.slane %v5629_v18, 7  ;;  %v5734_v17 = vshrl.u32 %v5291_v31, 16  ;;  %v4541_v58 = vmul.f32 %v10445_v3, %v10445_v3  ;;  %v5737_v37 = vshll.u32 %v5291_v31, 16 }
 0x3f2   : > { %v2710_v6 = vpop.f32.mrf.mxu0  ;;  %v4554_v47 = vmul.f32 %v10077_v21, %v10077_v21  ;;  %v4363_v59 = vadd.f32 %v4362_v16, %v10413_v19  ;;  %v10618_v33 = vadd.f32 %v4041_v9, %v3248_v2  ;;  %v4752_v31 = vadd.f32 %v4751_v53, %v10418_v23 }
 0x3f3   : > { %v5634_v25 = vor.u32 %v5632_v12, %v10592_v48  ;;  %v10613_v62 = vrot.slane %v5734_v17, 7  ;;  %v3180_v18 = vadd.f32 %v3179_v38, %v2710_v6  ;;  %v4939_v17 = vpack.c.bf16 %v10600_v13, %v10600_v13 }
 0x3f4   : > { %11200 = vst [vmem:[#allocation13_spill] sm:$0xff] %v10618_v33  ;;  %v4364_v21 = vsel %vm4194_vm6, %v10445_v3, 0.0  ;;  %v4542_v19 = vmul.f32 %v10474_v32, %v10474_v32  ;;  %v4753_v6 = vsel %vm4194_vm6, %v4541_v58, 0.0  ;;  %v4543_v16 = vmul.f32 %v10489_v44, %v10489_v44 }
 0x3f5   : > { %v5866_v42 = vsel %vm8299_vm9, 4048220490, %v5634_v25  ;;  %v5739_v12 = vor.u32 %v5737_v37, %v10613_v62  ;;  %v4967_v23 = vpack.c.bf16 %v10618_v33, %v10618_v33  ;;  %v4365_v58 = vadd.f32 %v4364_v21, %v4363_v59 }
 0x3f6   : > { %v3973_v46 = vpop.f32.mrf.mxu2  ;;  %v6085_v38 = vunpack.c.l.b16 %v5866_v42  ;;  %v6086_v9 = vunpack.c.h.b16 %v5866_v42  ;;  %v4366_v42 = vsel %vm4194_vm6, %v10474_v32, 0.0  ;;  %v5195_v51 = vunpack.c.l.b16 %v4939_v17 }
 0x3f7   : > { %v10625_v26 = vadd.f32 %v3973_v46, %v3180_v18  ;;  %v4043_v2 = vpop.f32.mrf.mxu3  ;;  %v5873_v53 = vsel %vm8299_vm9, 4048220490, %v5739_v12  ;;  %v4755_v22 = vsel %vm4194_vm6, %v4542_v19, 0.0  ;;  %v4754_v12 = vadd.f32 %v4753_v6, %v4752_v31 }
 0x3f8   : > { %v10637_v37 = vadd.f32 %v4043_v2, %v3250_v60  ;;  %v6247_v18 = vpack.c.b16 %v6085_v38, %v6085_v38  ;;  %v6248_v46 = vpack.c.b16 %v6086_v9, %v6086_v9  ;;  %v4544_v60 = vmul.f32 %v10511_v29, %v10511_v29 }
 0x3f9   : > { %v4940_v25 = vpack.c.bf16 %v10625_v26, %v10625_v26  ;;  %v6120_v33 = vunpack.c.l.b16 %v5873_v53  ;;  %v4368_v59 = vsel %vm4194_vm6, %v10489_v44, 0.0  ;;  %v6121_v21 = vunpack.c.h.b16 %v5873_v53 }
 0x3fa   : > { %11201 = vst [vmem:[#allocation14_spill] sm:$0xff] %v10637_v37  ;;  %v2713_v3 = vpop.f32.mrf.mxu0  ;;  %v4968_v2 = vpack.c.bf16 %v10637_v37, %v10637_v37  ;;  %v4757_v32 = vsel %vm4194_vm6, %v4543_v16, 0.0  ;;  %v5223_v17 = vunpack.c.l.b16 %v4967_v23  ;;  %v4367_v37 = vadd.f32 %v4366_v42, %v4365_v58 }
 0x3fb   : > { %v5196_v24 = vunpack.c.l.b16 %v4940_v25  ;;  %6576 = vst.msk [vmem:[%s8328_s11 + $0x1cc] sm:$0xf] %vm6459_vm10, %v6247_v18  ;;  %v6282_v25 = vpack.c.b16 %v6120_v33, %v6120_v33  ;;  %v4756_v54 = vadd.f32 %v4755_v22, %v4754_v12  ;;  %v6283_v18 = vpack.c.b16 %v6121_v21, %v6121_v21 }
 0x3fc   : > { %6577 = vst.msk [vmem:[%s8328_s11 + $0x1d0] sm:$0xf] %vm6459_vm10, %v6248_v46  ;;  %v5224_v19 = vunpack.c.l.b16 %v4968_v2  ;;  %v10658_v31 = vsel %vm4194_vm6, %v4554_v47, 0.0  ;;  %v4370_v44 = vsel %vm4194_vm6, %v10511_v29, 0.0  ;;  %v4369_v23 = vadd.f32 %v4368_v59, %v4367_v37 }
 0x3fd   : > { %v5278_v38 = vpack.c.b16 %v5196_v24, %v5195_v51  ;;  %v4759_v24 = vsel %vm4194_vm6, %v4544_v60, 0.0  ;;  %v3184_v51 = vpop.f32.mrf.mxu1  ;;  %6611 = vst.msk [vmem:[%s8328_s11 + $0x258] sm:$0xf] %vm6459_vm10, %v6282_v25  ;;  %v4758_v33 = vadd.f32 %v4757_v32, %v4756_v54  ;;  %v10669_v22 = vsel %vm4194_vm6, %v10088_v43, 0.0 }
 0x3fe   : > { %v3976_v9 = vpop.f32.mrf.mxu2  ;;  %v5292_v6 = vpack.c.b16 %v5224_v19, %v5223_v17  ;;  %6612 = vst.msk [vmem:[%s8328_s11 + $0x25c] sm:$0xf] %vm6459_vm10, %v6283_v18  ;;  %v4372_v29 = vsel %vm4194_vm6, %v10522_v5, 0.0  ;;  %v3183_v58 = vadd.f32 %v3182_v40, %v2713_v3  ;;  %v10675_v60 = vmul.f32 %v10088_v43, %v10088_v43 }
 0x3ff   : > { %v5636_v15 = vshrl.u32 %v5278_v38, 16  ;;  %v4046_v16 = vpop.f32.mrf.mxu3  ;;  %v5639_v46 = vshll.u32 %v5278_v38, 16  ;;  %v4371_v37 = vadd.f32 %v4370_v44, %v4369_v23  ;;  %v4760_v54 = vadd.f32 %v4759_v24, %v4758_v33 }
 0x400   : > { %v5741_v47 = vshrl.u32 %v5292_v6, 16  ;;  %v4545_v2 = vmul.f32 %v10522_v5, %v10522_v5  ;;  %v5744_v59 = vshll.u32 %v5292_v6, 16  ;;  %v4158_v38 = vadd.f32 %v3976_v9, %v3183_v58 }
 0x401   : > { %v5638_v53 = vrot.slane %v5636_v15, 7  ;;  %v4373_v21 = vadd.f32 %v4372_v29, %v4371_v37  ;;  %v4546_v43 = vmul.f32 %v10600_v13, %v10600_v13  ;;  %v10686_v5 = vadd.f32 %v4046_v16, %v10552_v57 }
 0x402   : > { %v2715_v42 = vpop.f32.mrf.mxu0  ;;  %v5743_v12 = vrot.slane %v5741_v47, 7  ;;  %v4941_v23 = vpack.c.bf16 %v4158_v38, %v4158_v38  ;;  %v4547_v57 = vmul.f32 %v10625_v26, %v10625_v26 }
 0x403   : > { %v5641_v15 = vor.u32 %v5639_v46, %v5638_v53  ;;  %v3185_v17 = vadd.f32 %v3184_v51, %v2715_v42  ;;  %v5898_v40 = vsel %vm8299_vm9, %v5638_v53, 4048220490  ;;  %v4761_v53 = vsel %vm4194_vm6, %v4545_v2, 0.0 }
 0x404   : > { %v5746_v25 = vor.u32 %v5744_v59, %v5743_v12  ;;  %v5905_v44 = vsel %vm8299_vm9, %v5743_v12, 4048220490  ;;  %v4969_v59 = vpack.c.bf16 %v10686_v5, %v10686_v5 }
 0x405   : > { %v5642_v32 = vsel %vm5297_vm7, %v10592_v48, %v5641_v15  ;;  %v6089_v48 = vunpack.c.l.b16 %v5898_v40  ;;  %v6124_v47 = vunpack.c.l.b16 %v5905_v44  ;;  %v3187_v16 = vpop.f32.mrf.mxu1  ;;  %v4374_v15 = vsel %vm4194_vm6, %v10600_v13, 0.0 }
 0x406   : > { %v6087_v3 = vunpack.c.l.b16 %v5642_v32  ;;  %v6088_v19 = vunpack.c.h.b16 %v5642_v32  ;;  %v3978_v18 = vpop.f32.mrf.mxu2  ;;  %v5747_v6 = vsel %vm5297_vm7, %v10613_v62, %v5746_v25  ;;  %v4762_v32 = vadd.f32 %v4761_v53, %v4760_v54 }
 0x407   : > { %v4159_v9 = vadd.f32 %v3978_v18, %v3185_v17  ;;  %v4048_v33 = vpop.f32.mrf.mxu3  ;;  %v6122_v46 = vunpack.c.l.b16 %v5747_v6  ;;  %v6123_v29 = vunpack.c.h.b16 %v5747_v6  ;;  %v6251_v37 = vpack.c.b16 %v6089_v48, %v6089_v48 }
 0x408   : > { %v6249_v24 = vpack.c.b16 %v6087_v3, %v6087_v3  ;;  %v6250_v51 = vpack.c.b16 %v6088_v19, %v6088_v19  ;;  %v10698_v42 = vadd.f32 %v4048_v33, %v10560_v34  ;;  %v4763_v17 = vsel %vm4194_vm6, %v4546_v43, 0.0 }
 0x409   : > { %v4942_v58 = vpack.c.bf16 %v4159_v9, %v4159_v9  ;;  %v6284_v2 = vpack.c.b16 %v6122_v46, %v6122_v46  ;;  %v6285_v12 = vpack.c.b16 %v6123_v29, %v6123_v29  ;;  %v5197_v40 = vunpack.c.l.b16 %v4941_v23  ;;  %6580 = vst.msk [vmem:[%s8328_s11 + $0x1dc] sm:$0x1] %vm6464_vm11, %v6251_v37 }
 0x40a   : > { %6578 = vst.msk [vmem:[%s8328_s11 + $0x1d4] sm:$0xf] %vm6459_vm10, %v6249_v24  ;;  %v2718_v62 = vpop.f32.mrf.mxu0  ;;  %v4548_v34 = vmul.f32 %v4158_v38, %v4158_v38  ;;  %v4970_v13 = vpack.c.bf16 %v10698_v42, %v10698_v42  ;;  %v6286_v25 = vpack.c.b16 %v6124_v47, %v6124_v47  ;;  %v4375_v18 = vadd.f32 %v4374_v15, %v4373_v21 }
 0x40b   : > { %6579 = vst.msk [vmem:[%s8328_s11 + $0x1d8] sm:$0xf] %vm6459_vm10, %v6250_v51  ;;  %v5198_v3 = vunpack.c.l.b16 %v4942_v58  ;;  %v3188_v19 = vadd.f32 %v3187_v16, %v2718_v62  ;;  %v4376_v44 = vsel %vm4194_vm6, %v10625_v26, 0.0  ;;  %v4765_v54 = vsel %vm4194_vm6, %v4547_v57, 0.0 }
 0x40c   : > { %6613 = vst.msk [vmem:[%s8328_s11 + $0x260] sm:$0xf] %vm6459_vm10, %v6284_v2  ;;  %v5225_v24 = vunpack.c.l.b16 %v4969_v59  ;;  %v4549_v51 = vmul.f32 %v4159_v9, %v4159_v9  ;;  %v5226_v6 = vunpack.c.l.b16 %v4970_v13  ;;  %v10722_v33 = vsel %vm4194_vm6, %v10675_v60, 0.0 }
 0x40d   : > { %6614 = vst.msk [vmem:[%s8328_s11 + $0x264] sm:$0xf] %vm6459_vm10, %v6285_v12  ;;  %v5279_v43 = vpack.c.b16 %v5198_v3, %v5197_v40  ;;  %v4764_v21 = vadd.f32 %v4763_v17, %v4762_v32  ;;  %v4378_v53 = vsel %vm4194_vm6, %v4158_v38, 0.0  ;;  %v4377_v29 = vadd.f32 %v4376_v44, %v4375_v18  ;;  %v3189_v17 = vpop.f32.mrf.mxu1 }
 0x40e   : > { %v3981_v48 = vpop.f32.mrf.mxu2  ;;  %6615 = vst.msk [vmem:[%s8328_s11 + $0x268] sm:$0x1] %vm6464_vm11, %v6286_v25  ;;  %v4767_v47 = vsel %vm4194_vm6, %v4548_v34, 0.0  ;;  %v5293_v57 = vpack.c.b16 %v5226_v6, %v5225_v24  ;;  %v10728_v58 = vsel %vm4194_vm6, %v10125_v41, 0.0  ;;  %v4380_v12 = vsel %vm4194_vm6, %v4159_v9, 0.0 }
 0x40f   : > { %v4160_v23 = vadd.f32 %v3981_v48, %v3188_v19  ;;  %v5644_v26 = vshrl.u32 %v5279_v43, 16  ;;  %v4051_v46 = vpop.f32.mrf.mxu3  ;;  %v4766_v62 = vadd.f32 %v4765_v54, %v4764_v21  ;;  %v5647_v15 = vshll.u32 %v5279_v43, 16 }
 0x410   : > { %v4379_v2 = vadd.f32 %v4378_v53, %v4377_v29  ;;  %v4769_v38 = vsel %vm4194_vm6, %v4549_v51, 0.0  ;;  %v5749_v59 = vshrl.u32 %v5293_v57, 16  ;;  %v10737_v34 = vadd.f32 %v4051_v46, %v10564_v4 }
 0x411   : > { %v4550_v16 = vmul.f32 %v4160_v23, %v4160_v23  ;;  %v10730_v37 = vrot.slane %v5644_v26, 7  ;;  %v4768_v32 = vadd.f32 %v4767_v47, %v4766_v62  ;;  %v4382_v3 = vsel %vm4194_vm6, %v4160_v23, 0.0 }
 0x412   : > { %v2720_v60 = vpop.f32.mrf.mxu0  ;;  %v10739_v13 = vrot.slane %v5749_v59, 7  ;;  %v5752_v19 = vshll.u32 %v5293_v57, 16  ;;  %v4556_v9 = vmul.f32 %v10125_v41, %v10125_v41  ;;  %v4381_v44 = vadd.f32 %v4380_v12, %v4379_v2 }
 0x413   : > { %v5649_v40 = vor.u32 %v5647_v15, %v10730_v37  ;;  %v4771_v25 = vsel %vm4194_vm6, %v4550_v16, 0.0  ;;  %v3190_v18 = vadd.f32 %v3189_v17, %v2720_v60  ;;  %v4770_v54 = vadd.f32 %v4769_v38, %v4768_v32 }
 0x414   : > { %v5754_v24 = vor.u32 %v5752_v19, %v10739_v13  ;;  %v4943_v51 = vpack.c.bf16 %v4160_v23, %v4160_v23  ;;  %v4383_v21 = vadd.f32 %v4382_v3, %v4381_v44  ;;  %v4971_v26 = vpack.c.bf16 %v10737_v34, %v10737_v34 }
 0x415   : > { %v5867_v48 = vsel %vm8299_vm9, 4048220490, %v5649_v40  ;;  %v4772_v53 = vadd.f32 %v4771_v25, %v4770_v54  ;;  %v4557_v2 = vmul.f32 %v10148_v20, %v10148_v20  ;;  %v4558_v3 = vmul.f32 %v10190_v50, %v10190_v50 }
 0x416   : > { %v3983_v43 = vpop.f32.mrf.mxu2  ;;  %v6090_v6 = vunpack.c.l.b16 %v5867_v48  ;;  %v6091_v29 = vunpack.c.h.b16 %v5867_v48  ;;  %v5874_v23 = vsel %vm8299_vm9, 4048220490, %v5754_v24  ;;  %v5199_v12 = vunpack.c.l.b16 %v4943_v51 }
 0x417   : > { %v4161_v4 = vadd.f32 %v3983_v43, %v3190_v18  ;;  %v4053_v46 = vpop.f32.mrf.mxu3  ;;  %v6125_v40 = vunpack.c.l.b16 %v5874_v23  ;;  %v5227_v19 = vunpack.c.l.b16 %v4971_v26  ;;  %v6126_v18 = vunpack.c.h.b16 %v5874_v23 }
 0x418   : > { %v10751_v16 = vadd.f32 %v4053_v46, %v10570_v1  ;;  %v6252_v15 = vpack.c.b16 %v6090_v6, %v6090_v6  ;;  %v6253_v60 = vpack.c.b16 %v6091_v29, %v6091_v29  ;;  %v4783_v48 = vsel %vm4194_vm6, %v4556_v9, 0.0 }
 0x419   : > { %v4384_v41 = vsel %vm4194_vm6, %v4161_v4, 0.0  ;;  %v4551_v47 = vmul.f32 %v4161_v4, %v4161_v4  ;;  %v4944_v57 = vpack.c.bf16 %v4161_v4, %v4161_v4  ;;  %v6287_v43 = vpack.c.b16 %v6125_v40, %v6125_v40 }
 0x41a   : > { %v4385_v62 = vadd.f32 %v4384_v41, %v4383_v21  ;;  %v4972_v1 = vpack.c.bf16 %v10751_v16, %v10751_v16  ;;  %6581 = vst.msk [vmem:[%s8328_s11 + $0x1e0] sm:$0xf] %vm6459_vm10, %v6252_v15  ;;  %v4559_v24 = vmul.f32 %v10220_v61, %v10220_v61  ;;  %v6288_v4 = vpack.c.b16 %v6126_v18, %v6126_v18 }
 0x41b   : > { %v4773_v38 = vsel %vm4194_vm6, %v4551_v47, 0.0  ;;  %v5200_v59 = vunpack.c.l.b16 %v4944_v57  ;;  %6582 = vst.msk [vmem:[%s8328_s11 + $0x1e4] sm:$0xf] %vm6459_vm10, %v6253_v60  ;;  %v4396_v6 = vsel %vm4194_vm6, %v10148_v20, 0.0  ;;  %v4398_v9 = vsel %vm4194_vm6, %v10190_v50, 0.0 }
 0x41c   : > { %v4387_v32 = vadd.f32 %v10587_v63, %v4385_v62  ;;  %v4774_v17 = vadd.f32 %v4773_v38, %v4772_v53  ;;  %v5228_v54 = vunpack.c.l.b16 %v4972_v1  ;;  %6616 = vst.msk [vmem:[%s8328_s11 + $0x26c] sm:$0xf] %vm6459_vm10, %v6287_v43  ;;  %v4787_v41 = vsel %vm4194_vm6, %v4558_v3, 0.0 }
 0x41d   : > { %v5280_v25 = vpack.c.b16 %v5200_v59, %v5199_v12  ;;  %6617 = vst.msk [vmem:[%s8328_s11 + $0x270] sm:$0xf] %vm6459_vm10, %v6288_v4  ;;  %v4400_v47 = vsel %vm4194_vm6, %v10220_v61, 0.0  ;;  %v4789_v57 = vsel %vm4194_vm6, %v4559_v24, 0.0  ;;  %v4402_v62 = vsel %vm4194_vm6, %v10268_v35, 0.0 }
 0x41e   : > { %v4389_v44 = vadd.f32 %v10596_v10, %v4387_v32  ;;  %v4776_v63 = vadd.f32 %v10590_v49, %v4774_v17  ;;  %v5294_v10 = vpack.c.b16 %v5228_v54, %v5227_v19  ;;  %v4785_v49 = vsel %vm4194_vm6, %v4557_v2, 0.0 }
 0x41f   : > { %v5651_v51 = vshrl.u32 %v5280_v25, 16  ;;  %v4056_v26 = vpop.f32.mrf.mxu3  ;;  %v5654_v29 = vshll.u32 %v5280_v25, 16 }
 0x420   : > { %v4391_v21 = vadd.f32 %v10607_v28, %v4389_v44  ;;  %v4778_v53 = vadd.f32 %v10603_v56, %v4776_v63  ;;  %v5756_v56 = vshrl.u32 %v5294_v10, 16  ;;  %v5759_v2 = vshll.u32 %v5294_v10, 16 }
 0x421   : > { %v5653_v46 = vrot.slane %v5651_v51, 7  ;;  %v10798_v61 = vadd.f32 %v4056_v26, %v10578_v8  ;;  %v4404_v26 = vsel %vm4194_vm6, %v10277_v52, 0.0 }
 0x422   : > { %v4393_v20 = vadd.f32 %v10669_v22, %v4391_v21  ;;  %v4780_v28 = vadd.f32 %v10658_v31, %v4778_v53  ;;  %v5758_v60 = vrot.slane %v5756_v56, 7  ;;  %v4563_v56 = vmul.f32 %v10323_v39, %v10323_v39 }
 0x423   : > { %v5656_v50 = vor.u32 %v5654_v29, %v5653_v46  ;;  %v5899_v22 = vsel %vm8299_vm9, %v5653_v46, 4048220490  ;;  %v4973_v44 = vpack.c.bf16 %v10798_v61, %v10798_v61 }
 0x424   : > { %v4395_v23 = vadd.f32 %v10728_v58, %v4393_v20  ;;  %v4782_v15 = vadd.f32 %v10722_v33, %v4780_v28  ;;  %v6094_v12 = vunpack.c.l.b16 %v5899_v22  ;;  %v4560_v33 = vmul.f32 %v10268_v35, %v10268_v35  ;;  %v11202_v22 = vld [vmem:[#allocation41_spill] sm:$0xff] }
 0x425   : > { %v5657_v31 = vsel %vm5297_vm7, %v10730_v37, %v5656_v50  ;;  %v5761_v58 = vor.u32 %v5759_v2, %v5758_v60  ;;  %v5906_v1 = vsel %vm8299_vm9, %v5758_v60, 4048220490  ;;  %v4406_v28 = vsel %vm4194_vm6, %v10306_v14, 0.0 }
 0x426   : > { %v4397_v38 = vadd.f32 %v4396_v6, %v4395_v23  ;;  %v4784_v59 = vadd.f32 %v4783_v48, %v4782_v15  ;;  %v6092_v32 = vunpack.c.l.b16 %v5657_v31  ;;  %v6093_v17 = vunpack.c.h.b16 %v5657_v31 }
 0x427   : > { %v6256_v40 = vpack.c.b16 %v6094_v12, %v6094_v12  ;;  %v4058_v25 = vpop.f32.mrf.mxu3  ;;  %v5762_v18 = vsel %vm5297_vm7, %v10739_v13, %v5761_v58  ;;  %v6129_v63 = vunpack.c.l.b16 %v5906_v1  ;;  %v4791_v51 = vsel %vm4194_vm6, %v4560_v33, 0.0 }
 0x428   : > { %v4399_v37 = vadd.f32 %v4398_v9, %v4397_v38  ;;  %v4786_v3 = vadd.f32 %v4785_v49, %v4784_v59  ;;  %v6254_v8 = vpack.c.b16 %v6092_v32, %v6092_v32  ;;  %v6255_v19 = vpack.c.b16 %v6093_v17, %v6093_v17 }
 0x429   : > { %v10809_v35 = vadd.f32 %v4058_v25, %v10582_v55  ;;  %6585 = vst.msk [vmem:[%s8328_s11 + $0x1f0] sm:$0x1] %vm6464_vm11, %v6256_v40  ;;  %v6127_v48 = vunpack.c.l.b16 %v5762_v18  ;;  %v6128_v24 = vunpack.c.h.b16 %v5762_v18  ;;  %v4561_v13 = vmul.f32 %v10277_v52, %v10277_v52 }
 0x42a   : > { %v4401_v54 = vadd.f32 %v4400_v47, %v4399_v37  ;;  %v4788_v43 = vadd.f32 %v4787_v41, %v4786_v3  ;;  %6583 = vst.msk [vmem:[%s8328_s11 + $0x1e8] sm:$0xf] %vm6459_vm10, %v6254_v8  ;;  %v6291_v4 = vpack.c.b16 %v6129_v63, %v6129_v63  ;;  %v4562_v49 = vmul.f32 %v10306_v14, %v10306_v14  ;;  %v11203_v3 = vld [vmem:[#allocation42_spill] sm:$0xff] }
 0x42b   : > { %6584 = vst.msk [vmem:[%s8328_s11 + $0x1ec] sm:$0xf] %vm6459_vm10, %v6255_v19  ;;  %v4974_v55 = vpack.c.bf16 %v10809_v35, %v10809_v35  ;;  %v6289_v53 = vpack.c.b16 %v6127_v48, %v6127_v48  ;;  %v6290_v10 = vpack.c.b16 %v6128_v24, %v6128_v24  ;;  %v5229_v9 = vunpack.c.l.b16 %v4973_v44  ;;  %v11204_v44 = vld [vmem:[#allocation7_spill] sm:$0xff] }
 0x42c   : > { %v4403_v6 = vadd.f32 %v4402_v62, %v4401_v54  ;;  %v4790_v21 = vadd.f32 %v4789_v57, %v4788_v43  ;;  %6620 = vst.msk [vmem:[%s8328_s11 + $0x27c] sm:$0x1] %vm6464_vm11, %v6291_v4  ;;  %v4793_v20 = vsel %vm4194_vm6, %v4561_v13, 0.0  ;;  %v4564_v47 = vmul.f32 %v10358_v27, %v10358_v27 }
 0x42d   : > { %v5230_v46 = vunpack.c.l.b16 %v4974_v55  ;;  %6618 = vst.msk [vmem:[%s8328_s11 + $0x274] sm:$0xf] %vm6459_vm10, %v6289_v53  ;;  %v4795_v23 = vsel %vm4194_vm6, %v4562_v49, 0.0  ;;  %v4408_v15 = vsel %vm4194_vm6, %v10323_v39, 0.0  ;;  %v3268_v14 = vadd.f32 %v9939_v11, %v11202_v22 }
 0x42e   : > { %v4405_v29 = vadd.f32 %v4404_v26, %v4403_v6  ;;  %v4792_v41 = vadd.f32 %v4791_v51, %v4790_v21  ;;  %6619 = vst.msk [vmem:[%s8328_s11 + $0x278] sm:$0xf] %vm6459_vm10, %v6290_v10  ;;  %v4565_v31 = vmul.f32 %v10367_v36, %v10367_v36  ;;  %v4797_v38 = vsel %vm4194_vm6, %v4563_v56, 0.0  ;;  %v11206_v56 = vld [vmem:[#allocation12_spill] sm:$0xff] }
 0x42f   : > { %v5295_v52 = vpack.c.b16 %v5230_v46, %v5229_v9  ;;  %v4061_v50 = vpop.f32.mrf.mxu3  ;;  %v4410_v59 = vsel %vm4194_vm6, %v10358_v27, 0.0  ;;  %v4799_v33 = vsel %vm4194_vm6, %v4564_v47, 0.0  ;;  %v4412_v11 = vsel %vm4194_vm6, %v10367_v36, 0.0  ;;  %v11205_v9 = vld [vmem:[#allocation8_spill] sm:$0xff] }
 0x430   : > { %v4407_v57 = vadd.f32 %v4406_v28, %v4405_v29  ;;  %v4794_v62 = vadd.f32 %v4793_v20, %v4792_v41  ;;  %v4566_v1 = vmul.f32 %v10398_v7, %v10398_v7  ;;  %v10857_v37 = vadd.f32 %v4061_v50, %v3268_v14 }
 0x431   : > { %v5764_v60 = vshrl.u32 %v5295_v52, 16  ;;  %v5767_v17 = vshll.u32 %v5295_v52, 16  ;;  %v3270_v27 = vadd.f32 %v9959_v30, %v11203_v3  ;;  %v4801_v8 = vsel %vm4194_vm6, %v4565_v31, 0.0  ;;  %v11208_v31 = vld [vmem:[#allocation10_spill] sm:$0xff] }
 0x432   : > { %v4409_v2 = vadd.f32 %v4408_v15, %v4407_v57  ;;  %v4796_v12 = vadd.f32 %v4795_v23, %v4794_v62  ;;  %v4414_v18 = vsel %vm4194_vm6, %v10398_v7, 0.0  ;;  %v4567_v36 = vmul.f32 %v10411_v45, %v10411_v45  ;;  %v11207_v62 = vld [vmem:[#allocation9_spill] sm:$0xff] }
 0x433   : > { %v10849_v32 = vrot.slane %v5764_v60, 7  ;;  %v4568_v63 = vmul.f32 %v11204_v44, %v11204_v44  ;;  %v4803_v13 = vsel %vm4194_vm6, %v4566_v1, 0.0  ;;  %v4416_v7 = vsel %vm4194_vm6, %v10411_v45, 0.0 }
 0x434   : > { %v4411_v39 = vadd.f32 %v4410_v59, %v4409_v2  ;;  %v4798_v58 = vadd.f32 %v4797_v38, %v4796_v12  ;;  %v4975_v55 = vpack.c.bf16 %v10857_v37, %v10857_v37  ;;  %v4805_v26 = vsel %vm4194_vm6, %v4567_v36, 0.0 }
 0x435   : > { %v5769_v40 = vor.u32 %v5767_v17, %v10849_v32  ;;  %v4418_v49 = vsel %vm4194_vm6, %v11204_v44, 0.0  ;;  %v4569_v46 = vmul.f32 %v11205_v9, %v11205_v9  ;;  %v4807_v29 = vsel %vm4194_vm6, %v4568_v63, 0.0  ;;  %v11210_v44 = vld [vmem:[#allocation13_spill] sm:$0xff] }
 0x436   : > { %v4800_v19 = vadd.f32 %v4799_v33, %v4798_v58  ;;  %v4413_v25 = vadd.f32 %v4412_v11, %v4411_v39  ;;  %v4420_v28 = vsel %vm4194_vm6, %v11205_v9, 0.0  ;;  %v4570_v52 = vmul.f32 %v11206_v56, %v11206_v56 }
 0x437   : > { %v5875_v54 = vsel %vm8299_vm9, 4048220490, %v5769_v40  ;;  %v4063_v24 = vpop.f32.mrf.mxu3  ;;  %v5231_v47 = vunpack.c.l.b16 %v4975_v55  ;;  %v4571_v50 = vmul.f32 %v11207_v62, %v11207_v62  ;;  %v4809_v60 = vsel %vm4194_vm6, %v4569_v46, 0.0  ;;  %v11209_v40 = vld [vmem:[#allocation11_spill] sm:$0xff] }
 0x438   : > { %v4415_v43 = vadd.f32 %v4414_v18, %v4413_v25  ;;  %v4802_v48 = vadd.f32 %v4801_v8, %v4800_v19  ;;  %v6130_v30 = vunpack.c.l.b16 %v5875_v54  ;;  %v6131_v51 = vunpack.c.h.b16 %v5875_v54 }
 0x439   : > { %v10875_v4 = vadd.f32 %v4063_v24, %v3270_v27  ;;  %v4422_v22 = vsel %vm4194_vm6, %v11206_v56, 0.0  ;;  %v4572_v2 = vmul.f32 %v11208_v31, %v11208_v31  ;;  %v4811_v59 = vsel %vm4194_vm6, %v4570_v52, 0.0 }
 0x43a   : > { %v4417_v6 = vadd.f32 %v4416_v7, %v4415_v43  ;;  %v4804_v21 = vadd.f32 %v4803_v13, %v4802_v48  ;;  %v6292_v53 = vpack.c.b16 %v6130_v30, %v6130_v30  ;;  %v6293_v10 = vpack.c.b16 %v6131_v51, %v6131_v51  ;;  %v11211_v7 = vld [vmem:[#allocation14_spill] sm:$0xff] }
 0x43b   : > { %v4976_v45 = vpack.c.bf16 %v10875_v4, %v10875_v4  ;;  %v4424_v17 = vsel %vm4194_vm6, %v11207_v62, 0.0  ;;  %v4813_v39 = vsel %vm4194_vm6, %v4571_v50, 0.0  ;;  %v4426_v1 = vsel %vm4194_vm6, %v11208_v31, 0.0 }
 0x43c   : > { %v4419_v41 = vadd.f32 %v4418_v49, %v4417_v6  ;;  %v4806_v20 = vadd.f32 %v4805_v26, %v4804_v21  ;;  %6621 = vst.msk [vmem:[%s8328_s11 + $0x280] sm:$0xf] %vm6459_vm10, %v6292_v53  ;;  %v4573_v3 = vmul.f32 %v11209_v40, %v11209_v40  ;;  %v4815_v19 = vsel %vm4194_vm6, %v4572_v2, 0.0 }
 0x43d   : > { %v5232_v57 = vunpack.c.l.b16 %v4976_v45  ;;  %6622 = vst.msk [vmem:[%s8328_s11 + $0x284] sm:$0xf] %vm6459_vm10, %v6293_v10  ;;  %v4428_v36 = vsel %vm4194_vm6, %v11209_v40, 0.0  ;;  %v4574_v63 = vmul.f32 %v11210_v44, %v11210_v44  ;;  %v4430_v13 = vsel %vm4194_vm6, %v11210_v44, 0.0 }
 0x43e   : > { %v4421_v23 = vadd.f32 %v4420_v28, %v4419_v41  ;;  %v4808_v15 = vadd.f32 %v4807_v29, %v4806_v20  ;;  %v4817_v51 = vsel %vm4194_vm6, %v4573_v3, 0.0  ;;  %v4575_v55 = vmul.f32 %v11211_v7, %v11211_v7 }
 0x43f   : > { %v5296_v14 = vpack.c.b16 %v5232_v57, %v5231_v47  ;;  %v4819_v26 = vsel %vm4194_vm6, %v4574_v63, 0.0  ;;  %v4432_v49 = vsel %vm4194_vm6, %v11211_v7, 0.0  ;;  %v4576_v9 = vmul.f32 %v10686_v5, %v10686_v5 }
 0x440   : > { %v4423_v12 = vadd.f32 %v4422_v22, %v4421_v23  ;;  %v4810_v38 = vadd.f32 %v4809_v60, %v4808_v15  ;;  %v4821_v20 = vsel %vm4194_vm6, %v4575_v55, 0.0  ;;  %v4434_v28 = vsel %vm4194_vm6, %v10686_v5, 0.0 }
 0x441   : > { %v5771_v33 = vshrl.u32 %v5296_v14, 16  ;;  %v5774_v8 = vshll.u32 %v5296_v14, 16  ;;  %v4577_v56 = vmul.f32 %v10698_v42, %v10698_v42  ;;  %v7464_v57 = vmov 4048220490  }
 0x442   : > { %v4425_v58 = vadd.f32 %v4424_v17, %v4423_v12  ;;  %v4812_v11 = vadd.f32 %v4811_v59, %v4810_v38  ;;  %v5973_v62 = vunpack.c.l.b16 %v7464_v57  ;;  %v5974_v50 = vunpack.c.h.b16 %v7464_v57 }
 0x443   : > { %v5773_v27 = vrot.slane %v5771_v33, 7  ;;  %v4823_v23 = vsel %vm4194_vm6, %v4576_v9, 0.0  ;;  %v4436_v15 = vsel %vm4194_vm6, %v10698_v42, 0.0  ;;  %v4578_v5 = vmul.f32 %v10737_v34, %v10737_v34 }
 0x444   : > { %v4427_v25 = vadd.f32 %v4426_v1, %v4425_v58  ;;  %v4814_v18 = vadd.f32 %v4813_v39, %v4812_v11  ;;  %v6135_v14 = vpack.c.b16 %v5973_v62, %v5973_v62  ;;  %v6136_v31 = vpack.c.b16 %v5974_v50, %v5974_v50 }
 0x445   : > { %v5776_v54 = vor.u32 %v5774_v8, %v5773_v27  ;;  %v5907_v43 = vsel %vm8299_vm9, %v5773_v27, 4048220490  ;;  %v4825_v2 = vsel %vm4194_vm6, %v4577_v56, 0.0  ;;  %v4438_v12 = vsel %vm4194_vm6, %v10737_v34, 0.0 }
 0x446   : > { %v4429_v48 = vadd.f32 %v4428_v36, %v4427_v25  ;;  %v4816_v24 = vadd.f32 %v4815_v19, %v4814_v18  ;;  %v6134_v30 = vunpack.c.l.b16 %v5907_v43  ;;  %v4579_v42 = vmul.f32 %v10751_v16, %v10751_v16  ;;  %6460 = vst.msk [vmem:[%s8328_s11] sm:$0xf] %vm6459_vm10, %v6135_v14 }
 0x447   : > { %v5777_v6 = vsel %vm5297_vm7, %v10849_v32, %v5776_v54  ;;  %v4827_v17 = vsel %vm4194_vm6, %v4578_v5, 0.0  ;;  %v4440_v33 = vsel %vm4194_vm6, %v10751_v16, 0.0  ;;  %v4580_v39 = vmul.f32 %v10798_v61, %v10798_v61  ;;  %6461 = vst.msk [vmem:[%s8328_s11 + $0x4] sm:$0xf] %vm6459_vm10, %v6136_v31 }
 0x448   : > { %v4431_v21 = vadd.f32 %v4430_v13, %v4429_v48  ;;  %v4818_v53 = vadd.f32 %v4817_v51, %v4816_v24  ;;  %v6132_v10 = vunpack.c.l.b16 %v5777_v6  ;;  %v6133_v0 = vunpack.c.h.b16 %v5777_v6  ;;  %6462 = vst.msk [vmem:[%s8328_s11 + $0x8] sm:$0xf] %vm6459_vm10, %v6135_v14 }
 0x449   : > { %v6296_v46 = vpack.c.b16 %v6134_v30, %v6134_v30  ;;  %v4829_v11 = vsel %vm4194_vm6, %v4579_v42, 0.0  ;;  %v4442_v1 = vsel %vm4194_vm6, %v10798_v61, 0.0  ;;  %v4581_v16 = vmul.f32 %v10809_v35, %v10809_v35  ;;  %6463 = vst.msk [vmem:[%s8328_s11 + $0xc] sm:$0xf] %vm6459_vm10, %v6136_v31 }
 0x44a   : > { %v4433_v45 = vadd.f32 %v4432_v49, %v4431_v21  ;;  %v4820_v29 = vadd.f32 %v4819_v26, %v4818_v53  ;;  %v6294_v41 = vpack.c.b16 %v6132_v10, %v6132_v10  ;;  %v6295_v32 = vpack.c.b16 %v6133_v0, %v6133_v0  ;;  %6465 = vst.msk [vmem:[%s8328_s11 + $0x10] sm:$0x1] %vm6464_vm11, %v6135_v14 }
 0x44b   : > { %6625 = vst.msk [vmem:[%s8328_s11 + $0x290] sm:$0x1] %vm6464_vm11, %v6296_v46  ;;  %v4831_v27 = vsel %vm4194_vm6, %v4580_v39, 0.0  ;;  %v4444_v8 = vsel %vm4194_vm6, %v10809_v35, 0.0  ;;  %v4582_v61 = vmul.f32 %v10857_v37, %v10857_v37  ;;  %v4833_v18 = vsel %vm4194_vm6, %v4581_v16, 0.0 }
 0x44c   : > { %v4435_v52 = vadd.f32 %v4434_v28, %v4433_v45  ;;  %v4822_v47 = vadd.f32 %v4821_v20, %v4820_v29  ;;  %6623 = vst.msk [vmem:[%s8328_s11 + $0x288] sm:$0xf] %vm6459_vm10, %v6294_v41  ;;  %v4446_v36 = vsel %vm4194_vm6, %v10857_v37, 0.0  ;;  %v4583_v44 = vmul.f32 %v10875_v4, %v10875_v4 }
 0x44d   : > { %6624 = vst.msk [vmem:[%s8328_s11 + $0x28c] sm:$0xf] %vm6459_vm10, %v6295_v32  ;;  %v4835_v54 = vsel %vm4194_vm6, %v4582_v61, 0.0  ;;  %v4448_v43 = vsel %vm4194_vm6, %v10875_v4, 0.0 }
 0x44e   : > { %v4437_v60 = vadd.f32 %v4436_v15, %v4435_v52  ;;  %v4824_v22 = vadd.f32 %v4823_v23, %v4822_v47  ;;  %6626 = vst.msk [vmem:[%s8328_s11 + $0x294] sm:$0xf] %vm6459_vm10, %v6135_v14  ;;  %v4837_v37 = vsel %vm4194_vm6, %v4583_v44, 0.0 }
 0x44f   : > { %6627 = vst.msk [vmem:[%s8328_s11 + $0x298] sm:$0xf] %vm6459_vm10, %v6136_v31 }
 0x450   : > { %v4439_v38 = vadd.f32 %v4438_v12, %v4437_v60  ;;  %v4826_v59 = vadd.f32 %v4825_v2, %v4824_v22  ;;  %6628 = vst.msk [vmem:[%s8328_s11 + $0x29c] sm:$0xf] %vm6459_vm10, %v6135_v14 }
 0x451   : > { %6629 = vst.msk [vmem:[%s8328_s11 + $0x2a0] sm:$0xf] %vm6459_vm10, %v6136_v31 }
 0x452   : > { %v4441_v34 = vadd.f32 %v4440_v33, %v4439_v38  ;;  %v4828_v58 = vadd.f32 %v4827_v17, %v4826_v59  ;;  %6630 = vst.msk [vmem:[%s8328_s11 + $0x2a4] sm:$0x1] %vm6464_vm11, %v6135_v14 }
 0x454   : > { %v4830_v40 = vadd.f32 %v4829_v11, %v4828_v58  ;;  %v4443_v3 = vadd.f32 %v4442_v1, %v4441_v34 }
 0x456   : > { %v4832_v19 = vadd.f32 %v4831_v27, %v4830_v40  ;;  %v4445_v25 = vadd.f32 %v4444_v8, %v4443_v3 }
 0x458   : > { %v4834_v35 = vadd.f32 %v4833_v18, %v4832_v19  ;;  %v4447_v63 = vadd.f32 %v4446_v36, %v4445_v25 }
 0x45a   : > { %v4836_v48 = vadd.f32 %v4835_v54, %v4834_v35  ;;  %v4449_v24 = vadd.f32 %v4448_v43, %v4447_v63 }
 0x45c   : > { %v4450_v30 = vrot.slane %v4449_v24, 4  ;;  %v4838_v51 = vadd.f32 %v4837_v37, %v4836_v48 }
 0x45e   : > { %v4451_v13 = vadd.f32 %v4450_v30, %v4449_v24  ;;  %v4839_v7 = vrot.slane %v4838_v51, 4 }
 0x460   : > { %v4452_v55 = vrot.slane %v4451_v13, 2  ;;  %v4840_v6 = vadd.f32 %v4839_v7, %v4838_v51 }
 0x462   : > { %v4453_v21 = vadd.f32 %v4452_v55, %v4451_v13  ;;  %v4841_v53 = vrot.slane %v4840_v6, 2 }
 0x464   : > { %v4454_v4 = vrot.slane %v4453_v21, 1  ;;  %v4842_v10 = vadd.f32 %v4841_v53, %v4840_v6 }
 0x466   : > { %v4843_v0 = vrot.slane %v4842_v10, 1  ;;  %v4455_v26 = vadd.f32 %v4454_v4, %v4453_v21 }
 0x468   : > { %v4844_v49 = vadd.f32 %v4843_v0, %v4842_v10 }
 0x46a   : > { %v4846_v9 = vsel %vm4845_vm8, %v4455_v26, %v4844_v49 }
 0x46b   : > { %4848 = vst.msk [vmem:[%s225_s13] sm:$0x3] %vm4847_vm12, %v4846_v9 }
 0x46c   : > { %7425 = shalt.err (!%p7422_p3)
}
 0x46d   : > { %7310 = dma.vmem_to_hbm [thread:$0]  (%p7533_p5), %s6653_s14, 32, %s6655_s15, %s6637_s2  }
 0x46e PF: > { %p7316_p4 = scmp.ge.s32.totalorder %s7460_s1, 2  ;;  %s6674_s10 = sand.u32 1, %s7448_s18  }
 0x46f   : > { %s6675_s11 = scalar_lea.sflag [#allocation3], %s6674_s10 }
 0x470   : > { %p7313_p7 = pnand %p7316_p4, %p7537_p6 }
 0x472   : > { %p7314_p8 = pneg %p7313_p7 }
 0x474   : > { %7443 = dma.done.wait (%p7314_p8), %s6675_s11, 32  }
 0x475   : > { %7445 = vsyncadd (%p7314_p8), %s6675_s11, 4294967264  ;;  %p16_p9 = scmp.ge.s32.totalorder %s7520_s22, 4   ;;  %s11212_s18 = smov %s7452_s19 }
 0x476   : > { %s11213_s19 = smov %s7456_s20  ;;  %s11214_s20 = smov %s7531_s25 }
 0x477   : > { %s11215_s1 = smov %s7520_s22  ;;  %18 = sbr.rel (!%p16_p9) target bundleno = 3 (0x3), region = 85 }
 0x47c   :  { %6681 = vsyncpa [#allocation3], 1 }
 0x47d   :  { %6683 = vsyncpa [#allocation3 + $0x1], 1 }

</bundles_post_ra>
